<compile_context>
chip_gen: v7x
topology: tpu7x:2x2x1
jax: 0.10.0
libtpu: 0.0.40
codegen_flags: <defaults>
</compile_context>

<pallas_src>
import functools
import math

import numpy as np
import jax
import jax.numpy as jnp
from jax.experimental import pallas as pl
from jax.experimental.pallas import tpu as pltpu

# ----------------------------- configuration -----------------------------
B            = 2      # batch
STATE_DIM    = 7      # qpos dim
ACTION_DIM   = 8
NUM_QUERIES  = 8      # also action sequence length (as in ACT)
HIDDEN_DIM   = 32     # transformer d_model
NUM_HEADS    = 4
HEAD_DIM     = HIDDEN_DIM // NUM_HEADS
FFN_DIM      = 64
LATENT_DIM   = 32     # hardcoded in the module
NUM_CAMERAS  = 1
IMG_C, IMG_H, IMG_W = 3, 16, 16
BACKBONE_CH  = 8      # backbones[0].num_channels
BACKBONE_STRIDE = 4

# ordered weight names for the fused layer kernels (kept in sync between the
# call-site argument lists and the in-kernel unpacking).
ENC_WNAMES = ("w_q", "b_q", "w_k", "b_k", "w_v", "b_v", "w_o", "b_o",
              "ln1_g", "ln1_b", "w1", "b1", "w2", "b2", "ln2_g", "ln2_b")
DEC_WNAMES = ("sa_w_q", "sa_b_q", "sa_w_k", "sa_b_k", "sa_w_v", "sa_b_v", "sa_w_o", "sa_b_o",
              "ln1_g", "ln1_b",
              "ca_w_q", "ca_b_q", "ca_w_k", "ca_b_k", "ca_w_v", "ca_b_v", "ca_w_o", "ca_b_o",
              "ln2_g", "ln2_b", "w1", "b1", "w2", "b2", "ln3_g", "ln3_b")


# ----------------------------- in-kernel math helpers -----------------------------
def _mm(x, w, b=None, relu=False):
    y = jnp.dot(x, w, preferred_element_type=jnp.float32)
    if b is not None:
        y = y + b
    if relu:
        y = jnp.maximum(y, 0.0)
    return y


def _ln(x, g, b, eps=1e-5):
    mu = jnp.mean(x, axis=-1, keepdims=True)
    xc = x - mu
    var = jnp.mean(xc * xc, axis=-1, keepdims=True)
    return xc * jax.lax.rsqrt(var + eps) * g + b


def _mha(q_in, k_in, v_in, w, prefix="", bias_row=None):
    """Multi-head attention on per-example 2-D slabs, fully VMEM/vreg resident.

    q_in:(Sq,D), k_in/v_in:(Sk,D) f32 values.  Attention weights are per-head
    refs: w_q/w_k/w_v (H, D, Dh), b_q/b_k/b_v (H, 1, Dh), w_o (H, Dh, D),
    b_o (1, D).  bias_row: optional (1, Sk) additive key-padding bias.
    Returns (Sq, D) — attention output after the output projection.
    """
    scale = 1.0 / math.sqrt(HEAD_DIM)
    wq, bq = w[prefix + "w_q"], w[prefix + "b_q"]
    wk, bk = w[prefix + "w_k"], w[prefix + "b_k"]
    wv, bv = w[prefix + "w_v"], w[prefix + "b_v"]
    wo, bo = w[prefix + "w_o"], w[prefix + "b_o"]
    out = None
    for h in range(NUM_HEADS):                                  # static unroll
        qh = _mm(q_in, wq[h], bq[h])                            # (Sq, Dh)
        kh = _mm(k_in, wk[h], bk[h])                            # (Sk, Dh)
        vh = _mm(v_in, wv[h], bv[h])                            # (Sk, Dh)
        s = jax.lax.dot_general(qh, kh, (((1,), (1,)), ((), ())),
                                preferred_element_type=jnp.float32) * scale
        if bias_row is not None:
            s = s + bias_row                                    # (Sq, Sk) + (1, Sk)
        m = jnp.max(s, axis=-1, keepdims=True)
        p = jnp.exp(s - m)
        p = p * pl.reciprocal(jnp.sum(p, axis=-1, keepdims=True), approx=True)
        hv = jnp.dot(p, vh, preferred_element_type=jnp.float32)            # (Sq, Dh)
        contrib = jnp.dot(hv, wo[h], preferred_element_type=jnp.float32)   # (Sq, D)
        out = contrib if out is None else out + contrib
    return out + bo[...]


def _encoder_layer(x, pos, w, bias_row=None):
    """DETR-style post-norm encoder layer (q = k = x + pos, v = x)."""
    xp = x + pos
    attn = _mha(xp, xp, x, w, "", bias_row)
    x = _ln(x + attn, w["ln1_g"][...], w["ln1_b"][...])
    ff = _mm(_mm(x, w["w1"][...], w["b1"][...], relu=True), w["w2"][...], w["b2"][...])
    return _ln(x + ff, w["ln2_g"][...], w["ln2_b"][...])


def _decoder_layer(tgt, query_pos, mem, mem_pos, w):
    """DETR-style post-norm decoder layer (self-attn + cross-attn + FFN)."""
    tq = tgt + query_pos
    sa = _mha(tq, tq, tgt, w, "sa_")
    tgt = _ln(tgt + sa, w["ln1_g"][...], w["ln1_b"][...])
    ca = _mha(tgt + query_pos, mem + mem_pos, mem, w, "ca_")
    tgt = _ln(tgt + ca, w["ln2_g"][...], w["ln2_b"][...])
    ff = _mm(_mm(tgt, w["w1"][...], w["b1"][...], relu=True), w["w2"][...], w["b2"][...])
    return _ln(tgt + ff, w["ln3_g"][...], w["ln3_b"][...])


# ----------------------------- fused kernels -----------------------------
def _cvae_encode_kernel(qpos_ref, actions_ref, pad_ref, eps_ref, cls_ref, pos_ref,
                        w_act_ref, b_act_ref, w_joint_ref, b_joint_ref, *rest,
                        num_actions):
    """Whole CVAE encode path (training branch) for ONE batch element per grid step."""
    n_enc = len(ENC_WNAMES)
    enc_w = dict(zip(ENC_WNAMES, rest[:n_enc]))
    (w_mu_ref, b_mu_ref, w_lv_ref, b_lv_ref, w_lout_ref, b_lout_ref,
     latent_ref, mu_ref, logvar_ref, xbuf) = rest[n_enc:]

    # --- assemble the encoder token sequence [cls, qpos_proj, action_proj...] in VMEM ---
    act_emb = _mm(actions_ref[0], w_act_ref[...], b_act_ref[...])      # (num_actions, D)
    qpos_emb = _mm(qpos_ref[0], w_joint_ref[...], b_joint_ref[...])    # (1, D)
    xbuf[0:1, :] = cls_ref[...]
    xbuf[1:2, :] = qpos_emb
    xbuf[2:2 + num_actions, :] = act_emb

    # --- transformer encoder layer; key-padding bias built in-kernel from compact mask ---
    bias_row = pad_ref[0] * jnp.float32(-1e9)                          # (1, S)
    x = _encoder_layer(xbuf[...], pos_ref[...], enc_w, bias_row)

    # --- latent heads + reparametrization (cls token = row 0) ---
    cls_out = x[0:1, :]                                                # (1, D)
    mu = _mm(cls_out, w_mu_ref[...], b_mu_ref[...])                    # (1, L)
    logvar = _mm(cls_out, w_lv_ref[...], b_lv_ref[...])                # (1, L)
    z = mu + jnp.exp(logvar * 0.5) * eps_ref[0]                        # reparametrize
    latent_ref[0] = _mm(z, w_lout_ref[...], b_lout_ref[...])
    mu_ref[0] = mu
    logvar_ref[0] = logvar


def _act_transformer_kernel(pixels_ref, qpos_ref, latent_ref, w_img_ref, b_img_ref,
                            w_robot_ref, b_robot_ref, enc_pos_ref, qemb_ref, *rest,
                            num_img_tokens):
    """Fused conv + DETR encoder + decoder + output heads for ONE batch element."""
    n_enc, n_dec = len(ENC_WNAMES), len(DEC_WNAMES)
    enc_w = dict(zip(ENC_WNAMES, rest[:n_enc]))
    dec_w = dict(zip(DEC_WNAMES, rest[n_enc:n_enc + n_dec]))
    (w_ahead_ref, b_ahead_ref, w_phead_ref, b_phead_ref,
     a_hat_ref, is_pad_hat_ref, xbuf) = rest[n_enc + n_dec:]

    # --- fused (backbone 1x1 conv o input_proj) on pre-downsampled NHWC pixels ---
    img_tok = _mm(pixels_ref[0], w_img_ref[...], b_img_ref[...])       # (HW, D)
    proprio = _mm(qpos_ref[0], w_robot_ref[...], b_robot_ref[...])     # (1, D)

    # --- assemble encoder memory tokens [latent, proprio, image...] in VMEM ---
    xbuf[0:1, :] = latent_ref[0]
    xbuf[1:2, :] = proprio
    xbuf[2:2 + num_img_tokens, :] = img_tok
    pos = enc_pos_ref[...]                                             # (S_mem, D)

    mem = _encoder_layer(xbuf[...], pos, enc_w)

    # --- decoder (tgt starts at zero, query_pos = query_embed) + output heads ---
    qemb = qemb_ref[...]                                               # (NQ, D)
    tgt = jnp.zeros((NUM_QUERIES, HIDDEN_DIM), jnp.float32)
    hs = _decoder_layer(tgt, qemb, mem, pos, dec_w)                    # (NQ, D)

    a_hat_ref[0] = _mm(hs, w_ahead_ref[...], b_ahead_ref[...])         # (NQ, ACTION_DIM)
    is_pad_hat_ref[0] = _mm(hs, w_phead_ref[...], b_phead_ref[...])    # (NQ, 1)


# ----------------------------- BlockSpec helpers -----------------------------
def _batched_spec(x):
    nd = x.ndim
    return pl.BlockSpec((1,) + tuple(x.shape[1:]),
                        lambda b, nd=nd: (b,) + (0,) * (nd - 1))


def _shared_spec(x):
    nd = x.ndim
    return pl.BlockSpec(tuple(x.shape), lambda b, nd=nd: (0,) * nd)


# ----------------------------- positional tables -----------------------------
@functools.lru_cache(maxsize=None)
def _sine_pos_tokens(h, w, d_model, ncams, temperature=10000.0):
    """DETR PositionEmbeddingSine (normalize=True) flattened to (h*w*ncams, d_model);
    cameras tiled along width (matching torch.cat(..., axis=3))."""
    num_pos_feats = d_model // 2
    scale = 2 * math.pi
    y_embed = np.arange(1, h + 1, dtype=np.float32)[:, None] * np.ones((1, w), np.float32)
    x_embed = np.arange(1, w + 1, dtype=np.float32)[None, :] * np.ones((h, 1), np.float32)
    eps = 1e-6
    y_embed = y_embed / (y_embed[-1:, :] + eps) * scale
    x_embed = x_embed / (x_embed[:, -1:] + eps) * scale
    dim_t = temperature ** (2 * (np.arange(num_pos_feats, dtype=np.float32) // 2) / num_pos_feats)
    pos_x = x_embed[:, :, None] / dim_t
    pos_y = y_embed[:, :, None] / dim_t
    pos_x = np.stack([np.sin(pos_x[:, :, 0::2]), np.cos(pos_x[:, :, 1::2])], axis=3).reshape(h, w, -1)
    pos_y = np.stack([np.sin(pos_y[:, :, 0::2]), np.cos(pos_y[:, :, 1::2])], axis=3).reshape(h, w, -1)
    pos = np.concatenate([pos_y, pos_x], axis=2)            # (h, w, d)
    pos = np.concatenate([pos] * ncams, axis=1)             # (h, w*ncams, d)
    return jnp.asarray(pos.reshape(h * w * ncams, d_model), jnp.float32)


def get_sinusoid_encoding_table(n_position, d_hid):
    def get_position_angle_vec(position):
        return [position / np.power(10000, 2 * (hid_j // 2) / d_hid) for hid_j in range(d_hid)]
    table = np.array([get_position_angle_vec(p) for p in range(n_position)], dtype=np.float64)
    table[:, 0::2] = np.sin(table[:, 0::2])
    table[:, 1::2] = np.cos(table[:, 1::2])
    return jnp.asarray(table, jnp.float32)                  # (n_position, d_hid)


# ----------------------------- pallas_call wrappers -----------------------------
def cvae_encode(params, qpos, actions, is_pad, eps):
    bs, num_act = actions.shape[0], actions.shape[1]
    s_enc = 2 + num_act
    enc = params["cvae_encoder"]["layer0"]

    pad_full = jnp.concatenate(
        [jnp.zeros((bs, 2), jnp.float32), is_pad.astype(jnp.float32)], axis=1)   # (B, S)

    batched = [qpos.reshape(bs, 1, STATE_DIM).astype(jnp.float32),
               actions.astype(jnp.float32),
               pad_full.reshape(bs, 1, s_enc),
               eps.reshape(bs, 1, LATENT_DIM)]
    shared = ([params["cls_embed"], params["pos_table"],
               params["encoder_action_proj_w"], params["encoder_action_proj_b"],
               params["encoder_joint_proj_w"], params["encoder_joint_proj_b"]]
              + [enc[k] for k in ENC_WNAMES]
              + [params["latent_proj_w_mu"], params["latent_proj_b_mu"],
                 params["latent_proj_w_logvar"], params["latent_proj_b_logvar"],
                 params["latent_out_proj_w"], params["latent_out_proj_b"]])

    out_shape = (jax.ShapeDtypeStruct((bs, 1, HIDDEN_DIM), jnp.float32),
                 jax.ShapeDtypeStruct((bs, 1, LATENT_DIM), jnp.float32),
                 jax.ShapeDtypeStruct((bs, 1, LATENT_DIM), jnp.float32))
    out_specs = (pl.BlockSpec((1, 1, HIDDEN_DIM), lambda b: (b, 0, 0)),
                 pl.BlockSpec((1, 1, LATENT_DIM), lambda b: (b, 0, 0)),
                 pl.BlockSpec((1, 1, LATENT_DIM), lambda b: (b, 0, 0)))

    latent, mu, logvar = pl.pallas_call(
        functools.partial(_cvae_encode_kernel, num_actions=num_act),
        grid=(bs,),
        in_specs=[_batched_spec(a) for a in batched] + [_shared_spec(a) for a in shared],
        out_specs=out_specs,
        out_shape=out_shape,
        scratch_shapes=[pltpu.VMEM((s_enc, HIDDEN_DIM), jnp.float32)],
        compiler_params=pltpu.CompilerParams(dimension_semantics=("parallel",)),
    )(*(batched + shared))
    return (latent.reshape(bs, HIDDEN_DIM),
            mu.reshape(bs, LATENT_DIM),
            logvar.reshape(bs, LATENT_DIM))


def act_vision_transformer(params, image, qpos, latent_input):
    bs = image.shape[0]
    # stride-4 spatial subsample BEFORE any channel projection (16x less work),
    # kept channels-last so features sit on the 128-lane axis.
    cams = []
    for cam in range(image.shape[1]):
        x = image[:, cam, :, ::BACKBONE_STRIDE, ::BACKBONE_STRIDE]      # (B, C, Hf, Wf)
        cams.append(jnp.transpose(x, (0, 2, 3, 1)))                     # (B, Hf, Wf, C)
    pix = jnp.concatenate(cams, axis=2)                                 # cameras along width
    _, hf, w_tot, c = pix.shape
    wf = w_tot // len(cams)
    num_img_tokens = hf * w_tot
    pix = pix.reshape(bs, num_img_tokens, c)

    # algebraically fuse backbone 1x1 conv with input_proj 1x1 conv (both linear).
    w_img = params["backbone"]["conv_w"] @ params["input_proj_w"]                       # (C, D)
    b_img = params["backbone"]["conv_b"] @ params["input_proj_w"] + params["input_proj_b"]

    sine = _sine_pos_tokens(hf, wf, HIDDEN_DIM, len(cams))                              # (HW, D)
    enc_pos = jnp.concatenate([params["additional_pos_embed"], sine], axis=0)           # (2+HW, D)
    s_mem = 2 + num_img_tokens

    t = params["transformer"]
    batched = [pix.astype(jnp.float32),
               qpos.reshape(bs, 1, STATE_DIM).astype(jnp.float32),
               latent_input.reshape(bs, 1, HIDDEN_DIM)]
    shared = ([w_img, b_img,
               params["input_proj_robot_state_w"], params["input_proj_robot_state_b"],
               enc_pos, params["query_embed"]]
              + [t["enc_layer0"][k] for k in ENC_WNAMES]
              + [t["dec_layer0"][k] for k in DEC_WNAMES]
              + [params["action_head_w"], params["action_head_b"],
                 params["is_pad_head_w"], params["is_pad_head_b"]])

    out_shape = (jax.ShapeDtypeStruct((bs, NUM_QUERIES, ACTION_DIM), jnp.float32),
                 jax.ShapeDtypeStruct((bs, NUM_QUERIES, 1), jnp.float32))
    out_specs = (pl.BlockSpec((1, NUM_QUERIES, ACTION_DIM), lambda b: (b, 0, 0)),
                 pl.BlockSpec((1, NUM_QUERIES, 1), lambda b: (b, 0, 0)))

    a_hat, is_pad_hat = pl.pallas_call(
        functools.partial(_act_transformer_kernel, num_img_tokens=num_img_tokens),
        grid=(bs,),
        in_specs=[_batched_spec(a) for a in batched] + [_shared_spec(a) for a in shared],
        out_specs=out_specs,
        out_shape=out_shape,
        scratch_shapes=[pltpu.VMEM((s_mem, HIDDEN_DIM), jnp.float32)],
        compiler_params=pltpu.CompilerParams(dimension_semantics=("parallel",)),
    )(*(batched + shared))
    return a_hat, is_pad_hat


# ----------------------------- DETR_VAE forward -----------------------------
def encode(params, qpos, actions=None, is_pad=None, vq_sample=None, eps_key=None):
    bs = qpos.shape[0]
    # TODO(synk): vq=True path (multinomial sampling + straight-through one-hot) not implemented.
    if actions is not None:                                            # training path
        eps = jax.random.normal(eps_key, (bs, LATENT_DIM), jnp.float32)
        latent_input, mu, logvar = cvae_encode(params, qpos, actions, is_pad, eps)
        return latent_input, None, None, mu, logvar
    # inference: latent_sample == 0  =>  latent_input == latent_out_proj bias (exact).
    latent_input = jnp.broadcast_to(params["latent_out_proj_b"], (bs, HIDDEN_DIM))
    return latent_input, None, None, None, None


def detr_vae_forward(params, qpos, image, env_state, actions=None, is_pad=None,
                     vq_sample=None, eps_key=None):
    # TODO(synk): backbones-is-None (env_state) branch not implemented; backbone branch only.
    latent_input, probs, binaries, mu, logvar = encode(params, qpos, actions, is_pad,
                                                       vq_sample, eps_key)
    a_hat, is_pad_hat = act_vision_transformer(params, image, qpos, latent_input)
    return a_hat, is_pad_hat, [mu, logvar], probs, binaries


# ----------------------------- parameter init -----------------------------
def init_params(key):
    keys = iter(jax.random.split(key, 256))

    def lin(in_d, out_d, scale=0.05):
        w = jax.random.normal(next(keys), (in_d, out_d), jnp.float32) * scale
        b = jax.random.normal(next(keys), (1, out_d), jnp.float32) * 0.01
        return w, b

    def mha_p(prefix=""):
        p = {}
        for n in ("q", "k", "v"):
            w, b = lin(HIDDEN_DIM, HIDDEN_DIM)
            # per-head layout so the head split happens in-kernel via leading-dim indexing
            p[prefix + "w_" + n] = w.reshape(HIDDEN_DIM, NUM_HEADS, HEAD_DIM).transpose(1, 0, 2)
            p[prefix + "b_" + n] = b.reshape(NUM_HEADS, 1, HEAD_DIM)
        wo, bo = lin(HIDDEN_DIM, HIDDEN_DIM)
        p[prefix + "w_o"] = wo.reshape(NUM_HEADS, HEAD_DIM, HIDDEN_DIM)
        p[prefix + "b_o"] = bo
        return p

    def enc_layer_p():
        p = mha_p("")
        p["w1"], p["b1"] = lin(HIDDEN_DIM, FFN_DIM)
        p["w2"], p["b2"] = lin(FFN_DIM, HIDDEN_DIM)
        for i in (1, 2):
            p[f"ln{i}_g"] = jnp.ones((1, HIDDEN_DIM), jnp.float32)
            p[f"ln{i}_b"] = jnp.zeros((1, HIDDEN_DIM), jnp.float32)
        return p

    def dec_layer_p():
        p = {}
        p.update(mha_p("sa_"))
        p.update(mha_p("ca_"))
        p["w1"], p["b1"] = lin(HIDDEN_DIM, FFN_DIM)
        p["w2"], p["b2"] = lin(FFN_DIM, HIDDEN_DIM)
        for i in (1, 2, 3):
            p[f"ln{i}_g"] = jnp.ones((1, HIDDEN_DIM), jnp.float32)
            p[f"ln{i}_b"] = jnp.zeros((1, HIDDEN_DIM), jnp.float32)
        return p

    params = {}
    # heads / projections belonging to DETR_VAE itself
    params["action_head_w"], params["action_head_b"] = lin(HIDDEN_DIM, ACTION_DIM)
    params["is_pad_head_w"], params["is_pad_head_b"] = lin(HIDDEN_DIM, 1)
    params["query_embed"] = jax.random.normal(next(keys), (NUM_QUERIES, HIDDEN_DIM), jnp.float32) * 0.05
    params["input_proj_w"], params["input_proj_b"] = lin(BACKBONE_CH, HIDDEN_DIM)       # Conv2d k=1
    params["input_proj_robot_state_w"], params["input_proj_robot_state_b"] = lin(STATE_DIM, HIDDEN_DIM)
    params["cls_embed"] = jax.random.normal(next(keys), (1, HIDDEN_DIM), jnp.float32) * 0.05
    params["encoder_action_proj_w"], params["encoder_action_proj_b"] = lin(ACTION_DIM, HIDDEN_DIM)
    params["encoder_joint_proj_w"], params["encoder_joint_proj_b"] = lin(STATE_DIM, HIDDEN_DIM)
    # latent_proj (D -> 2L) stored split into mu / logvar halves (algebraically identical)
    w_lat, b_lat = lin(HIDDEN_DIM, LATENT_DIM * 2)
    params["latent_proj_w_mu"] = w_lat[:, :LATENT_DIM]
    params["latent_proj_w_logvar"] = w_lat[:, LATENT_DIM:]
    params["latent_proj_b_mu"] = b_lat[:, :LATENT_DIM]
    params["latent_proj_b_logvar"] = b_lat[:, LATENT_DIM:]
    params["latent_out_proj_w"], params["latent_out_proj_b"] = lin(LATENT_DIM, HIDDEN_DIM)
    params["additional_pos_embed"] = jax.random.normal(next(keys), (2, HIDDEN_DIM), jnp.float32) * 0.05
    params["pos_table"] = get_sinusoid_encoding_table(1 + 1 + NUM_QUERIES, HIDDEN_DIM)  # (S_enc, D)

    # synthetic submodules (1x1-conv backbone; 1-layer DETR encoder/decoder; 1-layer CVAE encoder)
    # TODO(synk): real ResNet backbone replaced by stride-4 subsample + 1x1 conv stand-in.
    params["backbone"] = {}
    params["backbone"]["conv_w"], params["backbone"]["conv_b"] = lin(IMG_C, BACKBONE_CH)
    params["cvae_encoder"] = {"layer0": enc_layer_p()}
    params["transformer"] = {"enc_layer0": enc_layer_p(), "dec_layer0": dec_layer_p()}
    return params


# ----------------------------- main -----------------------------
if __name__ == "__main__":
    root = jax.random.PRNGKey(0)
    pkey, dkey, ekey = jax.random.split(root, 3)
    params = init_params(pkey)

    kq, ki, ka = jax.random.split(dkey, 3)
    qpos = jax.random.normal(kq, (B, STATE_DIM), jnp.float32)
    image = jax.random.normal(ki, (B, NUM_CAMERAS, IMG_C, IMG_H, IMG_W), jnp.float32)
    actions = jax.random.normal(ka, (B, NUM_QUERIES, ACTION_DIM), jnp.float32)
    is_pad = jnp.zeros((B, NUM_QUERIES), dtype=bool).at[:, -1].set(True)

    @jax.jit
    def run(qpos, image, actions, is_pad, eps_key):
        return detr_vae_forward(params, qpos, image, None, actions=actions,
                                is_pad=is_pad, eps_key=eps_key)

    a_hat, is_pad_hat, (mu, logvar), probs, binaries = run(qpos, image, actions, is_pad, ekey)
    jax.block_until_ready((a_hat, is_pad_hat, mu, logvar))

    assert a_hat.shape == (B, NUM_QUERIES, ACTION_DIM)
    assert is_pad_hat.shape == (B, NUM_QUERIES, 1)
    assert mu.shape == (B, LATENT_DIM) and logvar.shape == (B, LATENT_DIM)
    assert bool(jnp.all(jnp.isfinite(a_hat))) and bool(jnp.all(jnp.isfinite(is_pad_hat)))
    assert bool(jnp.all(jnp.isfinite(mu))) and bool(jnp.all(jnp.isfinite(logvar)))

    print("KERNEL_OK")
</pallas_src>

<mosaic_0001>
module attributes {stable_mosaic.version = 11 : i64} {
  func.func @_cvae_encode_kernel(%arg0: i32, %arg1: memref<1x1x7xf32, #tpu.memory_space<vmem>>, %arg2: memref<1x8x8xf32, #tpu.memory_space<vmem>>, %arg3: memref<1x1x10xf32, #tpu.memory_space<vmem>>, %arg4: memref<1x1x32xf32, #tpu.memory_space<vmem>>, %arg5: memref<1x32xf32, #tpu.memory_space<vmem>>, %arg6: memref<10x32xf32, #tpu.memory_space<vmem>>, %arg7: memref<8x32xf32, #tpu.memory_space<vmem>>, %arg8: memref<1x32xf32, #tpu.memory_space<vmem>>, %arg9: memref<7x32xf32, #tpu.memory_space<vmem>>, %arg10: memref<1x32xf32, #tpu.memory_space<vmem>>, %arg11: memref<4x32x8xf32, #tpu.memory_space<vmem>>, %arg12: memref<4x1x8xf32, #tpu.memory_space<vmem>>, %arg13: memref<4x32x8xf32, #tpu.memory_space<vmem>>, %arg14: memref<4x1x8xf32, #tpu.memory_space<vmem>>, %arg15: memref<4x32x8xf32, #tpu.memory_space<vmem>>, %arg16: memref<4x1x8xf32, #tpu.memory_space<vmem>>, %arg17: memref<4x8x32xf32, #tpu.memory_space<vmem>>, %arg18: memref<1x32xf32, #tpu.memory_space<vmem>>, %arg19: memref<1x32xf32, #tpu.memory_space<vmem>>, %arg20: memref<1x32xf32, #tpu.memory_space<vmem>>, %arg21: memref<32x64xf32, #tpu.memory_space<vmem>>, %arg22: memref<1x64xf32, #tpu.memory_space<vmem>>, %arg23: memref<64x32xf32, #tpu.memory_space<vmem>>, %arg24: memref<1x32xf32, #tpu.memory_space<vmem>>, %arg25: memref<1x32xf32, #tpu.memory_space<vmem>>, %arg26: memref<1x32xf32, #tpu.memory_space<vmem>>, %arg27: memref<32x32xf32, #tpu.memory_space<vmem>>, %arg28: memref<1x32xf32, #tpu.memory_space<vmem>>, %arg29: memref<32x32xf32, #tpu.memory_space<vmem>>, %arg30: memref<1x32xf32, #tpu.memory_space<vmem>>, %arg31: memref<32x32xf32, #tpu.memory_space<vmem>>, %arg32: memref<1x32xf32, #tpu.memory_space<vmem>>, %arg33: memref<1x1x32xf32, #tpu.memory_space<vmem>>, %arg34: memref<1x1x32xf32, #tpu.memory_space<vmem>>, %arg35: memref<1x1x32xf32, #tpu.memory_space<vmem>>, %arg36: memref<10x32xf32, #tpu.memory_space<vmem>>) attributes {dimension_semantics = [#tpu.dimension_semantics<parallel>], iteration_bounds = array<i64: 2>, scalar_prefetch = 0 : i64, scratch_operands = 1 : i64, tpu.core_type = #tpu.core_type<tc>, window_params = [{transform_indices = @transform_0, window_bounds = array<i64: 1, 1, 7>}, {transform_indices = @transform_1, window_bounds = array<i64: 1, 8, 8>}, {transform_indices = @transform_2, window_bounds = array<i64: 1, 1, 10>}, {transform_indices = @transform_3, window_bounds = array<i64: 1, 1, 32>}, {pipeline_mode = #tpu.pipeline_mode<synchronous>, transform_indices = @transform_4, window_bounds = array<i64: 1, 32>}, {pipeline_mode = #tpu.pipeline_mode<synchronous>, transform_indices = @transform_5, window_bounds = array<i64: 10, 32>}, {pipeline_mode = #tpu.pipeline_mode<synchronous>, transform_indices = @transform_6, window_bounds = array<i64: 8, 32>}, {pipeline_mode = #tpu.pipeline_mode<synchronous>, transform_indices = @transform_7, window_bounds = array<i64: 1, 32>}, {pipeline_mode = #tpu.pipeline_mode<synchronous>, transform_indices = @transform_8, window_bounds = array<i64: 7, 32>}, {pipeline_mode = #tpu.pipeline_mode<synchronous>, transform_indices = @transform_9, window_bounds = array<i64: 1, 32>}, {pipeline_mode = #tpu.pipeline_mode<synchronous>, transform_indices = @transform_10, window_bounds = array<i64: 4, 32, 8>}, {pipeline_mode = #tpu.pipeline_mode<synchronous>, transform_indices = @transform_11, window_bounds = array<i64: 4, 1, 8>}, {pipeline_mode = #tpu.pipeline_mode<synchronous>, transform_indices = @transform_12, window_bounds = array<i64: 4, 32, 8>}, {pipeline_mode = #tpu.pipeline_mode<synchronous>, transform_indices = @transform_13, window_bounds = array<i64: 4, 1, 8>}, {pipeline_mode = #tpu.pipeline_mode<synchronous>, transform_indices = @transform_14, window_bounds = array<i64: 4, 32, 8>}, {pipeline_mode = #tpu.pipeline_mode<synchronous>, transform_indices = @transform_15, window_bounds = array<i64: 4, 1, 8>}, {pipeline_mode = #tpu.pipeline_mode<synchronous>, transform_indices = @transform_16, window_bounds = array<i64: 4, 8, 32>}, {pipeline_mode = #tpu.pipeline_mode<synchronous>, transform_indices = @transform_17, window_bounds = array<i64: 1, 32>}, {pipeline_mode = #tpu.pipeline_mode<synchronous>, transform_indices = @transform_18, window_bounds = array<i64: 1, 32>}, {pipeline_mode = #tpu.pipeline_mode<synchronous>, transform_indices = @transform_19, window_bounds = array<i64: 1, 32>}, {pipeline_mode = #tpu.pipeline_mode<synchronous>, transform_indices = @transform_20, window_bounds = array<i64: 32, 64>}, {pipeline_mode = #tpu.pipeline_mode<synchronous>, transform_indices = @transform_21, window_bounds = array<i64: 1, 64>}, {pipeline_mode = #tpu.pipeline_mode<synchronous>, transform_indices = @transform_22, window_bounds = array<i64: 64, 32>}, {pipeline_mode = #tpu.pipeline_mode<synchronous>, transform_indices = @transform_23, window_bounds = array<i64: 1, 32>}, {pipeline_mode = #tpu.pipeline_mode<synchronous>, transform_indices = @transform_24, window_bounds = array<i64: 1, 32>}, {pipeline_mode = #tpu.pipeline_mode<synchronous>, transform_indices = @transform_25, window_bounds = array<i64: 1, 32>}, {pipeline_mode = #tpu.pipeline_mode<synchronous>, transform_indices = @transform_26, window_bounds = array<i64: 32, 32>}, {pipeline_mode = #tpu.pipeline_mode<synchronous>, transform_indices = @transform_27, window_bounds = array<i64: 1, 32>}, {pipeline_mode = #tpu.pipeline_mode<synchronous>, transform_indices = @transform_28, window_bounds = array<i64: 32, 32>}, {pipeline_mode = #tpu.pipeline_mode<synchronous>, transform_indices = @transform_29, window_bounds = array<i64: 1, 32>}, {pipeline_mode = #tpu.pipeline_mode<synchronous>, transform_indices = @transform_30, window_bounds = array<i64: 32, 32>}, {pipeline_mode = #tpu.pipeline_mode<synchronous>, transform_indices = @transform_31, window_bounds = array<i64: 1, 32>}, {transform_indices = @transform_32, window_bounds = array<i64: 1, 1, 32>}, {transform_indices = @transform_33, window_bounds = array<i64: 1, 1, 32>}, {transform_indices = @transform_34, window_bounds = array<i64: 1, 1, 32>}]} {
    %c0 = arith.constant 0 : index
    %c0_0 = arith.constant 0 : index
    %c0_1 = arith.constant 0 : index
    %0 = vector.load %arg2[%c0, %c0_0, %c0_1] : memref<1x8x8xf32, #tpu.memory_space<vmem>>, vector<1x8x8xf32>
    %1 = vector.shape_cast %0 : vector<1x8x8xf32> to vector<8x8xf32>
    %c0_2 = arith.constant 0 : index
    %c0_3 = arith.constant 0 : index
    %2 = vector.load %arg7[%c0_2, %c0_3] : memref<8x32xf32, #tpu.memory_space<vmem>>, vector<8x32xf32>
    %c0_4 = arith.constant 0 : index
    %c0_5 = arith.constant 0 : index
    %3 = vector.load %arg8[%c0_4, %c0_5] : memref<1x32xf32, #tpu.memory_space<vmem>>, vector<1x32xf32>
    %cst = arith.constant dense<0.000000e+00> : vector<8x32xf32>
    %4 = tpu.matmul %1, %2, %cst {dimension_numbers = #tpu.dot_dimension_numbers<[1], [0], [0], [1], [0, 0, 1, 1], [], []>} : vector<8x8xf32>, vector<8x32xf32>, vector<8x32xf32> -> vector<8x32xf32>
    %5 = vector.broadcast %3 : vector<1x32xf32> to vector<8x32xf32>
    %6 = arith.addf %4, %5 : vector<8x32xf32>
    %c0_6 = arith.constant 0 : index
    %c0_7 = arith.constant 0 : index
    %c0_8 = arith.constant 0 : index
    %7 = vector.load %arg1[%c0_6, %c0_7, %c0_8] : memref<1x1x7xf32, #tpu.memory_space<vmem>>, vector<1x1x7xf32>
    %8 = vector.shape_cast %7 : vector<1x1x7xf32> to vector<1x7xf32>
    %c0_9 = arith.constant 0 : index
    %c0_10 = arith.constant 0 : index
    %9 = vector.load %arg9[%c0_9, %c0_10] : memref<7x32xf32, #tpu.memory_space<vmem>>, vector<7x32xf32>
    %c0_11 = arith.constant 0 : index
    %c0_12 = arith.constant 0 : index
    %10 = vector.load %arg10[%c0_11, %c0_12] : memref<1x32xf32, #tpu.memory_space<vmem>>, vector<1x32xf32>
    %cst_13 = arith.constant dense<0.000000e+00> : vector<1x32xf32>
    %11 = tpu.matmul %8, %9, %cst_13 {dimension_numbers = #tpu.dot_dimension_numbers<[1], [0], [0], [1], [0, 0, 1, 1], [], []>} : vector<1x7xf32>, vector<7x32xf32>, vector<1x32xf32> -> vector<1x32xf32>
    %12 = arith.addf %11, %10 : vector<1x32xf32>
    %c0_14 = arith.constant 0 : index
    %c0_15 = arith.constant 0 : index
    %13 = vector.load %arg5[%c0_14, %c0_15] : memref<1x32xf32, #tpu.memory_space<vmem>>, vector<1x32xf32>
    %c0_16 = arith.constant 0 : index
    %c0_17 = arith.constant 0 : index
    %14 = vector.load %arg36[%c0_16, %c0_17] : memref<10x32xf32, #tpu.memory_space<vmem>>, vector<1x32xf32>
    tpu.vector_store %arg36[%c0_16, %c0_17], %13 {strides = array<i32>} : memref<10x32xf32, #tpu.memory_space<vmem>>, vector<1x32xf32>,
    %c1 = arith.constant 1 : index
    %c0_18 = arith.constant 0 : index
    %15 = vector.load %arg36[%c1, %c0_18] : memref<10x32xf32, #tpu.memory_space<vmem>>, vector<1x32xf32>
    tpu.vector_store %arg36[%c1, %c0_18], %12 {strides = array<i32>} : memref<10x32xf32, #tpu.memory_space<vmem>>, vector<1x32xf32>,
    %c2 = arith.constant 2 : index
    %c0_19 = arith.constant 0 : index
    %16 = vector.load %arg36[%c2, %c0_19] : memref<10x32xf32, #tpu.memory_space<vmem>>, vector<8x32xf32>
    tpu.vector_store %arg36[%c2, %c0_19], %6 {strides = array<i32>} : memref<10x32xf32, #tpu.memory_space<vmem>>, vector<8x32xf32>,
    %c0_20 = arith.constant 0 : index
    %c0_21 = arith.constant 0 : index
    %c0_22 = arith.constant 0 : index
    %17 = vector.load %arg3[%c0_20, %c0_21, %c0_22] : memref<1x1x10xf32, #tpu.memory_space<vmem>>, vector<1x1x10xf32>
    %18 = vector.shape_cast %17 : vector<1x1x10xf32> to vector<1x10xf32>
    %cst_23 = arith.constant -1.000000e+09 : f32
    %19 = vector.broadcast %cst_23 : f32 to vector<1x10xf32>
    %20 = arith.mulf %18, %19 : vector<1x10xf32>
    %c0_24 = arith.constant 0 : index
    %c0_25 = arith.constant 0 : index
    %21 = vector.load %arg36[%c0_24, %c0_25] : memref<10x32xf32, #tpu.memory_space<vmem>>, vector<10x32xf32>
    %c0_26 = arith.constant 0 : index
    %c0_27 = arith.constant 0 : index
    %22 = vector.load %arg6[%c0_26, %c0_27] : memref<10x32xf32, #tpu.memory_space<vmem>>, vector<10x32xf32>
    %23 = arith.addf %21, %22 : vector<10x32xf32>
    %c0_28 = arith.constant 0 : index
    %c0_29 = arith.constant 0 : index
    %c0_30 = arith.constant 0 : index
    %24 = vector.load %arg11[%c0_28, %c0_29, %c0_30] : memref<4x32x8xf32, #tpu.memory_space<vmem>>, vector<1x32x8xf32>
    %25 = vector.shape_cast %24 : vector<1x32x8xf32> to vector<32x8xf32>
    %c0_31 = arith.constant 0 : index
    %c0_32 = arith.constant 0 : index
    %c0_33 = arith.constant 0 : index
    %26 = vector.load %arg12[%c0_31, %c0_32, %c0_33] : memref<4x1x8xf32, #tpu.memory_space<vmem>>, vector<1x1x8xf32>
    %27 = vector.shape_cast %26 : vector<1x1x8xf32> to vector<1x8xf32>
    %cst_34 = arith.constant dense<0.000000e+00> : vector<10x8xf32>
    %28 = tpu.matmul %23, %25, %cst_34 {dimension_numbers = #tpu.dot_dimension_numbers<[1], [0], [0], [1], [0, 0, 1, 1], [], []>} : vector<10x32xf32>, vector<32x8xf32>, vector<10x8xf32> -> vector<10x8xf32>
    %29 = vector.broadcast %27 : vector<1x8xf32> to vector<10x8xf32>
    %30 = arith.addf %28, %29 : vector<10x8xf32>
    %c0_35 = arith.constant 0 : index
    %c0_36 = arith.constant 0 : index
    %c0_37 = arith.constant 0 : index
    %31 = vector.load %arg13[%c0_35, %c0_36, %c0_37] : memref<4x32x8xf32, #tpu.memory_space<vmem>>, vector<1x32x8xf32>
    %32 = vector.shape_cast %31 : vector<1x32x8xf32> to vector<32x8xf32>
    %c0_38 = arith.constant 0 : index
    %c0_39 = arith.constant 0 : index
    %c0_40 = arith.constant 0 : index
    %33 = vector.load %arg14[%c0_38, %c0_39, %c0_40] : memref<4x1x8xf32, #tpu.memory_space<vmem>>, vector<1x1x8xf32>
    %34 = vector.shape_cast %33 : vector<1x1x8xf32> to vector<1x8xf32>
    %cst_41 = arith.constant dense<0.000000e+00> : vector<10x8xf32>
    %35 = tpu.matmul %23, %32, %cst_41 {dimension_numbers = #tpu.dot_dimension_numbers<[1], [0], [0], [1], [0, 0, 1, 1], [], []>} : vector<10x32xf32>, vector<32x8xf32>, vector<10x8xf32> -> vector<10x8xf32>
    %36 = vector.broadcast %34 : vector<1x8xf32> to vector<10x8xf32>
    %37 = arith.addf %35, %36 : vector<10x8xf32>
    %c0_42 = arith.constant 0 : index
    %c0_43 = arith.constant 0 : index
    %c0_44 = arith.constant 0 : index
    %38 = vector.load %arg15[%c0_42, %c0_43, %c0_44] : memref<4x32x8xf32, #tpu.memory_space<vmem>>, vector<1x32x8xf32>
    %39 = vector.shape_cast %38 : vector<1x32x8xf32> to vector<32x8xf32>
    %c0_45 = arith.constant 0 : index
    %c0_46 = arith.constant 0 : index
    %c0_47 = arith.constant 0 : index
    %40 = vector.load %arg16[%c0_45, %c0_46, %c0_47] : memref<4x1x8xf32, #tpu.memory_space<vmem>>, vector<1x1x8xf32>
    %41 = vector.shape_cast %40 : vector<1x1x8xf32> to vector<1x8xf32>
    %cst_48 = arith.constant dense<0.000000e+00> : vector<10x8xf32>
    %42 = tpu.matmul %21, %39, %cst_48 {dimension_numbers = #tpu.dot_dimension_numbers<[1], [0], [0], [1], [0, 0, 1, 1], [], []>} : vector<10x32xf32>, vector<32x8xf32>, vector<10x8xf32> -> vector<10x8xf32>
    %43 = vector.broadcast %41 : vector<1x8xf32> to vector<10x8xf32>
    %44 = arith.addf %42, %43 : vector<10x8xf32>
    %cst_49 = arith.constant dense<0.000000e+00> : vector<10x10xf32>
    %45 = tpu.matmul %30, %37, %cst_49 {dimension_numbers = #tpu.dot_dimension_numbers<[1], [1], [0], [0], [0, 0, 1, 0], [], []>} : vector<10x8xf32>, vector<10x8xf32>, vector<10x10xf32> -> vector<10x10xf32>
    %cst_50 = arith.constant 0.353553385 : f32
    %46 = vector.broadcast %cst_50 : f32 to vector<10x10xf32>
    %47 = arith.mulf %45, %46 : vector<10x10xf32>
    %48 = vector.broadcast %20 : vector<1x10xf32> to vector<10x10xf32>
    %49 = arith.addf %47, %48 : vector<10x10xf32>
    %cst_51 = arith.constant dense<0xFF800000> : vector<10xf32>
    %50 = vector.multi_reduction <maximumf>, %49, %cst_51 [1] : vector<10x10xf32> to vector<10xf32>
    %51 = vector.shape_cast %50 : vector<10xf32> to vector<10x1xf32>
    %52 = vector.broadcast %51 : vector<10x1xf32> to vector<10x10xf32>
    %53 = arith.subf %49, %52 : vector<10x10xf32>
    %54 = math.exp %53 : vector<10x10xf32>
    %cst_52 = arith.constant dense<0.000000e+00> : vector<10xf32>
    %55 = vector.multi_reduction <add>, %54, %cst_52 [1] : vector<10x10xf32> to vector<10xf32>
    %56 = vector.shape_cast %55 : vector<10xf32> to vector<10x1xf32>
    %57 = tpu.reciprocal %56 {approx = true} : vector<10x1xf32> -> vector<10x1xf32>
    %58 = vector.broadcast %57 : vector<10x1xf32> to vector<10x10xf32>
    %59 = arith.mulf %54, %58 : vector<10x10xf32>
    %cst_53 = arith.constant dense<0.000000e+00> : vector<10x8xf32>
    %60 = tpu.matmul %59, %44, %cst_53 {dimension_numbers = #tpu.dot_dimension_numbers<[1], [0], [0], [1], [0, 0, 1, 1], [], []>} : vector<10x10xf32>, vector<10x8xf32>, vector<10x8xf32> -> vector<10x8xf32>
    %c0_54 = arith.constant 0 : index
    %c0_55 = arith.constant 0 : index
    %c0_56 = arith.constant 0 : index
    %61 = vector.load %arg17[%c0_54, %c0_55, %c0_56] : memref<4x8x32xf32, #tpu.memory_space<vmem>>, vector<1x8x32xf32>
    %62 = vector.shape_cast %61 : vector<1x8x32xf32> to vector<8x32xf32>
    %cst_57 = arith.constant dense<0.000000e+00> : vector<10x32xf32>
    %63 = tpu.matmul %60, %62, %cst_57 {dimension_numbers = #tpu.dot_dimension_numbers<[1], [0], [0], [1], [0, 0, 1, 1], [], []>} : vector<10x8xf32>, vector<8x32xf32>, vector<10x32xf32> -> vector<10x32xf32>
    %c1_58 = arith.constant 1 : index
    %c0_59 = arith.constant 0 : index
    %c0_60 = arith.constant 0 : index
    %64 = vector.load %arg11[%c1_58, %c0_59, %c0_60] : memref<4x32x8xf32, #tpu.memory_space<vmem>>, vector<1x32x8xf32>
    %65 = vector.shape_cast %64 : vector<1x32x8xf32> to vector<32x8xf32>
    %c1_61 = arith.constant 1 : index
    %c0_62 = arith.constant 0 : index
    %c0_63 = arith.constant 0 : index
    %66 = vector.load %arg12[%c1_61, %c0_62, %c0_63] : memref<4x1x8xf32, #tpu.memory_space<vmem>>, vector<1x1x8xf32>
    %67 = vector.shape_cast %66 : vector<1x1x8xf32> to vector<1x8xf32>
    %cst_64 = arith.constant dense<0.000000e+00> : vector<10x8xf32>
    %68 = tpu.matmul %23, %65, %cst_64 {dimension_numbers = #tpu.dot_dimension_numbers<[1], [0], [0], [1], [0, 0, 1, 1], [], []>} : vector<10x32xf32>, vector<32x8xf32>, vector<10x8xf32> -> vector<10x8xf32>
    %69 = vector.broadcast %67 : vector<1x8xf32> to vector<10x8xf32>
    %70 = arith.addf %68, %69 : vector<10x8xf32>
    %c1_65 = arith.constant 1 : index
    %c0_66 = arith.constant 0 : index
    %c0_67 = arith.constant 0 : index
    %71 = vector.load %arg13[%c1_65, %c0_66, %c0_67] : memref<4x32x8xf32, #tpu.memory_space<vmem>>, vector<1x32x8xf32>
    %72 = vector.shape_cast %71 : vector<1x32x8xf32> to vector<32x8xf32>
    %c1_68 = arith.constant 1 : index
    %c0_69 = arith.constant 0 : index
    %c0_70 = arith.constant 0 : index
    %73 = vector.load %arg14[%c1_68, %c0_69, %c0_70] : memref<4x1x8xf32, #tpu.memory_space<vmem>>, vector<1x1x8xf32>
    %74 = vector.shape_cast %73 : vector<1x1x8xf32> to vector<1x8xf32>
    %cst_71 = arith.constant dense<0.000000e+00> : vector<10x8xf32>
    %75 = tpu.matmul %23, %72, %cst_71 {dimension_numbers = #tpu.dot_dimension_numbers<[1], [0], [0], [1], [0, 0, 1, 1], [], []>} : vector<10x32xf32>, vector<32x8xf32>, vector<10x8xf32> -> vector<10x8xf32>
    %76 = vector.broadcast %74 : vector<1x8xf32> to vector<10x8xf32>
    %77 = arith.addf %75, %76 : vector<10x8xf32>
    %c1_72 = arith.constant 1 : index
    %c0_73 = arith.constant 0 : index
    %c0_74 = arith.constant 0 : index
    %78 = vector.load %arg15[%c1_72, %c0_73, %c0_74] : memref<4x32x8xf32, #tpu.memory_space<vmem>>, vector<1x32x8xf32>
    %79 = vector.shape_cast %78 : vector<1x32x8xf32> to vector<32x8xf32>
    %c1_75 = arith.constant 1 : index
    %c0_76 = arith.constant 0 : index
    %c0_77 = arith.constant 0 : index
    %80 = vector.load %arg16[%c1_75, %c0_76, %c0_77] : memref<4x1x8xf32, #tpu.memory_space<vmem>>, vector<1x1x8xf32>
    %81 = vector.shape_cast %80 : vector<1x1x8xf32> to vector<1x8xf32>
    %cst_78 = arith.constant dense<0.000000e+00> : vector<10x8xf32>
    %82 = tpu.matmul %21, %79, %cst_78 {dimension_numbers = #tpu.dot_dimension_numbers<[1], [0], [0], [1], [0, 0, 1, 1], [], []>} : vector<10x32xf32>, vector<32x8xf32>, vector<10x8xf32> -> vector<10x8xf32>
    %83 = vector.broadcast %81 : vector<1x8xf32> to vector<10x8xf32>
    %84 = arith.addf %82, %83 : vector<10x8xf32>
    %cst_79 = arith.constant dense<0.000000e+00> : vector<10x10xf32>
    %85 = tpu.matmul %70, %77, %cst_79 {dimension_numbers = #tpu.dot_dimension_numbers<[1], [1], [0], [0], [0, 0, 1, 0], [], []>} : vector<10x8xf32>, vector<10x8xf32>, vector<10x10xf32> -> vector<10x10xf32>
    %cst_80 = arith.constant 0.353553385 : f32
    %86 = vector.broadcast %cst_80 : f32 to vector<10x10xf32>
    %87 = arith.mulf %85, %86 : vector<10x10xf32>
    %88 = vector.broadcast %20 : vector<1x10xf32> to vector<10x10xf32>
    %89 = arith.addf %87, %88 : vector<10x10xf32>
    %cst_81 = arith.constant dense<0xFF800000> : vector<10xf32>
    %90 = vector.multi_reduction <maximumf>, %89, %cst_81 [1] : vector<10x10xf32> to vector<10xf32>
    %91 = vector.shape_cast %90 : vector<10xf32> to vector<10x1xf32>
    %92 = vector.broadcast %91 : vector<10x1xf32> to vector<10x10xf32>
    %93 = arith.subf %89, %92 : vector<10x10xf32>
    %94 = math.exp %93 : vector<10x10xf32>
    %cst_82 = arith.constant dense<0.000000e+00> : vector<10xf32>
    %95 = vector.multi_reduction <add>, %94, %cst_82 [1] : vector<10x10xf32> to vector<10xf32>
    %96 = vector.shape_cast %95 : vector<10xf32> to vector<10x1xf32>
    %97 = tpu.reciprocal %96 {approx = true} : vector<10x1xf32> -> vector<10x1xf32>
    %98 = vector.broadcast %97 : vector<10x1xf32> to vector<10x10xf32>
    %99 = arith.mulf %94, %98 : vector<10x10xf32>
    %cst_83 = arith.constant dense<0.000000e+00> : vector<10x8xf32>
    %100 = tpu.matmul %99, %84, %cst_83 {dimension_numbers = #tpu.dot_dimension_numbers<[1], [0], [0], [1], [0, 0, 1, 1], [], []>} : vector<10x10xf32>, vector<10x8xf32>, vector<10x8xf32> -> vector<10x8xf32>
    %c1_84 = arith.constant 1 : index
    %c0_85 = arith.constant 0 : index
    %c0_86 = arith.constant 0 : index
    %101 = vector.load %arg17[%c1_84, %c0_85, %c0_86] : memref<4x8x32xf32, #tpu.memory_space<vmem>>, vector<1x8x32xf32>
    %102 = vector.shape_cast %101 : vector<1x8x32xf32> to vector<8x32xf32>
    %cst_87 = arith.constant dense<0.000000e+00> : vector<10x32xf32>
    %103 = tpu.matmul %100, %102, %cst_87 {dimension_numbers = #tpu.dot_dimension_numbers<[1], [0], [0], [1], [0, 0, 1, 1], [], []>} : vector<10x8xf32>, vector<8x32xf32>, vector<10x32xf32> -> vector<10x32xf32>
    %104 = arith.addf %63, %103 : vector<10x32xf32>
    %c2_88 = arith.constant 2 : index
    %c0_89 = arith.constant 0 : index
    %c0_90 = arith.constant 0 : index
    %105 = vector.load %arg11[%c2_88, %c0_89, %c0_90] : memref<4x32x8xf32, #tpu.memory_space<vmem>>, vector<1x32x8xf32>
    %106 = vector.shape_cast %105 : vector<1x32x8xf32> to vector<32x8xf32>
    %c2_91 = arith.constant 2 : index
    %c0_92 = arith.constant 0 : index
    %c0_93 = arith.constant 0 : index
    %107 = vector.load %arg12[%c2_91, %c0_92, %c0_93] : memref<4x1x8xf32, #tpu.memory_space<vmem>>, vector<1x1x8xf32>
    %108 = vector.shape_cast %107 : vector<1x1x8xf32> to vector<1x8xf32>
    %cst_94 = arith.constant dense<0.000000e+00> : vector<10x8xf32>
    %109 = tpu.matmul %23, %106, %cst_94 {dimension_numbers = #tpu.dot_dimension_numbers<[1], [0], [0], [1], [0, 0, 1, 1], [], []>} : vector<10x32xf32>, vector<32x8xf32>, vector<10x8xf32> -> vector<10x8xf32>
    %110 = vector.broadcast %108 : vector<1x8xf32> to vector<10x8xf32>
    %111 = arith.addf %109, %110 : vector<10x8xf32>
    %c2_95 = arith.constant 2 : index
    %c0_96 = arith.constant 0 : index
    %c0_97 = arith.constant 0 : index
    %112 = vector.load %arg13[%c2_95, %c0_96, %c0_97] : memref<4x32x8xf32, #tpu.memory_space<vmem>>, vector<1x32x8xf32>
    %113 = vector.shape_cast %112 : vector<1x32x8xf32> to vector<32x8xf32>
    %c2_98 = arith.constant 2 : index
    %c0_99 = arith.constant 0 : index
    %c0_100 = arith.constant 0 : index
    %114 = vector.load %arg14[%c2_98, %c0_99, %c0_100] : memref<4x1x8xf32, #tpu.memory_space<vmem>>, vector<1x1x8xf32>
    %115 = vector.shape_cast %114 : vector<1x1x8xf32> to vector<1x8xf32>
    %cst_101 = arith.constant dense<0.000000e+00> : vector<10x8xf32>
    %116 = tpu.matmul %23, %113, %cst_101 {dimension_numbers = #tpu.dot_dimension_numbers<[1], [0], [0], [1], [0, 0, 1, 1], [], []>} : vector<10x32xf32>, vector<32x8xf32>, vector<10x8xf32> -> vector<10x8xf32>
    %117 = vector.broadcast %115 : vector<1x8xf32> to vector<10x8xf32>
    %118 = arith.addf %116, %117 : vector<10x8xf32>
    %c2_102 = arith.constant 2 : index
    %c0_103 = arith.constant 0 : index
    %c0_104 = arith.constant 0 : index
    %119 = vector.load %arg15[%c2_102, %c0_103, %c0_104] : memref<4x32x8xf32, #tpu.memory_space<vmem>>, vector<1x32x8xf32>
    %120 = vector.shape_cast %119 : vector<1x32x8xf32> to vector<32x8xf32>
    %c2_105 = arith.constant 2 : index
    %c0_106 = arith.constant 0 : index
    %c0_107 = arith.constant 0 : index
    %121 = vector.load %arg16[%c2_105, %c0_106, %c0_107] : memref<4x1x8xf32, #tpu.memory_space<vmem>>, vector<1x1x8xf32>
    %122 = vector.shape_cast %121 : vector<1x1x8xf32> to vector<1x8xf32>
    %cst_108 = arith.constant dense<0.000000e+00> : vector<10x8xf32>
    %123 = tpu.matmul %21, %120, %cst_108 {dimension_numbers = #tpu.dot_dimension_numbers<[1], [0], [0], [1], [0, 0, 1, 1], [], []>} : vector<10x32xf32>, vector<32x8xf32>, vector<10x8xf32> -> vector<10x8xf32>
    %124 = vector.broadcast %122 : vector<1x8xf32> to vector<10x8xf32>
    %125 = arith.addf %123, %124 : vector<10x8xf32>
    %cst_109 = arith.constant dense<0.000000e+00> : vector<10x10xf32>
    %126 = tpu.matmul %111, %118, %cst_109 {dimension_numbers = #tpu.dot_dimension_numbers<[1], [1], [0], [0], [0, 0, 1, 0], [], []>} : vector<10x8xf32>, vector<10x8xf32>, vector<10x10xf32> -> vector<10x10xf32>
    %cst_110 = arith.constant 0.353553385 : f32
    %127 = vector.broadcast %cst_110 : f32 to vector<10x10xf32>
    %128 = arith.mulf %126, %127 : vector<10x10xf32>
    %129 = vector.broadcast %20 : vector<1x10xf32> to vector<10x10xf32>
    %130 = arith.addf %128, %129 : vector<10x10xf32>
    %cst_111 = arith.constant dense<0xFF800000> : vector<10xf32>
    %131 = vector.multi_reduction <maximumf>, %130, %cst_111 [1] : vector<10x10xf32> to vector<10xf32>
    %132 = vector.shape_cast %131 : vector<10xf32> to vector<10x1xf32>
    %133 = vector.broadcast %132 : vector<10x1xf32> to vector<10x10xf32>
    %134 = arith.subf %130, %133 : vector<10x10xf32>
    %135 = math.exp %134 : vector<10x10xf32>
    %cst_112 = arith.constant dense<0.000000e+00> : vector<10xf32>
    %136 = vector.multi_reduction <add>, %135, %cst_112 [1] : vector<10x10xf32> to vector<10xf32>
    %137 = vector.shape_cast %136 : vector<10xf32> to vector<10x1xf32>
    %138 = tpu.reciprocal %137 {approx = true} : vector<10x1xf32> -> vector<10x1xf32>
    %139 = vector.broadcast %138 : vector<10x1xf32> to vector<10x10xf32>
    %140 = arith.mulf %135, %139 : vector<10x10xf32>
    %cst_113 = arith.constant dense<0.000000e+00> : vector<10x8xf32>
    %141 = tpu.matmul %140, %125, %cst_113 {dimension_numbers = #tpu.dot_dimension_numbers<[1], [0], [0], [1], [0, 0, 1, 1], [], []>} : vector<10x10xf32>, vector<10x8xf32>, vector<10x8xf32> -> vector<10x8xf32>
    %c2_114 = arith.constant 2 : index
    %c0_115 = arith.constant 0 : index
    %c0_116 = arith.constant 0 : index
    %142 = vector.load %arg17[%c2_114, %c0_115, %c0_116] : memref<4x8x32xf32, #tpu.memory_space<vmem>>, vector<1x8x32xf32>
    %143 = vector.shape_cast %142 : vector<1x8x32xf32> to vector<8x32xf32>
    %cst_117 = arith.constant dense<0.000000e+00> : vector<10x32xf32>
    %144 = tpu.matmul %141, %143, %cst_117 {dimension_numbers = #tpu.dot_dimension_numbers<[1], [0], [0], [1], [0, 0, 1, 1], [], []>} : vector<10x8xf32>, vector<8x32xf32>, vector<10x32xf32> -> vector<10x32xf32>
    %145 = arith.addf %104, %144 : vector<10x32xf32>
    %c3 = arith.constant 3 : index
    %c0_118 = arith.constant 0 : index
    %c0_119 = arith.constant 0 : index
    %146 = vector.load %arg11[%c3, %c0_118, %c0_119] : memref<4x32x8xf32, #tpu.memory_space<vmem>>, vector<1x32x8xf32>
    %147 = vector.shape_cast %146 : vector<1x32x8xf32> to vector<32x8xf32>
    %c3_120 = arith.constant 3 : index
    %c0_121 = arith.constant 0 : index
    %c0_122 = arith.constant 0 : index
    %148 = vector.load %arg12[%c3_120, %c0_121, %c0_122] : memref<4x1x8xf32, #tpu.memory_space<vmem>>, vector<1x1x8xf32>
    %149 = vector.shape_cast %148 : vector<1x1x8xf32> to vector<1x8xf32>
    %cst_123 = arith.constant dense<0.000000e+00> : vector<10x8xf32>
    %150 = tpu.matmul %23, %147, %cst_123 {dimension_numbers = #tpu.dot_dimension_numbers<[1], [0], [0], [1], [0, 0, 1, 1], [], []>} : vector<10x32xf32>, vector<32x8xf32>, vector<10x8xf32> -> vector<10x8xf32>
    %151 = vector.broadcast %149 : vector<1x8xf32> to vector<10x8xf32>
    %152 = arith.addf %150, %151 : vector<10x8xf32>
    %c3_124 = arith.constant 3 : index
    %c0_125 = arith.constant 0 : index
    %c0_126 = arith.constant 0 : index
    %153 = vector.load %arg13[%c3_124, %c0_125, %c0_126] : memref<4x32x8xf32, #tpu.memory_space<vmem>>, vector<1x32x8xf32>
    %154 = vector.shape_cast %153 : vector<1x32x8xf32> to vector<32x8xf32>
    %c3_127 = arith.constant 3 : index
    %c0_128 = arith.constant 0 : index
    %c0_129 = arith.constant 0 : index
    %155 = vector.load %arg14[%c3_127, %c0_128, %c0_129] : memref<4x1x8xf32, #tpu.memory_space<vmem>>, vector<1x1x8xf32>
    %156 = vector.shape_cast %155 : vector<1x1x8xf32> to vector<1x8xf32>
    %cst_130 = arith.constant dense<0.000000e+00> : vector<10x8xf32>
    %157 = tpu.matmul %23, %154, %cst_130 {dimension_numbers = #tpu.dot_dimension_numbers<[1], [0], [0], [1], [0, 0, 1, 1], [], []>} : vector<10x32xf32>, vector<32x8xf32>, vector<10x8xf32> -> vector<10x8xf32>
    %158 = vector.broadcast %156 : vector<1x8xf32> to vector<10x8xf32>
    %159 = arith.addf %157, %158 : vector<10x8xf32>
    %c3_131 = arith.constant 3 : index
    %c0_132 = arith.constant 0 : index
    %c0_133 = arith.constant 0 : index
    %160 = vector.load %arg15[%c3_131, %c0_132, %c0_133] : memref<4x32x8xf32, #tpu.memory_space<vmem>>, vector<1x32x8xf32>
    %161 = vector.shape_cast %160 : vector<1x32x8xf32> to vector<32x8xf32>
    %c3_134 = arith.constant 3 : index
    %c0_135 = arith.constant 0 : index
    %c0_136 = arith.constant 0 : index
    %162 = vector.load %arg16[%c3_134, %c0_135, %c0_136] : memref<4x1x8xf32, #tpu.memory_space<vmem>>, vector<1x1x8xf32>
    %163 = vector.shape_cast %162 : vector<1x1x8xf32> to vector<1x8xf32>
    %cst_137 = arith.constant dense<0.000000e+00> : vector<10x8xf32>
    %164 = tpu.matmul %21, %161, %cst_137 {dimension_numbers = #tpu.dot_dimension_numbers<[1], [0], [0], [1], [0, 0, 1, 1], [], []>} : vector<10x32xf32>, vector<32x8xf32>, vector<10x8xf32> -> vector<10x8xf32>
    %165 = vector.broadcast %163 : vector<1x8xf32> to vector<10x8xf32>
    %166 = arith.addf %164, %165 : vector<10x8xf32>
    %cst_138 = arith.constant dense<0.000000e+00> : vector<10x10xf32>
    %167 = tpu.matmul %152, %159, %cst_138 {dimension_numbers = #tpu.dot_dimension_numbers<[1], [1], [0], [0], [0, 0, 1, 0], [], []>} : vector<10x8xf32>, vector<10x8xf32>, vector<10x10xf32> -> vector<10x10xf32>
    %cst_139 = arith.constant 0.353553385 : f32
    %168 = vector.broadcast %cst_139 : f32 to vector<10x10xf32>
    %169 = arith.mulf %167, %168 : vector<10x10xf32>
    %170 = vector.broadcast %20 : vector<1x10xf32> to vector<10x10xf32>
    %171 = arith.addf %169, %170 : vector<10x10xf32>
    %cst_140 = arith.constant dense<0xFF800000> : vector<10xf32>
    %172 = vector.multi_reduction <maximumf>, %171, %cst_140 [1] : vector<10x10xf32> to vector<10xf32>
    %173 = vector.shape_cast %172 : vector<10xf32> to vector<10x1xf32>
    %174 = vector.broadcast %173 : vector<10x1xf32> to vector<10x10xf32>
    %175 = arith.subf %171, %174 : vector<10x10xf32>
    %176 = math.exp %175 : vector<10x10xf32>
    %cst_141 = arith.constant dense<0.000000e+00> : vector<10xf32>
    %177 = vector.multi_reduction <add>, %176, %cst_141 [1] : vector<10x10xf32> to vector<10xf32>
    %178 = vector.shape_cast %177 : vector<10xf32> to vector<10x1xf32>
    %179 = tpu.reciprocal %178 {approx = true} : vector<10x1xf32> -> vector<10x1xf32>
    %180 = vector.broadcast %179 : vector<10x1xf32> to vector<10x10xf32>
    %181 = arith.mulf %176, %180 : vector<10x10xf32>
    %cst_142 = arith.constant dense<0.000000e+00> : vector<10x8xf32>
    %182 = tpu.matmul %181, %166, %cst_142 {dimension_numbers = #tpu.dot_dimension_numbers<[1], [0], [0], [1], [0, 0, 1, 1], [], []>} : vector<10x10xf32>, vector<10x8xf32>, vector<10x8xf32> -> vector<10x8xf32>
    %c3_143 = arith.constant 3 : index
    %c0_144 = arith.constant 0 : index
    %c0_145 = arith.constant 0 : index
    %183 = vector.load %arg17[%c3_143, %c0_144, %c0_145] : memref<4x8x32xf32, #tpu.memory_space<vmem>>, vector<1x8x32xf32>
    %184 = vector.shape_cast %183 : vector<1x8x32xf32> to vector<8x32xf32>
    %cst_146 = arith.constant dense<0.000000e+00> : vector<10x32xf32>
    %185 = tpu.matmul %182, %184, %cst_146 {dimension_numbers = #tpu.dot_dimension_numbers<[1], [0], [0], [1], [0, 0, 1, 1], [], []>} : vector<10x8xf32>, vector<8x32xf32>, vector<10x32xf32> -> vector<10x32xf32>
    %186 = arith.addf %145, %185 : vector<10x32xf32>
    %c0_147 = arith.constant 0 : index
    %c0_148 = arith.constant 0 : index
    %187 = vector.load %arg18[%c0_147, %c0_148] : memref<1x32xf32, #tpu.memory_space<vmem>>, vector<1x32xf32>
    %188 = vector.broadcast %187 : vector<1x32xf32> to vector<10x32xf32>
    %189 = arith.addf %186, %188 : vector<10x32xf32>
    %190 = arith.addf %21, %189 : vector<10x32xf32>
    %c0_149 = arith.constant 0 : index
    %c0_150 = arith.constant 0 : index
    %191 = vector.load %arg19[%c0_149, %c0_150] : memref<1x32xf32, #tpu.memory_space<vmem>>, vector<1x32xf32>
    %c0_151 = arith.constant 0 : index
    %c0_152 = arith.constant 0 : index
    %192 = vector.load %arg20[%c0_151, %c0_152] : memref<1x32xf32, #tpu.memory_space<vmem>>, vector<1x32xf32>
    %cst_153 = arith.constant dense<0.000000e+00> : vector<10xf32>
    %193 = vector.multi_reduction <add>, %190, %cst_153 [1] : vector<10x32xf32> to vector<10xf32>
    %194 = vector.shape_cast %193 : vector<10xf32> to vector<10x1xf32>
    %cst_154 = arith.constant 3.200000e+01 : f32
    %195 = vector.broadcast %cst_154 : f32 to vector<10x1xf32>
    %196 = arith.divf %194, %195 : vector<10x1xf32>
    %197 = vector.broadcast %196 : vector<10x1xf32> to vector<10x32xf32>
    %198 = arith.subf %190, %197 : vector<10x32xf32>
    %199 = arith.mulf %198, %198 : vector<10x32xf32>
    %cst_155 = arith.constant dense<0.000000e+00> : vector<10xf32>
    %200 = vector.multi_reduction <add>, %199, %cst_155 [1] : vector<10x32xf32> to vector<10xf32>
    %201 = vector.shape_cast %200 : vector<10xf32> to vector<10x1xf32>
    %cst_156 = arith.constant 3.200000e+01 : f32
    %202 = vector.broadcast %cst_156 : f32 to vector<10x1xf32>
    %203 = arith.divf %201, %202 : vector<10x1xf32>
    %cst_157 = arith.constant 9.99999974E-6 : f32
    %204 = vector.broadcast %cst_157 : f32 to vector<10x1xf32>
    %205 = arith.addf %203, %204 : vector<10x1xf32>
    %206 = math.rsqrt %205 : vector<10x1xf32>
    %207 = vector.broadcast %206 : vector<10x1xf32> to vector<10x32xf32>
    %208 = arith.mulf %198, %207 : vector<10x32xf32>
    %209 = vector.broadcast %191 : vector<1x32xf32> to vector<10x32xf32>
    %210 = arith.mulf %208, %209 : vector<10x32xf32>
    %211 = vector.broadcast %192 : vector<1x32xf32> to vector<10x32xf32>
    %212 = arith.addf %210, %211 : vector<10x32xf32>
    %c0_158 = arith.constant 0 : index
    %c0_159 = arith.constant 0 : index
    %213 = vector.load %arg21[%c0_158, %c0_159] : memref<32x64xf32, #tpu.memory_space<vmem>>, vector<32x64xf32>
    %c0_160 = arith.constant 0 : index
    %c0_161 = arith.constant 0 : index
    %214 = vector.load %arg22[%c0_160, %c0_161] : memref<1x64xf32, #tpu.memory_space<vmem>>, vector<1x64xf32>
    %cst_162 = arith.constant dense<0.000000e+00> : vector<10x64xf32>
    %215 = tpu.matmul %212, %213, %cst_162 {dimension_numbers = #tpu.dot_dimension_numbers<[1], [0], [0], [1], [0, 0, 1, 1], [], []>} : vector<10x32xf32>, vector<32x64xf32>, vector<10x64xf32> -> vector<10x64xf32>
    %216 = vector.broadcast %214 : vector<1x64xf32> to vector<10x64xf32>
    %217 = arith.addf %215, %216 : vector<10x64xf32>
    %cst_163 = arith.constant 0.000000e+00 : f32
    %218 = vector.broadcast %cst_163 : f32 to vector<10x64xf32>
    %219 = arith.maximumf %217, %218 : vector<10x64xf32>
    %c0_164 = arith.constant 0 : index
    %c0_165 = arith.constant 0 : index
    %220 = vector.load %arg23[%c0_164, %c0_165] : memref<64x32xf32, #tpu.memory_space<vmem>>, vector<64x32xf32>
    %c0_166 = arith.constant 0 : index
    %c0_167 = arith.constant 0 : index
    %221 = vector.load %arg24[%c0_166, %c0_167] : memref<1x32xf32, #tpu.memory_space<vmem>>, vector<1x32xf32>
    %cst_168 = arith.constant dense<0.000000e+00> : vector<10x32xf32>
    %222 = tpu.matmul %219, %220, %cst_168 {dimension_numbers = #tpu.dot_dimension_numbers<[1], [0], [0], [1], [0, 0, 1, 1], [], []>} : vector<10x64xf32>, vector<64x32xf32>, vector<10x32xf32> -> vector<10x32xf32>
    %223 = vector.broadcast %221 : vector<1x32xf32> to vector<10x32xf32>
    %224 = arith.addf %222, %223 : vector<10x32xf32>
    %225 = arith.addf %212, %224 : vector<10x32xf32>
    %c0_169 = arith.constant 0 : index
    %c0_170 = arith.constant 0 : index
    %226 = vector.load %arg25[%c0_169, %c0_170] : memref<1x32xf32, #tpu.memory_space<vmem>>, vector<1x32xf32>
    %c0_171 = arith.constant 0 : index
    %c0_172 = arith.constant 0 : index
    %227 = vector.load %arg26[%c0_171, %c0_172] : memref<1x32xf32, #tpu.memory_space<vmem>>, vector<1x32xf32>
    %cst_173 = arith.constant dense<0.000000e+00> : vector<10xf32>
    %228 = vector.multi_reduction <add>, %225, %cst_173 [1] : vector<10x32xf32> to vector<10xf32>
    %229 = vector.shape_cast %228 : vector<10xf32> to vector<10x1xf32>
    %cst_174 = arith.constant 3.200000e+01 : f32
    %230 = vector.broadcast %cst_174 : f32 to vector<10x1xf32>
    %231 = arith.divf %229, %230 : vector<10x1xf32>
    %232 = vector.broadcast %231 : vector<10x1xf32> to vector<10x32xf32>
    %233 = arith.subf %225, %232 : vector<10x32xf32>
    %234 = arith.mulf %233, %233 : vector<10x32xf32>
    %cst_175 = arith.constant dense<0.000000e+00> : vector<10xf32>
    %235 = vector.multi_reduction <add>, %234, %cst_175 [1] : vector<10x32xf32> to vector<10xf32>
    %236 = vector.shape_cast %235 : vector<10xf32> to vector<10x1xf32>
    %cst_176 = arith.constant 3.200000e+01 : f32
    %237 = vector.broadcast %cst_176 : f32 to vector<10x1xf32>
    %238 = arith.divf %236, %237 : vector<10x1xf32>
    %cst_177 = arith.constant 9.99999974E-6 : f32
    %239 = vector.broadcast %cst_177 : f32 to vector<10x1xf32>
    %240 = arith.addf %238, %239 : vector<10x1xf32>
    %241 = math.rsqrt %240 : vector<10x1xf32>
    %242 = vector.broadcast %241 : vector<10x1xf32> to vector<10x32xf32>
    %243 = arith.mulf %233, %242 : vector<10x32xf32>
    %244 = vector.broadcast %226 : vector<1x32xf32> to vector<10x32xf32>
    %245 = arith.mulf %243, %244 : vector<10x32xf32>
    %246 = vector.broadcast %227 : vector<1x32xf32> to vector<10x32xf32>
    %247 = arith.addf %245, %246 : vector<10x32xf32>
    %248 = vector.extract_strided_slice %247 {offsets = [0, 0], sizes = [1, 32], strides = [1, 1]} : vector<10x32xf32> to vector<1x32xf32>
    %c0_178 = arith.constant 0 : index
    %c0_179 = arith.constant 0 : index
    %249 = vector.load %arg27[%c0_178, %c0_179] : memref<32x32xf32, #tpu.memory_space<vmem>>, vector<32x32xf32>
    %c0_180 = arith.constant 0 : index
    %c0_181 = arith.constant 0 : index
    %250 = vector.load %arg28[%c0_180, %c0_181] : memref<1x32xf32, #tpu.memory_space<vmem>>, vector<1x32xf32>
    %cst_182 = arith.constant dense<0.000000e+00> : vector<1x32xf32>
    %251 = tpu.matmul %248, %249, %cst_182 {dimension_numbers = #tpu.dot_dimension_numbers<[1], [0], [0], [1], [0, 0, 1, 1], [], []>} : vector<1x32xf32>, vector<32x32xf32>, vector<1x32xf32> -> vector<1x32xf32>
    %252 = arith.addf %251, %250 : vector<1x32xf32>
    %c0_183 = arith.constant 0 : index
    %c0_184 = arith.constant 0 : index
    %253 = vector.load %arg29[%c0_183, %c0_184] : memref<32x32xf32, #tpu.memory_space<vmem>>, vector<32x32xf32>
    %c0_185 = arith.constant 0 : index
    %c0_186 = arith.constant 0 : index
    %254 = vector.load %arg30[%c0_185, %c0_186] : memref<1x32xf32, #tpu.memory_space<vmem>>, vector<1x32xf32>
    %cst_187 = arith.constant dense<0.000000e+00> : vector<1x32xf32>
    %255 = tpu.matmul %248, %253, %cst_187 {dimension_numbers = #tpu.dot_dimension_numbers<[1], [0], [0], [1], [0, 0, 1, 1], [], []>} : vector<1x32xf32>, vector<32x32xf32>, vector<1x32xf32> -> vector<1x32xf32>
    %256 = arith.addf %255, %254 : vector<1x32xf32>
    %cst_188 = arith.constant 5.000000e-01 : f32
    %257 = vector.broadcast %cst_188 : f32 to vector<1x32xf32>
    %258 = arith.mulf %256, %257 : vector<1x32xf32>
    %259 = math.exp %258 : vector<1x32xf32>
    %c0_189 = arith.constant 0 : index
    %c0_190 = arith.constant 0 : index
    %c0_191 = arith.constant 0 : index
    %260 = vector.load %arg4[%c0_189, %c0_190, %c0_191] : memref<1x1x32xf32, #tpu.memory_space<vmem>>, vector<1x1x32xf32>
    %261 = vector.shape_cast %260 : vector<1x1x32xf32> to vector<1x32xf32>
    %262 = arith.mulf %259, %261 : vector<1x32xf32>
    %263 = arith.addf %252, %262 : vector<1x32xf32>
    %c0_192 = arith.constant 0 : index
    %c0_193 = arith.constant 0 : index
    %264 = vector.load %arg31[%c0_192, %c0_193] : memref<32x32xf32, #tpu.memory_space<vmem>>, vector<32x32xf32>
    %c0_194 = arith.constant 0 : index
    %c0_195 = arith.constant 0 : index
    %265 = vector.load %arg32[%c0_194, %c0_195] : memref<1x32xf32, #tpu.memory_space<vmem>>, vector<1x32xf32>
    %cst_196 = arith.constant dense<0.000000e+00> : vector<1x32xf32>
    %266 = tpu.matmul %263, %264, %cst_196 {dimension_numbers = #tpu.dot_dimension_numbers<[1], [0], [0], [1], [0, 0, 1, 1], [], []>} : vector<1x32xf32>, vector<32x32xf32>, vector<1x32xf32> -> vector<1x32xf32>
    %267 = arith.addf %266, %265 : vector<1x32xf32>
    %c0_197 = arith.constant 0 : index
    %c0_198 = arith.constant 0 : index
    %c0_199 = arith.constant 0 : index
    %268 = vector.load %arg33[%c0_197, %c0_198, %c0_199] : memref<1x1x32xf32, #tpu.memory_space<vmem>>, vector<1x1x32xf32>
    %269 = vector.shape_cast %268 : vector<1x1x32xf32> to vector<1x32xf32>
    %270 = vector.shape_cast %267 : vector<1x32xf32> to vector<1x1x32xf32>
    tpu.vector_store %arg33[%c0_197, %c0_198, %c0_199], %270 {strides = array<i32>} : memref<1x1x32xf32, #tpu.memory_space<vmem>>, vector<1x1x32xf32>,
    %c0_200 = arith.constant 0 : index
    %c0_201 = arith.constant 0 : index
    %c0_202 = arith.constant 0 : index
    %271 = vector.load %arg34[%c0_200, %c0_201, %c0_202] : memref<1x1x32xf32, #tpu.memory_space<vmem>>, vector<1x1x32xf32>
    %272 = vector.shape_cast %271 : vector<1x1x32xf32> to vector<1x32xf32>
    %273 = vector.shape_cast %252 : vector<1x32xf32> to vector<1x1x32xf32>
    tpu.vector_store %arg34[%c0_200, %c0_201, %c0_202], %273 {strides = array<i32>} : memref<1x1x32xf32, #tpu.memory_space<vmem>>, vector<1x1x32xf32>,
    %c0_203 = arith.constant 0 : index
    %c0_204 = arith.constant 0 : index
    %c0_205 = arith.constant 0 : index
    %274 = vector.load %arg35[%c0_203, %c0_204, %c0_205] : memref<1x1x32xf32, #tpu.memory_space<vmem>>, vector<1x1x32xf32>
    %275 = vector.shape_cast %274 : vector<1x1x32xf32> to vector<1x32xf32>
    %276 = vector.shape_cast %256 : vector<1x32xf32> to vector<1x1x32xf32>
    tpu.vector_store %arg35[%c0_203, %c0_204, %c0_205], %276 {strides = array<i32>} : memref<1x1x32xf32, #tpu.memory_space<vmem>>, vector<1x1x32xf32>,
    return
  }
  func.func @transform_0(%arg0: i32) -> (i32, i32, i32) {
    %c0_i32 = arith.constant 0 : i32
    %c0_i32_0 = arith.constant 0 : i32
    %c0_i32_1 = arith.constant 0 : i32
    return %arg0, %c0_i32, %c0_i32_0 : i32, i32, i32
  }
  func.func @transform_1(%arg0: i32) -> (i32, i32, i32) {
    %c0_i32 = arith.constant 0 : i32
    %c0_i32_0 = arith.constant 0 : i32
    %c0_i32_1 = arith.constant 0 : i32
    return %arg0, %c0_i32, %c0_i32_0 : i32, i32, i32
  }
  func.func @transform_2(%arg0: i32) -> (i32, i32, i32) {
    %c0_i32 = arith.constant 0 : i32
    %c0_i32_0 = arith.constant 0 : i32
    %c0_i32_1 = arith.constant 0 : i32
    return %arg0, %c0_i32, %c0_i32_0 : i32, i32, i32
  }
  func.func @transform_3(%arg0: i32) -> (i32, i32, i32) {
    %c0_i32 = arith.constant 0 : i32
    %c0_i32_0 = arith.constant 0 : i32
    %c0_i32_1 = arith.constant 0 : i32
    return %arg0, %c0_i32, %c0_i32_0 : i32, i32, i32
  }
  func.func @transform_4(%arg0: i32) -> (i32, i32) {
    %c0_i32 = arith.constant 0 : i32
    %c0_i32_0 = arith.constant 0 : i32
    %c0_i32_1 = arith.constant 0 : i32
    return %c0_i32, %c0_i32_0 : i32, i32
  }
  func.func @transform_5(%arg0: i32) -> (i32, i32) {
    %c0_i32 = arith.constant 0 : i32
    %c0_i32_0 = arith.constant 0 : i32
    %c0_i32_1 = arith.constant 0 : i32
    return %c0_i32, %c0_i32_0 : i32, i32
  }
  func.func @transform_6(%arg0: i32) -> (i32, i32) {
    %c0_i32 = arith.constant 0 : i32
    %c0_i32_0 = arith.constant 0 : i32
    %c0_i32_1 = arith.constant 0 : i32
    return %c0_i32, %c0_i32_0 : i32, i32
  }
  func.func @transform_7(%arg0: i32) -> (i32, i32) {
    %c0_i32 = arith.constant 0 : i32
    %c0_i32_0 = arith.constant 0 : i32
    %c0_i32_1 = arith.constant 0 : i32
    return %c0_i32, %c0_i32_0 : i32, i32
  }
  func.func @transform_8(%arg0: i32) -> (i32, i32) {
    %c0_i32 = arith.constant 0 : i32
    %c0_i32_0 = arith.constant 0 : i32
    %c0_i32_1 = arith.constant 0 : i32
    return %c0_i32, %c0_i32_0 : i32, i32
  }
  func.func @transform_9(%arg0: i32) -> (i32, i32) {
    %c0_i32 = arith.constant 0 : i32
    %c0_i32_0 = arith.constant 0 : i32
    %c0_i32_1 = arith.constant 0 : i32
    return %c0_i32, %c0_i32_0 : i32, i32
  }
  func.func @transform_10(%arg0: i32) -> (i32, i32, i32) {
    %c0_i32 = arith.constant 0 : i32
    %c0_i32_0 = arith.constant 0 : i32
    %c0_i32_1 = arith.constant 0 : i32
    %c0_i32_2 = arith.constant 0 : i32
    return %c0_i32, %c0_i32_0, %c0_i32_1 : i32, i32, i32
  }
  func.func @transform_11(%arg0: i32) -> (i32, i32, i32) {
    %c0_i32 = arith.constant 0 : i32
    %c0_i32_0 = arith.constant 0 : i32
    %c0_i32_1 = arith.constant 0 : i32
    %c0_i32_2 = arith.constant 0 : i32
    return %c0_i32, %c0_i32_0, %c0_i32_1 : i32, i32, i32
  }
  func.func @transform_12(%arg0: i32) -> (i32, i32, i32) {
    %c0_i32 = arith.constant 0 : i32
    %c0_i32_0 = arith.constant 0 : i32
    %c0_i32_1 = arith.constant 0 : i32
    %c0_i32_2 = arith.constant 0 : i32
    return %c0_i32, %c0_i32_0, %c0_i32_1 : i32, i32, i32
  }
  func.func @transform_13(%arg0: i32) -> (i32, i32, i32) {
    %c0_i32 = arith.constant 0 : i32
    %c0_i32_0 = arith.constant 0 : i32
    %c0_i32_1 = arith.constant 0 : i32
    %c0_i32_2 = arith.constant 0 : i32
    return %c0_i32, %c0_i32_0, %c0_i32_1 : i32, i32, i32
  }
  func.func @transform_14(%arg0: i32) -> (i32, i32, i32) {
    %c0_i32 = arith.constant 0 : i32
    %c0_i32_0 = arith.constant 0 : i32
    %c0_i32_1 = arith.constant 0 : i32
    %c0_i32_2 = arith.constant 0 : i32
    return %c0_i32, %c0_i32_0, %c0_i32_1 : i32, i32, i32
  }
  func.func @transform_15(%arg0: i32) -> (i32, i32, i32) {
    %c0_i32 = arith.constant 0 : i32
    %c0_i32_0 = arith.constant 0 : i32
    %c0_i32_1 = arith.constant 0 : i32
    %c0_i32_2 = arith.constant 0 : i32
    return %c0_i32, %c0_i32_0, %c0_i32_1 : i32, i32, i32
  }
  func.func @transform_16(%arg0: i32) -> (i32, i32, i32) {
    %c0_i32 = arith.constant 0 : i32
    %c0_i32_0 = arith.constant 0 : i32
    %c0_i32_1 = arith.constant 0 : i32
    %c0_i32_2 = arith.constant 0 : i32
    return %c0_i32, %c0_i32_0, %c0_i32_1 : i32, i32, i32
  }
  func.func @transform_17(%arg0: i32) -> (i32, i32) {
    %c0_i32 = arith.constant 0 : i32
    %c0_i32_0 = arith.constant 0 : i32
    %c0_i32_1 = arith.constant 0 : i32
    return %c0_i32, %c0_i32_0 : i32, i32
  }
  func.func @transform_18(%arg0: i32) -> (i32, i32) {
    %c0_i32 = arith.constant 0 : i32
    %c0_i32_0 = arith.constant 0 : i32
    %c0_i32_1 = arith.constant 0 : i32
    return %c0_i32, %c0_i32_0 : i32, i32
  }
  func.func @transform_19(%arg0: i32) -> (i32, i32) {
    %c0_i32 = arith.constant 0 : i32
    %c0_i32_0 = arith.constant 0 : i32
    %c0_i32_1 = arith.constant 0 : i32
    return %c0_i32, %c0_i32_0 : i32, i32
  }
  func.func @transform_20(%arg0: i32) -> (i32, i32) {
    %c0_i32 = arith.constant 0 : i32
    %c0_i32_0 = arith.constant 0 : i32
    %c0_i32_1 = arith.constant 0 : i32
    return %c0_i32, %c0_i32_0 : i32, i32
  }
  func.func @transform_21(%arg0: i32) -> (i32, i32) {
    %c0_i32 = arith.constant 0 : i32
    %c0_i32_0 = arith.constant 0 : i32
    %c0_i32_1 = arith.constant 0 : i32
    return %c0_i32, %c0_i32_0 : i32, i32
  }
  func.func @transform_22(%arg0: i32) -> (i32, i32) {
    %c0_i32 = arith.constant 0 : i32
    %c0_i32_0 = arith.constant 0 : i32
    %c0_i32_1 = arith.constant 0 : i32
    return %c0_i32, %c0_i32_0 : i32, i32
  }
  func.func @transform_23(%arg0: i32) -> (i32, i32) {
    %c0_i32 = arith.constant 0 : i32
    %c0_i32_0 = arith.constant 0 : i32
    %c0_i32_1 = arith.constant 0 : i32
    return %c0_i32, %c0_i32_0 : i32, i32
  }
  func.func @transform_24(%arg0: i32) -> (i32, i32) {
    %c0_i32 = arith.constant 0 : i32
    %c0_i32_0 = arith.constant 0 : i32
    %c0_i32_1 = arith.constant 0 : i32
    return %c0_i32, %c0_i32_0 : i32, i32
  }
  func.func @transform_25(%arg0: i32) -> (i32, i32) {
    %c0_i32 = arith.constant 0 : i32
    %c0_i32_0 = arith.constant 0 : i32
    %c0_i32_1 = arith.constant 0 : i32
    return %c0_i32, %c0_i32_0 : i32, i32
  }
  func.func @transform_26(%arg0: i32) -> (i32, i32) {
    %c0_i32 = arith.constant 0 : i32
    %c0_i32_0 = arith.constant 0 : i32
    %c0_i32_1 = arith.constant 0 : i32
    return %c0_i32, %c0_i32_0 : i32, i32
  }
  func.func @transform_27(%arg0: i32) -> (i32, i32) {
    %c0_i32 = arith.constant 0 : i32
    %c0_i32_0 = arith.constant 0 : i32
    %c0_i32_1 = arith.constant 0 : i32
    return %c0_i32, %c0_i32_0 : i32, i32
  }
  func.func @transform_28(%arg0: i32) -> (i32, i32) {
    %c0_i32 = arith.constant 0 : i32
    %c0_i32_0 = arith.constant 0 : i32
    %c0_i32_1 = arith.constant 0 : i32
    return %c0_i32, %c0_i32_0 : i32, i32
  }
  func.func @transform_29(%arg0: i32) -> (i32, i32) {
    %c0_i32 = arith.constant 0 : i32
    %c0_i32_0 = arith.constant 0 : i32
    %c0_i32_1 = arith.constant 0 : i32
    return %c0_i32, %c0_i32_0 : i32, i32
  }
  func.func @transform_30(%arg0: i32) -> (i32, i32) {
    %c0_i32 = arith.constant 0 : i32
    %c0_i32_0 = arith.constant 0 : i32
    %c0_i32_1 = arith.constant 0 : i32
    return %c0_i32, %c0_i32_0 : i32, i32
  }
  func.func @transform_31(%arg0: i32) -> (i32, i32) {
    %c0_i32 = arith.constant 0 : i32
    %c0_i32_0 = arith.constant 0 : i32
    %c0_i32_1 = arith.constant 0 : i32
    return %c0_i32, %c0_i32_0 : i32, i32
  }
  func.func @transform_32(%arg0: i32) -> (i32, i32, i32) {
    %c0_i32 = arith.constant 0 : i32
    %c0_i32_0 = arith.constant 0 : i32
    %c0_i32_1 = arith.constant 0 : i32
    return %arg0, %c0_i32, %c0_i32_0 : i32, i32, i32
  }
  func.func @transform_33(%arg0: i32) -> (i32, i32, i32) {
    %c0_i32 = arith.constant 0 : i32
    %c0_i32_0 = arith.constant 0 : i32
    %c0_i32_1 = arith.constant 0 : i32
    return %arg0, %c0_i32, %c0_i32_0 : i32, i32, i32
  }
  func.func @transform_34(%arg0: i32) -> (i32, i32, i32) {
    %c0_i32 = arith.constant 0 : i32
    %c0_i32_0 = arith.constant 0 : i32
    %c0_i32_1 = arith.constant 0 : i32
    return %arg0, %c0_i32, %c0_i32_0 : i32, i32, i32
  }
}

module attributes {stable_mosaic.version = 11 : i64} {
  func.func @_act_transformer_kernel(%arg0: i32, %arg1: memref<1x16x3xf32, #tpu.memory_space<vmem>>, %arg2: memref<1x1x7xf32, #tpu.memory_space<vmem>>, %arg3: memref<1x1x32xf32, #tpu.memory_space<vmem>>, %arg4: memref<3x32xf32, #tpu.memory_space<vmem>>, %arg5: memref<1x32xf32, #tpu.memory_space<vmem>>, %arg6: memref<7x32xf32, #tpu.memory_space<vmem>>, %arg7: memref<1x32xf32, #tpu.memory_space<vmem>>, %arg8: memref<18x32xf32, #tpu.memory_space<vmem>>, %arg9: memref<8x32xf32, #tpu.memory_space<vmem>>, %arg10: memref<4x32x8xf32, #tpu.memory_space<vmem>>, %arg11: memref<4x1x8xf32, #tpu.memory_space<vmem>>, %arg12: memref<4x32x8xf32, #tpu.memory_space<vmem>>, %arg13: memref<4x1x8xf32, #tpu.memory_space<vmem>>, %arg14: memref<4x32x8xf32, #tpu.memory_space<vmem>>, %arg15: memref<4x1x8xf32, #tpu.memory_space<vmem>>, %arg16: memref<4x8x32xf32, #tpu.memory_space<vmem>>, %arg17: memref<1x32xf32, #tpu.memory_space<vmem>>, %arg18: memref<1x32xf32, #tpu.memory_space<vmem>>, %arg19: memref<1x32xf32, #tpu.memory_space<vmem>>, %arg20: memref<32x64xf32, #tpu.memory_space<vmem>>, %arg21: memref<1x64xf32, #tpu.memory_space<vmem>>, %arg22: memref<64x32xf32, #tpu.memory_space<vmem>>, %arg23: memref<1x32xf32, #tpu.memory_space<vmem>>, %arg24: memref<1x32xf32, #tpu.memory_space<vmem>>, %arg25: memref<1x32xf32, #tpu.memory_space<vmem>>, %arg26: memref<4x32x8xf32, #tpu.memory_space<vmem>>, %arg27: memref<4x1x8xf32, #tpu.memory_space<vmem>>, %arg28: memref<4x32x8xf32, #tpu.memory_space<vmem>>, %arg29: memref<4x1x8xf32, #tpu.memory_space<vmem>>, %arg30: memref<4x32x8xf32, #tpu.memory_space<vmem>>, %arg31: memref<4x1x8xf32, #tpu.memory_space<vmem>>, %arg32: memref<4x8x32xf32, #tpu.memory_space<vmem>>, %arg33: memref<1x32xf32, #tpu.memory_space<vmem>>, %arg34: memref<1x32xf32, #tpu.memory_space<vmem>>, %arg35: memref<1x32xf32, #tpu.memory_space<vmem>>, %arg36: memref<4x32x8xf32, #tpu.memory_space<vmem>>, %arg37: memref<4x1x8xf32, #tpu.memory_space<vmem>>, %arg38: memref<4x32x8xf32, #tpu.memory_space<vmem>>, %arg39: memref<4x1x8xf32, #tpu.memory_space<vmem>>, %arg40: memref<4x32x8xf32, #tpu.memory_space<vmem>>, %arg41: memref<4x1x8xf32, #tpu.memory_space<vmem>>, %arg42: memref<4x8x32xf32, #tpu.memory_space<vmem>>, %arg43: memref<1x32xf32, #tpu.memory_space<vmem>>, %arg44: memref<1x32xf32, #tpu.memory_space<vmem>>, %arg45: memref<1x32xf32, #tpu.memory_space<vmem>>, %arg46: memref<32x64xf32, #tpu.memory_space<vmem>>, %arg47: memref<1x64xf32, #tpu.memory_space<vmem>>, %arg48: memref<64x32xf32, #tpu.memory_space<vmem>>, %arg49: memref<1x32xf32, #tpu.memory_space<vmem>>, %arg50: memref<1x32xf32, #tpu.memory_space<vmem>>, %arg51: memref<1x32xf32, #tpu.memory_space<vmem>>, %arg52: memref<32x8xf32, #tpu.memory_space<vmem>>, %arg53: memref<1x8xf32, #tpu.memory_space<vmem>>, %arg54: memref<32x1xf32, #tpu.memory_space<vmem>>, %arg55: memref<1x1xf32, #tpu.memory_space<vmem>>, %arg56: memref<1x8x8xf32, #tpu.memory_space<vmem>>, %arg57: memref<1x8x1xf32, #tpu.memory_space<vmem>>, %arg58: memref<18x32xf32, #tpu.memory_space<vmem>>) attributes {dimension_semantics = [#tpu.dimension_semantics<parallel>], iteration_bounds = array<i64: 2>, scalar_prefetch = 0 : i64, scratch_operands = 1 : i64, tpu.core_type = #tpu.core_type<tc>, window_params = [{transform_indices = @transform_0, window_bounds = array<i64: 1, 16, 3>}, {transform_indices = @transform_1, window_bounds = array<i64: 1, 1, 7>}, {transform_indices = @transform_2, window_bounds = array<i64: 1, 1, 32>}, {pipeline_mode = #tpu.pipeline_mode<synchronous>, transform_indices = @transform_3, window_bounds = array<i64: 3, 32>}, {pipeline_mode = #tpu.pipeline_mode<synchronous>, transform_indices = @transform_4, window_bounds = array<i64: 1, 32>}, {pipeline_mode = #tpu.pipeline_mode<synchronous>, transform_indices = @transform_5, window_bounds = array<i64: 7, 32>}, {pipeline_mode = #tpu.pipeline_mode<synchronous>, transform_indices = @transform_6, window_bounds = array<i64: 1, 32>}, {pipeline_mode = #tpu.pipeline_mode<synchronous>, transform_indices = @transform_7, window_bounds = array<i64: 18, 32>}, {pipeline_mode = #tpu.pipeline_mode<synchronous>, transform_indices = @transform_8, window_bounds = array<i64: 8, 32>}, {pipeline_mode = #tpu.pipeline_mode<synchronous>, transform_indices = @transform_9, window_bounds = array<i64: 4, 32, 8>}, {pipeline_mode = #tpu.pipeline_mode<synchronous>, transform_indices = @transform_10, window_bounds = array<i64: 4, 1, 8>}, {pipeline_mode = #tpu.pipeline_mode<synchronous>, transform_indices = @transform_11, window_bounds = array<i64: 4, 32, 8>}, {pipeline_mode = #tpu.pipeline_mode<synchronous>, transform_indices = @transform_12, window_bounds = array<i64: 4, 1, 8>}, {pipeline_mode = #tpu.pipeline_mode<synchronous>, transform_indices = @transform_13, window_bounds = array<i64: 4, 32, 8>}, {pipeline_mode = #tpu.pipeline_mode<synchronous>, transform_indices = @transform_14, window_bounds = array<i64: 4, 1, 8>}, {pipeline_mode = #tpu.pipeline_mode<synchronous>, transform_indices = @transform_15, window_bounds = array<i64: 4, 8, 32>}, {pipeline_mode = #tpu.pipeline_mode<synchronous>, transform_indices = @transform_16, window_bounds = array<i64: 1, 32>}, {pipeline_mode = #tpu.pipeline_mode<synchronous>, transform_indices = @transform_17, window_bounds = array<i64: 1, 32>}, {pipeline_mode = #tpu.pipeline_mode<synchronous>, transform_indices = @transform_18, window_bounds = array<i64: 1, 32>}, {pipeline_mode = #tpu.pipeline_mode<synchronous>, transform_indices = @transform_19, window_bounds = array<i64: 32, 64>}, {pipeline_mode = #tpu.pipeline_mode<synchronous>, transform_indices = @transform_20, window_bounds = array<i64: 1, 64>}, {pipeline_mode = #tpu.pipeline_mode<synchronous>, transform_indices = @transform_21, window_bounds = array<i64: 64, 32>}, {pipeline_mode = #tpu.pipeline_mode<synchronous>, transform_indices = @transform_22, window_bounds = array<i64: 1, 32>}, {pipeline_mode = #tpu.pipeline_mode<synchronous>, transform_indices = @transform_23, window_bounds = array<i64: 1, 32>}, {pipeline_mode = #tpu.pipeline_mode<synchronous>, transform_indices = @transform_24, window_bounds = array<i64: 1, 32>}, {pipeline_mode = #tpu.pipeline_mode<synchronous>, transform_indices = @transform_25, window_bounds = array<i64: 4, 32, 8>}, {pipeline_mode = #tpu.pipeline_mode<synchronous>, transform_indices = @transform_26, window_bounds = array<i64: 4, 1, 8>}, {pipeline_mode = #tpu.pipeline_mode<synchronous>, transform_indices = @transform_27, window_bounds = array<i64: 4, 32, 8>}, {pipeline_mode = #tpu.pipeline_mode<synchronous>, transform_indices = @transform_28, window_bounds = array<i64: 4, 1, 8>}, {pipeline_mode = #tpu.pipeline_mode<synchronous>, transform_indices = @transform_29, window_bounds = array<i64: 4, 32, 8>}, {pipeline_mode = #tpu.pipeline_mode<synchronous>, transform_indices = @transform_30, window_bounds = array<i64: 4, 1, 8>}, {pipeline_mode = #tpu.pipeline_mode<synchronous>, transform_indices = @transform_31, window_bounds = array<i64: 4, 8, 32>}, {pipeline_mode = #tpu.pipeline_mode<synchronous>, transform_indices = @transform_32, window_bounds = array<i64: 1, 32>}, {pipeline_mode = #tpu.pipeline_mode<synchronous>, transform_indices = @transform_33, window_bounds = array<i64: 1, 32>}, {pipeline_mode = #tpu.pipeline_mode<synchronous>, transform_indices = @transform_34, window_bounds = array<i64: 1, 32>}, {pipeline_mode = #tpu.pipeline_mode<synchronous>, transform_indices = @transform_35, window_bounds = array<i64: 4, 32, 8>}, {pipeline_mode = #tpu.pipeline_mode<synchronous>, transform_indices = @transform_36, window_bounds = array<i64: 4, 1, 8>}, {pipeline_mode = #tpu.pipeline_mode<synchronous>, transform_indices = @transform_37, window_bounds = array<i64: 4, 32, 8>}, {pipeline_mode = #tpu.pipeline_mode<synchronous>, transform_indices = @transform_38, window_bounds = array<i64: 4, 1, 8>}, {pipeline_mode = #tpu.pipeline_mode<synchronous>, transform_indices = @transform_39, window_bounds = array<i64: 4, 32, 8>}, {pipeline_mode = #tpu.pipeline_mode<synchronous>, transform_indices = @transform_40, window_bounds = array<i64: 4, 1, 8>}, {pipeline_mode = #tpu.pipeline_mode<synchronous>, transform_indices = @transform_41, window_bounds = array<i64: 4, 8, 32>}, {pipeline_mode = #tpu.pipeline_mode<synchronous>, transform_indices = @transform_42, window_bounds = array<i64: 1, 32>}, {pipeline_mode = #tpu.pipeline_mode<synchronous>, transform_indices = @transform_43, window_bounds = array<i64: 1, 32>}, {pipeline_mode = #tpu.pipeline_mode<synchronous>, transform_indices = @transform_44, window_bounds = array<i64: 1, 32>}, {pipeline_mode = #tpu.pipeline_mode<synchronous>, transform_indices = @transform_45, window_bounds = array<i64: 32, 64>}, {pipeline_mode = #tpu.pipeline_mode<synchronous>, transform_indices = @transform_46, window_bounds = array<i64: 1, 64>}, {pipeline_mode = #tpu.pipeline_mode<synchronous>, transform_indices = @transform_47, window_bounds = array<i64: 64, 32>}, {pipeline_mode = #tpu.pipeline_mode<synchronous>, transform_indices = @transform_48, window_bounds = array<i64: 1, 32>}, {pipeline_mode = #tpu.pipeline_mode<synchronous>, transform_indices = @transform_49, window_bounds = array<i64: 1, 32>}, {pipeline_mode = #tpu.pipeline_mode<synchronous>, transform_indices = @transform_50, window_bounds = array<i64: 1, 32>}, {pipeline_mode = #tpu.pipeline_mode<synchronous>, transform_indices = @transform_51, window_bounds = array<i64: 32, 8>}, {pipeline_mode = #tpu.pipeline_mode<synchronous>, transform_indices = @transform_52, window_bounds = array<i64: 1, 8>}, {pipeline_mode = #tpu.pipeline_mode<synchronous>, transform_indices = @transform_53, window_bounds = array<i64: 32, 1>}, {pipeline_mode = #tpu.pipeline_mode<synchronous>, transform_indices = @transform_54, window_bounds = array<i64: 1, 1>}, {transform_indices = @transform_55, window_bounds = array<i64: 1, 8, 8>}, {transform_indices = @transform_56, window_bounds = array<i64: 1, 8, 1>}]} {
    %c0 = arith.constant 0 : index
    %c0_0 = arith.constant 0 : index
    %c0_1 = arith.constant 0 : index
    %0 = vector.load %arg1[%c0, %c0_0, %c0_1] : memref<1x16x3xf32, #tpu.memory_space<vmem>>, vector<1x16x3xf32>
    %1 = vector.shape_cast %0 : vector<1x16x3xf32> to vector<16x3xf32>
    %c0_2 = arith.constant 0 : index
    %c0_3 = arith.constant 0 : index
    %2 = vector.load %arg4[%c0_2, %c0_3] : memref<3x32xf32, #tpu.memory_space<vmem>>, vector<3x32xf32>
    %c0_4 = arith.constant 0 : index
    %c0_5 = arith.constant 0 : index
    %3 = vector.load %arg5[%c0_4, %c0_5] : memref<1x32xf32, #tpu.memory_space<vmem>>, vector<1x32xf32>
    %cst = arith.constant dense<0.000000e+00> : vector<16x32xf32>
    %4 = tpu.matmul %1, %2, %cst {dimension_numbers = #tpu.dot_dimension_numbers<[1], [0], [0], [1], [0, 0, 1, 1], [], []>} : vector<16x3xf32>, vector<3x32xf32>, vector<16x32xf32> -> vector<16x32xf32>
    %5 = vector.broadcast %3 : vector<1x32xf32> to vector<16x32xf32>
    %6 = arith.addf %4, %5 : vector<16x32xf32>
    %c0_6 = arith.constant 0 : index
    %c0_7 = arith.constant 0 : index
    %c0_8 = arith.constant 0 : index
    %7 = vector.load %arg2[%c0_6, %c0_7, %c0_8] : memref<1x1x7xf32, #tpu.memory_space<vmem>>, vector<1x1x7xf32>
    %8 = vector.shape_cast %7 : vector<1x1x7xf32> to vector<1x7xf32>
    %c0_9 = arith.constant 0 : index
    %c0_10 = arith.constant 0 : index
    %9 = vector.load %arg6[%c0_9, %c0_10] : memref<7x32xf32, #tpu.memory_space<vmem>>, vector<7x32xf32>
    %c0_11 = arith.constant 0 : index
    %c0_12 = arith.constant 0 : index
    %10 = vector.load %arg7[%c0_11, %c0_12] : memref<1x32xf32, #tpu.memory_space<vmem>>, vector<1x32xf32>
    %cst_13 = arith.constant dense<0.000000e+00> : vector<1x32xf32>
    %11 = tpu.matmul %8, %9, %cst_13 {dimension_numbers = #tpu.dot_dimension_numbers<[1], [0], [0], [1], [0, 0, 1, 1], [], []>} : vector<1x7xf32>, vector<7x32xf32>, vector<1x32xf32> -> vector<1x32xf32>
    %12 = arith.addf %11, %10 : vector<1x32xf32>
    %c0_14 = arith.constant 0 : index
    %c0_15 = arith.constant 0 : index
    %c0_16 = arith.constant 0 : index
    %13 = vector.load %arg3[%c0_14, %c0_15, %c0_16] : memref<1x1x32xf32, #tpu.memory_space<vmem>>, vector<1x1x32xf32>
    %14 = vector.shape_cast %13 : vector<1x1x32xf32> to vector<1x32xf32>
    %c0_17 = arith.constant 0 : index
    %c0_18 = arith.constant 0 : index
    %15 = vector.load %arg58[%c0_17, %c0_18] : memref<18x32xf32, #tpu.memory_space<vmem>>, vector<1x32xf32>
    tpu.vector_store %arg58[%c0_17, %c0_18], %14 {strides = array<i32>} : memref<18x32xf32, #tpu.memory_space<vmem>>, vector<1x32xf32>,
    %c1 = arith.constant 1 : index
    %c0_19 = arith.constant 0 : index
    %16 = vector.load %arg58[%c1, %c0_19] : memref<18x32xf32, #tpu.memory_space<vmem>>, vector<1x32xf32>
    tpu.vector_store %arg58[%c1, %c0_19], %12 {strides = array<i32>} : memref<18x32xf32, #tpu.memory_space<vmem>>, vector<1x32xf32>,
    %c2 = arith.constant 2 : index
    %c0_20 = arith.constant 0 : index
    %17 = vector.load %arg58[%c2, %c0_20] : memref<18x32xf32, #tpu.memory_space<vmem>>, vector<16x32xf32>
    tpu.vector_store %arg58[%c2, %c0_20], %6 {strides = array<i32>} : memref<18x32xf32, #tpu.memory_space<vmem>>, vector<16x32xf32>,
    %c0_21 = arith.constant 0 : index
    %c0_22 = arith.constant 0 : index
    %18 = vector.load %arg8[%c0_21, %c0_22] : memref<18x32xf32, #tpu.memory_space<vmem>>, vector<18x32xf32>
    %c0_23 = arith.constant 0 : index
    %c0_24 = arith.constant 0 : index
    %19 = vector.load %arg58[%c0_23, %c0_24] : memref<18x32xf32, #tpu.memory_space<vmem>>, vector<18x32xf32>
    %20 = arith.addf %19, %18 : vector<18x32xf32>
    %c0_25 = arith.constant 0 : index
    %c0_26 = arith.constant 0 : index
    %c0_27 = arith.constant 0 : index
    %21 = vector.load %arg10[%c0_25, %c0_26, %c0_27] : memref<4x32x8xf32, #tpu.memory_space<vmem>>, vector<1x32x8xf32>
    %22 = vector.shape_cast %21 : vector<1x32x8xf32> to vector<32x8xf32>
    %c0_28 = arith.constant 0 : index
    %c0_29 = arith.constant 0 : index
    %c0_30 = arith.constant 0 : index
    %23 = vector.load %arg11[%c0_28, %c0_29, %c0_30] : memref<4x1x8xf32, #tpu.memory_space<vmem>>, vector<1x1x8xf32>
    %24 = vector.shape_cast %23 : vector<1x1x8xf32> to vector<1x8xf32>
    %cst_31 = arith.constant dense<0.000000e+00> : vector<18x8xf32>
    %25 = tpu.matmul %20, %22, %cst_31 {dimension_numbers = #tpu.dot_dimension_numbers<[1], [0], [0], [1], [0, 0, 1, 1], [], []>} : vector<18x32xf32>, vector<32x8xf32>, vector<18x8xf32> -> vector<18x8xf32>
    %26 = vector.broadcast %24 : vector<1x8xf32> to vector<18x8xf32>
    %27 = arith.addf %25, %26 : vector<18x8xf32>
    %c0_32 = arith.constant 0 : index
    %c0_33 = arith.constant 0 : index
    %c0_34 = arith.constant 0 : index
    %28 = vector.load %arg12[%c0_32, %c0_33, %c0_34] : memref<4x32x8xf32, #tpu.memory_space<vmem>>, vector<1x32x8xf32>
    %29 = vector.shape_cast %28 : vector<1x32x8xf32> to vector<32x8xf32>
    %c0_35 = arith.constant 0 : index
    %c0_36 = arith.constant 0 : index
    %c0_37 = arith.constant 0 : index
    %30 = vector.load %arg13[%c0_35, %c0_36, %c0_37] : memref<4x1x8xf32, #tpu.memory_space<vmem>>, vector<1x1x8xf32>
    %31 = vector.shape_cast %30 : vector<1x1x8xf32> to vector<1x8xf32>
    %cst_38 = arith.constant dense<0.000000e+00> : vector<18x8xf32>
    %32 = tpu.matmul %20, %29, %cst_38 {dimension_numbers = #tpu.dot_dimension_numbers<[1], [0], [0], [1], [0, 0, 1, 1], [], []>} : vector<18x32xf32>, vector<32x8xf32>, vector<18x8xf32> -> vector<18x8xf32>
    %33 = vector.broadcast %31 : vector<1x8xf32> to vector<18x8xf32>
    %34 = arith.addf %32, %33 : vector<18x8xf32>
    %c0_39 = arith.constant 0 : index
    %c0_40 = arith.constant 0 : index
    %c0_41 = arith.constant 0 : index
    %35 = vector.load %arg14[%c0_39, %c0_40, %c0_41] : memref<4x32x8xf32, #tpu.memory_space<vmem>>, vector<1x32x8xf32>
    %36 = vector.shape_cast %35 : vector<1x32x8xf32> to vector<32x8xf32>
    %c0_42 = arith.constant 0 : index
    %c0_43 = arith.constant 0 : index
    %c0_44 = arith.constant 0 : index
    %37 = vector.load %arg15[%c0_42, %c0_43, %c0_44] : memref<4x1x8xf32, #tpu.memory_space<vmem>>, vector<1x1x8xf32>
    %38 = vector.shape_cast %37 : vector<1x1x8xf32> to vector<1x8xf32>
    %cst_45 = arith.constant dense<0.000000e+00> : vector<18x8xf32>
    %39 = tpu.matmul %19, %36, %cst_45 {dimension_numbers = #tpu.dot_dimension_numbers<[1], [0], [0], [1], [0, 0, 1, 1], [], []>} : vector<18x32xf32>, vector<32x8xf32>, vector<18x8xf32> -> vector<18x8xf32>
    %40 = vector.broadcast %38 : vector<1x8xf32> to vector<18x8xf32>
    %41 = arith.addf %39, %40 : vector<18x8xf32>
    %cst_46 = arith.constant dense<0.000000e+00> : vector<18x18xf32>
    %42 = tpu.matmul %27, %34, %cst_46 {dimension_numbers = #tpu.dot_dimension_numbers<[1], [1], [0], [0], [0, 0, 1, 0], [], []>} : vector<18x8xf32>, vector<18x8xf32>, vector<18x18xf32> -> vector<18x18xf32>
    %cst_47 = arith.constant 0.353553385 : f32
    %43 = vector.broadcast %cst_47 : f32 to vector<18x18xf32>
    %44 = arith.mulf %42, %43 : vector<18x18xf32>
    %cst_48 = arith.constant dense<0xFF800000> : vector<18xf32>
    %45 = vector.multi_reduction <maximumf>, %44, %cst_48 [1] : vector<18x18xf32> to vector<18xf32>
    %46 = vector.shape_cast %45 : vector<18xf32> to vector<18x1xf32>
    %47 = vector.broadcast %46 : vector<18x1xf32> to vector<18x18xf32>
    %48 = arith.subf %44, %47 : vector<18x18xf32>
    %49 = math.exp %48 : vector<18x18xf32>
    %cst_49 = arith.constant dense<0.000000e+00> : vector<18xf32>
    %50 = vector.multi_reduction <add>, %49, %cst_49 [1] : vector<18x18xf32> to vector<18xf32>
    %51 = vector.shape_cast %50 : vector<18xf32> to vector<18x1xf32>
    %52 = tpu.reciprocal %51 {approx = true} : vector<18x1xf32> -> vector<18x1xf32>
    %53 = vector.broadcast %52 : vector<18x1xf32> to vector<18x18xf32>
    %54 = arith.mulf %49, %53 : vector<18x18xf32>
    %cst_50 = arith.constant dense<0.000000e+00> : vector<18x8xf32>
    %55 = tpu.matmul %54, %41, %cst_50 {dimension_numbers = #tpu.dot_dimension_numbers<[1], [0], [0], [1], [0, 0, 1, 1], [], []>} : vector<18x18xf32>, vector<18x8xf32>, vector<18x8xf32> -> vector<18x8xf32>
    %c0_51 = arith.constant 0 : index
    %c0_52 = arith.constant 0 : index
    %c0_53 = arith.constant 0 : index
    %56 = vector.load %arg16[%c0_51, %c0_52, %c0_53] : memref<4x8x32xf32, #tpu.memory_space<vmem>>, vector<1x8x32xf32>
    %57 = vector.shape_cast %56 : vector<1x8x32xf32> to vector<8x32xf32>
    %cst_54 = arith.constant dense<0.000000e+00> : vector<18x32xf32>
    %58 = tpu.matmul %55, %57, %cst_54 {dimension_numbers = #tpu.dot_dimension_numbers<[1], [0], [0], [1], [0, 0, 1, 1], [], []>} : vector<18x8xf32>, vector<8x32xf32>, vector<18x32xf32> -> vector<18x32xf32>
    %c1_55 = arith.constant 1 : index
    %c0_56 = arith.constant 0 : index
    %c0_57 = arith.constant 0 : index
    %59 = vector.load %arg10[%c1_55, %c0_56, %c0_57] : memref<4x32x8xf32, #tpu.memory_space<vmem>>, vector<1x32x8xf32>
    %60 = vector.shape_cast %59 : vector<1x32x8xf32> to vector<32x8xf32>
    %c1_58 = arith.constant 1 : index
    %c0_59 = arith.constant 0 : index
    %c0_60 = arith.constant 0 : index
    %61 = vector.load %arg11[%c1_58, %c0_59, %c0_60] : memref<4x1x8xf32, #tpu.memory_space<vmem>>, vector<1x1x8xf32>
    %62 = vector.shape_cast %61 : vector<1x1x8xf32> to vector<1x8xf32>
    %cst_61 = arith.constant dense<0.000000e+00> : vector<18x8xf32>
    %63 = tpu.matmul %20, %60, %cst_61 {dimension_numbers = #tpu.dot_dimension_numbers<[1], [0], [0], [1], [0, 0, 1, 1], [], []>} : vector<18x32xf32>, vector<32x8xf32>, vector<18x8xf32> -> vector<18x8xf32>
    %64 = vector.broadcast %62 : vector<1x8xf32> to vector<18x8xf32>
    %65 = arith.addf %63, %64 : vector<18x8xf32>
    %c1_62 = arith.constant 1 : index
    %c0_63 = arith.constant 0 : index
    %c0_64 = arith.constant 0 : index
    %66 = vector.load %arg12[%c1_62, %c0_63, %c0_64] : memref<4x32x8xf32, #tpu.memory_space<vmem>>, vector<1x32x8xf32>
    %67 = vector.shape_cast %66 : vector<1x32x8xf32> to vector<32x8xf32>
    %c1_65 = arith.constant 1 : index
    %c0_66 = arith.constant 0 : index
    %c0_67 = arith.constant 0 : index
    %68 = vector.load %arg13[%c1_65, %c0_66, %c0_67] : memref<4x1x8xf32, #tpu.memory_space<vmem>>, vector<1x1x8xf32>
    %69 = vector.shape_cast %68 : vector<1x1x8xf32> to vector<1x8xf32>
    %cst_68 = arith.constant dense<0.000000e+00> : vector<18x8xf32>
    %70 = tpu.matmul %20, %67, %cst_68 {dimension_numbers = #tpu.dot_dimension_numbers<[1], [0], [0], [1], [0, 0, 1, 1], [], []>} : vector<18x32xf32>, vector<32x8xf32>, vector<18x8xf32> -> vector<18x8xf32>
    %71 = vector.broadcast %69 : vector<1x8xf32> to vector<18x8xf32>
    %72 = arith.addf %70, %71 : vector<18x8xf32>
    %c1_69 = arith.constant 1 : index
    %c0_70 = arith.constant 0 : index
    %c0_71 = arith.constant 0 : index
    %73 = vector.load %arg14[%c1_69, %c0_70, %c0_71] : memref<4x32x8xf32, #tpu.memory_space<vmem>>, vector<1x32x8xf32>
    %74 = vector.shape_cast %73 : vector<1x32x8xf32> to vector<32x8xf32>
    %c1_72 = arith.constant 1 : index
    %c0_73 = arith.constant 0 : index
    %c0_74 = arith.constant 0 : index
    %75 = vector.load %arg15[%c1_72, %c0_73, %c0_74] : memref<4x1x8xf32, #tpu.memory_space<vmem>>, vector<1x1x8xf32>
    %76 = vector.shape_cast %75 : vector<1x1x8xf32> to vector<1x8xf32>
    %cst_75 = arith.constant dense<0.000000e+00> : vector<18x8xf32>
    %77 = tpu.matmul %19, %74, %cst_75 {dimension_numbers = #tpu.dot_dimension_numbers<[1], [0], [0], [1], [0, 0, 1, 1], [], []>} : vector<18x32xf32>, vector<32x8xf32>, vector<18x8xf32> -> vector<18x8xf32>
    %78 = vector.broadcast %76 : vector<1x8xf32> to vector<18x8xf32>
    %79 = arith.addf %77, %78 : vector<18x8xf32>
    %cst_76 = arith.constant dense<0.000000e+00> : vector<18x18xf32>
    %80 = tpu.matmul %65, %72, %cst_76 {dimension_numbers = #tpu.dot_dimension_numbers<[1], [1], [0], [0], [0, 0, 1, 0], [], []>} : vector<18x8xf32>, vector<18x8xf32>, vector<18x18xf32> -> vector<18x18xf32>
    %cst_77 = arith.constant 0.353553385 : f32
    %81 = vector.broadcast %cst_77 : f32 to vector<18x18xf32>
    %82 = arith.mulf %80, %81 : vector<18x18xf32>
    %cst_78 = arith.constant dense<0xFF800000> : vector<18xf32>
    %83 = vector.multi_reduction <maximumf>, %82, %cst_78 [1] : vector<18x18xf32> to vector<18xf32>
    %84 = vector.shape_cast %83 : vector<18xf32> to vector<18x1xf32>
    %85 = vector.broadcast %84 : vector<18x1xf32> to vector<18x18xf32>
    %86 = arith.subf %82, %85 : vector<18x18xf32>
    %87 = math.exp %86 : vector<18x18xf32>
    %cst_79 = arith.constant dense<0.000000e+00> : vector<18xf32>
    %88 = vector.multi_reduction <add>, %87, %cst_79 [1] : vector<18x18xf32> to vector<18xf32>
    %89 = vector.shape_cast %88 : vector<18xf32> to vector<18x1xf32>
    %90 = tpu.reciprocal %89 {approx = true} : vector<18x1xf32> -> vector<18x1xf32>
    %91 = vector.broadcast %90 : vector<18x1xf32> to vector<18x18xf32>
    %92 = arith.mulf %87, %91 : vector<18x18xf32>
    %cst_80 = arith.constant dense<0.000000e+00> : vector<18x8xf32>
    %93 = tpu.matmul %92, %79, %cst_80 {dimension_numbers = #tpu.dot_dimension_numbers<[1], [0], [0], [1], [0, 0, 1, 1], [], []>} : vector<18x18xf32>, vector<18x8xf32>, vector<18x8xf32> -> vector<18x8xf32>
    %c1_81 = arith.constant 1 : index
    %c0_82 = arith.constant 0 : index
    %c0_83 = arith.constant 0 : index
    %94 = vector.load %arg16[%c1_81, %c0_82, %c0_83] : memref<4x8x32xf32, #tpu.memory_space<vmem>>, vector<1x8x32xf32>
    %95 = vector.shape_cast %94 : vector<1x8x32xf32> to vector<8x32xf32>
    %cst_84 = arith.constant dense<0.000000e+00> : vector<18x32xf32>
    %96 = tpu.matmul %93, %95, %cst_84 {dimension_numbers = #tpu.dot_dimension_numbers<[1], [0], [0], [1], [0, 0, 1, 1], [], []>} : vector<18x8xf32>, vector<8x32xf32>, vector<18x32xf32> -> vector<18x32xf32>
    %97 = arith.addf %58, %96 : vector<18x32xf32>
    %c2_85 = arith.constant 2 : index
    %c0_86 = arith.constant 0 : index
    %c0_87 = arith.constant 0 : index
    %98 = vector.load %arg10[%c2_85, %c0_86, %c0_87] : memref<4x32x8xf32, #tpu.memory_space<vmem>>, vector<1x32x8xf32>
    %99 = vector.shape_cast %98 : vector<1x32x8xf32> to vector<32x8xf32>
    %c2_88 = arith.constant 2 : index
    %c0_89 = arith.constant 0 : index
    %c0_90 = arith.constant 0 : index
    %100 = vector.load %arg11[%c2_88, %c0_89, %c0_90] : memref<4x1x8xf32, #tpu.memory_space<vmem>>, vector<1x1x8xf32>
    %101 = vector.shape_cast %100 : vector<1x1x8xf32> to vector<1x8xf32>
    %cst_91 = arith.constant dense<0.000000e+00> : vector<18x8xf32>
    %102 = tpu.matmul %20, %99, %cst_91 {dimension_numbers = #tpu.dot_dimension_numbers<[1], [0], [0], [1], [0, 0, 1, 1], [], []>} : vector<18x32xf32>, vector<32x8xf32>, vector<18x8xf32> -> vector<18x8xf32>
    %103 = vector.broadcast %101 : vector<1x8xf32> to vector<18x8xf32>
    %104 = arith.addf %102, %103 : vector<18x8xf32>
    %c2_92 = arith.constant 2 : index
    %c0_93 = arith.constant 0 : index
    %c0_94 = arith.constant 0 : index
    %105 = vector.load %arg12[%c2_92, %c0_93, %c0_94] : memref<4x32x8xf32, #tpu.memory_space<vmem>>, vector<1x32x8xf32>
    %106 = vector.shape_cast %105 : vector<1x32x8xf32> to vector<32x8xf32>
    %c2_95 = arith.constant 2 : index
    %c0_96 = arith.constant 0 : index
    %c0_97 = arith.constant 0 : index
    %107 = vector.load %arg13[%c2_95, %c0_96, %c0_97] : memref<4x1x8xf32, #tpu.memory_space<vmem>>, vector<1x1x8xf32>
    %108 = vector.shape_cast %107 : vector<1x1x8xf32> to vector<1x8xf32>
    %cst_98 = arith.constant dense<0.000000e+00> : vector<18x8xf32>
    %109 = tpu.matmul %20, %106, %cst_98 {dimension_numbers = #tpu.dot_dimension_numbers<[1], [0], [0], [1], [0, 0, 1, 1], [], []>} : vector<18x32xf32>, vector<32x8xf32>, vector<18x8xf32> -> vector<18x8xf32>
    %110 = vector.broadcast %108 : vector<1x8xf32> to vector<18x8xf32>
    %111 = arith.addf %109, %110 : vector<18x8xf32>
    %c2_99 = arith.constant 2 : index
    %c0_100 = arith.constant 0 : index
    %c0_101 = arith.constant 0 : index
    %112 = vector.load %arg14[%c2_99, %c0_100, %c0_101] : memref<4x32x8xf32, #tpu.memory_space<vmem>>, vector<1x32x8xf32>
    %113 = vector.shape_cast %112 : vector<1x32x8xf32> to vector<32x8xf32>
    %c2_102 = arith.constant 2 : index
    %c0_103 = arith.constant 0 : index
    %c0_104 = arith.constant 0 : index
    %114 = vector.load %arg15[%c2_102, %c0_103, %c0_104] : memref<4x1x8xf32, #tpu.memory_space<vmem>>, vector<1x1x8xf32>
    %115 = vector.shape_cast %114 : vector<1x1x8xf32> to vector<1x8xf32>
    %cst_105 = arith.constant dense<0.000000e+00> : vector<18x8xf32>
    %116 = tpu.matmul %19, %113, %cst_105 {dimension_numbers = #tpu.dot_dimension_numbers<[1], [0], [0], [1], [0, 0, 1, 1], [], []>} : vector<18x32xf32>, vector<32x8xf32>, vector<18x8xf32> -> vector<18x8xf32>
    %117 = vector.broadcast %115 : vector<1x8xf32> to vector<18x8xf32>
    %118 = arith.addf %116, %117 : vector<18x8xf32>
    %cst_106 = arith.constant dense<0.000000e+00> : vector<18x18xf32>
    %119 = tpu.matmul %104, %111, %cst_106 {dimension_numbers = #tpu.dot_dimension_numbers<[1], [1], [0], [0], [0, 0, 1, 0], [], []>} : vector<18x8xf32>, vector<18x8xf32>, vector<18x18xf32> -> vector<18x18xf32>
    %cst_107 = arith.constant 0.353553385 : f32
    %120 = vector.broadcast %cst_107 : f32 to vector<18x18xf32>
    %121 = arith.mulf %119, %120 : vector<18x18xf32>
    %cst_108 = arith.constant dense<0xFF800000> : vector<18xf32>
    %122 = vector.multi_reduction <maximumf>, %121, %cst_108 [1] : vector<18x18xf32> to vector<18xf32>
    %123 = vector.shape_cast %122 : vector<18xf32> to vector<18x1xf32>
    %124 = vector.broadcast %123 : vector<18x1xf32> to vector<18x18xf32>
    %125 = arith.subf %121, %124 : vector<18x18xf32>
    %126 = math.exp %125 : vector<18x18xf32>
    %cst_109 = arith.constant dense<0.000000e+00> : vector<18xf32>
    %127 = vector.multi_reduction <add>, %126, %cst_109 [1] : vector<18x18xf32> to vector<18xf32>
    %128 = vector.shape_cast %127 : vector<18xf32> to vector<18x1xf32>
    %129 = tpu.reciprocal %128 {approx = true} : vector<18x1xf32> -> vector<18x1xf32>
    %130 = vector.broadcast %129 : vector<18x1xf32> to vector<18x18xf32>
    %131 = arith.mulf %126, %130 : vector<18x18xf32>
    %cst_110 = arith.constant dense<0.000000e+00> : vector<18x8xf32>
    %132 = tpu.matmul %131, %118, %cst_110 {dimension_numbers = #tpu.dot_dimension_numbers<[1], [0], [0], [1], [0, 0, 1, 1], [], []>} : vector<18x18xf32>, vector<18x8xf32>, vector<18x8xf32> -> vector<18x8xf32>
    %c2_111 = arith.constant 2 : index
    %c0_112 = arith.constant 0 : index
    %c0_113 = arith.constant 0 : index
    %133 = vector.load %arg16[%c2_111, %c0_112, %c0_113] : memref<4x8x32xf32, #tpu.memory_space<vmem>>, vector<1x8x32xf32>
    %134 = vector.shape_cast %133 : vector<1x8x32xf32> to vector<8x32xf32>
    %cst_114 = arith.constant dense<0.000000e+00> : vector<18x32xf32>
    %135 = tpu.matmul %132, %134, %cst_114 {dimension_numbers = #tpu.dot_dimension_numbers<[1], [0], [0], [1], [0, 0, 1, 1], [], []>} : vector<18x8xf32>, vector<8x32xf32>, vector<18x32xf32> -> vector<18x32xf32>
    %136 = arith.addf %97, %135 : vector<18x32xf32>
    %c3 = arith.constant 3 : index
    %c0_115 = arith.constant 0 : index
    %c0_116 = arith.constant 0 : index
    %137 = vector.load %arg10[%c3, %c0_115, %c0_116] : memref<4x32x8xf32, #tpu.memory_space<vmem>>, vector<1x32x8xf32>
    %138 = vector.shape_cast %137 : vector<1x32x8xf32> to vector<32x8xf32>
    %c3_117 = arith.constant 3 : index
    %c0_118 = arith.constant 0 : index
    %c0_119 = arith.constant 0 : index
    %139 = vector.load %arg11[%c3_117, %c0_118, %c0_119] : memref<4x1x8xf32, #tpu.memory_space<vmem>>, vector<1x1x8xf32>
    %140 = vector.shape_cast %139 : vector<1x1x8xf32> to vector<1x8xf32>
    %cst_120 = arith.constant dense<0.000000e+00> : vector<18x8xf32>
    %141 = tpu.matmul %20, %138, %cst_120 {dimension_numbers = #tpu.dot_dimension_numbers<[1], [0], [0], [1], [0, 0, 1, 1], [], []>} : vector<18x32xf32>, vector<32x8xf32>, vector<18x8xf32> -> vector<18x8xf32>
    %142 = vector.broadcast %140 : vector<1x8xf32> to vector<18x8xf32>
    %143 = arith.addf %141, %142 : vector<18x8xf32>
    %c3_121 = arith.constant 3 : index
    %c0_122 = arith.constant 0 : index
    %c0_123 = arith.constant 0 : index
    %144 = vector.load %arg12[%c3_121, %c0_122, %c0_123] : memref<4x32x8xf32, #tpu.memory_space<vmem>>, vector<1x32x8xf32>
    %145 = vector.shape_cast %144 : vector<1x32x8xf32> to vector<32x8xf32>
    %c3_124 = arith.constant 3 : index
    %c0_125 = arith.constant 0 : index
    %c0_126 = arith.constant 0 : index
    %146 = vector.load %arg13[%c3_124, %c0_125, %c0_126] : memref<4x1x8xf32, #tpu.memory_space<vmem>>, vector<1x1x8xf32>
    %147 = vector.shape_cast %146 : vector<1x1x8xf32> to vector<1x8xf32>
    %cst_127 = arith.constant dense<0.000000e+00> : vector<18x8xf32>
    %148 = tpu.matmul %20, %145, %cst_127 {dimension_numbers = #tpu.dot_dimension_numbers<[1], [0], [0], [1], [0, 0, 1, 1], [], []>} : vector<18x32xf32>, vector<32x8xf32>, vector<18x8xf32> -> vector<18x8xf32>
    %149 = vector.broadcast %147 : vector<1x8xf32> to vector<18x8xf32>
    %150 = arith.addf %148, %149 : vector<18x8xf32>
    %c3_128 = arith.constant 3 : index
    %c0_129 = arith.constant 0 : index
    %c0_130 = arith.constant 0 : index
    %151 = vector.load %arg14[%c3_128, %c0_129, %c0_130] : memref<4x32x8xf32, #tpu.memory_space<vmem>>, vector<1x32x8xf32>
    %152 = vector.shape_cast %151 : vector<1x32x8xf32> to vector<32x8xf32>
    %c3_131 = arith.constant 3 : index
    %c0_132 = arith.constant 0 : index
    %c0_133 = arith.constant 0 : index
    %153 = vector.load %arg15[%c3_131, %c0_132, %c0_133] : memref<4x1x8xf32, #tpu.memory_space<vmem>>, vector<1x1x8xf32>
    %154 = vector.shape_cast %153 : vector<1x1x8xf32> to vector<1x8xf32>
    %cst_134 = arith.constant dense<0.000000e+00> : vector<18x8xf32>
    %155 = tpu.matmul %19, %152, %cst_134 {dimension_numbers = #tpu.dot_dimension_numbers<[1], [0], [0], [1], [0, 0, 1, 1], [], []>} : vector<18x32xf32>, vector<32x8xf32>, vector<18x8xf32> -> vector<18x8xf32>
    %156 = vector.broadcast %154 : vector<1x8xf32> to vector<18x8xf32>
    %157 = arith.addf %155, %156 : vector<18x8xf32>
    %cst_135 = arith.constant dense<0.000000e+00> : vector<18x18xf32>
    %158 = tpu.matmul %143, %150, %cst_135 {dimension_numbers = #tpu.dot_dimension_numbers<[1], [1], [0], [0], [0, 0, 1, 0], [], []>} : vector<18x8xf32>, vector<18x8xf32>, vector<18x18xf32> -> vector<18x18xf32>
    %cst_136 = arith.constant 0.353553385 : f32
    %159 = vector.broadcast %cst_136 : f32 to vector<18x18xf32>
    %160 = arith.mulf %158, %159 : vector<18x18xf32>
    %cst_137 = arith.constant dense<0xFF800000> : vector<18xf32>
    %161 = vector.multi_reduction <maximumf>, %160, %cst_137 [1] : vector<18x18xf32> to vector<18xf32>
    %162 = vector.shape_cast %161 : vector<18xf32> to vector<18x1xf32>
    %163 = vector.broadcast %162 : vector<18x1xf32> to vector<18x18xf32>
    %164 = arith.subf %160, %163 : vector<18x18xf32>
    %165 = math.exp %164 : vector<18x18xf32>
    %cst_138 = arith.constant dense<0.000000e+00> : vector<18xf32>
    %166 = vector.multi_reduction <add>, %165, %cst_138 [1] : vector<18x18xf32> to vector<18xf32>
    %167 = vector.shape_cast %166 : vector<18xf32> to vector<18x1xf32>
    %168 = tpu.reciprocal %167 {approx = true} : vector<18x1xf32> -> vector<18x1xf32>
    %169 = vector.broadcast %168 : vector<18x1xf32> to vector<18x18xf32>
    %170 = arith.mulf %165, %169 : vector<18x18xf32>
    %cst_139 = arith.constant dense<0.000000e+00> : vector<18x8xf32>
    %171 = tpu.matmul %170, %157, %cst_139 {dimension_numbers = #tpu.dot_dimension_numbers<[1], [0], [0], [1], [0, 0, 1, 1], [], []>} : vector<18x18xf32>, vector<18x8xf32>, vector<18x8xf32> -> vector<18x8xf32>
    %c3_140 = arith.constant 3 : index
    %c0_141 = arith.constant 0 : index
    %c0_142 = arith.constant 0 : index
    %172 = vector.load %arg16[%c3_140, %c0_141, %c0_142] : memref<4x8x32xf32, #tpu.memory_space<vmem>>, vector<1x8x32xf32>
    %173 = vector.shape_cast %172 : vector<1x8x32xf32> to vector<8x32xf32>
    %cst_143 = arith.constant dense<0.000000e+00> : vector<18x32xf32>
    %174 = tpu.matmul %171, %173, %cst_143 {dimension_numbers = #tpu.dot_dimension_numbers<[1], [0], [0], [1], [0, 0, 1, 1], [], []>} : vector<18x8xf32>, vector<8x32xf32>, vector<18x32xf32> -> vector<18x32xf32>
    %175 = arith.addf %136, %174 : vector<18x32xf32>
    %c0_144 = arith.constant 0 : index
    %c0_145 = arith.constant 0 : index
    %176 = vector.load %arg17[%c0_144, %c0_145] : memref<1x32xf32, #tpu.memory_space<vmem>>, vector<1x32xf32>
    %177 = vector.broadcast %176 : vector<1x32xf32> to vector<18x32xf32>
    %178 = arith.addf %175, %177 : vector<18x32xf32>
    %179 = arith.addf %19, %178 : vector<18x32xf32>
    %c0_146 = arith.constant 0 : index
    %c0_147 = arith.constant 0 : index
    %180 = vector.load %arg18[%c0_146, %c0_147] : memref<1x32xf32, #tpu.memory_space<vmem>>, vector<1x32xf32>
    %c0_148 = arith.constant 0 : index
    %c0_149 = arith.constant 0 : index
    %181 = vector.load %arg19[%c0_148, %c0_149] : memref<1x32xf32, #tpu.memory_space<vmem>>, vector<1x32xf32>
    %cst_150 = arith.constant dense<0.000000e+00> : vector<18xf32>
    %182 = vector.multi_reduction <add>, %179, %cst_150 [1] : vector<18x32xf32> to vector<18xf32>
    %183 = vector.shape_cast %182 : vector<18xf32> to vector<18x1xf32>
    %cst_151 = arith.constant 3.200000e+01 : f32
    %184 = vector.broadcast %cst_151 : f32 to vector<18x1xf32>
    %185 = arith.divf %183, %184 : vector<18x1xf32>
    %186 = vector.broadcast %185 : vector<18x1xf32> to vector<18x32xf32>
    %187 = arith.subf %179, %186 : vector<18x32xf32>
    %188 = arith.mulf %187, %187 : vector<18x32xf32>
    %cst_152 = arith.constant dense<0.000000e+00> : vector<18xf32>
    %189 = vector.multi_reduction <add>, %188, %cst_152 [1] : vector<18x32xf32> to vector<18xf32>
    %190 = vector.shape_cast %189 : vector<18xf32> to vector<18x1xf32>
    %cst_153 = arith.constant 3.200000e+01 : f32
    %191 = vector.broadcast %cst_153 : f32 to vector<18x1xf32>
    %192 = arith.divf %190, %191 : vector<18x1xf32>
    %cst_154 = arith.constant 9.99999974E-6 : f32
    %193 = vector.broadcast %cst_154 : f32 to vector<18x1xf32>
    %194 = arith.addf %192, %193 : vector<18x1xf32>
    %195 = math.rsqrt %194 : vector<18x1xf32>
    %196 = vector.broadcast %195 : vector<18x1xf32> to vector<18x32xf32>
    %197 = arith.mulf %187, %196 : vector<18x32xf32>
    %198 = vector.broadcast %180 : vector<1x32xf32> to vector<18x32xf32>
    %199 = arith.mulf %197, %198 : vector<18x32xf32>
    %200 = vector.broadcast %181 : vector<1x32xf32> to vector<18x32xf32>
    %201 = arith.addf %199, %200 : vector<18x32xf32>
    %c0_155 = arith.constant 0 : index
    %c0_156 = arith.constant 0 : index
    %202 = vector.load %arg20[%c0_155, %c0_156] : memref<32x64xf32, #tpu.memory_space<vmem>>, vector<32x64xf32>
    %c0_157 = arith.constant 0 : index
    %c0_158 = arith.constant 0 : index
    %203 = vector.load %arg21[%c0_157, %c0_158] : memref<1x64xf32, #tpu.memory_space<vmem>>, vector<1x64xf32>
    %cst_159 = arith.constant dense<0.000000e+00> : vector<18x64xf32>
    %204 = tpu.matmul %201, %202, %cst_159 {dimension_numbers = #tpu.dot_dimension_numbers<[1], [0], [0], [1], [0, 0, 1, 1], [], []>} : vector<18x32xf32>, vector<32x64xf32>, vector<18x64xf32> -> vector<18x64xf32>
    %205 = vector.broadcast %203 : vector<1x64xf32> to vector<18x64xf32>
    %206 = arith.addf %204, %205 : vector<18x64xf32>
    %cst_160 = arith.constant 0.000000e+00 : f32
    %207 = vector.broadcast %cst_160 : f32 to vector<18x64xf32>
    %208 = arith.maximumf %206, %207 : vector<18x64xf32>
    %c0_161 = arith.constant 0 : index
    %c0_162 = arith.constant 0 : index
    %209 = vector.load %arg22[%c0_161, %c0_162] : memref<64x32xf32, #tpu.memory_space<vmem>>, vector<64x32xf32>
    %c0_163 = arith.constant 0 : index
    %c0_164 = arith.constant 0 : index
    %210 = vector.load %arg23[%c0_163, %c0_164] : memref<1x32xf32, #tpu.memory_space<vmem>>, vector<1x32xf32>
    %cst_165 = arith.constant dense<0.000000e+00> : vector<18x32xf32>
    %211 = tpu.matmul %208, %209, %cst_165 {dimension_numbers = #tpu.dot_dimension_numbers<[1], [0], [0], [1], [0, 0, 1, 1], [], []>} : vector<18x64xf32>, vector<64x32xf32>, vector<18x32xf32> -> vector<18x32xf32>
    %212 = vector.broadcast %210 : vector<1x32xf32> to vector<18x32xf32>
    %213 = arith.addf %211, %212 : vector<18x32xf32>
    %214 = arith.addf %201, %213 : vector<18x32xf32>
    %c0_166 = arith.constant 0 : index
    %c0_167 = arith.constant 0 : index
    %215 = vector.load %arg24[%c0_166, %c0_167] : memref<1x32xf32, #tpu.memory_space<vmem>>, vector<1x32xf32>
    %c0_168 = arith.constant 0 : index
    %c0_169 = arith.constant 0 : index
    %216 = vector.load %arg25[%c0_168, %c0_169] : memref<1x32xf32, #tpu.memory_space<vmem>>, vector<1x32xf32>
    %cst_170 = arith.constant dense<0.000000e+00> : vector<18xf32>
    %217 = vector.multi_reduction <add>, %214, %cst_170 [1] : vector<18x32xf32> to vector<18xf32>
    %218 = vector.shape_cast %217 : vector<18xf32> to vector<18x1xf32>
    %cst_171 = arith.constant 3.200000e+01 : f32
    %219 = vector.broadcast %cst_171 : f32 to vector<18x1xf32>
    %220 = arith.divf %218, %219 : vector<18x1xf32>
    %221 = vector.broadcast %220 : vector<18x1xf32> to vector<18x32xf32>
    %222 = arith.subf %214, %221 : vector<18x32xf32>
    %223 = arith.mulf %222, %222 : vector<18x32xf32>
    %cst_172 = arith.constant dense<0.000000e+00> : vector<18xf32>
    %224 = vector.multi_reduction <add>, %223, %cst_172 [1] : vector<18x32xf32> to vector<18xf32>
    %225 = vector.shape_cast %224 : vector<18xf32> to vector<18x1xf32>
    %cst_173 = arith.constant 3.200000e+01 : f32
    %226 = vector.broadcast %cst_173 : f32 to vector<18x1xf32>
    %227 = arith.divf %225, %226 : vector<18x1xf32>
    %cst_174 = arith.constant 9.99999974E-6 : f32
    %228 = vector.broadcast %cst_174 : f32 to vector<18x1xf32>
    %229 = arith.addf %227, %228 : vector<18x1xf32>
    %230 = math.rsqrt %229 : vector<18x1xf32>
    %231 = vector.broadcast %230 : vector<18x1xf32> to vector<18x32xf32>
    %232 = arith.mulf %222, %231 : vector<18x32xf32>
    %233 = vector.broadcast %215 : vector<1x32xf32> to vector<18x32xf32>
    %234 = arith.mulf %232, %233 : vector<18x32xf32>
    %235 = vector.broadcast %216 : vector<1x32xf32> to vector<18x32xf32>
    %236 = arith.addf %234, %235 : vector<18x32xf32>
    %c0_175 = arith.constant 0 : index
    %c0_176 = arith.constant 0 : index
    %237 = vector.load %arg9[%c0_175, %c0_176] : memref<8x32xf32, #tpu.memory_space<vmem>>, vector<8x32xf32>
    %cst_177 = arith.constant 0.000000e+00 : f32
    %238 = vector.broadcast %cst_177 : f32 to vector<8x32xf32>
    %239 = arith.addf %238, %237 : vector<8x32xf32>
    %c0_178 = arith.constant 0 : index
    %c0_179 = arith.constant 0 : index
    %c0_180 = arith.constant 0 : index
    %240 = vector.load %arg26[%c0_178, %c0_179, %c0_180] : memref<4x32x8xf32, #tpu.memory_space<vmem>>, vector<1x32x8xf32>
    %241 = vector.shape_cast %240 : vector<1x32x8xf32> to vector<32x8xf32>
    %c0_181 = arith.constant 0 : index
    %c0_182 = arith.constant 0 : index
    %c0_183 = arith.constant 0 : index
    %242 = vector.load %arg27[%c0_181, %c0_182, %c0_183] : memref<4x1x8xf32, #tpu.memory_space<vmem>>, vector<1x1x8xf32>
    %243 = vector.shape_cast %242 : vector<1x1x8xf32> to vector<1x8xf32>
    %cst_184 = arith.constant dense<0.000000e+00> : vector<8x8xf32>
    %244 = tpu.matmul %239, %241, %cst_184 {dimension_numbers = #tpu.dot_dimension_numbers<[1], [0], [0], [1], [0, 0, 1, 1], [], []>} : vector<8x32xf32>, vector<32x8xf32>, vector<8x8xf32> -> vector<8x8xf32>
    %245 = vector.broadcast %243 : vector<1x8xf32> to vector<8x8xf32>
    %246 = arith.addf %244, %245 : vector<8x8xf32>
    %c0_185 = arith.constant 0 : index
    %c0_186 = arith.constant 0 : index
    %c0_187 = arith.constant 0 : index
    %247 = vector.load %arg28[%c0_185, %c0_186, %c0_187] : memref<4x32x8xf32, #tpu.memory_space<vmem>>, vector<1x32x8xf32>
    %248 = vector.shape_cast %247 : vector<1x32x8xf32> to vector<32x8xf32>
    %c0_188 = arith.constant 0 : index
    %c0_189 = arith.constant 0 : index
    %c0_190 = arith.constant 0 : index
    %249 = vector.load %arg29[%c0_188, %c0_189, %c0_190] : memref<4x1x8xf32, #tpu.memory_space<vmem>>, vector<1x1x8xf32>
    %250 = vector.shape_cast %249 : vector<1x1x8xf32> to vector<1x8xf32>
    %cst_191 = arith.constant dense<0.000000e+00> : vector<8x8xf32>
    %251 = tpu.matmul %239, %248, %cst_191 {dimension_numbers = #tpu.dot_dimension_numbers<[1], [0], [0], [1], [0, 0, 1, 1], [], []>} : vector<8x32xf32>, vector<32x8xf32>, vector<8x8xf32> -> vector<8x8xf32>
    %252 = vector.broadcast %250 : vector<1x8xf32> to vector<8x8xf32>
    %253 = arith.addf %251, %252 : vector<8x8xf32>
    %c0_192 = arith.constant 0 : index
    %c0_193 = arith.constant 0 : index
    %c0_194 = arith.constant 0 : index
    %254 = vector.load %arg30[%c0_192, %c0_193, %c0_194] : memref<4x32x8xf32, #tpu.memory_space<vmem>>, vector<1x32x8xf32>
    %255 = vector.shape_cast %254 : vector<1x32x8xf32> to vector<32x8xf32>
    %c0_195 = arith.constant 0 : index
    %c0_196 = arith.constant 0 : index
    %c0_197 = arith.constant 0 : index
    %256 = vector.load %arg31[%c0_195, %c0_196, %c0_197] : memref<4x1x8xf32, #tpu.memory_space<vmem>>, vector<1x1x8xf32>
    %257 = vector.shape_cast %256 : vector<1x1x8xf32> to vector<1x8xf32>
    %cst_198 = arith.constant dense<0.000000e+00> : vector<8x8xf32>
    %258 = tpu.matmul %238, %255, %cst_198 {dimension_numbers = #tpu.dot_dimension_numbers<[1], [0], [0], [1], [0, 0, 1, 1], [], []>} : vector<8x32xf32>, vector<32x8xf32>, vector<8x8xf32> -> vector<8x8xf32>
    %259 = vector.broadcast %257 : vector<1x8xf32> to vector<8x8xf32>
    %260 = arith.addf %258, %259 : vector<8x8xf32>
    %cst_199 = arith.constant dense<0.000000e+00> : vector<8x8xf32>
    %261 = tpu.matmul %246, %253, %cst_199 {dimension_numbers = #tpu.dot_dimension_numbers<[1], [1], [0], [0], [0, 0, 1, 0], [], []>} : vector<8x8xf32>, vector<8x8xf32>, vector<8x8xf32> -> vector<8x8xf32>
    %cst_200 = arith.constant 0.353553385 : f32
    %262 = vector.broadcast %cst_200 : f32 to vector<8x8xf32>
    %263 = arith.mulf %261, %262 : vector<8x8xf32>
    %cst_201 = arith.constant dense<0xFF800000> : vector<8xf32>
    %264 = vector.multi_reduction <maximumf>, %263, %cst_201 [1] : vector<8x8xf32> to vector<8xf32>
    %265 = vector.shape_cast %264 : vector<8xf32> to vector<8x1xf32>
    %266 = vector.broadcast %265 : vector<8x1xf32> to vector<8x8xf32>
    %267 = arith.subf %263, %266 : vector<8x8xf32>
    %268 = math.exp %267 : vector<8x8xf32>
    %cst_202 = arith.constant dense<0.000000e+00> : vector<8xf32>
    %269 = vector.multi_reduction <add>, %268, %cst_202 [1] : vector<8x8xf32> to vector<8xf32>
    %270 = vector.shape_cast %269 : vector<8xf32> to vector<8x1xf32>
    %271 = tpu.reciprocal %270 {approx = true} : vector<8x1xf32> -> vector<8x1xf32>
    %272 = vector.broadcast %271 : vector<8x1xf32> to vector<8x8xf32>
    %273 = arith.mulf %268, %272 : vector<8x8xf32>
    %cst_203 = arith.constant dense<0.000000e+00> : vector<8x8xf32>
    %274 = tpu.matmul %273, %260, %cst_203 {dimension_numbers = #tpu.dot_dimension_numbers<[1], [0], [0], [1], [0, 0, 1, 1], [], []>} : vector<8x8xf32>, vector<8x8xf32>, vector<8x8xf32> -> vector<8x8xf32>
    %c0_204 = arith.constant 0 : index
    %c0_205 = arith.constant 0 : index
    %c0_206 = arith.constant 0 : index
    %275 = vector.load %arg32[%c0_204, %c0_205, %c0_206] : memref<4x8x32xf32, #tpu.memory_space<vmem>>, vector<1x8x32xf32>
    %276 = vector.shape_cast %275 : vector<1x8x32xf32> to vector<8x32xf32>
    %cst_207 = arith.constant dense<0.000000e+00> : vector<8x32xf32>
    %277 = tpu.matmul %274, %276, %cst_207 {dimension_numbers = #tpu.dot_dimension_numbers<[1], [0], [0], [1], [0, 0, 1, 1], [], []>} : vector<8x8xf32>, vector<8x32xf32>, vector<8x32xf32> -> vector<8x32xf32>
    %c1_208 = arith.constant 1 : index
    %c0_209 = arith.constant 0 : index
    %c0_210 = arith.constant 0 : index
    %278 = vector.load %arg26[%c1_208, %c0_209, %c0_210] : memref<4x32x8xf32, #tpu.memory_space<vmem>>, vector<1x32x8xf32>
    %279 = vector.shape_cast %278 : vector<1x32x8xf32> to vector<32x8xf32>
    %c1_211 = arith.constant 1 : index
    %c0_212 = arith.constant 0 : index
    %c0_213 = arith.constant 0 : index
    %280 = vector.load %arg27[%c1_211, %c0_212, %c0_213] : memref<4x1x8xf32, #tpu.memory_space<vmem>>, vector<1x1x8xf32>
    %281 = vector.shape_cast %280 : vector<1x1x8xf32> to vector<1x8xf32>
    %cst_214 = arith.constant dense<0.000000e+00> : vector<8x8xf32>
    %282 = tpu.matmul %239, %279, %cst_214 {dimension_numbers = #tpu.dot_dimension_numbers<[1], [0], [0], [1], [0, 0, 1, 1], [], []>} : vector<8x32xf32>, vector<32x8xf32>, vector<8x8xf32> -> vector<8x8xf32>
    %283 = vector.broadcast %281 : vector<1x8xf32> to vector<8x8xf32>
    %284 = arith.addf %282, %283 : vector<8x8xf32>
    %c1_215 = arith.constant 1 : index
    %c0_216 = arith.constant 0 : index
    %c0_217 = arith.constant 0 : index
    %285 = vector.load %arg28[%c1_215, %c0_216, %c0_217] : memref<4x32x8xf32, #tpu.memory_space<vmem>>, vector<1x32x8xf32>
    %286 = vector.shape_cast %285 : vector<1x32x8xf32> to vector<32x8xf32>
    %c1_218 = arith.constant 1 : index
    %c0_219 = arith.constant 0 : index
    %c0_220 = arith.constant 0 : index
    %287 = vector.load %arg29[%c1_218, %c0_219, %c0_220] : memref<4x1x8xf32, #tpu.memory_space<vmem>>, vector<1x1x8xf32>
    %288 = vector.shape_cast %287 : vector<1x1x8xf32> to vector<1x8xf32>
    %cst_221 = arith.constant dense<0.000000e+00> : vector<8x8xf32>
    %289 = tpu.matmul %239, %286, %cst_221 {dimension_numbers = #tpu.dot_dimension_numbers<[1], [0], [0], [1], [0, 0, 1, 1], [], []>} : vector<8x32xf32>, vector<32x8xf32>, vector<8x8xf32> -> vector<8x8xf32>
    %290 = vector.broadcast %288 : vector<1x8xf32> to vector<8x8xf32>
    %291 = arith.addf %289, %290 : vector<8x8xf32>
    %c1_222 = arith.constant 1 : index
    %c0_223 = arith.constant 0 : index
    %c0_224 = arith.constant 0 : index
    %292 = vector.load %arg30[%c1_222, %c0_223, %c0_224] : memref<4x32x8xf32, #tpu.memory_space<vmem>>, vector<1x32x8xf32>
    %293 = vector.shape_cast %292 : vector<1x32x8xf32> to vector<32x8xf32>
    %c1_225 = arith.constant 1 : index
    %c0_226 = arith.constant 0 : index
    %c0_227 = arith.constant 0 : index
    %294 = vector.load %arg31[%c1_225, %c0_226, %c0_227] : memref<4x1x8xf32, #tpu.memory_space<vmem>>, vector<1x1x8xf32>
    %295 = vector.shape_cast %294 : vector<1x1x8xf32> to vector<1x8xf32>
    %cst_228 = arith.constant dense<0.000000e+00> : vector<8x8xf32>
    %296 = tpu.matmul %238, %293, %cst_228 {dimension_numbers = #tpu.dot_dimension_numbers<[1], [0], [0], [1], [0, 0, 1, 1], [], []>} : vector<8x32xf32>, vector<32x8xf32>, vector<8x8xf32> -> vector<8x8xf32>
    %297 = vector.broadcast %295 : vector<1x8xf32> to vector<8x8xf32>
    %298 = arith.addf %296, %297 : vector<8x8xf32>
    %cst_229 = arith.constant dense<0.000000e+00> : vector<8x8xf32>
    %299 = tpu.matmul %284, %291, %cst_229 {dimension_numbers = #tpu.dot_dimension_numbers<[1], [1], [0], [0], [0, 0, 1, 0], [], []>} : vector<8x8xf32>, vector<8x8xf32>, vector<8x8xf32> -> vector<8x8xf32>
    %cst_230 = arith.constant 0.353553385 : f32
    %300 = vector.broadcast %cst_230 : f32 to vector<8x8xf32>
    %301 = arith.mulf %299, %300 : vector<8x8xf32>
    %cst_231 = arith.constant dense<0xFF800000> : vector<8xf32>
    %302 = vector.multi_reduction <maximumf>, %301, %cst_231 [1] : vector<8x8xf32> to vector<8xf32>
    %303 = vector.shape_cast %302 : vector<8xf32> to vector<8x1xf32>
    %304 = vector.broadcast %303 : vector<8x1xf32> to vector<8x8xf32>
    %305 = arith.subf %301, %304 : vector<8x8xf32>
    %306 = math.exp %305 : vector<8x8xf32>
    %cst_232 = arith.constant dense<0.000000e+00> : vector<8xf32>
    %307 = vector.multi_reduction <add>, %306, %cst_232 [1] : vector<8x8xf32> to vector<8xf32>
    %308 = vector.shape_cast %307 : vector<8xf32> to vector<8x1xf32>
    %309 = tpu.reciprocal %308 {approx = true} : vector<8x1xf32> -> vector<8x1xf32>
    %310 = vector.broadcast %309 : vector<8x1xf32> to vector<8x8xf32>
    %311 = arith.mulf %306, %310 : vector<8x8xf32>
    %cst_233 = arith.constant dense<0.000000e+00> : vector<8x8xf32>
    %312 = tpu.matmul %311, %298, %cst_233 {dimension_numbers = #tpu.dot_dimension_numbers<[1], [0], [0], [1], [0, 0, 1, 1], [], []>} : vector<8x8xf32>, vector<8x8xf32>, vector<8x8xf32> -> vector<8x8xf32>
    %c1_234 = arith.constant 1 : index
    %c0_235 = arith.constant 0 : index
    %c0_236 = arith.constant 0 : index
    %313 = vector.load %arg32[%c1_234, %c0_235, %c0_236] : memref<4x8x32xf32, #tpu.memory_space<vmem>>, vector<1x8x32xf32>
    %314 = vector.shape_cast %313 : vector<1x8x32xf32> to vector<8x32xf32>
    %cst_237 = arith.constant dense<0.000000e+00> : vector<8x32xf32>
    %315 = tpu.matmul %312, %314, %cst_237 {dimension_numbers = #tpu.dot_dimension_numbers<[1], [0], [0], [1], [0, 0, 1, 1], [], []>} : vector<8x8xf32>, vector<8x32xf32>, vector<8x32xf32> -> vector<8x32xf32>
    %316 = arith.addf %277, %315 : vector<8x32xf32>
    %c2_238 = arith.constant 2 : index
    %c0_239 = arith.constant 0 : index
    %c0_240 = arith.constant 0 : index
    %317 = vector.load %arg26[%c2_238, %c0_239, %c0_240] : memref<4x32x8xf32, #tpu.memory_space<vmem>>, vector<1x32x8xf32>
    %318 = vector.shape_cast %317 : vector<1x32x8xf32> to vector<32x8xf32>
    %c2_241 = arith.constant 2 : index
    %c0_242 = arith.constant 0 : index
    %c0_243 = arith.constant 0 : index
    %319 = vector.load %arg27[%c2_241, %c0_242, %c0_243] : memref<4x1x8xf32, #tpu.memory_space<vmem>>, vector<1x1x8xf32>
    %320 = vector.shape_cast %319 : vector<1x1x8xf32> to vector<1x8xf32>
    %cst_244 = arith.constant dense<0.000000e+00> : vector<8x8xf32>
    %321 = tpu.matmul %239, %318, %cst_244 {dimension_numbers = #tpu.dot_dimension_numbers<[1], [0], [0], [1], [0, 0, 1, 1], [], []>} : vector<8x32xf32>, vector<32x8xf32>, vector<8x8xf32> -> vector<8x8xf32>
    %322 = vector.broadcast %320 : vector<1x8xf32> to vector<8x8xf32>
    %323 = arith.addf %321, %322 : vector<8x8xf32>
    %c2_245 = arith.constant 2 : index
    %c0_246 = arith.constant 0 : index
    %c0_247 = arith.constant 0 : index
    %324 = vector.load %arg28[%c2_245, %c0_246, %c0_247] : memref<4x32x8xf32, #tpu.memory_space<vmem>>, vector<1x32x8xf32>
    %325 = vector.shape_cast %324 : vector<1x32x8xf32> to vector<32x8xf32>
    %c2_248 = arith.constant 2 : index
    %c0_249 = arith.constant 0 : index
    %c0_250 = arith.constant 0 : index
    %326 = vector.load %arg29[%c2_248, %c0_249, %c0_250] : memref<4x1x8xf32, #tpu.memory_space<vmem>>, vector<1x1x8xf32>
    %327 = vector.shape_cast %326 : vector<1x1x8xf32> to vector<1x8xf32>
    %cst_251 = arith.constant dense<0.000000e+00> : vector<8x8xf32>
    %328 = tpu.matmul %239, %325, %cst_251 {dimension_numbers = #tpu.dot_dimension_numbers<[1], [0], [0], [1], [0, 0, 1, 1], [], []>} : vector<8x32xf32>, vector<32x8xf32>, vector<8x8xf32> -> vector<8x8xf32>
    %329 = vector.broadcast %327 : vector<1x8xf32> to vector<8x8xf32>
    %330 = arith.addf %328, %329 : vector<8x8xf32>
    %c2_252 = arith.constant 2 : index
    %c0_253 = arith.constant 0 : index
    %c0_254 = arith.constant 0 : index
    %331 = vector.load %arg30[%c2_252, %c0_253, %c0_254] : memref<4x32x8xf32, #tpu.memory_space<vmem>>, vector<1x32x8xf32>
    %332 = vector.shape_cast %331 : vector<1x32x8xf32> to vector<32x8xf32>
    %c2_255 = arith.constant 2 : index
    %c0_256 = arith.constant 0 : index
    %c0_257 = arith.constant 0 : index
    %333 = vector.load %arg31[%c2_255, %c0_256, %c0_257] : memref<4x1x8xf32, #tpu.memory_space<vmem>>, vector<1x1x8xf32>
    %334 = vector.shape_cast %333 : vector<1x1x8xf32> to vector<1x8xf32>
    %cst_258 = arith.constant dense<0.000000e+00> : vector<8x8xf32>
    %335 = tpu.matmul %238, %332, %cst_258 {dimension_numbers = #tpu.dot_dimension_numbers<[1], [0], [0], [1], [0, 0, 1, 1], [], []>} : vector<8x32xf32>, vector<32x8xf32>, vector<8x8xf32> -> vector<8x8xf32>
    %336 = vector.broadcast %334 : vector<1x8xf32> to vector<8x8xf32>
    %337 = arith.addf %335, %336 : vector<8x8xf32>
    %cst_259 = arith.constant dense<0.000000e+00> : vector<8x8xf32>
    %338 = tpu.matmul %323, %330, %cst_259 {dimension_numbers = #tpu.dot_dimension_numbers<[1], [1], [0], [0], [0, 0, 1, 0], [], []>} : vector<8x8xf32>, vector<8x8xf32>, vector<8x8xf32> -> vector<8x8xf32>
    %cst_260 = arith.constant 0.353553385 : f32
    %339 = vector.broadcast %cst_260 : f32 to vector<8x8xf32>
    %340 = arith.mulf %338, %339 : vector<8x8xf32>
    %cst_261 = arith.constant dense<0xFF800000> : vector<8xf32>
    %341 = vector.multi_reduction <maximumf>, %340, %cst_261 [1] : vector<8x8xf32> to vector<8xf32>
    %342 = vector.shape_cast %341 : vector<8xf32> to vector<8x1xf32>
    %343 = vector.broadcast %342 : vector<8x1xf32> to vector<8x8xf32>
    %344 = arith.subf %340, %343 : vector<8x8xf32>
    %345 = math.exp %344 : vector<8x8xf32>
    %cst_262 = arith.constant dense<0.000000e+00> : vector<8xf32>
    %346 = vector.multi_reduction <add>, %345, %cst_262 [1] : vector<8x8xf32> to vector<8xf32>
    %347 = vector.shape_cast %346 : vector<8xf32> to vector<8x1xf32>
    %348 = tpu.reciprocal %347 {approx = true} : vector<8x1xf32> -> vector<8x1xf32>
    %349 = vector.broadcast %348 : vector<8x1xf32> to vector<8x8xf32>
    %350 = arith.mulf %345, %349 : vector<8x8xf32>
    %cst_263 = arith.constant dense<0.000000e+00> : vector<8x8xf32>
    %351 = tpu.matmul %350, %337, %cst_263 {dimension_numbers = #tpu.dot_dimension_numbers<[1], [0], [0], [1], [0, 0, 1, 1], [], []>} : vector<8x8xf32>, vector<8x8xf32>, vector<8x8xf32> -> vector<8x8xf32>
    %c2_264 = arith.constant 2 : index
    %c0_265 = arith.constant 0 : index
    %c0_266 = arith.constant 0 : index
    %352 = vector.load %arg32[%c2_264, %c0_265, %c0_266] : memref<4x8x32xf32, #tpu.memory_space<vmem>>, vector<1x8x32xf32>
    %353 = vector.shape_cast %352 : vector<1x8x32xf32> to vector<8x32xf32>
    %cst_267 = arith.constant dense<0.000000e+00> : vector<8x32xf32>
    %354 = tpu.matmul %351, %353, %cst_267 {dimension_numbers = #tpu.dot_dimension_numbers<[1], [0], [0], [1], [0, 0, 1, 1], [], []>} : vector<8x8xf32>, vector<8x32xf32>, vector<8x32xf32> -> vector<8x32xf32>
    %355 = arith.addf %316, %354 : vector<8x32xf32>
    %c3_268 = arith.constant 3 : index
    %c0_269 = arith.constant 0 : index
    %c0_270 = arith.constant 0 : index
    %356 = vector.load %arg26[%c3_268, %c0_269, %c0_270] : memref<4x32x8xf32, #tpu.memory_space<vmem>>, vector<1x32x8xf32>
    %357 = vector.shape_cast %356 : vector<1x32x8xf32> to vector<32x8xf32>
    %c3_271 = arith.constant 3 : index
    %c0_272 = arith.constant 0 : index
    %c0_273 = arith.constant 0 : index
    %358 = vector.load %arg27[%c3_271, %c0_272, %c0_273] : memref<4x1x8xf32, #tpu.memory_space<vmem>>, vector<1x1x8xf32>
    %359 = vector.shape_cast %358 : vector<1x1x8xf32> to vector<1x8xf32>
    %cst_274 = arith.constant dense<0.000000e+00> : vector<8x8xf32>
    %360 = tpu.matmul %239, %357, %cst_274 {dimension_numbers = #tpu.dot_dimension_numbers<[1], [0], [0], [1], [0, 0, 1, 1], [], []>} : vector<8x32xf32>, vector<32x8xf32>, vector<8x8xf32> -> vector<8x8xf32>
    %361 = vector.broadcast %359 : vector<1x8xf32> to vector<8x8xf32>
    %362 = arith.addf %360, %361 : vector<8x8xf32>
    %c3_275 = arith.constant 3 : index
    %c0_276 = arith.constant 0 : index
    %c0_277 = arith.constant 0 : index
    %363 = vector.load %arg28[%c3_275, %c0_276, %c0_277] : memref<4x32x8xf32, #tpu.memory_space<vmem>>, vector<1x32x8xf32>
    %364 = vector.shape_cast %363 : vector<1x32x8xf32> to vector<32x8xf32>
    %c3_278 = arith.constant 3 : index
    %c0_279 = arith.constant 0 : index
    %c0_280 = arith.constant 0 : index
    %365 = vector.load %arg29[%c3_278, %c0_279, %c0_280] : memref<4x1x8xf32, #tpu.memory_space<vmem>>, vector<1x1x8xf32>
    %366 = vector.shape_cast %365 : vector<1x1x8xf32> to vector<1x8xf32>
    %cst_281 = arith.constant dense<0.000000e+00> : vector<8x8xf32>
    %367 = tpu.matmul %239, %364, %cst_281 {dimension_numbers = #tpu.dot_dimension_numbers<[1], [0], [0], [1], [0, 0, 1, 1], [], []>} : vector<8x32xf32>, vector<32x8xf32>, vector<8x8xf32> -> vector<8x8xf32>
    %368 = vector.broadcast %366 : vector<1x8xf32> to vector<8x8xf32>
    %369 = arith.addf %367, %368 : vector<8x8xf32>
    %c3_282 = arith.constant 3 : index
    %c0_283 = arith.constant 0 : index
    %c0_284 = arith.constant 0 : index
    %370 = vector.load %arg30[%c3_282, %c0_283, %c0_284] : memref<4x32x8xf32, #tpu.memory_space<vmem>>, vector<1x32x8xf32>
    %371 = vector.shape_cast %370 : vector<1x32x8xf32> to vector<32x8xf32>
    %c3_285 = arith.constant 3 : index
    %c0_286 = arith.constant 0 : index
    %c0_287 = arith.constant 0 : index
    %372 = vector.load %arg31[%c3_285, %c0_286, %c0_287] : memref<4x1x8xf32, #tpu.memory_space<vmem>>, vector<1x1x8xf32>
    %373 = vector.shape_cast %372 : vector<1x1x8xf32> to vector<1x8xf32>
    %cst_288 = arith.constant dense<0.000000e+00> : vector<8x8xf32>
    %374 = tpu.matmul %238, %371, %cst_288 {dimension_numbers = #tpu.dot_dimension_numbers<[1], [0], [0], [1], [0, 0, 1, 1], [], []>} : vector<8x32xf32>, vector<32x8xf32>, vector<8x8xf32> -> vector<8x8xf32>
    %375 = vector.broadcast %373 : vector<1x8xf32> to vector<8x8xf32>
    %376 = arith.addf %374, %375 : vector<8x8xf32>
    %cst_289 = arith.constant dense<0.000000e+00> : vector<8x8xf32>
    %377 = tpu.matmul %362, %369, %cst_289 {dimension_numbers = #tpu.dot_dimension_numbers<[1], [1], [0], [0], [0, 0, 1, 0], [], []>} : vector<8x8xf32>, vector<8x8xf32>, vector<8x8xf32> -> vector<8x8xf32>
    %cst_290 = arith.constant 0.353553385 : f32
    %378 = vector.broadcast %cst_290 : f32 to vector<8x8xf32>
    %379 = arith.mulf %377, %378 : vector<8x8xf32>
    %cst_291 = arith.constant dense<0xFF800000> : vector<8xf32>
    %380 = vector.multi_reduction <maximumf>, %379, %cst_291 [1] : vector<8x8xf32> to vector<8xf32>
    %381 = vector.shape_cast %380 : vector<8xf32> to vector<8x1xf32>
    %382 = vector.broadcast %381 : vector<8x1xf32> to vector<8x8xf32>
    %383 = arith.subf %379, %382 : vector<8x8xf32>
    %384 = math.exp %383 : vector<8x8xf32>
    %cst_292 = arith.constant dense<0.000000e+00> : vector<8xf32>
    %385 = vector.multi_reduction <add>, %384, %cst_292 [1] : vector<8x8xf32> to vector<8xf32>
    %386 = vector.shape_cast %385 : vector<8xf32> to vector<8x1xf32>
    %387 = tpu.reciprocal %386 {approx = true} : vector<8x1xf32> -> vector<8x1xf32>
    %388 = vector.broadcast %387 : vector<8x1xf32> to vector<8x8xf32>
    %389 = arith.mulf %384, %388 : vector<8x8xf32>
    %cst_293 = arith.constant dense<0.000000e+00> : vector<8x8xf32>
    %390 = tpu.matmul %389, %376, %cst_293 {dimension_numbers = #tpu.dot_dimension_numbers<[1], [0], [0], [1], [0, 0, 1, 1], [], []>} : vector<8x8xf32>, vector<8x8xf32>, vector<8x8xf32> -> vector<8x8xf32>
    %c3_294 = arith.constant 3 : index
    %c0_295 = arith.constant 0 : index
    %c0_296 = arith.constant 0 : index
    %391 = vector.load %arg32[%c3_294, %c0_295, %c0_296] : memref<4x8x32xf32, #tpu.memory_space<vmem>>, vector<1x8x32xf32>
    %392 = vector.shape_cast %391 : vector<1x8x32xf32> to vector<8x32xf32>
    %cst_297 = arith.constant dense<0.000000e+00> : vector<8x32xf32>
    %393 = tpu.matmul %390, %392, %cst_297 {dimension_numbers = #tpu.dot_dimension_numbers<[1], [0], [0], [1], [0, 0, 1, 1], [], []>} : vector<8x8xf32>, vector<8x32xf32>, vector<8x32xf32> -> vector<8x32xf32>
    %394 = arith.addf %355, %393 : vector<8x32xf32>
    %c0_298 = arith.constant 0 : index
    %c0_299 = arith.constant 0 : index
    %395 = vector.load %arg33[%c0_298, %c0_299] : memref<1x32xf32, #tpu.memory_space<vmem>>, vector<1x32xf32>
    %396 = vector.broadcast %395 : vector<1x32xf32> to vector<8x32xf32>
    %397 = arith.addf %394, %396 : vector<8x32xf32>
    %398 = arith.addf %238, %397 : vector<8x32xf32>
    %c0_300 = arith.constant 0 : index
    %c0_301 = arith.constant 0 : index
    %399 = vector.load %arg34[%c0_300, %c0_301] : memref<1x32xf32, #tpu.memory_space<vmem>>, vector<1x32xf32>
    %c0_302 = arith.constant 0 : index
    %c0_303 = arith.constant 0 : index
    %400 = vector.load %arg35[%c0_302, %c0_303] : memref<1x32xf32, #tpu.memory_space<vmem>>, vector<1x32xf32>
    %cst_304 = arith.constant dense<0.000000e+00> : vector<8xf32>
    %401 = vector.multi_reduction <add>, %398, %cst_304 [1] : vector<8x32xf32> to vector<8xf32>
    %402 = vector.shape_cast %401 : vector<8xf32> to vector<8x1xf32>
    %cst_305 = arith.constant 3.200000e+01 : f32
    %403 = vector.broadcast %cst_305 : f32 to vector<8x1xf32>
    %404 = arith.divf %402, %403 : vector<8x1xf32>
    %405 = vector.broadcast %404 : vector<8x1xf32> to vector<8x32xf32>
    %406 = arith.subf %398, %405 : vector<8x32xf32>
    %407 = arith.mulf %406, %406 : vector<8x32xf32>
    %cst_306 = arith.constant dense<0.000000e+00> : vector<8xf32>
    %408 = vector.multi_reduction <add>, %407, %cst_306 [1] : vector<8x32xf32> to vector<8xf32>
    %409 = vector.shape_cast %408 : vector<8xf32> to vector<8x1xf32>
    %cst_307 = arith.constant 3.200000e+01 : f32
    %410 = vector.broadcast %cst_307 : f32 to vector<8x1xf32>
    %411 = arith.divf %409, %410 : vector<8x1xf32>
    %cst_308 = arith.constant 9.99999974E-6 : f32
    %412 = vector.broadcast %cst_308 : f32 to vector<8x1xf32>
    %413 = arith.addf %411, %412 : vector<8x1xf32>
    %414 = math.rsqrt %413 : vector<8x1xf32>
    %415 = vector.broadcast %414 : vector<8x1xf32> to vector<8x32xf32>
    %416 = arith.mulf %406, %415 : vector<8x32xf32>
    %417 = vector.broadcast %399 : vector<1x32xf32> to vector<8x32xf32>
    %418 = arith.mulf %416, %417 : vector<8x32xf32>
    %419 = vector.broadcast %400 : vector<1x32xf32> to vector<8x32xf32>
    %420 = arith.addf %418, %419 : vector<8x32xf32>
    %421 = arith.addf %420, %237 : vector<8x32xf32>
    %422 = arith.addf %236, %18 : vector<18x32xf32>
    %c0_309 = arith.constant 0 : index
    %c0_310 = arith.constant 0 : index
    %c0_311 = arith.constant 0 : index
    %423 = vector.load %arg36[%c0_309, %c0_310, %c0_311] : memref<4x32x8xf32, #tpu.memory_space<vmem>>, vector<1x32x8xf32>
    %424 = vector.shape_cast %423 : vector<1x32x8xf32> to vector<32x8xf32>
    %c0_312 = arith.constant 0 : index
    %c0_313 = arith.constant 0 : index
    %c0_314 = arith.constant 0 : index
    %425 = vector.load %arg37[%c0_312, %c0_313, %c0_314] : memref<4x1x8xf32, #tpu.memory_space<vmem>>, vector<1x1x8xf32>
    %426 = vector.shape_cast %425 : vector<1x1x8xf32> to vector<1x8xf32>
    %cst_315 = arith.constant dense<0.000000e+00> : vector<8x8xf32>
    %427 = tpu.matmul %421, %424, %cst_315 {dimension_numbers = #tpu.dot_dimension_numbers<[1], [0], [0], [1], [0, 0, 1, 1], [], []>} : vector<8x32xf32>, vector<32x8xf32>, vector<8x8xf32> -> vector<8x8xf32>
    %428 = vector.broadcast %426 : vector<1x8xf32> to vector<8x8xf32>
    %429 = arith.addf %427, %428 : vector<8x8xf32>
    %c0_316 = arith.constant 0 : index
    %c0_317 = arith.constant 0 : index
    %c0_318 = arith.constant 0 : index
    %430 = vector.load %arg38[%c0_316, %c0_317, %c0_318] : memref<4x32x8xf32, #tpu.memory_space<vmem>>, vector<1x32x8xf32>
    %431 = vector.shape_cast %430 : vector<1x32x8xf32> to vector<32x8xf32>
    %c0_319 = arith.constant 0 : index
    %c0_320 = arith.constant 0 : index
    %c0_321 = arith.constant 0 : index
    %432 = vector.load %arg39[%c0_319, %c0_320, %c0_321] : memref<4x1x8xf32, #tpu.memory_space<vmem>>, vector<1x1x8xf32>
    %433 = vector.shape_cast %432 : vector<1x1x8xf32> to vector<1x8xf32>
    %cst_322 = arith.constant dense<0.000000e+00> : vector<18x8xf32>
    %434 = tpu.matmul %422, %431, %cst_322 {dimension_numbers = #tpu.dot_dimension_numbers<[1], [0], [0], [1], [0, 0, 1, 1], [], []>} : vector<18x32xf32>, vector<32x8xf32>, vector<18x8xf32> -> vector<18x8xf32>
    %435 = vector.broadcast %433 : vector<1x8xf32> to vector<18x8xf32>
    %436 = arith.addf %434, %435 : vector<18x8xf32>
    %c0_323 = arith.constant 0 : index
    %c0_324 = arith.constant 0 : index
    %c0_325 = arith.constant 0 : index
    %437 = vector.load %arg40[%c0_323, %c0_324, %c0_325] : memref<4x32x8xf32, #tpu.memory_space<vmem>>, vector<1x32x8xf32>
    %438 = vector.shape_cast %437 : vector<1x32x8xf32> to vector<32x8xf32>
    %c0_326 = arith.constant 0 : index
    %c0_327 = arith.constant 0 : index
    %c0_328 = arith.constant 0 : index
    %439 = vector.load %arg41[%c0_326, %c0_327, %c0_328] : memref<4x1x8xf32, #tpu.memory_space<vmem>>, vector<1x1x8xf32>
    %440 = vector.shape_cast %439 : vector<1x1x8xf32> to vector<1x8xf32>
    %cst_329 = arith.constant dense<0.000000e+00> : vector<18x8xf32>
    %441 = tpu.matmul %236, %438, %cst_329 {dimension_numbers = #tpu.dot_dimension_numbers<[1], [0], [0], [1], [0, 0, 1, 1], [], []>} : vector<18x32xf32>, vector<32x8xf32>, vector<18x8xf32> -> vector<18x8xf32>
    %442 = vector.broadcast %440 : vector<1x8xf32> to vector<18x8xf32>
    %443 = arith.addf %441, %442 : vector<18x8xf32>
    %cst_330 = arith.constant dense<0.000000e+00> : vector<8x18xf32>
    %444 = tpu.matmul %429, %436, %cst_330 {dimension_numbers = #tpu.dot_dimension_numbers<[1], [1], [0], [0], [0, 0, 1, 0], [], []>} : vector<8x8xf32>, vector<18x8xf32>, vector<8x18xf32> -> vector<8x18xf32>
    %cst_331 = arith.constant 0.353553385 : f32
    %445 = vector.broadcast %cst_331 : f32 to vector<8x18xf32>
    %446 = arith.mulf %444, %445 : vector<8x18xf32>
    %cst_332 = arith.constant dense<0xFF800000> : vector<8xf32>
    %447 = vector.multi_reduction <maximumf>, %446, %cst_332 [1] : vector<8x18xf32> to vector<8xf32>
    %448 = vector.shape_cast %447 : vector<8xf32> to vector<8x1xf32>
    %449 = vector.broadcast %448 : vector<8x1xf32> to vector<8x18xf32>
    %450 = arith.subf %446, %449 : vector<8x18xf32>
    %451 = math.exp %450 : vector<8x18xf32>
    %cst_333 = arith.constant dense<0.000000e+00> : vector<8xf32>
    %452 = vector.multi_reduction <add>, %451, %cst_333 [1] : vector<8x18xf32> to vector<8xf32>
    %453 = vector.shape_cast %452 : vector<8xf32> to vector<8x1xf32>
    %454 = tpu.reciprocal %453 {approx = true} : vector<8x1xf32> -> vector<8x1xf32>
    %455 = vector.broadcast %454 : vector<8x1xf32> to vector<8x18xf32>
    %456 = arith.mulf %451, %455 : vector<8x18xf32>
    %cst_334 = arith.constant dense<0.000000e+00> : vector<8x8xf32>
    %457 = tpu.matmul %456, %443, %cst_334 {dimension_numbers = #tpu.dot_dimension_numbers<[1], [0], [0], [1], [0, 0, 1, 1], [], []>} : vector<8x18xf32>, vector<18x8xf32>, vector<8x8xf32> -> vector<8x8xf32>
    %c0_335 = arith.constant 0 : index
    %c0_336 = arith.constant 0 : index
    %c0_337 = arith.constant 0 : index
    %458 = vector.load %arg42[%c0_335, %c0_336, %c0_337] : memref<4x8x32xf32, #tpu.memory_space<vmem>>, vector<1x8x32xf32>
    %459 = vector.shape_cast %458 : vector<1x8x32xf32> to vector<8x32xf32>
    %cst_338 = arith.constant dense<0.000000e+00> : vector<8x32xf32>
    %460 = tpu.matmul %457, %459, %cst_338 {dimension_numbers = #tpu.dot_dimension_numbers<[1], [0], [0], [1], [0, 0, 1, 1], [], []>} : vector<8x8xf32>, vector<8x32xf32>, vector<8x32xf32> -> vector<8x32xf32>
    %c1_339 = arith.constant 1 : index
    %c0_340 = arith.constant 0 : index
    %c0_341 = arith.constant 0 : index
    %461 = vector.load %arg36[%c1_339, %c0_340, %c0_341] : memref<4x32x8xf32, #tpu.memory_space<vmem>>, vector<1x32x8xf32>
    %462 = vector.shape_cast %461 : vector<1x32x8xf32> to vector<32x8xf32>
    %c1_342 = arith.constant 1 : index
    %c0_343 = arith.constant 0 : index
    %c0_344 = arith.constant 0 : index
    %463 = vector.load %arg37[%c1_342, %c0_343, %c0_344] : memref<4x1x8xf32, #tpu.memory_space<vmem>>, vector<1x1x8xf32>
    %464 = vector.shape_cast %463 : vector<1x1x8xf32> to vector<1x8xf32>
    %cst_345 = arith.constant dense<0.000000e+00> : vector<8x8xf32>
    %465 = tpu.matmul %421, %462, %cst_345 {dimension_numbers = #tpu.dot_dimension_numbers<[1], [0], [0], [1], [0, 0, 1, 1], [], []>} : vector<8x32xf32>, vector<32x8xf32>, vector<8x8xf32> -> vector<8x8xf32>
    %466 = vector.broadcast %464 : vector<1x8xf32> to vector<8x8xf32>
    %467 = arith.addf %465, %466 : vector<8x8xf32>
    %c1_346 = arith.constant 1 : index
    %c0_347 = arith.constant 0 : index
    %c0_348 = arith.constant 0 : index
    %468 = vector.load %arg38[%c1_346, %c0_347, %c0_348] : memref<4x32x8xf32, #tpu.memory_space<vmem>>, vector<1x32x8xf32>
    %469 = vector.shape_cast %468 : vector<1x32x8xf32> to vector<32x8xf32>
    %c1_349 = arith.constant 1 : index
    %c0_350 = arith.constant 0 : index
    %c0_351 = arith.constant 0 : index
    %470 = vector.load %arg39[%c1_349, %c0_350, %c0_351] : memref<4x1x8xf32, #tpu.memory_space<vmem>>, vector<1x1x8xf32>
    %471 = vector.shape_cast %470 : vector<1x1x8xf32> to vector<1x8xf32>
    %cst_352 = arith.constant dense<0.000000e+00> : vector<18x8xf32>
    %472 = tpu.matmul %422, %469, %cst_352 {dimension_numbers = #tpu.dot_dimension_numbers<[1], [0], [0], [1], [0, 0, 1, 1], [], []>} : vector<18x32xf32>, vector<32x8xf32>, vector<18x8xf32> -> vector<18x8xf32>
    %473 = vector.broadcast %471 : vector<1x8xf32> to vector<18x8xf32>
    %474 = arith.addf %472, %473 : vector<18x8xf32>
    %c1_353 = arith.constant 1 : index
    %c0_354 = arith.constant 0 : index
    %c0_355 = arith.constant 0 : index
    %475 = vector.load %arg40[%c1_353, %c0_354, %c0_355] : memref<4x32x8xf32, #tpu.memory_space<vmem>>, vector<1x32x8xf32>
    %476 = vector.shape_cast %475 : vector<1x32x8xf32> to vector<32x8xf32>
    %c1_356 = arith.constant 1 : index
    %c0_357 = arith.constant 0 : index
    %c0_358 = arith.constant 0 : index
    %477 = vector.load %arg41[%c1_356, %c0_357, %c0_358] : memref<4x1x8xf32, #tpu.memory_space<vmem>>, vector<1x1x8xf32>
    %478 = vector.shape_cast %477 : vector<1x1x8xf32> to vector<1x8xf32>
    %cst_359 = arith.constant dense<0.000000e+00> : vector<18x8xf32>
    %479 = tpu.matmul %236, %476, %cst_359 {dimension_numbers = #tpu.dot_dimension_numbers<[1], [0], [0], [1], [0, 0, 1, 1], [], []>} : vector<18x32xf32>, vector<32x8xf32>, vector<18x8xf32> -> vector<18x8xf32>
    %480 = vector.broadcast %478 : vector<1x8xf32> to vector<18x8xf32>
    %481 = arith.addf %479, %480 : vector<18x8xf32>
    %cst_360 = arith.constant dense<0.000000e+00> : vector<8x18xf32>
    %482 = tpu.matmul %467, %474, %cst_360 {dimension_numbers = #tpu.dot_dimension_numbers<[1], [1], [0], [0], [0, 0, 1, 0], [], []>} : vector<8x8xf32>, vector<18x8xf32>, vector<8x18xf32> -> vector<8x18xf32>
    %cst_361 = arith.constant 0.353553385 : f32
    %483 = vector.broadcast %cst_361 : f32 to vector<8x18xf32>
    %484 = arith.mulf %482, %483 : vector<8x18xf32>
    %cst_362 = arith.constant dense<0xFF800000> : vector<8xf32>
    %485 = vector.multi_reduction <maximumf>, %484, %cst_362 [1] : vector<8x18xf32> to vector<8xf32>
    %486 = vector.shape_cast %485 : vector<8xf32> to vector<8x1xf32>
    %487 = vector.broadcast %486 : vector<8x1xf32> to vector<8x18xf32>
    %488 = arith.subf %484, %487 : vector<8x18xf32>
    %489 = math.exp %488 : vector<8x18xf32>
    %cst_363 = arith.constant dense<0.000000e+00> : vector<8xf32>
    %490 = vector.multi_reduction <add>, %489, %cst_363 [1] : vector<8x18xf32> to vector<8xf32>
    %491 = vector.shape_cast %490 : vector<8xf32> to vector<8x1xf32>
    %492 = tpu.reciprocal %491 {approx = true} : vector<8x1xf32> -> vector<8x1xf32>
    %493 = vector.broadcast %492 : vector<8x1xf32> to vector<8x18xf32>
    %494 = arith.mulf %489, %493 : vector<8x18xf32>
    %cst_364 = arith.constant dense<0.000000e+00> : vector<8x8xf32>
    %495 = tpu.matmul %494, %481, %cst_364 {dimension_numbers = #tpu.dot_dimension_numbers<[1], [0], [0], [1], [0, 0, 1, 1], [], []>} : vector<8x18xf32>, vector<18x8xf32>, vector<8x8xf32> -> vector<8x8xf32>
    %c1_365 = arith.constant 1 : index
    %c0_366 = arith.constant 0 : index
    %c0_367 = arith.constant 0 : index
    %496 = vector.load %arg42[%c1_365, %c0_366, %c0_367] : memref<4x8x32xf32, #tpu.memory_space<vmem>>, vector<1x8x32xf32>
    %497 = vector.shape_cast %496 : vector<1x8x32xf32> to vector<8x32xf32>
    %cst_368 = arith.constant dense<0.000000e+00> : vector<8x32xf32>
    %498 = tpu.matmul %495, %497, %cst_368 {dimension_numbers = #tpu.dot_dimension_numbers<[1], [0], [0], [1], [0, 0, 1, 1], [], []>} : vector<8x8xf32>, vector<8x32xf32>, vector<8x32xf32> -> vector<8x32xf32>
    %499 = arith.addf %460, %498 : vector<8x32xf32>
    %c2_369 = arith.constant 2 : index
    %c0_370 = arith.constant 0 : index
    %c0_371 = arith.constant 0 : index
    %500 = vector.load %arg36[%c2_369, %c0_370, %c0_371] : memref<4x32x8xf32, #tpu.memory_space<vmem>>, vector<1x32x8xf32>
    %501 = vector.shape_cast %500 : vector<1x32x8xf32> to vector<32x8xf32>
    %c2_372 = arith.constant 2 : index
    %c0_373 = arith.constant 0 : index
    %c0_374 = arith.constant 0 : index
    %502 = vector.load %arg37[%c2_372, %c0_373, %c0_374] : memref<4x1x8xf32, #tpu.memory_space<vmem>>, vector<1x1x8xf32>
    %503 = vector.shape_cast %502 : vector<1x1x8xf32> to vector<1x8xf32>
    %cst_375 = arith.constant dense<0.000000e+00> : vector<8x8xf32>
    %504 = tpu.matmul %421, %501, %cst_375 {dimension_numbers = #tpu.dot_dimension_numbers<[1], [0], [0], [1], [0, 0, 1, 1], [], []>} : vector<8x32xf32>, vector<32x8xf32>, vector<8x8xf32> -> vector<8x8xf32>
    %505 = vector.broadcast %503 : vector<1x8xf32> to vector<8x8xf32>
    %506 = arith.addf %504, %505 : vector<8x8xf32>
    %c2_376 = arith.constant 2 : index
    %c0_377 = arith.constant 0 : index
    %c0_378 = arith.constant 0 : index
    %507 = vector.load %arg38[%c2_376, %c0_377, %c0_378] : memref<4x32x8xf32, #tpu.memory_space<vmem>>, vector<1x32x8xf32>
    %508 = vector.shape_cast %507 : vector<1x32x8xf32> to vector<32x8xf32>
    %c2_379 = arith.constant 2 : index
    %c0_380 = arith.constant 0 : index
    %c0_381 = arith.constant 0 : index
    %509 = vector.load %arg39[%c2_379, %c0_380, %c0_381] : memref<4x1x8xf32, #tpu.memory_space<vmem>>, vector<1x1x8xf32>
    %510 = vector.shape_cast %509 : vector<1x1x8xf32> to vector<1x8xf32>
    %cst_382 = arith.constant dense<0.000000e+00> : vector<18x8xf32>
    %511 = tpu.matmul %422, %508, %cst_382 {dimension_numbers = #tpu.dot_dimension_numbers<[1], [0], [0], [1], [0, 0, 1, 1], [], []>} : vector<18x32xf32>, vector<32x8xf32>, vector<18x8xf32> -> vector<18x8xf32>
    %512 = vector.broadcast %510 : vector<1x8xf32> to vector<18x8xf32>
    %513 = arith.addf %511, %512 : vector<18x8xf32>
    %c2_383 = arith.constant 2 : index
    %c0_384 = arith.constant 0 : index
    %c0_385 = arith.constant 0 : index
    %514 = vector.load %arg40[%c2_383, %c0_384, %c0_385] : memref<4x32x8xf32, #tpu.memory_space<vmem>>, vector<1x32x8xf32>
    %515 = vector.shape_cast %514 : vector<1x32x8xf32> to vector<32x8xf32>
    %c2_386 = arith.constant 2 : index
    %c0_387 = arith.constant 0 : index
    %c0_388 = arith.constant 0 : index
    %516 = vector.load %arg41[%c2_386, %c0_387, %c0_388] : memref<4x1x8xf32, #tpu.memory_space<vmem>>, vector<1x1x8xf32>
    %517 = vector.shape_cast %516 : vector<1x1x8xf32> to vector<1x8xf32>
    %cst_389 = arith.constant dense<0.000000e+00> : vector<18x8xf32>
    %518 = tpu.matmul %236, %515, %cst_389 {dimension_numbers = #tpu.dot_dimension_numbers<[1], [0], [0], [1], [0, 0, 1, 1], [], []>} : vector<18x32xf32>, vector<32x8xf32>, vector<18x8xf32> -> vector<18x8xf32>
    %519 = vector.broadcast %517 : vector<1x8xf32> to vector<18x8xf32>
    %520 = arith.addf %518, %519 : vector<18x8xf32>
    %cst_390 = arith.constant dense<0.000000e+00> : vector<8x18xf32>
    %521 = tpu.matmul %506, %513, %cst_390 {dimension_numbers = #tpu.dot_dimension_numbers<[1], [1], [0], [0], [0, 0, 1, 0], [], []>} : vector<8x8xf32>, vector<18x8xf32>, vector<8x18xf32> -> vector<8x18xf32>
    %cst_391 = arith.constant 0.353553385 : f32
    %522 = vector.broadcast %cst_391 : f32 to vector<8x18xf32>
    %523 = arith.mulf %521, %522 : vector<8x18xf32>
    %cst_392 = arith.constant dense<0xFF800000> : vector<8xf32>
    %524 = vector.multi_reduction <maximumf>, %523, %cst_392 [1] : vector<8x18xf32> to vector<8xf32>
    %525 = vector.shape_cast %524 : vector<8xf32> to vector<8x1xf32>
    %526 = vector.broadcast %525 : vector<8x1xf32> to vector<8x18xf32>
    %527 = arith.subf %523, %526 : vector<8x18xf32>
    %528 = math.exp %527 : vector<8x18xf32>
    %cst_393 = arith.constant dense<0.000000e+00> : vector<8xf32>
    %529 = vector.multi_reduction <add>, %528, %cst_393 [1] : vector<8x18xf32> to vector<8xf32>
    %530 = vector.shape_cast %529 : vector<8xf32> to vector<8x1xf32>
    %531 = tpu.reciprocal %530 {approx = true} : vector<8x1xf32> -> vector<8x1xf32>
    %532 = vector.broadcast %531 : vector<8x1xf32> to vector<8x18xf32>
    %533 = arith.mulf %528, %532 : vector<8x18xf32>
    %cst_394 = arith.constant dense<0.000000e+00> : vector<8x8xf32>
    %534 = tpu.matmul %533, %520, %cst_394 {dimension_numbers = #tpu.dot_dimension_numbers<[1], [0], [0], [1], [0, 0, 1, 1], [], []>} : vector<8x18xf32>, vector<18x8xf32>, vector<8x8xf32> -> vector<8x8xf32>
    %c2_395 = arith.constant 2 : index
    %c0_396 = arith.constant 0 : index
    %c0_397 = arith.constant 0 : index
    %535 = vector.load %arg42[%c2_395, %c0_396, %c0_397] : memref<4x8x32xf32, #tpu.memory_space<vmem>>, vector<1x8x32xf32>
    %536 = vector.shape_cast %535 : vector<1x8x32xf32> to vector<8x32xf32>
    %cst_398 = arith.constant dense<0.000000e+00> : vector<8x32xf32>
    %537 = tpu.matmul %534, %536, %cst_398 {dimension_numbers = #tpu.dot_dimension_numbers<[1], [0], [0], [1], [0, 0, 1, 1], [], []>} : vector<8x8xf32>, vector<8x32xf32>, vector<8x32xf32> -> vector<8x32xf32>
    %538 = arith.addf %499, %537 : vector<8x32xf32>
    %c3_399 = arith.constant 3 : index
    %c0_400 = arith.constant 0 : index
    %c0_401 = arith.constant 0 : index
    %539 = vector.load %arg36[%c3_399, %c0_400, %c0_401] : memref<4x32x8xf32, #tpu.memory_space<vmem>>, vector<1x32x8xf32>
    %540 = vector.shape_cast %539 : vector<1x32x8xf32> to vector<32x8xf32>
    %c3_402 = arith.constant 3 : index
    %c0_403 = arith.constant 0 : index
    %c0_404 = arith.constant 0 : index
    %541 = vector.load %arg37[%c3_402, %c0_403, %c0_404] : memref<4x1x8xf32, #tpu.memory_space<vmem>>, vector<1x1x8xf32>
    %542 = vector.shape_cast %541 : vector<1x1x8xf32> to vector<1x8xf32>
    %cst_405 = arith.constant dense<0.000000e+00> : vector<8x8xf32>
    %543 = tpu.matmul %421, %540, %cst_405 {dimension_numbers = #tpu.dot_dimension_numbers<[1], [0], [0], [1], [0, 0, 1, 1], [], []>} : vector<8x32xf32>, vector<32x8xf32>, vector<8x8xf32> -> vector<8x8xf32>
    %544 = vector.broadcast %542 : vector<1x8xf32> to vector<8x8xf32>
    %545 = arith.addf %543, %544 : vector<8x8xf32>
    %c3_406 = arith.constant 3 : index
    %c0_407 = arith.constant 0 : index
    %c0_408 = arith.constant 0 : index
    %546 = vector.load %arg38[%c3_406, %c0_407, %c0_408] : memref<4x32x8xf32, #tpu.memory_space<vmem>>, vector<1x32x8xf32>
    %547 = vector.shape_cast %546 : vector<1x32x8xf32> to vector<32x8xf32>
    %c3_409 = arith.constant 3 : index
    %c0_410 = arith.constant 0 : index
    %c0_411 = arith.constant 0 : index
    %548 = vector.load %arg39[%c3_409, %c0_410, %c0_411] : memref<4x1x8xf32, #tpu.memory_space<vmem>>, vector<1x1x8xf32>
    %549 = vector.shape_cast %548 : vector<1x1x8xf32> to vector<1x8xf32>
    %cst_412 = arith.constant dense<0.000000e+00> : vector<18x8xf32>
    %550 = tpu.matmul %422, %547, %cst_412 {dimension_numbers = #tpu.dot_dimension_numbers<[1], [0], [0], [1], [0, 0, 1, 1], [], []>} : vector<18x32xf32>, vector<32x8xf32>, vector<18x8xf32> -> vector<18x8xf32>
    %551 = vector.broadcast %549 : vector<1x8xf32> to vector<18x8xf32>
    %552 = arith.addf %550, %551 : vector<18x8xf32>
    %c3_413 = arith.constant 3 : index
    %c0_414 = arith.constant 0 : index
    %c0_415 = arith.constant 0 : index
    %553 = vector.load %arg40[%c3_413, %c0_414, %c0_415] : memref<4x32x8xf32, #tpu.memory_space<vmem>>, vector<1x32x8xf32>
    %554 = vector.shape_cast %553 : vector<1x32x8xf32> to vector<32x8xf32>
    %c3_416 = arith.constant 3 : index
    %c0_417 = arith.constant 0 : index
    %c0_418 = arith.constant 0 : index
    %555 = vector.load %arg41[%c3_416, %c0_417, %c0_418] : memref<4x1x8xf32, #tpu.memory_space<vmem>>, vector<1x1x8xf32>
    %556 = vector.shape_cast %555 : vector<1x1x8xf32> to vector<1x8xf32>
    %cst_419 = arith.constant dense<0.000000e+00> : vector<18x8xf32>
    %557 = tpu.matmul %236, %554, %cst_419 {dimension_numbers = #tpu.dot_dimension_numbers<[1], [0], [0], [1], [0, 0, 1, 1], [], []>} : vector<18x32xf32>, vector<32x8xf32>, vector<18x8xf32> -> vector<18x8xf32>
    %558 = vector.broadcast %556 : vector<1x8xf32> to vector<18x8xf32>
    %559 = arith.addf %557, %558 : vector<18x8xf32>
    %cst_420 = arith.constant dense<0.000000e+00> : vector<8x18xf32>
    %560 = tpu.matmul %545, %552, %cst_420 {dimension_numbers = #tpu.dot_dimension_numbers<[1], [1], [0], [0], [0, 0, 1, 0], [], []>} : vector<8x8xf32>, vector<18x8xf32>, vector<8x18xf32> -> vector<8x18xf32>
    %cst_421 = arith.constant 0.353553385 : f32
    %561 = vector.broadcast %cst_421 : f32 to vector<8x18xf32>
    %562 = arith.mulf %560, %561 : vector<8x18xf32>
    %cst_422 = arith.constant dense<0xFF800000> : vector<8xf32>
    %563 = vector.multi_reduction <maximumf>, %562, %cst_422 [1] : vector<8x18xf32> to vector<8xf32>
    %564 = vector.shape_cast %563 : vector<8xf32> to vector<8x1xf32>
    %565 = vector.broadcast %564 : vector<8x1xf32> to vector<8x18xf32>
    %566 = arith.subf %562, %565 : vector<8x18xf32>
    %567 = math.exp %566 : vector<8x18xf32>
    %cst_423 = arith.constant dense<0.000000e+00> : vector<8xf32>
    %568 = vector.multi_reduction <add>, %567, %cst_423 [1] : vector<8x18xf32> to vector<8xf32>
    %569 = vector.shape_cast %568 : vector<8xf32> to vector<8x1xf32>
    %570 = tpu.reciprocal %569 {approx = true} : vector<8x1xf32> -> vector<8x1xf32>
    %571 = vector.broadcast %570 : vector<8x1xf32> to vector<8x18xf32>
    %572 = arith.mulf %567, %571 : vector<8x18xf32>
    %cst_424 = arith.constant dense<0.000000e+00> : vector<8x8xf32>
    %573 = tpu.matmul %572, %559, %cst_424 {dimension_numbers = #tpu.dot_dimension_numbers<[1], [0], [0], [1], [0, 0, 1, 1], [], []>} : vector<8x18xf32>, vector<18x8xf32>, vector<8x8xf32> -> vector<8x8xf32>
    %c3_425 = arith.constant 3 : index
    %c0_426 = arith.constant 0 : index
    %c0_427 = arith.constant 0 : index
    %574 = vector.load %arg42[%c3_425, %c0_426, %c0_427] : memref<4x8x32xf32, #tpu.memory_space<vmem>>, vector<1x8x32xf32>
    %575 = vector.shape_cast %574 : vector<1x8x32xf32> to vector<8x32xf32>
    %cst_428 = arith.constant dense<0.000000e+00> : vector<8x32xf32>
    %576 = tpu.matmul %573, %575, %cst_428 {dimension_numbers = #tpu.dot_dimension_numbers<[1], [0], [0], [1], [0, 0, 1, 1], [], []>} : vector<8x8xf32>, vector<8x32xf32>, vector<8x32xf32> -> vector<8x32xf32>
    %577 = arith.addf %538, %576 : vector<8x32xf32>
    %c0_429 = arith.constant 0 : index
    %c0_430 = arith.constant 0 : index
    %578 = vector.load %arg43[%c0_429, %c0_430] : memref<1x32xf32, #tpu.memory_space<vmem>>, vector<1x32xf32>
    %579 = vector.broadcast %578 : vector<1x32xf32> to vector<8x32xf32>
    %580 = arith.addf %577, %579 : vector<8x32xf32>
    %581 = arith.addf %420, %580 : vector<8x32xf32>
    %c0_431 = arith.constant 0 : index
    %c0_432 = arith.constant 0 : index
    %582 = vector.load %arg44[%c0_431, %c0_432] : memref<1x32xf32, #tpu.memory_space<vmem>>, vector<1x32xf32>
    %c0_433 = arith.constant 0 : index
    %c0_434 = arith.constant 0 : index
    %583 = vector.load %arg45[%c0_433, %c0_434] : memref<1x32xf32, #tpu.memory_space<vmem>>, vector<1x32xf32>
    %cst_435 = arith.constant dense<0.000000e+00> : vector<8xf32>
    %584 = vector.multi_reduction <add>, %581, %cst_435 [1] : vector<8x32xf32> to vector<8xf32>
    %585 = vector.shape_cast %584 : vector<8xf32> to vector<8x1xf32>
    %cst_436 = arith.constant 3.200000e+01 : f32
    %586 = vector.broadcast %cst_436 : f32 to vector<8x1xf32>
    %587 = arith.divf %585, %586 : vector<8x1xf32>
    %588 = vector.broadcast %587 : vector<8x1xf32> to vector<8x32xf32>
    %589 = arith.subf %581, %588 : vector<8x32xf32>
    %590 = arith.mulf %589, %589 : vector<8x32xf32>
    %cst_437 = arith.constant dense<0.000000e+00> : vector<8xf32>
    %591 = vector.multi_reduction <add>, %590, %cst_437 [1] : vector<8x32xf32> to vector<8xf32>
    %592 = vector.shape_cast %591 : vector<8xf32> to vector<8x1xf32>
    %cst_438 = arith.constant 3.200000e+01 : f32
    %593 = vector.broadcast %cst_438 : f32 to vector<8x1xf32>
    %594 = arith.divf %592, %593 : vector<8x1xf32>
    %cst_439 = arith.constant 9.99999974E-6 : f32
    %595 = vector.broadcast %cst_439 : f32 to vector<8x1xf32>
    %596 = arith.addf %594, %595 : vector<8x1xf32>
    %597 = math.rsqrt %596 : vector<8x1xf32>
    %598 = vector.broadcast %597 : vector<8x1xf32> to vector<8x32xf32>
    %599 = arith.mulf %589, %598 : vector<8x32xf32>
    %600 = vector.broadcast %582 : vector<1x32xf32> to vector<8x32xf32>
    %601 = arith.mulf %599, %600 : vector<8x32xf32>
    %602 = vector.broadcast %583 : vector<1x32xf32> to vector<8x32xf32>
    %603 = arith.addf %601, %602 : vector<8x32xf32>
    %c0_440 = arith.constant 0 : index
    %c0_441 = arith.constant 0 : index
    %604 = vector.load %arg46[%c0_440, %c0_441] : memref<32x64xf32, #tpu.memory_space<vmem>>, vector<32x64xf32>
    %c0_442 = arith.constant 0 : index
    %c0_443 = arith.constant 0 : index
    %605 = vector.load %arg47[%c0_442, %c0_443] : memref<1x64xf32, #tpu.memory_space<vmem>>, vector<1x64xf32>
    %cst_444 = arith.constant dense<0.000000e+00> : vector<8x64xf32>
    %606 = tpu.matmul %603, %604, %cst_444 {dimension_numbers = #tpu.dot_dimension_numbers<[1], [0], [0], [1], [0, 0, 1, 1], [], []>} : vector<8x32xf32>, vector<32x64xf32>, vector<8x64xf32> -> vector<8x64xf32>
    %607 = vector.broadcast %605 : vector<1x64xf32> to vector<8x64xf32>
    %608 = arith.addf %606, %607 : vector<8x64xf32>
    %cst_445 = arith.constant 0.000000e+00 : f32
    %609 = vector.broadcast %cst_445 : f32 to vector<8x64xf32>
    %610 = arith.maximumf %608, %609 : vector<8x64xf32>
    %c0_446 = arith.constant 0 : index
    %c0_447 = arith.constant 0 : index
    %611 = vector.load %arg48[%c0_446, %c0_447] : memref<64x32xf32, #tpu.memory_space<vmem>>, vector<64x32xf32>
    %c0_448 = arith.constant 0 : index
    %c0_449 = arith.constant 0 : index
    %612 = vector.load %arg49[%c0_448, %c0_449] : memref<1x32xf32, #tpu.memory_space<vmem>>, vector<1x32xf32>
    %cst_450 = arith.constant dense<0.000000e+00> : vector<8x32xf32>
    %613 = tpu.matmul %610, %611, %cst_450 {dimension_numbers = #tpu.dot_dimension_numbers<[1], [0], [0], [1], [0, 0, 1, 1], [], []>} : vector<8x64xf32>, vector<64x32xf32>, vector<8x32xf32> -> vector<8x32xf32>
    %614 = vector.broadcast %612 : vector<1x32xf32> to vector<8x32xf32>
    %615 = arith.addf %613, %614 : vector<8x32xf32>
    %616 = arith.addf %603, %615 : vector<8x32xf32>
    %c0_451 = arith.constant 0 : index
    %c0_452 = arith.constant 0 : index
    %617 = vector.load %arg50[%c0_451, %c0_452] : memref<1x32xf32, #tpu.memory_space<vmem>>, vector<1x32xf32>
    %c0_453 = arith.constant 0 : index
    %c0_454 = arith.constant 0 : index
    %618 = vector.load %arg51[%c0_453, %c0_454] : memref<1x32xf32, #tpu.memory_space<vmem>>, vector<1x32xf32>
    %cst_455 = arith.constant dense<0.000000e+00> : vector<8xf32>
    %619 = vector.multi_reduction <add>, %616, %cst_455 [1] : vector<8x32xf32> to vector<8xf32>
    %620 = vector.shape_cast %619 : vector<8xf32> to vector<8x1xf32>
    %cst_456 = arith.constant 3.200000e+01 : f32
    %621 = vector.broadcast %cst_456 : f32 to vector<8x1xf32>
    %622 = arith.divf %620, %621 : vector<8x1xf32>
    %623 = vector.broadcast %622 : vector<8x1xf32> to vector<8x32xf32>
    %624 = arith.subf %616, %623 : vector<8x32xf32>
    %625 = arith.mulf %624, %624 : vector<8x32xf32>
    %cst_457 = arith.constant dense<0.000000e+00> : vector<8xf32>
    %626 = vector.multi_reduction <add>, %625, %cst_457 [1] : vector<8x32xf32> to vector<8xf32>
    %627 = vector.shape_cast %626 : vector<8xf32> to vector<8x1xf32>
    %cst_458 = arith.constant 3.200000e+01 : f32
    %628 = vector.broadcast %cst_458 : f32 to vector<8x1xf32>
    %629 = arith.divf %627, %628 : vector<8x1xf32>
    %cst_459 = arith.constant 9.99999974E-6 : f32
    %630 = vector.broadcast %cst_459 : f32 to vector<8x1xf32>
    %631 = arith.addf %629, %630 : vector<8x1xf32>
    %632 = math.rsqrt %631 : vector<8x1xf32>
    %633 = vector.broadcast %632 : vector<8x1xf32> to vector<8x32xf32>
    %634 = arith.mulf %624, %633 : vector<8x32xf32>
    %635 = vector.broadcast %617 : vector<1x32xf32> to vector<8x32xf32>
    %636 = arith.mulf %634, %635 : vector<8x32xf32>
    %637 = vector.broadcast %618 : vector<1x32xf32> to vector<8x32xf32>
    %638 = arith.addf %636, %637 : vector<8x32xf32>
    %c0_460 = arith.constant 0 : index
    %c0_461 = arith.constant 0 : index
    %639 = vector.load %arg52[%c0_460, %c0_461] : memref<32x8xf32, #tpu.memory_space<vmem>>, vector<32x8xf32>
    %c0_462 = arith.constant 0 : index
    %c0_463 = arith.constant 0 : index
    %640 = vector.load %arg53[%c0_462, %c0_463] : memref<1x8xf32, #tpu.memory_space<vmem>>, vector<1x8xf32>
    %cst_464 = arith.constant dense<0.000000e+00> : vector<8x8xf32>
    %641 = tpu.matmul %638, %639, %cst_464 {dimension_numbers = #tpu.dot_dimension_numbers<[1], [0], [0], [1], [0, 0, 1, 1], [], []>} : vector<8x32xf32>, vector<32x8xf32>, vector<8x8xf32> -> vector<8x8xf32>
    %642 = vector.broadcast %640 : vector<1x8xf32> to vector<8x8xf32>
    %643 = arith.addf %641, %642 : vector<8x8xf32>
    %c0_465 = arith.constant 0 : index
    %c0_466 = arith.constant 0 : index
    %c0_467 = arith.constant 0 : index
    %644 = vector.load %arg56[%c0_465, %c0_466, %c0_467] : memref<1x8x8xf32, #tpu.memory_space<vmem>>, vector<1x8x8xf32>
    %645 = vector.shape_cast %644 : vector<1x8x8xf32> to vector<8x8xf32>
    %646 = vector.shape_cast %643 : vector<8x8xf32> to vector<1x8x8xf32>
    tpu.vector_store %arg56[%c0_465, %c0_466, %c0_467], %646 {strides = array<i32>} : memref<1x8x8xf32, #tpu.memory_space<vmem>>, vector<1x8x8xf32>,
    %c0_468 = arith.constant 0 : index
    %c0_469 = arith.constant 0 : index
    %647 = vector.load %arg54[%c0_468, %c0_469] : memref<32x1xf32, #tpu.memory_space<vmem>>, vector<32x1xf32>
    %c0_470 = arith.constant 0 : index
    %c0_471 = arith.constant 0 : index
    %648 = vector.load %arg55[%c0_470, %c0_471] : memref<1x1xf32, #tpu.memory_space<vmem>>, vector<1x1xf32>
    %cst_472 = arith.constant dense<0.000000e+00> : vector<8x1xf32>
    %649 = tpu.matmul %638, %647, %cst_472 {dimension_numbers = #tpu.dot_dimension_numbers<[1], [0], [0], [1], [0, 0, 1, 1], [], []>} : vector<8x32xf32>, vector<32x1xf32>, vector<8x1xf32> -> vector<8x1xf32>
    %650 = vector.broadcast %648 : vector<1x1xf32> to vector<8x1xf32>
    %651 = arith.addf %649, %650 : vector<8x1xf32>
    %c0_473 = arith.constant 0 : index
    %c0_474 = arith.constant 0 : index
    %c0_475 = arith.constant 0 : index
    %652 = vector.load %arg57[%c0_473, %c0_474, %c0_475] : memref<1x8x1xf32, #tpu.memory_space<vmem>>, vector<1x8x1xf32>
    %653 = vector.shape_cast %652 : vector<1x8x1xf32> to vector<8x1xf32>
    %654 = vector.shape_cast %651 : vector<8x1xf32> to vector<1x8x1xf32>
    tpu.vector_store %arg57[%c0_473, %c0_474, %c0_475], %654 {strides = array<i32>} : memref<1x8x1xf32, #tpu.memory_space<vmem>>, vector<1x8x1xf32>,
    return
  }
  func.func @transform_0(%arg0: i32) -> (i32, i32, i32) {
    %c0_i32 = arith.constant 0 : i32
    %c0_i32_0 = arith.constant 0 : i32
    %c0_i32_1 = arith.constant 0 : i32
    return %arg0, %c0_i32, %c0_i32_0 : i32, i32, i32
  }
  func.func @transform_1(%arg0: i32) -> (i32, i32, i32) {
    %c0_i32 = arith.constant 0 : i32
    %c0_i32_0 = arith.constant 0 : i32
    %c0_i32_1 = arith.constant 0 : i32
    return %arg0, %c0_i32, %c0_i32_0 : i32, i32, i32
  }
  func.func @transform_2(%arg0: i32) -> (i32, i32, i32) {
    %c0_i32 = arith.constant 0 : i32
    %c0_i32_0 = arith.constant 0 : i32
    %c0_i32_1 = arith.constant 0 : i32
    return %arg0, %c0_i32, %c0_i32_0 : i32, i32, i32
  }
  func.func @transform_3(%arg0: i32) -> (i32, i32) {
    %c0_i32 = arith.constant 0 : i32
    %c0_i32_0 = arith.constant 0 : i32
    %c0_i32_1 = arith.constant 0 : i32
    return %c0_i32, %c0_i32_0 : i32, i32
  }
  func.func @transform_4(%arg0: i32) -> (i32, i32) {
    %c0_i32 = arith.constant 0 : i32
    %c0_i32_0 = arith.constant 0 : i32
    %c0_i32_1 = arith.constant 0 : i32
    return %c0_i32, %c0_i32_0 : i32, i32
  }
  func.func @transform_5(%arg0: i32) -> (i32, i32) {
    %c0_i32 = arith.constant 0 : i32
    %c0_i32_0 = arith.constant 0 : i32
    %c0_i32_1 = arith.constant 0 : i32
    return %c0_i32, %c0_i32_0 : i32, i32
  }
  func.func @transform_6(%arg0: i32) -> (i32, i32) {
    %c0_i32 = arith.constant 0 : i32
    %c0_i32_0 = arith.constant 0 : i32
    %c0_i32_1 = arith.constant 0 : i32
    return %c0_i32, %c0_i32_0 : i32, i32
  }
  func.func @transform_7(%arg0: i32) -> (i32, i32) {
    %c0_i32 = arith.constant 0 : i32
    %c0_i32_0 = arith.constant 0 : i32
    %c0_i32_1 = arith.constant 0 : i32
    return %c0_i32, %c0_i32_0 : i32, i32
  }
  func.func @transform_8(%arg0: i32) -> (i32, i32) {
    %c0_i32 = arith.constant 0 : i32
    %c0_i32_0 = arith.constant 0 : i32
    %c0_i32_1 = arith.constant 0 : i32
    return %c0_i32, %c0_i32_0 : i32, i32
  }
  func.func @transform_9(%arg0: i32) -> (i32, i32, i32) {
    %c0_i32 = arith.constant 0 : i32
    %c0_i32_0 = arith.constant 0 : i32
    %c0_i32_1 = arith.constant 0 : i32
    %c0_i32_2 = arith.constant 0 : i32
    return %c0_i32, %c0_i32_0, %c0_i32_1 : i32, i32, i32
  }
  func.func @transform_10(%arg0: i32) -> (i32, i32, i32) {
    %c0_i32 = arith.constant 0 : i32
    %c0_i32_0 = arith.constant 0 : i32
    %c0_i32_1 = arith.constant 0 : i32
    %c0_i32_2 = arith.constant 0 : i32
    return %c0_i32, %c0_i32_0, %c0_i32_1 : i32, i32, i32
  }
  func.func @transform_11(%arg0: i32) -> (i32, i32, i32) {
    %c0_i32 = arith.constant 0 : i32
    %c0_i32_0 = arith.constant 0 : i32
    %c0_i32_1 = arith.constant 0 : i32
    %c0_i32_2 = arith.constant 0 : i32
    return %c0_i32, %c0_i32_0, %c0_i32_1 : i32, i32, i32
  }
  func.func @transform_12(%arg0: i32) -> (i32, i32, i32) {
    %c0_i32 = arith.constant 0 : i32
    %c0_i32_0 = arith.constant 0 : i32
    %c0_i32_1 = arith.constant 0 : i32
    %c0_i32_2 = arith.constant 0 : i32
    return %c0_i32, %c0_i32_0, %c0_i32_1 : i32, i32, i32
  }
  func.func @transform_13(%arg0: i32) -> (i32, i32, i32) {
    %c0_i32 = arith.constant 0 : i32
    %c0_i32_0 = arith.constant 0 : i32
    %c0_i32_1 = arith.constant 0 : i32
    %c0_i32_2 = arith.constant 0 : i32
    return %c0_i32, %c0_i32_0, %c0_i32_1 : i32, i32, i32
  }
  func.func @transform_14(%arg0: i32) -> (i32, i32, i32) {
    %c0_i32 = arith.constant 0 : i32
    %c0_i32_0 = arith.constant 0 : i32
    %c0_i32_1 = arith.constant 0 : i32
    %c0_i32_2 = arith.constant 0 : i32
    return %c0_i32, %c0_i32_0, %c0_i32_1 : i32, i32, i32
  }
  func.func @transform_15(%arg0: i32) -> (i32, i32, i32) {
    %c0_i32 = arith.constant 0 : i32
    %c0_i32_0 = arith.constant 0 : i32
    %c0_i32_1 = arith.constant 0 : i32
    %c0_i32_2 = arith.constant 0 : i32
    return %c0_i32, %c0_i32_0, %c0_i32_1 : i32, i32, i32
  }
  func.func @transform_16(%arg0: i32) -> (i32, i32) {
    %c0_i32 = arith.constant 0 : i32
    %c0_i32_0 = arith.constant 0 : i32
    %c0_i32_1 = arith.constant 0 : i32
    return %c0_i32, %c0_i32_0 : i32, i32
  }
  func.func @transform_17(%arg0: i32) -> (i32, i32) {
    %c0_i32 = arith.constant 0 : i32
    %c0_i32_0 = arith.constant 0 : i32
    %c0_i32_1 = arith.constant 0 : i32
    return %c0_i32, %c0_i32_0 : i32, i32
  }
  func.func @transform_18(%arg0: i32) -> (i32, i32) {
    %c0_i32 = arith.constant 0 : i32
    %c0_i32_0 = arith.constant 0 : i32
    %c0_i32_1 = arith.constant 0 : i32
    return %c0_i32, %c0_i32_0 : i32, i32
  }
  func.func @transform_19(%arg0: i32) -> (i32, i32) {
    %c0_i32 = arith.constant 0 : i32
    %c0_i32_0 = arith.constant 0 : i32
    %c0_i32_1 = arith.constant 0 : i32
    return %c0_i32, %c0_i32_0 : i32, i32
  }
  func.func @transform_20(%arg0: i32) -> (i32, i32) {
    %c0_i32 = arith.constant 0 : i32
    %c0_i32_0 = arith.constant 0 : i32
    %c0_i32_1 = arith.constant 0 : i32
    return %c0_i32, %c0_i32_0 : i32, i32
  }
  func.func @transform_21(%arg0: i32) -> (i32, i32) {
    %c0_i32 = arith.constant 0 : i32
    %c0_i32_0 = arith.constant 0 : i32
    %c0_i32_1 = arith.constant 0 : i32
    return %c0_i32, %c0_i32_0 : i32, i32
  }
  func.func @transform_22(%arg0: i32) -> (i32, i32) {
    %c0_i32 = arith.constant 0 : i32
    %c0_i32_0 = arith.constant 0 : i32
    %c0_i32_1 = arith.constant 0 : i32
    return %c0_i32, %c0_i32_0 : i32, i32
  }
  func.func @transform_23(%arg0: i32) -> (i32, i32) {
    %c0_i32 = arith.constant 0 : i32
    %c0_i32_0 = arith.constant 0 : i32
    %c0_i32_1 = arith.constant 0 : i32
    return %c0_i32, %c0_i32_0 : i32, i32
  }
  func.func @transform_24(%arg0: i32) -> (i32, i32) {
    %c0_i32 = arith.constant 0 : i32
    %c0_i32_0 = arith.constant 0 : i32
    %c0_i32_1 = arith.constant 0 : i32
    return %c0_i32, %c0_i32_0 : i32, i32
  }
  func.func @transform_25(%arg0: i32) -> (i32, i32, i32) {
    %c0_i32 = arith.constant 0 : i32
    %c0_i32_0 = arith.constant 0 : i32
    %c0_i32_1 = arith.constant 0 : i32
    %c0_i32_2 = arith.constant 0 : i32
    return %c0_i32, %c0_i32_0, %c0_i32_1 : i32, i32, i32
  }
  func.func @transform_26(%arg0: i32) -> (i32, i32, i32) {
    %c0_i32 = arith.constant 0 : i32
    %c0_i32_0 = arith.constant 0 : i32
    %c0_i32_1 = arith.constant 0 : i32
    %c0_i32_2 = arith.constant 0 : i32
    return %c0_i32, %c0_i32_0, %c0_i32_1 : i32, i32, i32
  }
  func.func @transform_27(%arg0: i32) -> (i32, i32, i32) {
    %c0_i32 = arith.constant 0 : i32
    %c0_i32_0 = arith.constant 0 : i32
    %c0_i32_1 = arith.constant 0 : i32
    %c0_i32_2 = arith.constant 0 : i32
    return %c0_i32, %c0_i32_0, %c0_i32_1 : i32, i32, i32
  }
  func.func @transform_28(%arg0: i32) -> (i32, i32, i32) {
    %c0_i32 = arith.constant 0 : i32
    %c0_i32_0 = arith.constant 0 : i32
    %c0_i32_1 = arith.constant 0 : i32
    %c0_i32_2 = arith.constant 0 : i32
    return %c0_i32, %c0_i32_0, %c0_i32_1 : i32, i32, i32
  }
  func.func @transform_29(%arg0: i32) -> (i32, i32, i32) {
    %c0_i32 = arith.constant 0 : i32
    %c0_i32_0 = arith.constant 0 : i32
    %c0_i32_1 = arith.constant 0 : i32
    %c0_i32_2 = arith.constant 0 : i32
    return %c0_i32, %c0_i32_0, %c0_i32_1 : i32, i32, i32
  }
  func.func @transform_30(%arg0: i32) -> (i32, i32, i32) {
    %c0_i32 = arith.constant 0 : i32
    %c0_i32_0 = arith.constant 0 : i32
    %c0_i32_1 = arith.constant 0 : i32
    %c0_i32_2 = arith.constant 0 : i32
    return %c0_i32, %c0_i32_0, %c0_i32_1 : i32, i32, i32
  }
  func.func @transform_31(%arg0: i32) -> (i32, i32, i32) {
    %c0_i32 = arith.constant 0 : i32
    %c0_i32_0 = arith.constant 0 : i32
    %c0_i32_1 = arith.constant 0 : i32
    %c0_i32_2 = arith.constant 0 : i32
    return %c0_i32, %c0_i32_0, %c0_i32_1 : i32, i32, i32
  }
  func.func @transform_32(%arg0: i32) -> (i32, i32) {
    %c0_i32 = arith.constant 0 : i32
    %c0_i32_0 = arith.constant 0 : i32
    %c0_i32_1 = arith.constant 0 : i32
    return %c0_i32, %c0_i32_0 : i32, i32
  }
  func.func @transform_33(%arg0: i32) -> (i32, i32) {
    %c0_i32 = arith.constant 0 : i32
    %c0_i32_0 = arith.constant 0 : i32
    %c0_i32_1 = arith.constant 0 : i32
    return %c0_i32, %c0_i32_0 : i32, i32
  }
  func.func @transform_34(%arg0: i32) -> (i32, i32) {
    %c0_i32 = arith.constant 0 : i32
    %c0_i32_0 = arith.constant 0 : i32
    %c0_i32_1 = arith.constant 0 : i32
    return %c0_i32, %c0_i32_0 : i32, i32
  }
  func.func @transform_35(%arg0: i32) -> (i32, i32, i32) {
    %c0_i32 = arith.constant 0 : i32
    %c0_i32_0 = arith.constant 0 : i32
    %c0_i32_1 = arith.constant 0 : i32
    %c0_i32_2 = arith.constant 0 : i32
    return %c0_i32, %c0_i32_0, %c0_i32_1 : i32, i32, i32
  }
  func.func @transform_36(%arg0: i32) -> (i32, i32, i32) {
    %c0_i32 = arith.constant 0 : i32
    %c0_i32_0 = arith.constant 0 : i32
    %c0_i32_1 = arith.constant 0 : i32
    %c0_i32_2 = arith.constant 0 : i32
    return %c0_i32, %c0_i32_0, %c0_i32_1 : i32, i32, i32
  }
  func.func @transform_37(%arg0: i32) -> (i32, i32, i32) {
    %c0_i32 = arith.constant 0 : i32
    %c0_i32_0 = arith.constant 0 : i32
    %c0_i32_1 = arith.constant 0 : i32
    %c0_i32_2 = arith.constant 0 : i32
    return %c0_i32, %c0_i32_0, %c0_i32_1 : i32, i32, i32
  }
  func.func @transform_38(%arg0: i32) -> (i32, i32, i32) {
    %c0_i32 = arith.constant 0 : i32
    %c0_i32_0 = arith.constant 0 : i32
    %c0_i32_1 = arith.constant 0 : i32
    %c0_i32_2 = arith.constant 0 : i32
    return %c0_i32, %c0_i32_0, %c0_i32_1 : i32, i32, i32
  }
  func.func @transform_39(%arg0: i32) -> (i32, i32, i32) {
    %c0_i32 = arith.constant 0 : i32
    %c0_i32_0 = arith.constant 0 : i32
    %c0_i32_1 = arith.constant 0 : i32
    %c0_i32_2 = arith.constant 0 : i32
    return %c0_i32, %c0_i32_0, %c0_i32_1 : i32, i32, i32
  }
  func.func @transform_40(%arg0: i32) -> (i32, i32, i32) {
    %c0_i32 = arith.constant 0 : i32
    %c0_i32_0 = arith.constant 0 : i32
    %c0_i32_1 = arith.constant 0 : i32
    %c0_i32_2 = arith.constant 0 : i32
    return %c0_i32, %c0_i32_0, %c0_i32_1 : i32, i32, i32
  }
  func.func @transform_41(%arg0: i32) -> (i32, i32, i32) {
    %c0_i32 = arith.constant 0 : i32
    %c0_i32_0 = arith.constant 0 : i32
    %c0_i32_1 = arith.constant 0 : i32
    %c0_i32_2 = arith.constant 0 : i32
    return %c0_i32, %c0_i32_0, %c0_i32_1 : i32, i32, i32
  }
  func.func @transform_42(%arg0: i32) -> (i32, i32) {
    %c0_i32 = arith.constant 0 : i32
    %c0_i32_0 = arith.constant 0 : i32
    %c0_i32_1 = arith.constant 0 : i32
    return %c0_i32, %c0_i32_0 : i32, i32
  }
  func.func @transform_43(%arg0: i32) -> (i32, i32) {
    %c0_i32 = arith.constant 0 : i32
    %c0_i32_0 = arith.constant 0 : i32
    %c0_i32_1 = arith.constant 0 : i32
    return %c0_i32, %c0_i32_0 : i32, i32
  }
  func.func @transform_44(%arg0: i32) -> (i32, i32) {
    %c0_i32 = arith.constant 0 : i32
    %c0_i32_0 = arith.constant 0 : i32
    %c0_i32_1 = arith.constant 0 : i32
    return %c0_i32, %c0_i32_0 : i32, i32
  }
  func.func @transform_45(%arg0: i32) -> (i32, i32) {
    %c0_i32 = arith.constant 0 : i32
    %c0_i32_0 = arith.constant 0 : i32
    %c0_i32_1 = arith.constant 0 : i32
    return %c0_i32, %c0_i32_0 : i32, i32
  }
  func.func @transform_46(%arg0: i32) -> (i32, i32) {
    %c0_i32 = arith.constant 0 : i32
    %c0_i32_0 = arith.constant 0 : i32
    %c0_i32_1 = arith.constant 0 : i32
    return %c0_i32, %c0_i32_0 : i32, i32
  }
  func.func @transform_47(%arg0: i32) -> (i32, i32) {
    %c0_i32 = arith.constant 0 : i32
    %c0_i32_0 = arith.constant 0 : i32
    %c0_i32_1 = arith.constant 0 : i32
    return %c0_i32, %c0_i32_0 : i32, i32
  }
  func.func @transform_48(%arg0: i32) -> (i32, i32) {
    %c0_i32 = arith.constant 0 : i32
    %c0_i32_0 = arith.constant 0 : i32
    %c0_i32_1 = arith.constant 0 : i32
    return %c0_i32, %c0_i32_0 : i32, i32
  }
  func.func @transform_49(%arg0: i32) -> (i32, i32) {
    %c0_i32 = arith.constant 0 : i32
    %c0_i32_0 = arith.constant 0 : i32
    %c0_i32_1 = arith.constant 0 : i32
    return %c0_i32, %c0_i32_0 : i32, i32
  }
  func.func @transform_50(%arg0: i32) -> (i32, i32) {
    %c0_i32 = arith.constant 0 : i32
    %c0_i32_0 = arith.constant 0 : i32
    %c0_i32_1 = arith.constant 0 : i32
    return %c0_i32, %c0_i32_0 : i32, i32
  }
  func.func @transform_51(%arg0: i32) -> (i32, i32) {
    %c0_i32 = arith.constant 0 : i32
    %c0_i32_0 = arith.constant 0 : i32
    %c0_i32_1 = arith.constant 0 : i32
    return %c0_i32, %c0_i32_0 : i32, i32
  }
  func.func @transform_52(%arg0: i32) -> (i32, i32) {
    %c0_i32 = arith.constant 0 : i32
    %c0_i32_0 = arith.constant 0 : i32
    %c0_i32_1 = arith.constant 0 : i32
    return %c0_i32, %c0_i32_0 : i32, i32
  }
  func.func @transform_53(%arg0: i32) -> (i32, i32) {
    %c0_i32 = arith.constant 0 : i32
    %c0_i32_0 = arith.constant 0 : i32
    %c0_i32_1 = arith.constant 0 : i32
    return %c0_i32, %c0_i32_0 : i32, i32
  }
  func.func @transform_54(%arg0: i32) -> (i32, i32) {
    %c0_i32 = arith.constant 0 : i32
    %c0_i32_0 = arith.constant 0 : i32
    %c0_i32_1 = arith.constant 0 : i32
    return %c0_i32, %c0_i32_0 : i32, i32
  }
  func.func @transform_55(%arg0: i32) -> (i32, i32, i32) {
    %c0_i32 = arith.constant 0 : i32
    %c0_i32_0 = arith.constant 0 : i32
    %c0_i32_1 = arith.constant 0 : i32
    return %arg0, %c0_i32, %c0_i32_0 : i32, i32, i32
  }
  func.func @transform_56(%arg0: i32) -> (i32, i32, i32) {
    %c0_i32 = arith.constant 0 : i32
    %c0_i32_0 = arith.constant 0 : i32
    %c0_i32_1 = arith.constant 0 : i32
    return %arg0, %c0_i32, %c0_i32_0 : i32, i32, i32
  }
}

</mosaic_0001>

<bundles_post_ra>
// kernel: run.2
= control target key start
LH: loop header
LB: loop body
LE: loop exit
PB: predicated region body
PF: predicated region fallthrough
CT: control target
= control target key end

     0   :  { %s6336_s6 = smov 1   ;;  %s6337_s10 = smov 2   ;;  %s7288_s0 = inlined_call_operand.smem [shape: u32[35], index: -1, kind: input, shape index: {}] }
   0x1   :  { %s6406_s5 = sld [smem:[%s7288_s0]]   ;;  %s6338_s14 = smov 3  }
   0x2   :  { %s6411_s9 = sld [smem:[%s7288_s0 + %s6336_s6]]   ;;  %s6339_s18 = smov 4  }
   0x3   :  { %s6416_s13 = sld [smem:[%s7288_s0 + %s6337_s10]]   ;;  %s6340_s22 = smov 5  }
   0x4   :  { %s6421_s17 = sld [smem:[%s7288_s0 + %s6338_s14]]   ;;  %s6341_s26 = smov 6  }
   0x5   :  { %s6426_s21 = sld [smem:[%s7288_s0 + %s6339_s18]]   ;;  %s6342_s30 = smov 7  }
   0x6   :  { %s6431_s25 = sld [smem:[%s7288_s0 + %s6340_s22]]   ;;  %s6343_s4 = smov 8  }
   0x7   :  { %7322 = sst [smem:[#allocation48_spill]] %s6406_s5  ;;  %s6344_s10 = smov 9  }
   0x8   :  { %7323 = sst [smem:[#allocation49_spill]] %s6411_s9  ;;  %s6345_s15 = smov 10  }
   0x9   :  { %7324 = sst [smem:[#allocation50_spill]] %s6416_s13  ;;  %s6346_s20 = smov 11  }
   0xa   :  { %7325 = sst [smem:[#allocation51_spill]] %s6421_s17  ;;  %s6348_s1 = smov 13  }
   0xb   :  { %7326 = sst [smem:[#allocation52_spill]] %s6426_s21  ;;  %s6349_s7 = smov 14  }
   0xc   :  { %7327 = sst [smem:[#allocation53_spill]] %s6431_s25  ;;  %s6351_s22 = smov 16  }
   0xd   :  { %s6436_s29 = sld [smem:[%s7288_s0 + %s6341_s26]]   ;;  %s6347_s26 = smov 12  }
   0xe   :  { %s6441_s3 = sld [smem:[%s7288_s0 + %s6342_s30]]   ;;  %s6352_s28 = smov 17  }
   0xf   :  { %s6446_s8 = sld [smem:[%s7288_s0 + %s6343_s4]]  }
  0x10   :  { %s6451_s14 = sld [smem:[%s7288_s0 + %s6344_s10]]  }
  0x11   :  { %s6456_s19 = sld [smem:[%s7288_s0 + %s6345_s15]]   ;;  %s6350_s15 = smov 15  }
  0x12   :  { %s6461_s24 = sld [smem:[%s7288_s0 + %s6346_s20]]  }
  0x13   :  { %s6466_s30 = sld [smem:[%s7288_s0 + %s6347_s26]]  }
  0x14   :  { %7328 = sst [smem:[#allocation54_spill]] %s6441_s3 }
  0x15   :  { %7329 = sst [smem:[#allocation55_spill]] %s6446_s8 }
  0x16   :  { %7330 = sst [smem:[#allocation56_spill]] %s6451_s14 }
  0x17   :  { %7331 = sst [smem:[#allocation57_spill]] %s6456_s19 }
  0x18   :  { %7332 = sst [smem:[#allocation58_spill]] %s6461_s24 }
  0x19   :  { %s6471_s6 = sld [smem:[%s7288_s0 + %s6348_s1]]  }
  0x1a   :  { %s6476_s12 = sld [smem:[%s7288_s0 + %s6349_s7]]   ;;  %s6353_s7 = smov 18  }
  0x1b   :  { %s6481_s20 = sld [smem:[%s7288_s0 + %s6350_s15]]   ;;  %s6354_s15 = smov 19  }
  0x1c   :  { %s6486_s27 = sld [smem:[%s7288_s0 + %s6351_s22]]   ;;  %s6355_s22 = smov 20  }
  0x1d   :  { %s6491_s4 = sld [smem:[%s7288_s0 + %s6352_s28]]   ;;  %s6356_s28 = smov 21  }
  0x1e   :  { %s6496_s17 = sld [smem:[%s7288_s0 + %s6353_s7]]   ;;  %s6357_s7 = smov 22  }
  0x1f   :  { %7333 = sst [smem:[#allocation59_spill]] %s6471_s6 }
  0x20   :  { %7334 = sst [smem:[#allocation60_spill]] %s6476_s12 }
  0x21   :  { %7335 = sst [smem:[#allocation61_spill]] %s6481_s20 }
  0x22   :  { %s6501_s13 = sld [smem:[%s7288_s0 + %s6354_s15]]   ;;  %s6358_s15 = smov 23  }
  0x23   :  { %7336 = sst [smem:[#allocation62_spill]] %s6491_s4 }
  0x24   :  { %7337 = sst [smem:[#allocation63_spill]] %s6496_s17 }
  0x25   :  { %s6506_s12 = sld [smem:[%s7288_s0 + %s6355_s22]]   ;;  %s6359_s22 = smov 24  }
  0x26   :  { %s6511_s9 = sld [smem:[%s7288_s0 + %s6356_s28]]   ;;  %s6360_s28 = smov 25  }
  0x27   :  { %s6516_s17 = sld [smem:[%s7288_s0 + %s6357_s7]]   ;;  %s6361_s7 = smov 26  }
  0x28   :  { %7338 = sst [smem:[#allocation64_spill]] %s6501_s13 }
  0x29   :  { %s6521_s13 = sld [smem:[%s7288_s0 + %s6358_s15]]   ;;  %s6362_s15 = smov 27  }
  0x2a   :  { %s6526_s5 = sld [smem:[%s7288_s0 + %s6359_s22]]   ;;  %s6363_s22 = smov 28  }
  0x2b   :  { %7339 = sst [smem:[#allocation65_spill]] %s6506_s12 }
  0x2c   :  { %7340 = sst [smem:[#allocation66_spill]] %s6511_s9 }
  0x2d   :  { %7341 = sst [smem:[#allocation67_spill]] %s6516_s17 }
  0x2e   :  { %s6531_s9 = sld [smem:[%s7288_s0 + %s6360_s28]]   ;;  %s6364_s28 = smov 29  }
  0x2f   :  { %7342 = sst [smem:[#allocation68_spill]] %s6521_s13 }
  0x30   :  { %7343 = sst [smem:[#allocation69_spill]] %s6526_s5 }
  0x31   :  { %s6536_s17 = sld [smem:[%s7288_s0 + %s6361_s7]]   ;;  %s6365_s7 = smov 30  }
  0x32   :  { %s6541_s13 = sld [smem:[%s7288_s0 + %s6362_s15]]   ;;  %s6366_s15 = smov 31  }
  0x33   :  { %s6546_s5 = sld [smem:[%s7288_s0 + %s6363_s22]]   ;;  %s6367_s22 = smov 32  }
  0x34   :  { %7344 = sst [smem:[#allocation70_spill]] %s6531_s9 }
  0x35   :  { %s6551_s9 = sld [smem:[%s7288_s0 + %s6364_s28]]   ;;  %s6368_s28 = smov 33  }
  0x37   :  { %7345 = sst [smem:[#allocation71_spill]] %s6536_s17 }
  0x38   :  { %7346 = sst [smem:[#allocation72_spill]] %s6541_s13 }
  0x39   :  { %7347 = sst [smem:[#allocation73_spill]] %s6546_s5 }
  0x3a   :  { %s6556_s17 = sld [smem:[%s7288_s0 + %s6365_s7]]   ;;  %s6369_s7 = smov 34  }
  0x3b   :  { %7348 = sst [smem:[#allocation74_spill]] %s6551_s9 }
  0x3c   :  { %s6561_s13 = sld [smem:[%s7288_s0 + %s6366_s15]]  }
  0x3d   :  { %s6566_s5 = sld [smem:[%s7288_s0 + %s6367_s22]]  }
  0x3e   :  { %s6571_s9 = sld [smem:[%s7288_s0 + %s6368_s28]]  }
  0x40   :  { %7349 = sst [smem:[#allocation75_spill]] %s6556_s17 }
  0x41   :  { %s6576_s17 = sld [smem:[%s7288_s0 + %s6369_s7]]  }
  0x43   :  { %7350 = sst [smem:[#allocation76_spill]] %s6566_s5 }
  0x44   :  { %75 = vsyncpa [#allocation4], 0 }
  0x45   :  { %77 = vsyncpa [#allocation4 + $0x1], 0 }
  0x46   :  { %78 = vsyncpa [#allocation7], 0 }
  0x47   :  { %80 = vsyncpa [#allocation7 + $0x1], 0 }
  0x48   :  { %81 = vsyncpa [#allocation10], 0 }
  0x49   :  { %82 = vsyncpa [#allocation13], 0 }
  0x4a   :  { %83 = vsyncpa [#allocation16], 0 }
  0x4b   :  { %84 = vsyncpa [#allocation19], 0 }
  0x4c   :  { %85 = vsyncpa [#allocation22], 0 }
  0x4d   :  { %86 = vsyncpa [#allocation25], 0 }
  0x4e   :  { %87 = vsyncpa [#allocation28], 0 }
  0x4f   :  { %88 = vsyncpa [#allocation31], 0 }
  0x50   :  { %89 = vsyncpa [#allocation5], 0 }
  0x51   :  { %91 = vsyncpa [#allocation5 + $0x1], 0 }
  0x52   :  { %92 = vsyncpa [#allocation34], 0 }
  0x53   :  { %94 = vsyncpa [#allocation34 + $0x1], 0  ;;  %s6578_s15 = smov 0   ;;  %s6580_s0 = smov 0  }
  0x54   :  { %s6582_s16 = smov 0   ;;  %s6584_s18 = smov 0  }
  0x55 LB: > { %s7351_s24 = sld [smem:[#allocation58_spill]]  ;;  %s7352_s20 = sld [smem:[#allocation61_spill]]  ;;  %s6330_s16 = sphi %s6582_s16, %s7424_s16   ;;  %s6326_s0 = sphi %s6580_s0, %s7423_s0   ;;  %s6322_s15 = sphi %s6578_s15, %s7422_s15   ;;  %s6334_s18 = sphi %s6584_s18, %s7425_s18  }
  0x56   : > { %s7353_s19 = sld [smem:[#allocation57_spill]]  ;;  %s7354_s14 = sld [smem:[#allocation56_spill]] }
  0x57   : > { %s7355_s12 = sld [smem:[#allocation65_spill]]  ;;  %s7356_s4 = sld [smem:[#allocation62_spill]] }
  0x58   : > { %s7357_s8 = sld [smem:[#allocation55_spill]]  ;;  %s7358_s6 = sld [smem:[#allocation59_spill]] }
  0x59   : > { %s7359_s3 = sld [smem:[#allocation54_spill]]  ;;  %s7360_s25 = sld [smem:[#allocation53_spill]] }
  0x5a   : > { %s7361_s21 = sld [smem:[#allocation52_spill]]  ;;  %s6370_s22 = smov [#allocation8]  }
  0x5b   : > { %s888_s23 = sshll.u32 %s6370_s22, 4  ;;  %s6599_s26 = sadd.s32 4294967295, %s6334_s18   ;;  %s6604_s23 = int_to_ptr.vmem [resolvable:$true] %s888_s23 }
  0x5c   : > { %p4620_p0 = scmp.ge.s32.totalorder %s6334_s18, 1  ;;  %p7296_p1 = scmp.eq.s32.totalorder %s6599_s26, 0 }
  0x5d   : > { %p875_p2 = scmp.lt.s32.totalorder %s6334_s18, 3  ;;  %s6371_s1 = smov [#allocation9]  }
  0x5e   : > { %s898_s2 = sshll.u32 %s6371_s1, 4  ;;  %s6372_s10 = smov [#allocation12]   ;;  %s6613_s2 = int_to_ptr.vmem [resolvable:$true] %s898_s2 }
  0x5f   : > { %p6606_p3 = pnand %p4620_p0, %p875_p2  ;;  %s923_s11 = sshll.u32 %s6372_s10, 4  ;;  %s6621_s11 = int_to_ptr.vmem [resolvable:$true] %s923_s11 }
  0x60   : > { %s5688_s22 = scalar_lea.hbm %s7361_s21, 16 }
  0x61   : > { %s7362_s28 = scalar_select %p6606_p3, 1, 0 }
  0x62   : > { %p5461_p5 = pneg %p6606_p3  ;;  %p5689_p7 = scmp.ne.s32.totalorder %s7361_s21, %s5688_s22 }
  0x63   : > { %p5695_p11 = scmp.lt.u32.totalorder %s5688_s22, %s7361_s21 }
  0x64   : > { %p6617_p6 = pnand %p5461_p5, %p7296_p1 }
  0x66   : > { %p6627_p8 = pneg %p6617_p6 }
  0x68   : > { %p5691_p9 = pnand %p6627_p8, %p5689_p7 }
  0x6a   : > { %p5692_p10 = pneg %p5691_p9 }
  0x6c   : > { %p5697_p12 = pnand %p5695_p11, %p5692_p10 }
  0x6e   : > { %5700 = shalt.err (!%p5697_p12)
}
  0x6f   : > { %s5701_s1 = scalar_lea.vmem %s6604_s23, 16  ;;  %s5708_s10 = scalar_lea.vmem %s6604_s23, 32 }
  0x70   : > { %p5702_p13 = scmp.ne.s32.totalorder %s6604_s23, %s5701_s1  ;;  %p5709_p5 = scmp.lt.s32.totalorder %s6604_s23, %s6604_s23 }
  0x71   : > { %p5710_p4 = scmp.lt.s32.totalorder %s5708_s10, %s5701_s1 }
  0x72   : > { %p5704_p0 = pnand %p5702_p13, %p6627_p8 }
  0x73   : > { %p5711_p1 = por %p5710_p4, %p5709_p5 }
  0x74   : > { %p5705_p2 = pneg %p5704_p0 }
  0x76   : > { %p5712_p7 = pnand %p5711_p1, %p5705_p2 }
  0x78   : > { %5715 = shalt.err (!%p5712_p7)
}
  0x79   : > { %5464 = dma.hbm_to_vmem [thread:$0]  (!%p6617_p6), %s7361_s21, 16, %s6604_s23, [#allocation7]  }
  0x7a   : > { %s5716_s22 = scalar_lea.hbm %s7360_s25, 256 }
  0x7b   : > { %p5717_p9 = scmp.ne.s32.totalorder %s7360_s25, %s5716_s22  ;;  %p5723_p12 = scmp.lt.u32.totalorder %s5716_s22, %s7360_s25 }
  0x7d   : > { %p5719_p10 = pnand %p5717_p9, %p6627_p8 }
  0x7f   : > { %p5720_p11 = pneg %p5719_p10 }
  0x81   : > { %p5725_p13 = pnand %p5723_p12, %p5720_p11 }
  0x83   : > { %5728 = shalt.err (!%p5725_p13)
}
  0x84   : > { %s5729_s1 = scalar_lea.vmem %s6613_s2, 256  ;;  %p5737_p2 = scmp.lt.s32.totalorder %s6613_s2, %s6613_s2 }
  0x85   : > { %p5730_p1 = scmp.ne.s32.totalorder %s6613_s2, %s5729_s1  ;;  %p5738_p5 = scmp.lt.s32.totalorder %s5729_s1, %s5729_s1 }
  0x87   : > { %p5732_p4 = pnand %p5730_p1, %p6627_p8  ;;  %p5739_p7 = por %p5738_p5, %p5737_p2 }
  0x89   : > { %p5733_p0 = pneg %p5732_p4 }
  0x8b   : > { %p5740_p3 = pnand %p5739_p7, %p5733_p0 }
  0x8d   : > { %5743 = shalt.err (!%p5740_p3)
}
  0x8e   : > { %s7299_s23 = smov 128   ;;  %s7301_s10 = smov 8  }
  0x8f   : > { %5467 = dma.hbm_to_vmem [thread:$0]  (!%p6617_p6), %s7360_s25, 256, %s6613_s2, [#allocation10], %s7299_s23, %s7299_s23, %s7301_s10  }
  0x90   : > { %s5744_s22 = scalar_lea.hbm %s7359_s3, 16 }
  0x91   : > { %p5745_p9 = scmp.ne.s32.totalorder %s7359_s3, %s5744_s22  ;;  %p5751_p3 = scmp.lt.u32.totalorder %s5744_s22, %s7359_s3 }
  0x93   : > { %p5747_p10 = pnand %p5745_p9, %p6627_p8 }
  0x95   : > { %p5748_p11 = pneg %p5747_p10 }
  0x97   : > { %p5753_p12 = pnand %p5751_p3, %p5748_p11 }
  0x99   : > { %5756 = shalt.err (!%p5753_p12)
}
  0x9a   : > { %s5757_s1 = scalar_lea.vmem %s6621_s11, 16  ;;  %s5764_s21 = scalar_lea.vmem %s6621_s11, 32 }
  0x9b   : > { %p5758_p13 = scmp.ne.s32.totalorder %s6621_s11, %s5757_s1  ;;  %p5765_p0 = scmp.lt.s32.totalorder %s6621_s11, %s6621_s11 }
  0x9c   : > { %p5766_p2 = scmp.lt.s32.totalorder %s5764_s21, %s5757_s1 }
  0x9d   : > { %p5760_p1 = pnand %p5758_p13, %p6627_p8 }
  0x9e   : > { %p5767_p5 = por %p5766_p2, %p5765_p0 }
  0x9f   : > { %p5761_p4 = pneg %p5760_p1 }
  0xa1   : > { %p5768_p7 = pnand %p5767_p5, %p5761_p4 }
  0xa3   : > { %5771 = shalt.err (!%p5768_p7)
}
  0xa4   : > { %5473 = dma.hbm_to_vmem [thread:$0]  (!%p6617_p6), %s7359_s3, 16, %s6621_s11, [#allocation13]  }
  0xa5   : > { %s6375_s2 = smov [#allocation15]   ;;  %s6376_s23 = smov [#allocation18]  }
  0xa6   : > { %s945_s22 = sshll.u32 %s6375_s2, 4  ;;  %s968_s10 = sshll.u32 %s6376_s23, 4  ;;  %s946_s22 = int_to_ptr.vmem [resolvable:$true] %s945_s22  ;;  %s969_s10 = int_to_ptr.vmem [resolvable:$true] %s968_s10 }
  0xa7   : > { %s5772_s25 = scalar_lea.hbm %s7354_s14, 16 }
  0xa8   : > { %p5773_p9 = scmp.ne.s32.totalorder %s7354_s14, %s5772_s25  ;;  %p5779_p3 = scmp.lt.u32.totalorder %s5772_s25, %s7354_s14 }
  0xaa   : > { %p5775_p10 = pnand %p5773_p9, %p6627_p8 }
  0xac   : > { %p5776_p11 = pneg %p5775_p10 }
  0xae   : > { %p5781_p12 = pnand %p5779_p3, %p5776_p11 }
  0xb0   : > { %5784 = shalt.err (!%p5781_p12)
}
  0xb1   : > { %s5785_s21 = scalar_lea.vmem %s946_s22, 16  ;;  %s5792_s11 = scalar_lea.vmem %s946_s22, 32 }
  0xb2   : > { %p5786_p13 = scmp.ne.s32.totalorder %s946_s22, %s5785_s21  ;;  %p5793_p0 = scmp.lt.s32.totalorder %s946_s22, %s946_s22 }
  0xb3   : > { %p5794_p2 = scmp.lt.s32.totalorder %s5792_s11, %s5785_s21 }
  0xb4   : > { %p5788_p1 = pnand %p5786_p13, %p6627_p8 }
  0xb5   : > { %p5795_p5 = por %p5794_p2, %p5793_p0 }
  0xb6   : > { %p5789_p4 = pneg %p5788_p1 }
  0xb8   : > { %p5796_p7 = pnand %p5795_p5, %p5789_p4 }
  0xba   : > { %5799 = shalt.err (!%p5796_p7)
}
  0xbb   : > { %5479 = dma.hbm_to_vmem [thread:$0]  (!%p6617_p6), %s7354_s14, 16, %s946_s22, [#allocation16]  }
  0xbc   : > { %s5800_s25 = scalar_lea.hbm %s7351_s24, 64 }
  0xbd   : > { %p5801_p9 = scmp.ne.s32.totalorder %s7351_s24, %s5800_s25  ;;  %p5807_p3 = scmp.lt.u32.totalorder %s5800_s25, %s7351_s24 }
  0xbf   : > { %p5803_p10 = pnand %p5801_p9, %p6627_p8 }
  0xc1   : > { %p5804_p11 = pneg %p5803_p10 }
  0xc3   : > { %p5809_p12 = pnand %p5807_p3, %p5804_p11 }
  0xc5   : > { %5812 = shalt.err (!%p5809_p12)
}
  0xc6   : > { %s5813_s23 = scalar_lea.vmem %s969_s10, 64  ;;  %p5821_p0 = scmp.lt.s32.totalorder %s969_s10, %s969_s10 }
  0xc7   : > { %p5814_p13 = scmp.ne.s32.totalorder %s969_s10, %s5813_s23  ;;  %p5822_p2 = scmp.lt.s32.totalorder %s5813_s23, %s5813_s23 }
  0xc9   : > { %p5816_p1 = pnand %p5814_p13, %p6627_p8  ;;  %p5823_p5 = por %p5822_p2, %p5821_p0 }
  0xcb   : > { %p5817_p4 = pneg %p5816_p1 }
  0xcd   : > { %p5824_p7 = pnand %p5823_p5, %p5817_p4 }
  0xcf   : > { %5827 = shalt.err (!%p5824_p7)
}
  0xd0   : > { %s7305_s1 = smov 16   ;;  %s7306_s2 = smov 1  }
  0xd1   : > { %5485 = dma.hbm_to_vmem [thread:$0]  (!%p6617_p6), %s7351_s24, 64, %s969_s10, [#allocation19], %s7305_s1, %s7305_s1, %s7306_s2  }
  0xd2   : > { %s6379_s22 = smov [#allocation21]   ;;  %s6380_s11 = smov [#allocation24]  }
  0xd3   : > { %s994_s21 = sshll.u32 %s6379_s22, 4  ;;  %s1023_s25 = sshll.u32 %s6380_s11, 4  ;;  %s995_s21 = int_to_ptr.vmem [resolvable:$true] %s994_s21  ;;  %s1024_s25 = int_to_ptr.vmem [resolvable:$true] %s1023_s25 }
  0xd4   : > { %s5828_s23 = scalar_lea.hbm %s7358_s6, 64 }
  0xd5   : > { %p5829_p9 = scmp.ne.s32.totalorder %s7358_s6, %s5828_s23  ;;  %p5835_p3 = scmp.lt.u32.totalorder %s5828_s23, %s7358_s6 }
  0xd7   : > { %p5831_p10 = pnand %p5829_p9, %p6627_p8 }
  0xd9   : > { %p5832_p11 = pneg %p5831_p10 }
  0xdb   : > { %p5837_p12 = pnand %p5835_p3, %p5832_p11 }
  0xdd   : > { %5840 = shalt.err (!%p5837_p12)
}
  0xde   : > { %s5841_s3 = scalar_lea.vmem %s995_s21, 64  ;;  %p5849_p0 = scmp.lt.s32.totalorder %s995_s21, %s995_s21 }
  0xdf   : > { %p5842_p13 = scmp.ne.s32.totalorder %s995_s21, %s5841_s3  ;;  %p5850_p2 = scmp.lt.s32.totalorder %s5841_s3, %s5841_s3 }
  0xe1   : > { %p5844_p1 = pnand %p5842_p13, %p6627_p8  ;;  %p5851_p5 = por %p5850_p2, %p5849_p0 }
  0xe3   : > { %p5845_p4 = pneg %p5844_p1 }
  0xe5   : > { %p5852_p7 = pnand %p5851_p5, %p5845_p4 }
  0xe7   : > { %5855 = shalt.err (!%p5852_p7)
}
  0xe8   : > { %5491 = dma.hbm_to_vmem [thread:$0]  (!%p6617_p6), %s7358_s6, 64, %s995_s21, [#allocation22], %s7305_s1, %s7305_s1, %s7306_s2  }
  0xe9   : > { %s5856_s10 = scalar_lea.hbm %s6486_s27, 512 }
  0xea   : > { %p5857_p9 = scmp.ne.s32.totalorder %s6486_s27, %s5856_s10  ;;  %p5863_p3 = scmp.lt.u32.totalorder %s5856_s10, %s6486_s27 }
  0xec   : > { %p5859_p10 = pnand %p5857_p9, %p6627_p8 }
  0xee   : > { %p5860_p11 = pneg %p5859_p10 }
  0xf0   : > { %p5865_p12 = pnand %p5863_p3, %p5860_p11 }
  0xf2   : > { %5868 = shalt.err (!%p5865_p12)
}
  0xf3   : > { %s5869_s3 = scalar_lea.vmem %s1024_s25, 512  ;;  %p5877_p0 = scmp.lt.s32.totalorder %s1024_s25, %s1024_s25 }
  0xf4   : > { %p5870_p13 = scmp.ne.s32.totalorder %s1024_s25, %s5869_s3  ;;  %p5878_p2 = scmp.lt.s32.totalorder %s5869_s3, %s5869_s3 }
  0xf6   : > { %p5872_p1 = pnand %p5870_p13, %p6627_p8  ;;  %p5879_p5 = por %p5878_p2, %p5877_p0 }
  0xf8   : > { %p5873_p4 = pneg %p5872_p1 }
  0xfa   : > { %p5880_p7 = pnand %p5879_p5, %p5873_p4 }
  0xfc   : > { %5883 = shalt.err (!%p5880_p7)
}
  0xfd   : > { %s7365_s22 = smov 8   ;;  %s7366_s21 = smov 128  }
  0xfe   : > { %5497 = dma.hbm_to_vmem [thread:$0]  (!%p6617_p6), %s6486_s27, 512, %s1024_s25, [#allocation25], %s7366_s21, %s7366_s21, %s7365_s22  }
  0xff   : > { %s6381_s11 = smov [#allocation27]   ;;  %s6382_s10 = smov [#allocation11]  }
 0x100   : > { %s1053_s23 = sshll.u32 %s6381_s11, 4  ;;  %s912_s1 = sshll.u32 %s6382_s10, 4  ;;  %s1054_s23 = int_to_ptr.vmem [resolvable:$true] %s1053_s23  ;;  %s913_s1 = int_to_ptr.vmem [resolvable:$true] %s912_s1 }
 0x101   : > { %s5884_s3 = scalar_lea.hbm %s7355_s12, 512 }
 0x102   : > { %p5885_p9 = scmp.ne.s32.totalorder %s7355_s12, %s5884_s3  ;;  %p5891_p3 = scmp.lt.u32.totalorder %s5884_s3, %s7355_s12 }
 0x104   : > { %p5887_p10 = pnand %p5885_p9, %p6627_p8 }
 0x106   : > { %p5888_p11 = pneg %p5887_p10 }
 0x108   : > { %p5893_p12 = pnand %p5891_p3, %p5888_p11 }
 0x10a   : > { %5896 = shalt.err (!%p5893_p12)
}
 0x10b   : > { %s5897_s2 = scalar_lea.vmem %s1054_s23, 512  ;;  %p5905_p0 = scmp.lt.s32.totalorder %s1054_s23, %s1054_s23 }
 0x10c   : > { %p5898_p13 = scmp.ne.s32.totalorder %s1054_s23, %s5897_s2  ;;  %p5906_p2 = scmp.lt.s32.totalorder %s5897_s2, %s5897_s2 }
 0x10e   : > { %p5900_p1 = pnand %p5898_p13, %p6627_p8  ;;  %p5907_p5 = por %p5906_p2, %p5905_p0 }
 0x110   : > { %p5901_p4 = pneg %p5900_p1 }
 0x112   : > { %p5908_p7 = pnand %p5907_p5, %p5901_p4 }
 0x114   : > { %5911 = shalt.err (!%p5908_p7)
}
 0x115   : > { %5503 = dma.hbm_to_vmem [thread:$0]  (!%p6617_p6), %s7355_s12, 512, %s1054_s23, [#allocation28], %s7366_s21, %s7366_s21, %s7365_s22  }
 0x116   : > { %s5912_s25 = scalar_lea.hbm %s6436_s29, 128 }
 0x117   : > { %p5913_p9 = scmp.ne.s32.totalorder %s6436_s29, %s5912_s25  ;;  %p5919_p3 = scmp.lt.u32.totalorder %s5912_s25, %s6436_s29 }
 0x119   : > { %p5915_p10 = pnand %p5913_p9, %p6627_p8 }
 0x11b   : > { %p5916_p11 = pneg %p5915_p10 }
 0x11d   : > { %p5921_p12 = pnand %p5919_p3, %p5916_p11 }
 0x11f   : > { %5924 = shalt.err (!%p5921_p12)
}
 0x120   : > { %s5925_s2 = scalar_lea.vmem %s913_s1, 128  ;;  %p5933_p0 = scmp.lt.s32.totalorder %s913_s1, %s913_s1 }
 0x121   : > { %p5926_p13 = scmp.ne.s32.totalorder %s913_s1, %s5925_s2  ;;  %p5934_p2 = scmp.lt.s32.totalorder %s5925_s2, %s5925_s2 }
 0x123   : > { %p5928_p1 = pnand %p5926_p13, %p6627_p8  ;;  %p5935_p5 = por %p5934_p2, %p5933_p0 }
 0x125   : > { %p5929_p4 = pneg %p5928_p1 }
 0x127   : > { %p5936_p7 = pnand %p5935_p5, %p5929_p4 }
 0x129   : > { %5939 = shalt.err (!%p5936_p7)
}
 0x12a   : > { %5470 = dma.hbm_to_vmem [thread:$0]  (!%p6617_p6), %s6436_s29, 128, %s913_s1, [#allocation10]  }
 0x12b   : > { %s6383_s11 = smov [#allocation14]   ;;  %s6384_s10 = smov [#allocation17]  }
 0x12c   : > { %s934_s23 = sshll.u32 %s6383_s11, 4  ;;  %s955_s3 = sshll.u32 %s6384_s10, 4  ;;  %s935_s23 = int_to_ptr.vmem [resolvable:$true] %s934_s23  ;;  %s956_s3 = int_to_ptr.vmem [resolvable:$true] %s955_s3 }
 0x12d   : > { %s5940_s25 = scalar_lea.hbm %s7357_s8, 128 }
 0x12e   : > { %p5941_p9 = scmp.ne.s32.totalorder %s7357_s8, %s5940_s25  ;;  %p5947_p3 = scmp.lt.u32.totalorder %s5940_s25, %s7357_s8 }
 0x130   : > { %p5943_p10 = pnand %p5941_p9, %p6627_p8 }
 0x132   : > { %p5944_p11 = pneg %p5943_p10 }
 0x134   : > { %p5949_p12 = pnand %p5947_p3, %p5944_p11 }
 0x136   : > { %5952 = shalt.err (!%p5949_p12)
}
 0x137   : > { %s5953_s2 = scalar_lea.vmem %s935_s23, 128  ;;  %p5961_p0 = scmp.lt.s32.totalorder %s935_s23, %s935_s23 }
 0x138   : > { %p5954_p13 = scmp.ne.s32.totalorder %s935_s23, %s5953_s2  ;;  %p5962_p2 = scmp.lt.s32.totalorder %s5953_s2, %s5953_s2 }
 0x13a   : > { %p5956_p1 = pnand %p5954_p13, %p6627_p8  ;;  %p5963_p5 = por %p5962_p2, %p5961_p0 }
 0x13c   : > { %p5957_p4 = pneg %p5956_p1 }
 0x13e   : > { %p5964_p7 = pnand %p5963_p5, %p5957_p4 }
 0x140   : > { %5967 = shalt.err (!%p5964_p7)
}
 0x141   : > { %5476 = dma.hbm_to_vmem [thread:$0]  (!%p6617_p6), %s7357_s8, 128, %s935_s23, [#allocation13]  }
 0x142   : > { %s5968_s1 = scalar_lea.hbm %s7353_s19, 2048 }
 0x143   : > { %p5969_p9 = scmp.ne.s32.totalorder %s7353_s19, %s5968_s1  ;;  %p5975_p3 = scmp.lt.u32.totalorder %s5968_s1, %s7353_s19 }
 0x145   : > { %p5971_p10 = pnand %p5969_p9, %p6627_p8 }
 0x147   : > { %p5972_p11 = pneg %p5971_p10 }
 0x149   : > { %p5977_p12 = pnand %p5975_p3, %p5972_p11 }
 0x14b   : > { %5980 = shalt.err (!%p5977_p12)
}
 0x14c   : > { %s5981_s11 = scalar_lea.vmem %s956_s3, 2048  ;;  %p5989_p0 = scmp.lt.s32.totalorder %s956_s3, %s956_s3 }
 0x14d   : > { %p5982_p13 = scmp.ne.s32.totalorder %s956_s3, %s5981_s11  ;;  %p5990_p2 = scmp.lt.s32.totalorder %s5981_s11, %s5981_s11 }
 0x14f   : > { %p5984_p1 = pnand %p5982_p13, %p6627_p8  ;;  %p5991_p5 = por %p5990_p2, %p5989_p0 }
 0x151   : > { %p5985_p4 = pneg %p5984_p1 }
 0x153   : > { %p5992_p7 = pnand %p5991_p5, %p5985_p4 }
 0x155   : > { %5995 = shalt.err (!%p5992_p7)
}
 0x156   : > { %5482 = dma.hbm_to_vmem [thread:$0]  (!%p6617_p6), %s7353_s19, 2048, %s956_s3, [#allocation16], %s7366_s21, %s7366_s21, %s7365_s22  }
 0x157   : > { %s6385_s23 = smov [#allocation20]   ;;  %s6386_s25 = smov [#allocation23]  }
 0x158   : > { %s981_s10 = sshll.u32 %s6385_s23, 4  ;;  %s1010_s2 = sshll.u32 %s6386_s25, 4  ;;  %s982_s10 = int_to_ptr.vmem [resolvable:$true] %s981_s10  ;;  %s1011_s2 = int_to_ptr.vmem [resolvable:$true] %s1010_s2 }
 0x159   : > { %s5996_s1 = scalar_lea.hbm %s6466_s30, 2048 }
 0x15a   : > { %p5997_p9 = scmp.ne.s32.totalorder %s6466_s30, %s5996_s1  ;;  %p6003_p3 = scmp.lt.u32.totalorder %s5996_s1, %s6466_s30 }
 0x15c   : > { %p5999_p10 = pnand %p5997_p9, %p6627_p8 }
 0x15e   : > { %p6000_p11 = pneg %p5999_p10 }
 0x160   : > { %p6005_p12 = pnand %p6003_p3, %p6000_p11 }
 0x162   : > { %6008 = shalt.err (!%p6005_p12)
}
 0x163   : > { %s6009_s11 = scalar_lea.vmem %s982_s10, 2048  ;;  %p6017_p0 = scmp.lt.s32.totalorder %s982_s10, %s982_s10 }
 0x164   : > { %p6010_p13 = scmp.ne.s32.totalorder %s982_s10, %s6009_s11  ;;  %p6018_p2 = scmp.lt.s32.totalorder %s6009_s11, %s6009_s11 }
 0x166   : > { %p6012_p1 = pnand %p6010_p13, %p6627_p8  ;;  %p6019_p5 = por %p6018_p2, %p6017_p0 }
 0x168   : > { %p6013_p4 = pneg %p6012_p1 }
 0x16a   : > { %p6020_p7 = pnand %p6019_p5, %p6013_p4 }
 0x16c   : > { %6023 = shalt.err (!%p6020_p7)
}
 0x16d   : > { %5488 = dma.hbm_to_vmem [thread:$0]  (!%p6617_p6), %s6466_s30, 2048, %s982_s10, [#allocation19], %s7366_s21, %s7366_s21, %s7365_s22  }
 0x16e   : > { %s6024_s3 = scalar_lea.hbm %s7352_s20, 64 }
 0x16f   : > { %p6025_p9 = scmp.ne.s32.totalorder %s7352_s20, %s6024_s3  ;;  %p6031_p3 = scmp.lt.u32.totalorder %s6024_s3, %s7352_s20 }
 0x171   : > { %p6027_p10 = pnand %p6025_p9, %p6627_p8 }
 0x173   : > { %p6028_p11 = pneg %p6027_p10 }
 0x175   : > { %p6033_p12 = pnand %p6031_p3, %p6028_p11 }
 0x177   : > { %6036 = shalt.err (!%p6033_p12)
}
 0x178   : > { %s6037_s23 = scalar_lea.vmem %s1011_s2, 64  ;;  %p6045_p0 = scmp.lt.s32.totalorder %s1011_s2, %s1011_s2 }
 0x179   : > { %p6038_p13 = scmp.ne.s32.totalorder %s1011_s2, %s6037_s23  ;;  %p6046_p2 = scmp.lt.s32.totalorder %s6037_s23, %s6037_s23 }
 0x17b   : > { %p6040_p1 = pnand %p6038_p13, %p6627_p8  ;;  %p6047_p5 = por %p6046_p2, %p6045_p0 }
 0x17d   : > { %p6041_p4 = pneg %p6040_p1 }
 0x17f   : > { %p6048_p7 = pnand %p6047_p5, %p6041_p4 }
 0x181   : > { %6051 = shalt.err (!%p6048_p7)
}
 0x182   : > { %s7367_s10 = smov 1   ;;  %s7368_s25 = smov 16  }
 0x183   : > { %5494 = dma.hbm_to_vmem [thread:$0]  (!%p6617_p6), %s7352_s20, 64, %s1011_s2, [#allocation22], %s7368_s25, %s7368_s25, %s7367_s10  }
 0x184   : > { %s6387_s1 = smov [#allocation26]   ;;  %s6388_s3 = smov [#allocation29]  }
 0x185   : > { %s1037_s11 = sshll.u32 %s6387_s1, 4  ;;  %s1081_s6 = sshll.u32 %s6388_s3, 4  ;;  %s1038_s11 = int_to_ptr.vmem [resolvable:$true] %s1037_s11  ;;  %s1082_s6 = int_to_ptr.vmem [resolvable:$true] %s1081_s6 }
 0x186   : > { %s6052_s23 = scalar_lea.hbm %s7356_s4, 16 }
 0x187   : > { %p6053_p9 = scmp.ne.s32.totalorder %s7356_s4, %s6052_s23  ;;  %p6059_p3 = scmp.lt.u32.totalorder %s6052_s23, %s7356_s4 }
 0x189   : > { %p6055_p10 = pnand %p6053_p9, %p6627_p8 }
 0x18b   : > { %p6056_p11 = pneg %p6055_p10 }
 0x18d   : > { %p6061_p12 = pnand %p6059_p3, %p6056_p11 }
 0x18f   : > { %6064 = shalt.err (!%p6061_p12)
}
 0x190   : > { %s6065_s8 = scalar_lea.vmem %s1038_s11, 16  ;;  %s6072_s2 = scalar_lea.vmem %s1038_s11, 32 }
 0x191   : > { %p6066_p13 = scmp.ne.s32.totalorder %s1038_s11, %s6065_s8  ;;  %p6073_p0 = scmp.lt.s32.totalorder %s1038_s11, %s1038_s11 }
 0x192   : > { %p6074_p2 = scmp.lt.s32.totalorder %s6072_s2, %s6065_s8 }
 0x193   : > { %p6068_p1 = pnand %p6066_p13, %p6627_p8 }
 0x194   : > { %p6075_p5 = por %p6074_p2, %p6073_p0 }
 0x195   : > { %p6069_p4 = pneg %p6068_p1 }
 0x197   : > { %p6076_p7 = pnand %p6075_p5, %p6069_p4 }
 0x199   : > { %6079 = shalt.err (!%p6076_p7)
}
 0x19a   : > { %s7369_s10 = sld [smem:[#allocation71_spill]] }
 0x19b   : > { %5500 = dma.hbm_to_vmem [thread:$0]  (!%p6617_p6), %s7356_s4, 16, %s1038_s11, [#allocation25]  }
 0x1a0   : > { %s6080_s25 = scalar_lea.hbm %s7369_s10, 512 }
 0x1a1   : > { %p6081_p9 = scmp.ne.s32.totalorder %s7369_s10, %s6080_s25  ;;  %p6087_p3 = scmp.lt.u32.totalorder %s6080_s25, %s7369_s10 }
 0x1a3   : > { %p6083_p10 = pnand %p6081_p9, %p6627_p8 }
 0x1a5   : > { %p6084_p11 = pneg %p6083_p10 }
 0x1a7   : > { %p6089_p12 = pnand %p6087_p3, %p6084_p11 }
 0x1a9   : > { %6092 = shalt.err (!%p6089_p12)
}
 0x1aa   : > { %s6093_s8 = scalar_lea.vmem %s1082_s6, 512  ;;  %p6101_p0 = scmp.lt.s32.totalorder %s1082_s6, %s1082_s6 }
 0x1ab   : > { %p6094_p13 = scmp.ne.s32.totalorder %s1082_s6, %s6093_s8  ;;  %p6102_p2 = scmp.lt.s32.totalorder %s6093_s8, %s6093_s8 }
 0x1ad   : > { %p6096_p1 = pnand %p6094_p13, %p6627_p8  ;;  %p6103_p5 = por %p6102_p2, %p6101_p0 }
 0x1af   : > { %p6097_p4 = pneg %p6096_p1 }
 0x1b1   : > { %p6104_p7 = pnand %p6103_p5, %p6097_p4 }
 0x1b3   : > { %6107 = shalt.err (!%p6104_p7)
}
 0x1b4   : > { %s7370_s1 = sld [smem:[#allocation73_spill]]  ;;  %s6389_s11 = smov [#allocation30]  }
 0x1b5   : > { %5506 = dma.hbm_to_vmem [thread:$0]  (!%p6617_p6), %s7369_s10, 512, %s1082_s6, [#allocation28], %s7366_s21, %s7366_s21, %s7365_s22  }
 0x1b6   : > { %s1097_s3 = sshll.u32 %s6389_s11, 4  ;;  %s1098_s3 = int_to_ptr.vmem [resolvable:$true] %s1097_s3 }
 0x1ba   : > { %s6108_s23 = scalar_lea.hbm %s7370_s1, 512 }
 0x1bb   : > { %p6109_p9 = scmp.ne.s32.totalorder %s7370_s1, %s6108_s23  ;;  %p6115_p3 = scmp.lt.u32.totalorder %s6108_s23, %s7370_s1 }
 0x1bd   : > { %p6111_p10 = pnand %p6109_p9, %p6627_p8 }
 0x1bf   : > { %p6112_p11 = pneg %p6111_p10 }
 0x1c1   : > { %p6117_p12 = pnand %p6115_p3, %p6112_p11 }
 0x1c3   : > { %6120 = shalt.err (!%p6117_p12)
}
 0x1c4   : > { %s6121_s2 = scalar_lea.vmem %s1098_s3, 512  ;;  %p6129_p0 = scmp.lt.s32.totalorder %s1098_s3, %s1098_s3 }
 0x1c5   : > { %p6122_p13 = scmp.ne.s32.totalorder %s1098_s3, %s6121_s2  ;;  %p6130_p2 = scmp.lt.s32.totalorder %s6121_s2, %s6121_s2 }
 0x1c7   : > { %p6124_p1 = pnand %p6122_p13, %p6627_p8  ;;  %p6131_p5 = por %p6130_p2, %p6129_p0 }
 0x1c9   : > { %p6125_p4 = pneg %p6124_p1 }
 0x1cb   : > { %p6132_p7 = pnand %p6131_p5, %p6125_p4 }
 0x1cd   : > { %6135 = shalt.err (!%p6132_p7)
}
 0x1ce   : > { %5509 = dma.hbm_to_vmem [thread:$0]  (!%p6617_p6), %s7370_s1, 512, %s1098_s3, [#allocation31], %s7366_s21, %s7366_s21, %s7365_s22  }
 0x1cf   : > { %s4619_s5 = sadd.s32 4294967294, %s6334_s18   ;;  %s6838_s6 = sadd.s32 1, %s6334_s18  }
 0x1d0   : > { %s104_s7 = ssub.s32 %s6334_s18, %s6838_s6  ;;  %s107_s25 = sadd.s32 1, %s6330_s16 }
 0x1d1   : > { %p105_p8 = scmp.eq.s32.totalorder %s104_s7, 0  ;;  %s7371_s8 = sld [smem:[#allocation48_spill]] }
 0x1d2   : > { %p114_p9 = scmp.ne.s32.totalorder %s6330_s16, %s6326_s0  ;;  %p115_p10 = scmp.eq.s32.totalorder %s6334_s18, 0 }
 0x1d3   : > { %p120_p11 = scmp.ne.s32.totalorder %s6326_s0, %s6322_s15  ;;  %p7373_p6 = scmp.eq.s32.totalorder %s6599_s26, 0 }
 0x1d4   : > { %s6849_s11 = scalar_select %p105_p8, %s6330_s16, %s107_s25  }
 0x1d5   : > { %p6851_p3 = por %p115_p10, %p114_p9  ;;  %p6857_p12 = por %p7373_p6, %p120_p11 }
 0x1d6   : > { %p836_p13 = scmp.eq.s32.totalorder %s6599_s26, 1  ;;  %p842_p1 = scmp.eq.s32.totalorder %s4619_s5, 1 }
 0x1d7   : > { %s7374_s22 = scalar_select %p6857_p12, 1, 0 }
 0x1d8   : > { %p5540_p4 = scmp.lt.s32.totalorder %s6334_s18, 2  ;;  %s6864_s21 = sand.u32 1, %s6330_s16  }
 0x1d9   : > { %p6866_p0 = por %p836_p13, %p114_p9  ;;  %p6870_p2 = por %p842_p1, %p120_p11 }
 0x1da   : > { %s4638_s7 = sshll.u32 %s6334_s18, 4  ;;  %s1123_s25 = scalar_lea.vmem [#allocation3], %s6864_s21 }
 0x1db   : > { %s7375_s3 = scalar_select %p6866_p0, 1, 0 }
 0x1dc   : > { %s7376_s2 = scalar_select %p6870_p2, 1, 0 }
 0x1dd   : > { %s1130_s1 = sshll.u32 %s1123_s25, 4  ;;  %s6877_s5 = scalar_lea.hbm %s7371_s8, %s4638_s7  ;;  %s6879_s1 = int_to_ptr.vmem [resolvable:$true] %s1130_s1 }
 0x1de   : > { %p6883_p5 = pnand %p5540_p4, %p6851_p3  ;;  %s1121_s14 = scalar_lea.sflag [#allocation4], %s6864_s21 }
 0x1df   : > { %s6136_s19 = scalar_lea.hbm %s6877_s5, 16  ;;  %s6141_s7 = scalar_lea.hbm %s7371_s8, 32 }
 0x1e0   : > { %p6137_p7 = scmp.ne.s32.totalorder %s6877_s5, %s6136_s19  ;;  %p6138_p8 = pneg %p6883_p5 }
 0x1e1   : > { %p6142_p11 = scmp.lt.u32.totalorder %s6877_s5, %s7371_s8  ;;  %p6143_p6 = scmp.lt.u32.totalorder %s6141_s7, %s6136_s19 }
 0x1e2   : > { %p6139_p9 = pnand %p6138_p8, %p6137_p7  ;;  %p6145_p13 = scmp.lt.u32.totalorder %s6136_s19, %s6877_s5 }
 0x1e3   : > { %p6144_p3 = por %p6143_p6, %p6142_p11 }
 0x1e4   : > { %p6140_p10 = pneg %p6139_p9 }
 0x1e5   : > { %p6146_p1 = por %p6145_p13, %p6144_p3 }
 0x1e7   : > { %p6147_p4 = pnand %p6146_p1, %p6140_p10 }
 0x1e9   : > { %6150 = shalt.err (!%p6147_p4)
}
 0x1ea   : > { %s6151_s23 = scalar_lea.vmem %s6879_s1, 16  ;;  %s6390_s25 = smov [#allocation3]  }
 0x1eb   : > { %p6152_p2 = scmp.ne.s32.totalorder %s6879_s1, %s6151_s23  ;;  %s6156_s10 = sshll.u32 %s6390_s25, 4  ;;  %s6157_s10 = int_to_ptr.vmem [resolvable:$false] %s6156_s10 }
 0x1ec   : > { %s6158_s12 = scalar_lea.vmem %s6157_s10, 32  ;;  %p6159_p7 = scmp.lt.s32.totalorder %s6879_s1, %s6157_s10 }
 0x1ed   : > { %p6154_p0 = pnand %p6152_p2, %p6138_p8  ;;  %p6160_p9 = scmp.lt.s32.totalorder %s6158_s12, %s6151_s23 }
 0x1ef   : > { %p6155_p12 = pneg %p6154_p0  ;;  %p6161_p11 = por %p6160_p9, %p6159_p7 }
 0x1f1   : > { %p6162_p6 = pnand %p6161_p11, %p6155_p12 }
 0x1f3   : > { %6165 = shalt.err (!%p6162_p6)
}
 0x1f4   : > { %s7378_s19 = sld [smem:[#allocation49_spill]]  ;;  %s4640_s7 = sshll.u32 %s6334_s18, 7 }
 0x1f5   : > { %5513 = dma.hbm_to_vmem [thread:$0]  (!%p6883_p5), %s6877_s5, 16, %s6879_s1, %s1121_s14  }
 0x1f6   : > { %s7379_s25 = sshll.u32 %s6864_s21, 3  ;;  %s7380_s23 = sand.u32 1, %s6334_s18  }
 0x1f7   : > { %s1141_s8 = scalar_lea.vmem [#allocation6], %s7379_s25  ;;  %s1138_s20 = scalar_lea.sflag [#allocation7], %s7380_s23 }
 0x1f8   : > { %s1148_s10 = sshll.u32 %s1141_s8, 4  ;;  %s1149_s10 = int_to_ptr.vmem [resolvable:$true] %s1148_s10 }
 0x1fa   : > { %s6915_s12 = scalar_lea.hbm %s7378_s19, %s4640_s7  ;;  %s6171_s14 = scalar_lea.hbm %s7378_s19, 256 }
 0x1fb   : > { %s6166_s24 = scalar_lea.hbm %s6915_s12, 128  ;;  %p6172_p10 = scmp.lt.u32.totalorder %s6915_s12, %s7378_s19 }
 0x1fc   : > { %p6167_p12 = scmp.ne.s32.totalorder %s6915_s12, %s6166_s24  ;;  %p6173_p3 = scmp.lt.u32.totalorder %s6171_s14, %s6166_s24 }
 0x1fd   : > { %p6175_p1 = scmp.lt.u32.totalorder %s6166_s24, %s6915_s12 }
 0x1fe   : > { %p6169_p0 = pnand %p6167_p12, %p6138_p8  ;;  %p6174_p13 = por %p6173_p3, %p6172_p10 }
 0x200   : > { %p6170_p2 = pneg %p6169_p0  ;;  %p6176_p4 = por %p6175_p1, %p6174_p13 }
 0x202   : > { %p6177_p7 = pnand %p6176_p4, %p6170_p2 }
 0x204   : > { %6180 = shalt.err (!%p6177_p7)
}
 0x205   : > { %s6181_s1 = scalar_lea.vmem %s1149_s10, 128  ;;  %s6391_s8 = smov [#allocation6]  }
 0x206   : > { %p6182_p9 = scmp.ne.s32.totalorder %s1149_s10, %s6181_s1  ;;  %s6186_s21 = sshll.u32 %s6391_s8, 4  ;;  %s6187_s21 = int_to_ptr.vmem [resolvable:$false] %s6186_s21 }
 0x207   : > { %s6188_s5 = scalar_lea.vmem %s6187_s21, 256  ;;  %p6189_p12 = scmp.lt.s32.totalorder %s1149_s10, %s6187_s21 }
 0x208   : > { %p6184_p11 = pnand %p6182_p9, %p6138_p8  ;;  %p6190_p0 = scmp.lt.s32.totalorder %s6188_s5, %s6181_s1 }
 0x20a   : > { %p6185_p6 = pneg %p6184_p11  ;;  %p6191_p3 = por %p6190_p0, %p6189_p12 }
 0x20c   : > { %p6192_p10 = pnand %p6191_p3, %p6185_p6 }
 0x20e   : > { %6195 = shalt.err (!%p6192_p10)
}
 0x20f   : > { %5516 = dma.hbm_to_vmem [thread:$0]  (!%p6883_p5), %s6915_s12, 128, %s1149_s10, %s1138_s20  }
 0x210   : > { %p7381_p2 = scmp.ne.s32.totalorder %s7362_s28, 0 }
 0x211   : > { %s6937_s24 = sand.u32 (!%p7381_p2), 1, %s6326_s0   ;;  %p7382_p8 = scmp.ne.s32.totalorder (!%p7381_p2), %s7374_s22, 0 }
 0x212   : > { %1169 = sbr.rel (%p7381_p2) target bundleno = 6230 (0x1856), region = 148  ;;  %s1172_s7 = scalar_lea.sflag (!%p7381_p2), [#allocation4], %s6937_s24 }
 0x213   : > { %s1174_s25 = scalar_lea.vmem (!%p7381_p2), [#allocation3], %s6937_s24 }
 0x219   : > { %6269 = dma.done.wait (%p7382_p8), %s1172_s7, 16  }
 0x21a   : > { %6271 = vsyncadd (%p7382_p8), %s1172_s7, 4294967280  ;;  %s1179_s20 = sand.u32 1, %s6599_s26   ;;  %s4642_s4 = sshll.u32 %s6937_s24, 3 }
 0x21b   : > { %s1180_s28 = scalar_lea.sflag [#allocation7], %s1179_s20  ;;  %s6947_s10 = scalar_lea.vmem [#allocation6], %s4642_s4 }
 0x21c   : > { %6273 = dma.done.wait (%p7382_p8), %s1180_s28, 128  }
 0x21d   : > { %6275 = vsyncadd (%p7382_p8), %s1180_s28, 4294967168  ;;  %p7383_p5 = scmp.eq.s32.totalorder %s6599_s26, 0 }
 0x21f   : > { %6277 = dma.done.wait (%p7383_p5), [#allocation7], 16   ;;  %p7384_p13 = pmov %p7383_p5 }
 0x220   : > { %p7385_p1 = pmov %p7383_p5 }
 0x221   : > { %6279 = vsyncadd (%p7384_p13), [#allocation7], 4294967280 }
 0x222   : > { %6281 = dma.done.wait (%p7385_p1), [#allocation10], 384   ;;  %p7386_p4 = pmov %p7385_p1 }
 0x223   : > { %p7387_p7 = pmov %p7385_p1 }
 0x224   : > { %6283 = vsyncadd (%p7386_p4), [#allocation10], 4294966912 }
 0x225   : > { %6285 = dma.done.wait (%p7387_p7), [#allocation13], 144   ;;  %p7388_p9 = pmov %p7385_p1 }
 0x226   : > { %p7389_p11 = pmov %p7385_p1 }
 0x227   : > { %6287 = vsyncadd (%p7388_p9), [#allocation13], 4294967152 }
 0x228   : > { %6289 = dma.done.wait (%p7389_p11), [#allocation16], 2064   ;;  %p7390_p6 = pmov %p7385_p1 }
 0x229   : > { %p7391_p12 = pmov %p7385_p1 }
 0x22a   : > { %6291 = vsyncadd (%p7390_p6), [#allocation16], 4294965232 }
 0x22b   : > { %6293 = dma.done.wait (%p7391_p12), [#allocation19], 2112   ;;  %p7392_p0 = pmov %p7385_p1 }
 0x22d   : > { %6295 = vsyncadd (%p7392_p0), [#allocation19], 4294965184  ;;  %p7393_p3 = pmov %p7392_p0 }
 0x22e   : > { %p7394_p10 = pmov %p7392_p0 }
 0x22f   : > { %6297 = dma.done.wait (%p7393_p3), [#allocation22], 128  }
 0x230   : > { %6299 = vsyncadd (%p7394_p10), [#allocation22], 4294967168  ;;  %p7395_p2 = pmov %p7392_p0 }
 0x231   : > { %p7396_p8 = pmov %p7392_p0 }
 0x232   : > { %6301 = dma.done.wait (%p7395_p2), [#allocation25], 528  }
 0x233   : > { %6303 = vsyncadd (%p7396_p8), [#allocation25], 4294966768  ;;  %p7397_p5 = pmov %p7392_p0 }
 0x234   : > { %p7398_p13 = pmov %p7392_p0 }
 0x235   : > { %6305 = dma.done.wait (%p7397_p5), [#allocation28], 1024  }
 0x236   : > { %6307 = vsyncadd (%p7398_p13), [#allocation28], 4294966272  ;;  %p7399_p1 = pmov %p7392_p0 }
 0x237   : > { %p7400_p4 = pmov %p7392_p0 }
 0x238   : > { %6309 = dma.done.wait (%p7399_p1), [#allocation31], 512  }
 0x239   : > { %6311 = vsyncadd (%p7400_p4), [#allocation31], 4294966784  ;;  %v6392_v0 = vmov 0.0   ;;  %vm6393_vm0 = vmmov 0   ;;  %vm1447_vm1 = vcmask 1046528   ;;  %vm1366_vm2 = vcmask 64512  }
 0x23a   : > { %4916 = vmatprep.subr.mxu0 %v6392_v0  ;;  %4921 = vmatprep.subr.mxu1 %v6392_v0  ;;  %vm1443_vm3 = vcmask 56320   ;;  %v1358_v1 = vld [vmem:[#allocation11] sm:$0xff]  ;;  %v1441_v2 = vld [vmem:[#allocation14] sm:$0x7f]  ;;  %vm1522_vm4 = vcmask 253952   ;;  %v1535_v6 = vld [vmem:[#allocation17] sm:$0xff] }
 0x23b   : > { %4918 = vmatprep.mubr.msk.f32.mxu0 %vm6393_vm0, %v6392_v0  ;;  %4923 = vmatprep.mubr.msk.f32.mxu1 %vm6393_vm0, %v6392_v0  ;;  %v1357_v3 = vld [vmem:[%s6947_s10] sm:$0xff]  ;;  %v1521_v5 = vld [vmem:[#allocation8] sm:$0x1]  ;;  %s7401_s22 = sld [smem:[#allocation60_spill]]  ;;  %v1630_v16 = vld [vmem:[#allocation20 + $0x18] sm:$0xff]  ;;  %vm1525_vm5 = vcmask 261120  }
 0x23c   : > { %4917 = vmatpush3.msra.mxu0 %v1358_v1  ;;  %4922 = vmatpush3.msk.msra.mxu1 %vm1447_vm1, %v1441_v2  ;;  %v1440_v4 = vld [vmem:[%s1174_s25] sm:$0x1]  ;;  %v1536_v7 = vld [vmem:[#allocation17 + $0x8] sm:$0xff]  ;;  %1523 = vst.msk [vmem:[#allocation2] sm:$0x1] %vm1522_vm4, %v1521_v5  ;;  %v1537_v12 = vld [vmem:[#allocation17 + $0x10] sm:$0xff] }
 0x23d   : > { %4919 = vmatmul.mubr.msk.f32.vlgmr.msra.gmra.mrb[0].mxu0 %vm1366_vm2, %v1357_v3  ;;  %4924 = vmatmul.mubr.msk.f32.vlgmr.msra.gmra.mrb[0].mxu1 %vm1443_vm3, %v1440_v4  ;;  %v5197_v8 = vpack.c.bf16 %v1536_v7, %v1535_v6  ;;  %v1627_v9 = vld [vmem:[#allocation20] sm:$0xff]  ;;  %v1628_v10 = vld [vmem:[#allocation20 + $0x8] sm:$0xff]  ;;  %v1538_v13 = vld [vmem:[#allocation17 + $0x18] sm:$0xff]  ;;  %vm1932_vm7 = vcmask 1041408   ;;  %vm6394_vm8 = vmmov 1   ;;  %s7406_s12 = sld [smem:[#allocation50_spill]]  ;;  %v1895_v6 = vlaneseq }
 0x23e   : > { %v5205_v11 = vpack.c.bf16 %v1628_v10, %v1627_v9  ;;  %v5201_v14 = vpack.c.bf16 %v1538_v13, %v1537_v12  ;;  %v1629_v15 = vld [vmem:[#allocation20 + $0x10] sm:$0xff]  ;;  %v1442_v22 = vld [vmem:[#allocation15] sm:$0x1]  ;;  %v1532_v30 = vld [vmem:[#allocation9 + $0x8] sm:$0x3]  ;;  %p1348_p7 = scmp.lt.s32.totalorder %s6599_s26, 1 }
 0x23f   : > { %5198 = vmatprep.subr.bf16.mxu0 %v5197_v8  ;;  %v5209_v17 = vpack.c.bf16 %v1630_v16, %v1629_v15  ;;  %v4659_v21 = vld [vmem:[#allocation12] ss:$0 sm:$0xff]  ;;  %v1531_v29 = vld [vmem:[#allocation9] sm:$0xff]  ;;  %v2101_v38 = vld [vmem:[#allocation20 + $0x20] sm:$0xff]  ;;  %v1896_v7 = vshrl.u32 %v1895_v6, 7  ;;  %vm1902_vm10 = vcmask 80896  }
 0x240   : > { %5200 = vmatpush3.bf16.msra.mxu0 %v5197_v8  ;;  %5206 = vmatprep.subr.bf16.mxu1 %v5205_v11  ;;  %v2102_v39 = vld [vmem:[#allocation20 + $0x28] sm:$0xff]  ;;  %v2103_v41 = vld [vmem:[#allocation20 + $0x30] sm:$0xff]  ;;  %v2104_v42 = vld [vmem:[#allocation20 + $0x38] sm:$0xff]  ;;  %s7058_s23 = scalar_select %p1348_p7, %s6599_s26, 1  ;;  %vm1906_vm11 = vcmask 74752   ;;  %vm3745_vm12 = vcmask 254976  }
 0x241   : > { %5208 = vmatpush3.bf16.msra.mxu1 %v5205_v11  ;;  %5202 = vmatprep.subr.bf16.mxu0 %v5201_v14  ;;  %v1713_v18 = vld [vmem:[%s7401_s22] sm:$0xff]  ;;  %v1714_v19 = vld [vmem:[%s7401_s22 + $0x8] sm:$0xff]  ;;  %v1715_v31 = vld [vmem:[%s7401_s22 + $0x10] sm:$0xff]  ;;  %v5241_v40 = vpack.c.bf16 %v2102_v39, %v2101_v38  ;;  %v5245_v43 = vpack.c.bf16 %v2104_v42, %v2103_v41  ;;  %v1897_v10 = vsub.s32 0, %v1896_v7  ;;  %s7407_s1 = sld [smem:[#allocation67_spill]]  ;;  %s7408_s8 = sld [smem:[#allocation63_spill]] }
 0x242   : > { %5210 = vmatprep.subr.bf16.mxu1 %v5209_v17  ;;  %v5213_v20 = vpack.c.bf16 %v1714_v19, %v1713_v18  ;;  %v1716_v32 = vld [vmem:[%s7401_s22 + $0x18] sm:$0xff]  ;;  %v4666_v44 = vld [vmem:[#allocation21] ss:$0 sm:$0xff]  ;;  %v4663_v45 = vld [vmem:[#allocation18] ss:$0 sm:$0xff]  ;;  %s7409_s21 = sld [smem:[#allocation64_spill]] }
 0x243   : > { %v5217_v37 = vpack.c.bf16 %v1716_v32, %v1715_v31  ;;  %vm7034_vm6 = vmpackc.low %vm1366_vm2, %vm1366_vm2  ;;  %v4669_v55 = vld [vmem:[#allocation23] ss:$0 sm:$0xff]  ;;  %v4682_v63 = vld [vmem:[#allocation21 + $0x1] ss:$0 sm:$0xff]  ;;  %s1350_s14 = scalar_lea.vmem %s7406_s12, %s7058_s23  ;;  %s7410_s5 = sld [smem:[#allocation66_spill]]  ;;  %vm3895_vm13 = vcmask 523264  }
 0x244   : > { %5204 = vmatpush3.bf16.msra.mxu0 %v5201_v14  ;;  %vm7043_vm9 = vmpackc.low %vm1932_vm7, %vm6394_vm8  ;;  %v1527_v8 = vld [vmem:[%s1350_s14] sm:$0x1]  ;;  %v2014_v31 = vld [vmem:[#allocation17 + $0x28] sm:$0xff]  ;;  %s7411_s7 = sld [smem:[#allocation68_spill]]  ;;  %s7412_s25 = sld [smem:[#allocation69_spill]] }
 0x245   : > { %5212 = vmatpush3.bf16.msra.mxu1 %v5209_v17  ;;  %5214 = vmatprep.subr.bf16.mxu0 %v5213_v20  ;;  %v1528_v9 = vmul.f32 -1e+09, %v1527_v8  ;;  %v2015_v41 = vld [vmem:[#allocation17 + $0x30] sm:$0xff]  ;;  %v2016_v42 = vld [vmem:[#allocation17 + $0x38] sm:$0xff]  ;;  %s7413_s20 = sld [smem:[#allocation70_spill]]  ;;  %s7414_s4 = sld [smem:[#allocation75_spill]] }
 0x246   : > { %s7415_s28 = sld [smem:[#allocation72_spill]]  ;;  %s7416_s10 = sld [smem:[#allocation74_spill]] }
 0x247   : > { %v7062_v12 = vrot.slane %v1528_v9, %v1897_v10  ;;  %s7417_s12 = sld [smem:[#allocation51_spill]]  ;;  %s1341_s14 = scalar_lea.vmem [#allocation32], %s6937_s24 }
 0x248   : > { %p7418_p11 = scmp.ne.s32.totalorder %s7375_s3, 0 }
 0x310   : > { %v1436_v23 = vpop.f32.mrb[0].mxu0  ;;  %v1517_v24 = vpop.f32.mrb[0].mxu1 }
 0x311   : > { %v1437_v25 = vadd.f32 %v4659_v21, %v1436_v23  ;;  %v1518_v26 = vadd.f32 %v1517_v24, %v1442_v22  ;;  %v4920_v27 = vpop.f32.mrb[1].mxu0  ;;  %v4925_v28 = vpop.f32.mrb[1].mxu1 }
 0x313   : > { %1526 = vst.msk [vmem:[#allocation2 + $0x2] sm:$0xff] %vm1525_vm5, %v1437_v25 }
 0x314   : > { %1524 = vst.msk [vmem:[#allocation2 + $0x1] sm:$0x1] %vm1522_vm4, %v1518_v26 }
 0x31a   : > { %v7006_v33 = vld [vmem:[#allocation2 + $0x8] sm:$0x3] }
 0x31b   : > { %v7008_v34 = vld [vmem:[#allocation2] sm:$0xff]  ;;  %v7014_v36 = vadd.f32 %v1532_v30, %v7006_v33  ;;  %v2013_v30 = vld [vmem:[#allocation17 + $0x20] sm:$0xff] }
 0x31c   : > { %v7011_v35 = vadd.f32 %v1531_v29, %v7008_v34  ;;  %v5233_v32 = vpack.c.bf16 %v2014_v31, %v2013_v30  ;;  %v2640_v30 = vld [vmem:[#allocation17 + $0x50] sm:$0xff]  ;;  %v2641_v31 = vld [vmem:[#allocation17 + $0x58] sm:$0xff] }
 0x31e   : > { %4934 = vmatprep.mubr.msk.f32.mxu0 %vm1525_vm5, %v7011_v35  ;;  %4945 = vmatprep.mubr.msk.f32.mxu1 %vm1525_vm5, %v7011_v35 }
 0x31f   : > { %4935 = vmatmul.mubr.msk.f32.vlgmr.msra.gmra.mrb[2].mxu0 %vm1525_vm5, %v7014_v36  ;;  %4946 = vmatmul.mubr.msk.f32.vlgmr.msra.gmra.mrb[2].mxu1 %vm1525_vm5, %v7014_v36 }
 0x320   : > { %5216 = vmatpush3.bf16.msra.mxu0 %v5213_v20  ;;  %4956 = vmatprep.mubr.msk.f32.mxu0 %vm1525_vm5, %v7008_v34 }
 0x321   : > { %5218 = vmatprep.subr.bf16.mxu0 %v5217_v37 }
 0x324   : > { %5220 = vmatpush3.bf16.msra.mxu0 %v5217_v37 }
 0x325   : > { %5242 = vmatprep.subr.bf16.mxu0 %v5241_v40 }
 0x327   : > { %4957 = vmatmul.mubr.msk.f32.vlgmr.msra.gmra.mrb[4].mxu0 %vm1525_vm5, %v7006_v33 }
 0x328   : > { %5244 = vmatpush3.bf16.msra.mxu0 %v5241_v40  ;;  %4992 = vmatprep.mubr.msk.f32.mxu0 %vm1525_vm5, %v7011_v35 }
 0x329   : > { %5246 = vmatprep.subr.bf16.mxu0 %v5245_v43 }
 0x32c   : > { %5248 = vmatpush3.bf16.msra.mxu0 %v5245_v43 }
 0x32f   : > { %4993 = vmatmul.mubr.msk.f32.vlgmr.msra.gmra.mrb[6].mxu0 %vm1525_vm5, %v7014_v36 }
 0x3f2   : > { %v4936_v46 = vpop.f32.mrb[2].mxu0  ;;  %v4947_v47 = vpop.f32.mrb[2].mxu1 }
 0x3f3   : > { %v1710_v48 = vadd.f32 %v4947_v47, %v4666_v44  ;;  %v1618_v49 = vpop.f32.mrb[3].mxu0  ;;  %v1704_v50 = vpop.f32.mrb[3].mxu1  ;;  %v1624_v61 = vadd.f32 %v4936_v46, %v4663_v45  ;;  %v4685_v46 = vld [vmem:[%s7401_s22 + $0x20] sm:$0xff]  ;;  %v4686_v47 = vld [vmem:[%s7401_s22 + $0x28] sm:$0xff] }
 0x3f4   : > { %v1619_v51 = vadd.f32 %v4663_v45, %v1618_v49  ;;  %v1705_v52 = vadd.f32 %v4666_v44, %v1704_v50  ;;  %v5237_v45 = vpack.c.bf16 %v2016_v42, %v2015_v41  ;;  %v4687_v49 = vld [vmem:[%s7401_s22 + $0x30] sm:$0xff]  ;;  %v4688_v50 = vld [vmem:[%s7401_s22 + $0x38] sm:$0xff]  ;;  %v4710_v41 = vld [vmem:[%s7401_s22 + $0x48] sm:$0xff] }
 0x3f6   : > { %v5221_v54 = vpack.c.bf16 %v1710_v48, %v1705_v52  ;;  %4963 = vmatprep.mubr.msk.f32.mxu1 %vm1366_vm2, %v1619_v51  ;;  %v5249_v48 = vpack.c.bf16 %v4686_v47, %v4685_v46  ;;  %v5253_v51 = vpack.c.bf16 %v4688_v50, %v4687_v49  ;;  %v2011_v46 = vld [vmem:[#allocation24] sm:$0xff]  ;;  %v2726_v47 = vld [vmem:[#allocation20 + $0x40] sm:$0xff] }
 0x3f8   : > { %5223 = vmatprep.subr.msk.bf16.mxu1 %vm7034_vm6, %v5221_v54 }
 0x3f9   : > { %5226 = vmatpush3.bf16.xpose.msk.msra.mxu1 %vm7034_vm6, %v5221_v54 }
 0x3fa   : > { %v4958_v56 = vpop.f32.mrb[4].mxu0 }
 0x3fb   : > { %v1802_v57 = vadd.f32 %v4958_v56, %v4669_v55  ;;  %v1796_v58 = vpop.f32.mrb[5].mxu0 }
 0x3fc   : > { %v1797_v59 = vadd.f32 %v4669_v55, %v1796_v58  ;;  %v4679_v55 = vld [vmem:[#allocation18 + $0x1] ss:$0 sm:$0xff] }
 0x3fe   : > { %v5227_v62 = vpack.c.bf16 %v1802_v57, %v1797_v59 }
 0x400   : > { %5229 = vmatprep.subr.msk.bf16.mxu1 %vm7043_vm9, %v5227_v62  ;;  %4964 = vmatmul.mubr.msk.f32.vlgmr.msra.gmra.mrb[4].mxu1 %vm1366_vm2, %v1624_v61  ;;  %v4689_v61 = vld [vmem:[#allocation23 + $0x1] ss:$0 sm:$0xff] }
 0x401   : > { %5232 = vmatpush3.bf16.msk.msra.mxu1 %vm7043_vm9, %v5227_v62 }
 0x402   : > { %v4994_v1 = vpop.f32.mrb[6].mxu0  ;;  %5234 = vmatprep.subr.bf16.mxu1 %v5233_v32 }
 0x403   : > { %v2185_v2 = vadd.f32 %v4994_v1, %v4682_v63  ;;  %v2179_v3 = vpop.f32.mrb[7].mxu0 }
 0x404   : > { %v2180_v4 = vadd.f32 %v4682_v63, %v2179_v3 }
 0x406   : > { %v5257_v5 = vpack.c.bf16 %v2185_v2, %v2180_v4 }
 0x408   : > { %5259 = vmatprep.subr.msk.bf16.mxu0 %vm7034_vm6, %v5257_v5 }
 0x409   : > { %5262 = vmatpush3.bf16.xpose.msk.msra.mxu0 %vm7034_vm6, %v5257_v5 }
 0x4d3   : > { %v4965_v11 = vpop.f32.mrb[4].mxu1 }
 0x4d4   : > { %v1883_v13 = vpop.f32.mrb[5].mxu1  ;;  %v1893_v14 = vmul.f32 0.35355338, %v4965_v11 }
 0x4d5   : > { %v1892_v15 = vmul.f32 0.35355338, %v1883_v13 }
 0x4d6   : > { %v1901_v18 = vadd.f32 %v7062_v12, %v1893_v14 }
 0x4d7   : > { %v1900_v16 = vadd.f32 %v7062_v12, %v1892_v15 }
 0x4d8   : > { %v1907_v19 = vsel %vm1906_vm11, %v1901_v18, -inf }
 0x4d9   : > { %v1903_v17 = vsel %vm1902_vm10, %v1900_v16, -inf }
 0x4da   : > { %1904 = vmax.xlane.f32.xlu0 %v1903_v17 }
 0x4de   : > { %1908 = vmax.xlane.f32.xlu0 %v1907_v19 }
 0x567   : > { %v1905_v20 = vpop.xlane.xlu0 %1904 }
 0x568   : > { %v1910_v21 = vsub.f32 %v1900_v16, %v1905_v20 }
 0x56a   : > { %v1912_v22 = vmul.f32 1.442695, %v1910_v21 }
 0x56b   : > { %v1909_v23 = vpop.xlane.xlu0 %1908 }
 0x56c   : > { %5648 = vpow2.f32 %v1912_v22  ;;  %v1911_v24 = vsub.f32 %v1901_v18, %v1909_v23  ;;  %v2638_v23 = vld [vmem:[#allocation17 + $0x40] sm:$0xff] }
 0x56e   : > { %v1914_v25 = vmul.f32 1.442695, %v1911_v24  ;;  %v2639_v24 = vld [vmem:[#allocation17 + $0x48] sm:$0xff] }
 0x570   : > { %5650 = vpow2.f32 %v1914_v25  ;;  %v5269_v25 = vpack.c.bf16 %v2639_v24, %v2638_v23 }
 0x576   : > { %v5649_v26 = vpop.eup %5648 }
 0x577   : > { %v1916_v27 = vsel %vm1902_vm10, %v5649_v26, 0.0 }
 0x578   : > { %1917 = vadd.xlane.f32.xlu1 %v1916_v27 }
 0x57a   : > { %v5651_v28 = vpop.eup %5650 }
 0x57b   : > { %v1919_v29 = vsel %vm1906_vm11, %v5651_v28, 0.0 }
 0x57c   : > { %1920 = vadd.xlane.f32.xlu1 %v1919_v29 }
 0x605   : > { %v1918_v37 = vpop.xlane.xlu1 %1917 }
 0x606   : > { %5652 = vrcp.f32 %v1918_v37 }
 0x609   : > { %v1921_v38 = vpop.xlane.xlu1 %1920 }
 0x60a   : > { %5654 = vrcp.f32 %v1921_v38 }
 0x610   : > { %v5653_v39 = vpop.eup %5652 }
 0x611   : > { %v1924_v40 = vmul.f32 %v5653_v39, %v5649_v26  ;;  %v2474_v26 = vld [vmem:[#allocation24 + $0x8] sm:$0xff]  ;;  %v5273_v39 = vpack.c.bf16 %v2641_v31, %v2640_v30  ;;  %v3184_v30 = vld [vmem:[#allocation17 + $0x60] sm:$0xff]  ;;  %v3185_v31 = vld [vmem:[#allocation17 + $0x68] sm:$0xff] }
 0x612   : > { %5020 = vmatprep.subr.mxu0 %v2474_v26 }
 0x613   : > { %4970 = vmatprep.mubr.msk.f32.mxu1 %vm1902_vm10, %v1924_v40  ;;  %v4709_v40 = vld [vmem:[%s7401_s22 + $0x40] sm:$0xff] }
 0x614   : > { %v5655_v43 = vpop.eup %5654  ;;  %v5285_v42 = vpack.c.bf16 %v4710_v41, %v4709_v40  ;;  %v3186_v41 = vld [vmem:[#allocation17 + $0x70] sm:$0xff] }
 0x615   : > { %v1925_v44 = vmul.f32 %v5655_v43, %v5651_v28  ;;  %v4711_v43 = vld [vmem:[%s7401_s22 + $0x50] sm:$0xff] }
 0x617   : > { %4971 = vmatmul.mubr.msk.f32.vlgmr.msra.gmra.mrb[6].mxu1 %vm1902_vm10, %v1925_v44  ;;  %v4712_v44 = vld [vmem:[%s7401_s22 + $0x58] sm:$0xff] }
 0x618   : > { %5236 = vmatpush3.bf16.msra.mxu1 %v5233_v32  ;;  %4981 = vmatprep.mubr.msk.f32.mxu1 %vm1525_vm5, %v7011_v35 }
 0x619   : > { %5238 = vmatprep.subr.bf16.mxu1 %v5237_v45 }
 0x61c   : > { %5240 = vmatpush3.bf16.msra.mxu1 %v5237_v45  ;;  %v5289_v45 = vpack.c.bf16 %v4712_v44, %v4711_v43 }
 0x61d   : > { %5250 = vmatprep.subr.bf16.mxu1 %v5249_v48 }
 0x61f   : > { %4982 = vmatmul.mubr.msk.f32.vlgmr.msra.gmra.mrb[8].mxu1 %vm1525_vm5, %v7014_v36 }
 0x620   : > { %5252 = vmatpush3.bf16.msra.mxu1 %v5249_v48  ;;  %5003 = vmatprep.mubr.msk.f32.mxu1 %vm1525_vm5, %v7008_v34  ;;  %v2727_v48 = vld [vmem:[#allocation20 + $0x48] sm:$0xff] }
 0x621   : > { %5254 = vmatprep.subr.bf16.mxu1 %v5253_v51 }
 0x624   : > { %5256 = vmatpush3.bf16.msra.mxu1 %v5253_v51  ;;  %v5277_v51 = vpack.c.bf16 %v2727_v48, %v2726_v47  ;;  %v4731_v47 = vld [vmem:[%s7401_s22 + $0x60] sm:$0xff]  ;;  %v4732_v48 = vld [vmem:[%s7401_s22 + $0x68] sm:$0xff] }
 0x627   : > { %5004 = vmatmul.mubr.msk.f32.vlgmr.msra.gmra.mrb[10].mxu1 %vm1525_vm5, %v7006_v33 }
 0x6ea   : > { %v7084_v52 = vpop.f32.mrb[6].mxu1 }
 0x6eb   : > { %v7086_v54 = vpop.f32.mrb[7].mxu1 }
 0x6f2   : > { %v4983_v56 = vpop.f32.mrb[8].mxu1 }
 0x6f3   : > { %v2091_v57 = vpop.f32.mrb[9].mxu1  ;;  %v2097_v59 = vadd.f32 %v4983_v56, %v4679_v55  ;;  %v2728_v56 = vld [vmem:[#allocation20 + $0x50] sm:$0xff] }
 0x6f4   : > { %v2092_v58 = vadd.f32 %v4679_v55, %v2091_v57  ;;  %v4703_v55 = vld [vmem:[#allocation18 + $0x2] ss:$0 sm:$0xff] }
 0x6f5   : > { %v2729_v57 = vld [vmem:[#allocation20 + $0x58] sm:$0xff] }
 0x6f6   : > { %5010 = vmatprep.mubr.msk.f32.mxu0 %vm1366_vm2, %v2092_v58 }
 0x6f7   : > { %5011 = vmatmul.mubr.msk.f32.vlgmr.msra.gmra.mrb[8].mxu0 %vm1366_vm2, %v2097_v59 }
 0x6f8   : > { %5021 = vmatpush3.msra.mxu0 %v2474_v26 }
 0x6f9   : > { %5025 = vmatprep.subr.mxu0 %v2011_v46 }
 0x6fa   : > { %v5005_v62 = vpop.f32.mrb[10].mxu1 }
 0x6fb   : > { %v2273_v63 = vadd.f32 %v5005_v62, %v4689_v61  ;;  %v2267_v1 = vpop.f32.mrb[11].mxu1  ;;  %v5281_v62 = vpack.c.bf16 %v2729_v57, %v2728_v56  ;;  %v3272_v56 = vld [vmem:[#allocation20 + $0x60] sm:$0xff]  ;;  %v3273_v57 = vld [vmem:[#allocation20 + $0x68] sm:$0xff] }
 0x6fc   : > { %v2268_v2 = vadd.f32 %v4689_v61, %v2267_v1 }
 0x6fe   : > { %v5263_v3 = vpack.c.bf16 %v2273_v63, %v2268_v2  ;;  %v4713_v63 = vld [vmem:[#allocation23 + $0x2] ss:$0 sm:$0xff] }
 0x700   : > { %5265 = vmatprep.subr.msk.bf16.mxu1 %vm7043_vm9, %v5263_v3 }
 0x701   : > { %5268 = vmatpush3.bf16.msk.msra.mxu1 %vm7043_vm9, %v5263_v3 }
 0x702   : > { %5270 = vmatprep.subr.bf16.mxu1 %v5269_v25 }
 0x7ca   : > { %v5012_v4 = vpop.f32.mrb[8].mxu0 }
 0x7cb   : > { %v2364_v5 = vmul.f32 0.35355338, %v5012_v4  ;;  %v2354_v6 = vpop.f32.mrb[9].mxu0 }
 0x7cc   : > { %v2363_v7 = vmul.f32 0.35355338, %v2354_v6 }
 0x7cd   : > { %v2366_v8 = vadd.f32 %v2364_v5, %v7062_v12 }
 0x7ce   : > { %v2365_v9 = vadd.f32 %v2363_v7, %v7062_v12 }
 0x7cf   : > { %v2370_v10 = vsel %vm1906_vm11, %v2366_v8, -inf }
 0x7d0   : > { %2371 = vmax.xlane.f32.xlu1 %v2370_v10  ;;  %v2367_v11 = vsel %vm1902_vm10, %v2365_v9, -inf }
 0x7d1   : > { %2368 = vmax.xlane.f32.xlu0 %v2367_v11 }
 0x85d   : > { %v2372_v13 = vpop.xlane.xlu1 %2371 }
 0x85e   : > { %v2374_v14 = vsub.f32 %v2366_v8, %v2372_v13  ;;  %v2369_v15 = vpop.xlane.xlu0 %2368 }
 0x85f   : > { %v2373_v16 = vsub.f32 %v2365_v9, %v2369_v15 }
 0x860   : > { %v2377_v17 = vmul.f32 1.442695, %v2374_v14 }
 0x861   : > { %v2375_v18 = vmul.f32 1.442695, %v2373_v16 }
 0x862   : > { %5656 = vpow2.f32 %v2377_v17 }
 0x863   : > { %5658 = vpow2.f32 %v2375_v18 }
 0x86c   : > { %v5657_v19 = vpop.eup %5656 }
 0x86d   : > { %v5659_v20 = vpop.eup %5658  ;;  %v2382_v21 = vsel %vm1906_vm11, %v5657_v19, 0.0 }
 0x86e   : > { %2383 = vadd.xlane.f32.xlu1 %v2382_v21  ;;  %v2379_v22 = vsel %vm1902_vm10, %v5659_v20, 0.0 }
 0x86f   : > { %2380 = vadd.xlane.f32.xlu0 %v2379_v22 }
 0x8fb   : > { %v2384_v27 = vpop.xlane.xlu1 %2383 }
 0x8fc   : > { %5660 = vrcp.f32 %v2384_v27  ;;  %v2381_v28 = vpop.xlane.xlu0 %2380 }
 0x8fd   : > { %5662 = vrcp.f32 %v2381_v28 }
 0x906   : > { %v5661_v29 = vpop.eup %5660 }
 0x907   : > { %v5663_v32 = vpop.eup %5662  ;;  %v2388_v38 = vmul.f32 %v5661_v29, %v5657_v19 }
 0x908   : > { %v2387_v37 = vmul.f32 %v5663_v32, %v5659_v20  ;;  %v5305_v32 = vpack.c.bf16 %v3185_v31, %v3184_v30  ;;  %v3645_v31 = vld [vmem:[#allocation24 + $0x18] sm:$0xff] }
 0x90a   : > { %5017 = vmatprep.mubr.msk.f32.mxu1 %vm1902_vm10, %v2387_v37  ;;  %v3099_v37 = vld [vmem:[#allocation24 + $0x10] sm:$0xff] }
 0x90b   : > { %5018 = vmatmul.mubr.msk.f32.vlgmr.msra.gmra.mrb[12].mxu1 %vm1902_vm10, %v2388_v38 }
 0x90c   : > { %5272 = vmatpush3.bf16.msra.mxu1 %v5269_v25  ;;  %5038 = vmatprep.mubr.msk.f32.mxu1 %vm1525_vm5, %v7011_v35 }
 0x90d   : > { %5274 = vmatprep.subr.bf16.mxu1 %v5273_v39 }
 0x910   : > { %5276 = vmatpush3.bf16.msra.mxu1 %v5273_v39 }
 0x911   : > { %5286 = vmatprep.subr.bf16.mxu1 %v5285_v42 }
 0x913   : > { %5039 = vmatmul.mubr.msk.f32.vlgmr.msra.gmra.mrb[14].mxu1 %vm1525_vm5, %v7014_v36 }
 0x914   : > { %5288 = vmatpush3.bf16.msra.mxu1 %v5285_v42  ;;  %5060 = vmatprep.mubr.msk.f32.mxu1 %vm1525_vm5, %v7008_v34  ;;  %v3187_v42 = vld [vmem:[#allocation17 + $0x78] sm:$0xff] }
 0x915   : > { %5290 = vmatprep.subr.bf16.mxu1 %v5289_v45 }
 0x918   : > { %5292 = vmatpush3.bf16.msra.mxu1 %v5289_v45 }
 0x91b   : > { %5061 = vmatmul.mubr.msk.f32.vlgmr.msra.gmra.mrb[16].mxu1 %vm1525_vm5, %v7006_v33 }
 0x9de   : > { %v5019_v49 = vpop.f32.mrb[12].mxu1 }
 0x9df   : > { %v2464_v50 = vpop.f32.mrb[13].mxu1 }
 0x9e0   : > { %5022 = vmatprep.mubr.msk.f32.mxu0 %vm1366_vm2, %v2464_v50  ;;  %v4733_v50 = vld [vmem:[%s7401_s22 + $0x70] sm:$0xff] }
 0x9e1   : > { %5023 = vmatmul.mubr.msk.f32.vlgmr.msra.gmra.mrb[10].mxu0 %vm1366_vm2, %v5019_v49  ;;  %v5321_v49 = vpack.c.bf16 %v4732_v48, %v4731_v47 }
 0x9e2   : > { %5026 = vmatpush3.msra.mxu0 %v2011_v46  ;;  %5027 = vmatprep.mubr.msk.f32.mxu0 %vm1366_vm2, %v7086_v54  ;;  %v5309_v46 = vpack.c.bf16 %v3187_v42, %v3186_v41 }
 0x9e3   : > { %5278 = vmatprep.subr.bf16.mxu0 %v5277_v51 }
 0x9e6   : > { %v5040_v58 = vpop.f32.mrb[14].mxu1 }
 0x9e7   : > { %v2722_v59 = vadd.f32 %v5040_v58, %v4703_v55  ;;  %v2716_v61 = vpop.f32.mrb[15].mxu1  ;;  %v5313_v58 = vpack.c.bf16 %v3273_v57, %v3272_v56 }
 0x9e8   : > { %v2717_v3 = vadd.f32 %v4703_v55, %v2716_v61  ;;  %v3275_v61 = vld [vmem:[#allocation20 + $0x78] sm:$0xff] }
 0x9e9   : > { %5028 = vmatmul.mubr.msk.f32.vlgmr.msra.gmra.mrb[10].mxu0 %vm1366_vm2, %v7084_v52  ;;  %v4706_v52 = vld [vmem:[#allocation21 + $0x2] ss:$0 sm:$0xff] }
 0x9ea   : > { %5280 = vmatpush3.bf16.msra.mxu0 %v5277_v51  ;;  %5049 = vmatprep.mubr.msk.f32.mxu0 %vm1525_vm5, %v7011_v35  ;;  %v4734_v51 = vld [vmem:[%s7401_s22 + $0x78] sm:$0xff] }
 0x9eb   : > { %5282 = vmatprep.subr.bf16.mxu0 %v5281_v62  ;;  %v5325_v55 = vpack.c.bf16 %v4734_v51, %v4733_v50 }
 0x9ee   : > { %5284 = vmatpush3.bf16.msra.mxu0 %v5281_v62  ;;  %v5062_v1 = vpop.f32.mrb[16].mxu1 }
 0x9ef   : > { %v2898_v54 = vadd.f32 %v5062_v1, %v4713_v63  ;;  %v2892_v2 = vpop.f32.mrb[17].mxu1 }
 0x9f0   : > { %v2893_v4 = vadd.f32 %v4713_v63, %v2892_v2 }
 0x9f1   : > { %5050 = vmatmul.mubr.msk.f32.vlgmr.msra.gmra.mrb[12].mxu0 %vm1525_vm5, %v7014_v36 }
 0x9f2   : > { %v5299_v5 = vpack.c.bf16 %v2898_v54, %v2893_v4  ;;  %5067 = vmatprep.mubr.msk.f32.mxu0 %vm1366_vm2, %v2717_v3  ;;  %v4725_v54 = vld [vmem:[#allocation18 + $0x3] ss:$0 sm:$0xff] }
 0x9f4   : > { %5301 = vmatprep.subr.msk.bf16.mxu1 %vm7043_vm9, %v5299_v5 }
 0x9f5   : > { %5304 = vmatpush3.bf16.msk.msra.mxu1 %vm7043_vm9, %v5299_v5 }
 0x9f6   : > { %5306 = vmatprep.subr.bf16.mxu1 %v5305_v32 }
 0xac4   : > { %v5051_v6 = vpop.f32.mrb[12].mxu0 }
 0xac5   : > { %v2810_v7 = vadd.f32 %v5051_v6, %v4706_v52  ;;  %v2804_v8 = vpop.f32.mrb[13].mxu0 }
 0xac6   : > { %v2805_v9 = vadd.f32 %v4706_v52, %v2804_v8  ;;  %v4735_v52 = vld [vmem:[#allocation23 + $0x3] ss:$0 sm:$0xff] }
 0xac8   : > { %v5293_v10 = vpack.c.bf16 %v2810_v7, %v2805_v9 }
 0xaca   : > { %5295 = vmatprep.subr.msk.bf16.mxu0 %vm7034_vm6, %v5293_v10 }
 0xacb   : > { %5298 = vmatpush3.bf16.xpose.msk.msra.mxu0 %vm7034_vm6, %v5293_v10 }
 0xacc   : > { %5077 = vmatprep.subr.mxu0 %v3099_v37 }
 0xad2   : > { %5068 = vmatmul.mubr.msk.f32.vlgmr.msra.gmra.mrb[14].mxu0 %vm1366_vm2, %v2722_v59  ;;  %v3274_v59 = vld [vmem:[#allocation20 + $0x70] sm:$0xff] }
 0xad3   : > { %5078 = vmatpush3.msra.mxu0 %v3099_v37  ;;  %v5317_v1 = vpack.c.bf16 %v3275_v61, %v3274_v59 }
 0xad4   : > { %5314 = vmatprep.subr.bf16.mxu0 %v5313_v58 }
 0xba5   : > { %v5069_v11 = vpop.f32.mrb[14].mxu0 }
 0xba6   : > { %v2989_v13 = vmul.f32 0.35355338, %v5069_v11  ;;  %v2979_v14 = vpop.f32.mrb[15].mxu0 }
 0xba7   : > { %v2988_v15 = vmul.f32 0.35355338, %v2979_v14 }
 0xba8   : > { %v2991_v16 = vadd.f32 %v2989_v13, %v7062_v12 }
 0xba9   : > { %v2990_v17 = vadd.f32 %v2988_v15, %v7062_v12 }
 0xbaa   : > { %v2995_v18 = vsel %vm1906_vm11, %v2991_v16, -inf }
 0xbab   : > { %2996 = vmax.xlane.f32.xlu1 %v2995_v18  ;;  %v2992_v19 = vsel %vm1902_vm10, %v2990_v17, -inf }
 0xbac   : > { %2993 = vmax.xlane.f32.xlu0 %v2992_v19 }
 0xc38   : > { %v2997_v20 = vpop.xlane.xlu1 %2996 }
 0xc39   : > { %v2999_v21 = vsub.f32 %v2991_v16, %v2997_v20  ;;  %v2994_v22 = vpop.xlane.xlu0 %2993 }
 0xc3a   : > { %v2998_v23 = vsub.f32 %v2990_v17, %v2994_v22 }
 0xc3b   : > { %v3002_v24 = vmul.f32 1.442695, %v2999_v21 }
 0xc3c   : > { %v3000_v25 = vmul.f32 1.442695, %v2998_v23 }
 0xc3d   : > { %5664 = vpow2.f32 %v3002_v24 }
 0xc3e   : > { %5666 = vpow2.f32 %v3000_v25 }
 0xc47   : > { %v5665_v26 = vpop.eup %5664 }
 0xc48   : > { %v5667_v27 = vpop.eup %5666  ;;  %v3007_v28 = vsel %vm1906_vm11, %v5665_v26, 0.0 }
 0xc49   : > { %3008 = vadd.xlane.f32.xlu1 %v3007_v28  ;;  %v3004_v29 = vsel %vm1902_vm10, %v5667_v27, 0.0 }
 0xc4a   : > { %3005 = vadd.xlane.f32.xlu0 %v3004_v29 }
 0xcd6   : > { %v3009_v38 = vpop.xlane.xlu1 %3008 }
 0xcd7   : > { %5668 = vrcp.f32 %v3009_v38  ;;  %v3006_v39 = vpop.xlane.xlu0 %3005 }
 0xcd8   : > { %5670 = vrcp.f32 %v3006_v39 }
 0xce1   : > { %v5669_v40 = vpop.eup %5668 }
 0xce2   : > { %v5671_v43 = vpop.eup %5670  ;;  %v3013_v45 = vmul.f32 %v5669_v40, %v5665_v26 }
 0xce3   : > { %v3012_v44 = vmul.f32 %v5671_v43, %v5667_v27 }
 0xce5   : > { %5074 = vmatprep.mubr.msk.f32.mxu1 %vm1902_vm10, %v3012_v44  ;;  %v4747_v44 = vld [vmem:[#allocation26] ss:$0 sm:$0xff] }
 0xce6   : > { %5075 = vmatmul.mubr.msk.f32.vlgmr.msra.gmra.mrb[18].mxu1 %vm1902_vm10, %v3013_v45 }
 0xce7   : > { %5308 = vmatpush3.bf16.msra.mxu1 %v5305_v32  ;;  %5090 = vmatprep.mubr.msk.f32.mxu1 %vm1525_vm5, %v7011_v35 }
 0xce8   : > { %5310 = vmatprep.subr.bf16.mxu1 %v5309_v46 }
 0xceb   : > { %5312 = vmatpush3.bf16.msra.mxu1 %v5309_v46 }
 0xcec   : > { %5322 = vmatprep.subr.bf16.mxu1 %v5321_v49 }
 0xcee   : > { %5091 = vmatmul.mubr.msk.f32.vlgmr.msra.gmra.mrb[20].mxu1 %vm1525_vm5, %v7014_v36 }
 0xcef   : > { %5324 = vmatpush3.bf16.msra.mxu1 %v5321_v49  ;;  %5112 = vmatprep.mubr.msk.f32.mxu1 %vm1525_vm5, %v7008_v34 }
 0xcf0   : > { %5326 = vmatprep.subr.bf16.mxu1 %v5325_v55 }
 0xcf3   : > { %5328 = vmatpush3.bf16.msra.mxu1 %v5325_v55 }
 0xcf6   : > { %5113 = vmatmul.mubr.msk.f32.vlgmr.msra.gmra.mrb[22].mxu1 %vm1525_vm5, %v7006_v33 }
 0xdb9   : > { %v5076_v62 = vpop.f32.mrb[18].mxu1 }
 0xdba   : > { %v3089_v63 = vpop.f32.mrb[19].mxu1 }
 0xdbb   : > { %5079 = vmatprep.mubr.msk.f32.mxu0 %vm1366_vm2, %v3089_v63 }
 0xdbc   : > { %5080 = vmatmul.mubr.msk.f32.vlgmr.msra.gmra.mrb[10].mxu0 %vm1366_vm2, %v5076_v62 }
 0xdbd   : > { %5316 = vmatpush3.bf16.msra.mxu0 %v5313_v58  ;;  %5101 = vmatprep.mubr.msk.f32.mxu0 %vm1525_vm5, %v7011_v35  ;;  %v4728_v35 = vld [vmem:[#allocation21 + $0x3] ss:$0 sm:$0xff] }
 0xdbe   : > { %5318 = vmatprep.subr.bf16.mxu0 %v5317_v1 }
 0xdc1   : > { %v5092_v2 = vpop.f32.mrb[20].mxu1  ;;  %5320 = vmatpush3.bf16.msra.mxu0 %v5317_v1 }
 0xdc2   : > { %v3268_v3 = vadd.f32 %v5092_v2, %v4725_v54  ;;  %v3262_v4 = vpop.f32.mrb[21].mxu1  ;;  %v3787_v2 = vld [vmem:[#allocation27 + $0x8] sm:$0xff] }
 0xdc3   : > { %v3263_v5 = vadd.f32 %v4725_v54, %v3262_v4  ;;  %v3788_v4 = vld [vmem:[#allocation27 + $0x10] sm:$0xff] }
 0xdc4   : > { %5102 = vmatmul.mubr.msk.f32.vlgmr.msra.gmra.mrb[16].mxu0 %vm1525_vm5, %v7014_v36 }
 0xdc5   : > { %5119 = vmatprep.mubr.msk.f32.mxu0 %vm1366_vm2, %v3263_v5  ;;  %v3789_v5 = vld [vmem:[#allocation27 + $0x18] sm:$0xff] }
 0xdc9   : > { %v5114_v6 = vpop.f32.mrb[22].mxu1 }
 0xdca   : > { %v3444_v7 = vadd.f32 %v5114_v6, %v4735_v52  ;;  %v3438_v8 = vpop.f32.mrb[23].mxu1  ;;  %v3880_v6 = vld [vmem:[%s7407_s1] sm:$0xff] }
 0xdcb   : > { %v3439_v9 = vadd.f32 %v4735_v52, %v3438_v8  ;;  %v5345_v52 = vpack.c.bf16 %v3789_v5, %v3788_v4  ;;  %v3882_v8 = vld [vmem:[%s7407_s1 + $0x10] sm:$0xff]  ;;  %v4085_v4 = vld [vmem:[#allocation30 + $0x8] sm:$0xff] }
 0xdcc   : > { %v4757_v5 = vld [vmem:[%s7413_s20] ss:$0 sm:$0xff]  ;;  %s4250_s20 = scalar_lea.sflag [#allocation5], %s6937_s24 }
 0xdcd   : > { %v5335_v10 = vpack.c.bf16 %v3444_v7, %v3439_v9  ;;  %v3881_v7 = vld [vmem:[%s7407_s1 + $0x8] sm:$0xff] }
 0xdce   : > { %v5349_v9 = vpack.c.bf16 %v3881_v7, %v3880_v6 }
 0xdcf   : > { %5337 = vmatprep.subr.msk.bf16.mxu1 %vm7043_vm9, %v5335_v10 }
 0xdd0   : > { %5340 = vmatpush3.bf16.msk.msra.mxu1 %vm7043_vm9, %v5335_v10  ;;  %v3883_v10 = vld [vmem:[%s7407_s1 + $0x18] sm:$0xff] }
 0xe97   : > { %v5103_v11 = vpop.f32.mrb[16].mxu0 }
 0xe98   : > { %v3356_v13 = vadd.f32 %v5103_v11, %v4728_v35  ;;  %v3350_v14 = vpop.f32.mrb[17].mxu0  ;;  %v3884_v11 = vld [vmem:[%s7407_s1 + $0x20] sm:$0xff] }
 0xe99   : > { %v3351_v15 = vadd.f32 %v4728_v35, %v3350_v14  ;;  %v5353_v35 = vpack.c.bf16 %v3883_v10, %v3882_v8  ;;  %v4086_v8 = vld [vmem:[#allocation30 + $0x10] sm:$0xff] }
 0xe9b   : > { %v5329_v36 = vpack.c.bf16 %v3356_v13, %v3351_v15  ;;  %v3885_v13 = vld [vmem:[%s7407_s1 + $0x28] sm:$0xff] }
 0xe9c   : > { %v5357_v14 = vpack.c.bf16 %v3885_v13, %v3884_v11  ;;  %v4166_v11 = vld [vmem:[%s7414_s4 + $0x8] sm:$0xff]  ;;  %v4167_v13 = vld [vmem:[%s7414_s4 + $0x10] sm:$0xff] }
 0xe9d   : > { %5331 = vmatprep.subr.msk.bf16.mxu0 %vm7034_vm6, %v5329_v36 }
 0xe9e   : > { %5334 = vmatpush3.bf16.xpose.msk.msra.mxu0 %vm7034_vm6, %v5329_v36 }
 0xe9f   : > { %5129 = vmatprep.subr.mxu0 %v3645_v31 }
 0xea5   : > { %5120 = vmatmul.mubr.msk.f32.vlgmr.msra.gmra.mrb[18].mxu0 %vm1366_vm2, %v3268_v3 }
 0xea6   : > { %5130 = vmatpush3.msra.mxu0 %v3645_v31 }
 0xea7   : > { %5350 = vmatprep.subr.bf16.mxu0 %v5349_v9 }
 0xf78   : > { %v5121_v16 = vpop.f32.mrb[18].mxu0 }
 0xf79   : > { %v3535_v17 = vmul.f32 0.35355338, %v5121_v16  ;;  %v3525_v18 = vpop.f32.mrb[19].mxu0 }
 0xf7a   : > { %v3534_v19 = vmul.f32 0.35355338, %v3525_v18 }
 0xf7b   : > { %v3537_v60 = vadd.f32 %v3535_v17, %v7062_v12 }
 0xf7c   : > { %v3536_v20 = vadd.f32 %v3534_v19, %v7062_v12 }
 0xf7d   : > { %v3541_v21 = vsel %vm1906_vm11, %v3537_v60, -inf }
 0xf7e   : > { %3542 = vmax.xlane.f32.xlu1 %v3541_v21  ;;  %v3538_v22 = vsel %vm1902_vm10, %v3536_v20, -inf }
 0xf7f   : > { %3539 = vmax.xlane.f32.xlu0 %v3538_v22 }
0x100b   : > { %v3543_v23 = vpop.xlane.xlu1 %3542 }
0x100c   : > { %v3545_v24 = vsub.f32 %v3537_v60, %v3543_v23  ;;  %v3540_v53 = vpop.xlane.xlu0 %3539 }
0x100d   : > { %v3544_v25 = vsub.f32 %v3536_v20, %v3540_v53  ;;  %v4748_v20 = vld [vmem:[%s7408_s8] ss:$0 sm:$0xff]  ;;  %s1347_s8 = scalar_lea.vmem [#allocation33], %s6937_s24 }
0x100e   : > { %v3548_v26 = vmul.f32 1.442695, %v3545_v24  ;;  %v4749_v24 = vld [vmem:[%s7409_s21] ss:$0 sm:$0xff]  ;;  %s1353_s21 = scalar_lea.vmem %s7417_s12, %s7058_s23 }
0x100f   : > { %v3546_v27 = vmul.f32 1.442695, %v3544_v25 }
0x1010   : > { %5672 = vpow2.f32 %v3548_v26 }
0x1011   : > { %5674 = vpow2.f32 %v3546_v27 }
0x101a   : > { %v5673_v28 = vpop.eup %5672 }
0x101b   : > { %v5675_v29 = vpop.eup %5674  ;;  %v3553_v30 = vsel %vm1906_vm11, %v5673_v28, 0.0 }
0x101c   : > { %3554 = vadd.xlane.f32.xlu1 %v3553_v30  ;;  %v3550_v12 = vsel %vm1902_vm10, %v5675_v29, 0.0 }
0x101d   : > { %3551 = vadd.xlane.f32.xlu0 %v3550_v12  ;;  %v4750_v12 = vld [vmem:[%s7410_s5] ss:$0 sm:$0xff]  ;;  %s4761_s5 = sshll.u32 %s6599_s26, 4 }
0x10a9   : > { %v3555_v32 = vpop.xlane.xlu1 %3554 }
0x10aa   : > { %5676 = vrcp.f32 %v3555_v32  ;;  %v3552_v37 = vpop.xlane.xlu0 %3551 }
0x10ab   : > { %5678 = vrcp.f32 %v3552_v37 }
0x10b4   : > { %v5677_v38 = vpop.eup %5676 }
0x10b5   : > { %v5679_v39 = vpop.eup %5678  ;;  %v3559_v41 = vmul.f32 %v5677_v38, %v5673_v28  ;;  %v3886_v28 = vld [vmem:[%s7407_s1 + $0x30] sm:$0xff] }
0x10b6   : > { %v3558_v40 = vmul.f32 %v5679_v39, %v5675_v29  ;;  %v3887_v29 = vld [vmem:[%s7407_s1 + $0x38] sm:$0xff] }
0x10b7   : > { %v5361_v30 = vpack.c.bf16 %v3887_v29, %v3886_v28 }
0x10b8   : > { %5126 = vmatprep.mubr.msk.f32.mxu1 %vm1902_vm10, %v3558_v40 }
0x10b9   : > { %5127 = vmatmul.mubr.msk.f32.vlgmr.msra.gmra.mrb[24].mxu1 %vm1902_vm10, %v3559_v41  ;;  %v4753_v41 = vld [vmem:[%s7411_s7] ss:$0 sm:$0xff]  ;;  %s4269_s7 = sshll.u32 %s1341_s14, 4  ;;  %s4270_s7 = int_to_ptr.vmem [resolvable:$true] %s4269_s7 }
0x118c   : > { %v5128_v42 = vpop.f32.mrb[24].mxu1 }
0x118d   : > { %v3635_v43 = vpop.f32.mrb[25].mxu1 }
0x118e   : > { %5131 = vmatprep.mubr.msk.f32.mxu0 %vm1366_vm2, %v3635_v43 }
0x118f   : > { %5132 = vmatmul.mubr.msk.f32.vlgmr.msra.gmra.mrb[10].mxu0 %vm1366_vm2, %v5128_v42 }
0x1190   : > { %5352 = vmatpush3.bf16.msra.mxu0 %v5349_v9  ;;  %v4087_v9 = vld [vmem:[#allocation30 + $0x18] sm:$0xff] }
0x1191   : > { %5354 = vmatprep.subr.bf16.mxu0 %v5353_v35  ;;  %v5375_v10 = vpack.c.bf16 %v4087_v9, %v4086_v8 }
0x1194   : > { %5356 = vmatpush3.bf16.msra.mxu0 %v5353_v35  ;;  %v4165_v35 = vld [vmem:[%s7414_s4] sm:$0xff] }
0x1195   : > { %5358 = vmatprep.subr.bf16.mxu0 %v5357_v14 }
0x1198   : > { %5360 = vmatpush3.bf16.msra.mxu0 %v5357_v14  ;;  %v5378_v14 = vpack.c.bf16 %v4166_v11, %v4165_v35 }
0x1199   : > { %5362 = vmatprep.subr.bf16.mxu0 %v5361_v30 }
0x119c   : > { %5364 = vmatpush3.bf16.msra.mxu0 %v5361_v30 }
0x1262   : > { %v5133_v45 = vpop.f32.mrb[10].mxu0 }
0x1263   : > { %v3737_v46 = vadd.f32 %v5133_v45, %v4747_v44  ;;  %v3718_v47 = vpop.f32.mrb[11].mxu0 }
0x1264   : > { %v3736_v48 = vadd.f32 %v4747_v44, %v3718_v47 }
0x1265   : > { %v3739_v49 = vadd.f32 %v3737_v46, %v7006_v33 }
0x1266   : > { %v3738_v50 = vadd.f32 %v3736_v48, %v7008_v34  ;;  %v3786_v34 = vld [vmem:[#allocation27] sm:$0xff] }
0x1267   : > { %v3746_v51 = vsel %vm3745_vm12, %v3739_v49, 0.0  ;;  %v5341_v3 = vpack.c.bf16 %v3787_v2, %v3786_v34  ;;  %v4756_v34 = vld [vmem:[%s7412_s25] ss:$0 sm:$0xff]  ;;  %s7229_s25 = scalar_lea.hbm %s6571_s9, %s4761_s5 }
0x1268   : > { %3747 = vadd.xlane.f32.xlu1 %v3746_v51  ;;  %v3742_v55 = vsel %vm1525_vm5, %v3738_v50, 0.0 }
0x1269   : > { %3743 = vadd.xlane.f32.xlu0 %v3742_v55  ;;  %5342 = vmatprep.subr.bf16.mxu1 %v5341_v3  ;;  %v4006_v55 = vld [vmem:[#allocation29] sm:$0xff] }
0x126a   : > { %5344 = vmatpush3.bf16.msra.mxu1 %v5341_v3  ;;  %v4084_v3 = vld [vmem:[#allocation30] sm:$0xff] }
0x126b   : > { %5346 = vmatprep.subr.bf16.mxu1 %v5345_v52  ;;  %v5372_v6 = vpack.c.bf16 %v4085_v4, %v4084_v3 }
0x126e   : > { %5348 = vmatpush3.bf16.msra.mxu1 %v5345_v52 }
0x12f5   : > { %v3748_v56 = vpop.xlane.xlu1 %3747 }
0x12f6   : > { %v3751_v57 = vmul.f32 0.03125, %v3748_v56  ;;  %v3744_v58 = vpop.xlane.xlu0 %3743  ;;  %v4007_v56 = vld [vmem:[#allocation29 + $0x8] sm:$0xff] }
0x12f7   : > { %v3750_v59 = vmul.f32 0.03125, %v3744_v58  ;;  %v6395_v58 = vmov 0.0|0.0  }
0x12f8   : > { %v3753_v61 = vsub.f32 %v3739_v49, %v3751_v57  ;;  %v5366_v57 = vpack.c.bf16 %v4007_v56, %v4006_v55  ;;  %5365 = vmatprep.subr.bf16.mxu1 %v6395_v58  ;;  %5377 = vmatprep.subr.bf16.mxu0 %v6395_v58 }
0x12f9   : > { %v3752_v62 = vsub.f32 %v3738_v50, %v3750_v59  ;;  %v4008_v59 = vld [vmem:[#allocation29 + $0x10] sm:$0xff] }
0x12fa   : > { %v3755_v63 = vmul.f32 %v3753_v61, %v3753_v61 }
0x12fb   : > { %v3754_v1 = vmul.f32 %v3752_v62, %v3752_v62 }
0x12fc   : > { %v3759_v54 = vsel %vm3745_vm12, %v3755_v63, 0.0 }
0x12fd   : > { %3760 = vadd.xlane.f32.xlu1 %v3759_v54  ;;  %v3756_v33 = vsel %vm1525_vm5, %v3754_v1, 0.0 }
0x12fe   : > { %3757 = vadd.xlane.f32.xlu0 %v3756_v33 }
0x138a   : > { %v3761_v15 = vpop.xlane.xlu1 %3760 }
0x138b   : > { %v3763_v36 = vmul.f32 0.03125, %v3761_v15  ;;  %v3758_v16 = vpop.xlane.xlu0 %3757  ;;  %v4168_v15 = vld [vmem:[%s7414_s4 + $0x18] sm:$0xff] }
0x138c   : > { %v3762_v17 = vmul.f32 0.03125, %v3758_v16 }
0x138d   : > { %v3765_v18 = vadd.f32 1e-05, %v3763_v36  ;;  %v5381_v36 = vpack.c.bf16 %v4168_v15, %v4167_v13 }
0x138e   : > { %v3764_v19 = vadd.f32 1e-05, %v3762_v17 }
0x138f   : > { %5680 = vrsqrt.f32 %v3765_v18 }
0x1390   : > { %5682 = vrsqrt.f32 %v3764_v19  ;;  %v4088_v19 = vld [vmem:[%s7416_s10] sm:$0x1]  ;;  %s6396_s10 = smov [#allocation32]  }
0x1391   : > { %s6200_s12 = sshll.u32 %s6396_s10, 4  ;;  %s6201_s12 = int_to_ptr.vmem [resolvable:$false] %s6200_s12 }
0x1392   : > { %p6203_p0 = scmp.lt.s32.totalorder %s4270_s7, %s6201_s12 }
0x1399   : > { %v5681_v60 = vpop.eup %5680 }
0x139a   : > { %v5683_v21 = vpop.eup %5682  ;;  %v3769_v22 = vmul.f32 %v5681_v60, %v3753_v61  ;;  %v4009_v61 = vld [vmem:[#allocation29 + $0x18] sm:$0xff] }
0x139b   : > { %v3768_v23 = vmul.f32 %v5683_v21, %v3752_v62  ;;  %v5369_v62 = vpack.c.bf16 %v4009_v61, %v4008_v59 }
0x139c   : > { %v3777_v53 = vmul.f32 %v4748_v20, %v3769_v22 }
0x139d   : > { %v3776_v25 = vmul.f32 %v4748_v20, %v3768_v23 }
0x139e   : > { %v3785_v27 = vadd.f32 %v4749_v24, %v3777_v53 }
0x139f   : > { %v3784_v26 = vadd.f32 %v4749_v24, %v3776_v25  ;;  %v4162_v24 = vld [vmem:[%s1353_s21] sm:$0x1]  ;;  %s6202_s21 = scalar_lea.vmem %s6201_s12, 32 }
0x13a1   : > { %5142 = vmatprep.mubr.msk.f32.mxu1 %vm1525_vm5, %v3784_v26 }
0x13a2   : > { %5143 = vmatmul.mubr.msk.f32.vlgmr.msra.gmra.mrb[26].mxu1 %vm1525_vm5, %v3785_v27 }
0x13a3   : > { %5172 = vmatprep.mubr.msk.f32.mxu1 %vm6393_vm0, %v6392_v0  ;;  %5367 = vmatpush3.bf16.msra.mxu1 %v5366_v57 }
0x13a4   : > { %5368 = vmatprep.subr.bf16.mxu1 %v6395_v58 }
0x13a7   : > { %5370 = vmatpush3.bf16.msra.mxu1 %v5369_v62 }
0x13a8   : > { %5371 = vmatprep.subr.bf16.mxu1 %v6395_v58 }
0x1475   : > { %v5144_v31 = vpop.f32.mrb[26].mxu1 }
0x1476   : > { %v3875_v32 = vadd.f32 %v5144_v31, %v4750_v12  ;;  %v3869_v37 = vpop.f32.mrb[27].mxu1 }
0x1477   : > { %v3870_v38 = vadd.f32 %v4750_v12, %v3869_v37 }
0x1478   : > { %v3879_v40 = vmax.f32 %v3875_v32, 0.0 }
0x1479   : > { %v3878_v39 = vmax.f32 %v3870_v38, 0.0 }
0x147b   : > { %5161 = vmatprep.mubr.msk.f32.mxu0 %vm3895_vm13, %v3878_v39 }
0x147c   : > { %5162 = vmatmul.mubr.msk.f32.vlgmr.msra.gmra.mrb[20].mxu0 %vm3895_vm13, %v3879_v40 }
0x147d   : > { %5194 = vmatprep.mubr.msk.f32.mxu0 %vm6393_vm0, %v6392_v0  ;;  %5379 = vmatpush3.bf16.msra.mxu0 %v5378_v14 }
0x147e   : > { %5380 = vmatprep.subr.bf16.mxu0 %v6395_v58 }
0x1481   : > { %5382 = vmatpush3.bf16.msra.mxu0 %v5381_v36 }
0x154f   : > { %v5163_v42 = vpop.f32.mrb[20].mxu0 }
0x1550   : > { %v3968_v43 = vpop.f32.mrb[21].mxu0 }
0x1551   : > { %v3969_v44 = vadd.f32 %v4753_v41, %v3968_v43 }
0x1553   : > { %v3976_v45 = vadd.f32 %v3969_v44, %v3784_v26 }
0x1555   : > { %v3979_v46 = vsel %vm1525_vm5, %v3976_v45, 0.0 }
0x1556   : > { %3980 = vadd.xlane.f32.xlu0 %v3979_v46 }
0x15e3   : > { %v3981_v47 = vpop.xlane.xlu0 %3980 }
0x15e4   : > { %v3982_v48 = vmul.f32 0.03125, %v3981_v47 }
0x15e6   : > { %v3983_v49 = vsub.f32 %v3976_v45, %v3982_v48 }
0x15e8   : > { %v3984_v50 = vmul.f32 %v3983_v49, %v3983_v49 }
0x15ea   : > { %v3985_v51 = vsel %vm1525_vm5, %v3984_v50, 0.0 }
0x15eb   : > { %3986 = vadd.xlane.f32.xlu1 %v3985_v51 }
0x1678   : > { %v3987_v63 = vpop.xlane.xlu1 %3986 }
0x1679   : > { %v3988_v1 = vmul.f32 0.03125, %v3987_v63 }
0x167b   : > { %v3989_v54 = vadd.f32 1e-05, %v3988_v1 }
0x167d   : > { %5684 = vrsqrt.f32 %v3989_v54 }
0x1687   : > { %v5685_v33 = vpop.eup %5684 }
0x1688   : > { %v3991_v2 = vmul.f32 %v5685_v33, %v3983_v49 }
0x168a   : > { %v3998_v52 = vmul.f32 %v4756_v34, %v3991_v2 }
0x168c   : > { %v4005_v7 = vadd.f32 %v4757_v5, %v3998_v52 }
0x168e   : > { %5173 = vmatmul.mubr.msk.f32.vlgmr.msra.gmra.mrb[28].mxu1 %vm1525_vm5, %v4005_v7 }
0x168f   : > { %5373 = vmatpush3.bf16.msra.mxu1 %v5372_v6  ;;  %5183 = vmatprep.mubr.msk.f32.mxu1 %vm6393_vm0, %v6392_v0  ;;  %v4010_v0 = vld [vmem:[%s7415_s28] sm:$0x1]  ;;  %s6196_s28 = scalar_lea.vmem %s4270_s7, 16 }
0x1690   : > { %5374 = vmatprep.subr.bf16.mxu1 %v6395_v58  ;;  %p6197_p9 = scmp.ne.s32.totalorder %s4270_s7, %s6196_s28  ;;  %p6204_p3 = scmp.lt.s32.totalorder %s6202_s21, %s6196_s28 }
0x1692   : > { %p6198_p6 = pnand %p6197_p9, %p7418_p11  ;;  %p6205_p10 = por %p6204_p3, %p6203_p0 }
0x1693   : > { %5376 = vmatpush3.bf16.msra.mxu1 %v5375_v10 }
0x1694   : > { %p6199_p12 = pneg %p6198_p6 }
0x1696   : > { %5184 = vmatmul.mubr.msk.f32.vlgmr.msra.gmra.mrb[30].mxu1 %vm1525_vm5, %v4005_v7  ;;  %p6206_p2 = pnand %p6205_p10, %p6199_p12 }
0x1761   : > { %v4080_v16 = vpop.f32.mrb[28].mxu1 }
0x1762   : > { %v4081_v17 = vadd.f32 %v4080_v16, %v4010_v0  ;;  %v5174_v18 = vpop.f32.mrb[29].mxu1 }
0x1764   : > { %4244 = vst.msk [vmem:[%s1341_s14] sm:$0x1] %vm1522_vm4, %v4081_v17 }
0x1769   : > { %v4155_v60 = vpop.f32.mrb[30].mxu1 }
0x176a   : > { %v4156_v20 = vadd.f32 %v4155_v60, %v4088_v19  ;;  %v5185_v21 = vpop.f32.mrb[31].mxu1 }
0x176c   : > { %v4159_v22 = vmul.f32 0.5, %v4156_v20  ;;  %4245 = vst.msk [vmem:[%s1347_s8] sm:$0x1] %vm1522_vm4, %v4156_v20 }
0x176e   : > { %v4160_v23 = vmul.f32 1.442695, %v4159_v22 }
0x1770   : > { %5686 = vpow2.f32 %v4160_v23 }
0x177a   : > { %v5687_v53 = vpop.eup %5686 }
0x177b   : > { %v4163_v25 = vmul.f32 %v5687_v53, %v4162_v24 }
0x177d   : > { %v4164_v26 = vadd.f32 %v4163_v25, %v4081_v17 }
0x177f   : > { %5195 = vmatmul.mubr.msk.f32.vlgmr.msra.gmra.mrb[22].mxu0 %vm1525_vm5, %v4164_v26 }
0x1780   : > { %6209 = shalt.err (!%p6206_p2)
}
0x1781   : > { %s6210_s14 = scalar_lea.hbm %s7229_s25, 16  ;;  %s6214_s10 = scalar_lea.hbm %s6571_s9, 32 }
0x1782   : > { %p6211_p8 = scmp.ne.s32.totalorder %s7229_s25, %s6210_s14  ;;  %p6215_p1 = scmp.lt.u32.totalorder %s7229_s25, %s6571_s9 }
0x1783   : > { %p6216_p4 = scmp.lt.u32.totalorder %s6214_s10, %s6210_s14  ;;  %p6218_p9 = scmp.lt.u32.totalorder %s6210_s14, %s7229_s25 }
0x1784   : > { %p6212_p5 = pnand %p6211_p8, %p7418_p11 }
0x1785   : > { %p6217_p7 = por %p6216_p4, %p6215_p1 }
0x1786   : > { %p6213_p13 = pneg %p6212_p5 }
0x1787   : > { %p6219_p6 = por %p6218_p9, %p6217_p7 }
0x1789   : > { %p6220_p12 = pnand %p6219_p6, %p6213_p13 }
0x178b   : > { %6223 = shalt.err (!%p6220_p12)
}
0x178c   : > { %5457 = dma.vmem_to_hbm [thread:$0]  (%p7418_p11), %s4270_s7, 16, %s7229_s25, %s4250_s20  }
0x178d   : > { %s7248_s28 = scalar_lea.hbm %s6576_s17, %s4761_s5  ;;  %s4282_s12 = sshll.u32 %s1347_s8, 4  ;;  %s4283_s12 = int_to_ptr.vmem [resolvable:$true] %s4282_s12 }
0x178e   : > { %s4254_s21 = scalar_lea.sflag [#allocation34], %s6937_s24  ;;  %s6224_s14 = scalar_lea.vmem %s4283_s12, 16 }
0x178f   : > { %p6225_p0 = scmp.ne.s32.totalorder %s4283_s12, %s6224_s14  ;;  %s6397_s10 = smov [#allocation33]  }
0x1790   : > { %s6228_s1 = sshll.u32 %s6397_s10, 4  ;;  %s6229_s1 = int_to_ptr.vmem [resolvable:$false] %s6228_s1 }
0x1791   : > { %p6226_p3 = pnand %p6225_p0, %p7418_p11  ;;  %s6230_s4 = scalar_lea.vmem %s6229_s1, 32 }
0x1792   : > { %p6231_p2 = scmp.lt.s32.totalorder %s4283_s12, %s6229_s1  ;;  %p6232_p8 = scmp.lt.s32.totalorder %s6230_s4, %s6224_s14 }
0x1793   : > { %p6227_p10 = pneg %p6226_p3 }
0x1794   : > { %p6233_p5 = por %p6232_p8, %p6231_p2 }
0x1796   : > { %p6234_p13 = pnand %p6233_p5, %p6227_p10 }
0x1798   : > { %6237 = shalt.err (!%p6234_p13)
}
0x1799   : > { %s6238_s26 = scalar_lea.hbm %s7248_s28, 16  ;;  %s6242_s24 = scalar_lea.hbm %s6576_s17, 32 }
0x179a   : > { %p6239_p1 = scmp.ne.s32.totalorder %s7248_s28, %s6238_s26  ;;  %p6243_p9 = scmp.lt.u32.totalorder %s7248_s28, %s6576_s17 }
0x179b   : > { %p6244_p6 = scmp.lt.u32.totalorder %s6242_s24, %s6238_s26  ;;  %p6246_p0 = scmp.lt.u32.totalorder %s6238_s26, %s7248_s28 }
0x179c   : > { %p6240_p4 = pnand %p6239_p1, %p7418_p11 }
0x179d   : > { %p6245_p12 = por %p6244_p6, %p6243_p9 }
0x179e   : > { %p6241_p7 = pneg %p6240_p4 }
0x179f   : > { %p6247_p3 = por %p6246_p0, %p6245_p12 }
0x17a1   : > { %p6248_p10 = pnand %p6247_p3, %p6241_p7 }
0x17a3   : > { %6251 = shalt.err (!%p6248_p10)
}
0x17a4   : > { %s7419_s1 = sld [smem:[#allocation76_spill]]  ;;  %v4169_v27 = vld [vmem:[%s6561_s13] sm:$0x1] }
0x17a5   : > { %5458 = dma.vmem_to_hbm [thread:$0]  (%p7418_p11), %s4283_s12, 16, %s7248_s28, %s4254_s21  }
0x17aa   : > { %s1356_s4 = scalar_lea.vmem %s7419_s1, %s7058_s23 }
0x1852   : > { %v4239_v28 = vpop.f32.mrb[22].mxu0 }
0x1853   : > { %v4240_v29 = vadd.f32 %v4239_v28, %v4169_v27  ;;  %v5196_v30 = vpop.f32.mrb[23].mxu0 }
0x1855   : > { %4243 = vst.msk [vmem:[%s1356_s4] sm:$0x1] %vm1522_vm4, %v4240_v29 }
0x1856 PF: > { %s4300_s8 = sand.u32 1, %s6322_s15   ;;  %p7420_p2 = scmp.ne.s32.totalorder %s7376_s2, 0 }
0x1857   : > { %p7421_p8 = scmp.ge.s32.totalorder %s6334_s18, 2  ;;  %s4301_s3 = scalar_lea.sflag [#allocation5], %s4300_s8 }
0x1859   : > { %p5518_p5 = pnand %p7421_p8, %p7420_p2 }
0x185b   : > { %6313 = dma.done.wait (!%p5518_p5), %s4301_s3, 16  }
0x185c   : > { %6315 = vsyncadd (!%p5518_p5), %s4301_s3, 4294967280  ;;  %s4309_s5 = scalar_lea.sflag [#allocation34], %s4300_s8 }
0x185d   : > { %6317 = dma.done.wait (!%p5518_p5), %s4309_s5, 16  }
0x185e   : > { %6319 = vsyncadd (!%p5518_p5), %s4309_s5, 4294967280  ;;  %p97_p11 = scmp.ge.s32.totalorder %s6838_s6, 4   ;;  %s7422_s15 = smov %s6326_s0 }
0x185f   : > { %s7423_s0 = smov %s6330_s16  ;;  %s7424_s16 = smov %s6849_s11 }
0x1860   : > { %s7425_s18 = smov %s6838_s6  ;;  %99 = sbr.rel (!%p97_p11) target bundleno = 85 (0x55), region = 360 }
0x1867   :  { %4313 = vsyncpa [#allocation4], 1 }
0x1868   :  { %4315 = vsyncpa [#allocation4 + $0x1], 1 }
0x1869   :  { %4316 = vsyncpa [#allocation7], 1 }
0x186a   :  { %4318 = vsyncpa [#allocation7 + $0x1], 1 }
0x186b   :  { %4319 = vsyncpa [#allocation10], 1 }
0x186c   :  { %4320 = vsyncpa [#allocation13], 1 }
0x186d   :  { %4321 = vsyncpa [#allocation16], 1 }
0x186e   :  { %4322 = vsyncpa [#allocation19], 1 }
0x186f   :  { %4323 = vsyncpa [#allocation22], 1 }
0x1870   :  { %4324 = vsyncpa [#allocation25], 1 }
0x1871   :  { %4325 = vsyncpa [#allocation28], 1 }
0x1872   :  { %4326 = vsyncpa [#allocation31], 1 }
0x1873   :  { %4327 = vsyncpa [#allocation5], 1 }
0x1874   :  { %4329 = vsyncpa [#allocation5 + $0x1], 1 }
0x1875   :  { %4330 = vsyncpa [#allocation34], 1 }
0x1876   :  { %4332 = vsyncpa [#allocation34 + $0x1], 1 }

// kernel: run.3
= control target key start
LH: loop header
LB: loop body
LE: loop exit
PB: predicated region body
PF: predicated region fallthrough
CT: control target
= control target key end

     0   :  { %s13662_s6 = smov 1   ;;  %s13663_s10 = smov 2   ;;  %s15799_s0 = inlined_call_operand.smem [shape: u32[57], index: -1, kind: input, shape index: {}] }
   0x1   :  { %s13769_s5 = sld [smem:[%s15799_s0]]   ;;  %s13664_s14 = smov 3  }
   0x2   :  { %s13774_s9 = sld [smem:[%s15799_s0 + %s13662_s6]]   ;;  %s13665_s18 = smov 4  }
   0x3   :  { %s13779_s13 = sld [smem:[%s15799_s0 + %s13663_s10]]   ;;  %s13666_s22 = smov 5  }
   0x4   :  { %s13784_s17 = sld [smem:[%s15799_s0 + %s13664_s14]]   ;;  %s13667_s26 = smov 6  }
   0x5   :  { %s13789_s21 = sld [smem:[%s15799_s0 + %s13665_s18]]   ;;  %s13668_s30 = smov 7  }
   0x6   :  { %s13794_s25 = sld [smem:[%s15799_s0 + %s13666_s22]]   ;;  %s13669_s4 = smov 8  }
   0x7   :  { %15870 = sst [smem:[#allocation78_spill]] %s13769_s5  ;;  %s13670_s10 = smov 9  }
   0x8   :  { %15871 = sst [smem:[#allocation79_spill]] %s13774_s9  ;;  %s13671_s15 = smov 10  }
   0x9   :  { %15872 = sst [smem:[#allocation80_spill]] %s13779_s13  ;;  %s13672_s20 = smov 11  }
   0xa   :  { %15873 = sst [smem:[#allocation81_spill]] %s13784_s17  ;;  %s13674_s1 = smov 13  }
   0xb   :  { %15874 = sst [smem:[#allocation82_spill]] %s13789_s21  ;;  %s13675_s7 = smov 14  }
   0xc   :  { %15875 = sst [smem:[#allocation83_spill]] %s13794_s25  ;;  %s13677_s22 = smov 16  }
   0xd   :  { %s13799_s29 = sld [smem:[%s15799_s0 + %s13667_s26]]   ;;  %s13673_s26 = smov 12  }
   0xe   :  { %s13804_s3 = sld [smem:[%s15799_s0 + %s13668_s30]]   ;;  %s13678_s28 = smov 17  }
   0xf   :  { %s13809_s8 = sld [smem:[%s15799_s0 + %s13669_s4]]   ;;  %s13716_s16 = smov 55  }
  0x10   :  { %s13814_s14 = sld [smem:[%s15799_s0 + %s13670_s10]]   ;;  %s13717_s23 = smov 56  }
  0x11   :  { %s13819_s19 = sld [smem:[%s15799_s0 + %s13671_s15]]   ;;  %s13676_s15 = smov 15  }
  0x12   :  { %s13824_s24 = sld [smem:[%s15799_s0 + %s13672_s20]]  }
  0x13   :  { %15876 = sst [smem:[#allocation84_spill]] %s13799_s29 }
  0x14   :  { %15877 = sst [smem:[#allocation85_spill]] %s13804_s3 }
  0x15   :  { %15878 = sst [smem:[#allocation86_spill]] %s13809_s8 }
  0x16   :  { %15879 = sst [smem:[#allocation87_spill]] %s13814_s14 }
  0x17   :  { %15880 = sst [smem:[#allocation88_spill]] %s13819_s19 }
  0x18   :  { %s13829_s30 = sld [smem:[%s15799_s0 + %s13673_s26]]  }
  0x19   :  { %s13834_s6 = sld [smem:[%s15799_s0 + %s13674_s1]]  }
  0x1a   :  { %s13839_s12 = sld [smem:[%s15799_s0 + %s13675_s7]]   ;;  %s13679_s7 = smov 18  }
  0x1b   :  { %s13844_s20 = sld [smem:[%s15799_s0 + %s13676_s15]]   ;;  %s13680_s15 = smov 19  }
  0x1c   :  { %s13849_s27 = sld [smem:[%s15799_s0 + %s13677_s22]]   ;;  %s13681_s22 = smov 20  }
  0x1d   :  { %s13854_s4 = sld [smem:[%s15799_s0 + %s13678_s28]]   ;;  %s13682_s28 = smov 21  }
  0x1e   :  { %15881 = sst [smem:[#allocation89_spill]] %s13829_s30 }
  0x1f   :  { %15882 = sst [smem:[#allocation90_spill]] %s13834_s6 }
  0x20   :  { %15883 = sst [smem:[#allocation91_spill]] %s13839_s12 }
  0x21   :  { %15884 = sst [smem:[#allocation92_spill]] %s13844_s20 }
  0x22   :  { %s13859_s6 = sld [smem:[%s15799_s0 + %s13679_s7]]   ;;  %s13683_s7 = smov 22  }
  0x23   :  { %15885 = sst [smem:[#allocation93_spill]] %s13854_s4 }
  0x24   :  { %s13864_s13 = sld [smem:[%s15799_s0 + %s13680_s15]]   ;;  %s13684_s15 = smov 23  }
  0x25   :  { %s13869_s5 = sld [smem:[%s15799_s0 + %s13681_s22]]   ;;  %s13685_s22 = smov 24  }
  0x26   :  { %s13874_s4 = sld [smem:[%s15799_s0 + %s13682_s28]]   ;;  %s13686_s28 = smov 25  }
  0x27   :  { %s13884_s9 = sld [smem:[%s15799_s0 + %s13684_s15]]   ;;  %s13688_s15 = smov 27  }
  0x28   :  { %15886 = sst [smem:[#allocation94_spill]] %s13859_s6 }
  0x29   :  { %s13879_s6 = sld [smem:[%s15799_s0 + %s13683_s7]]   ;;  %s13687_s7 = smov 26  }
  0x2a   :  { %15887 = sst [smem:[#allocation95_spill]] %s13864_s13 }
  0x2b   :  { %15888 = sst [smem:[#allocation96_spill]] %s13869_s5 }
  0x2c   :  { %15889 = sst [smem:[#allocation97_spill]] %s13874_s4 }
  0x2d   :  { %15891 = sst [smem:[#allocation99_spill]] %s13884_s9 }
  0x2e   :  { %s13889_s13 = sld [smem:[%s15799_s0 + %s13685_s22]]   ;;  %s13689_s22 = smov 28  }
  0x2f   :  { %15890 = sst [smem:[#allocation98_spill]] %s13879_s6 }
  0x30   :  { %s13894_s4 = sld [smem:[%s15799_s0 + %s13686_s28]]   ;;  %s13690_s28 = smov 29  }
  0x31   :  { %s13899_s20 = sld [smem:[%s15799_s0 + %s13687_s7]]   ;;  %s13691_s7 = smov 30  }
  0x32   :  { %s13904_s9 = sld [smem:[%s15799_s0 + %s13688_s15]]   ;;  %s13692_s15 = smov 31  }
  0x34   :  { %15892 = sst [smem:[#allocation100_spill]] %s13889_s13 }
  0x35   :  { %s13909_s13 = sld [smem:[%s15799_s0 + %s13689_s22]]   ;;  %s13693_s22 = smov 32  }
  0x36   :  { %15893 = sst [smem:[#allocation101_spill]] %s13894_s4 }
  0x37   :  { %15894 = sst [smem:[#allocation102_spill]] %s13899_s20 }
  0x38   :  { %15895 = sst [smem:[#allocation103_spill]] %s13904_s9 }
  0x39   :  { %s13914_s4 = sld [smem:[%s15799_s0 + %s13690_s28]]   ;;  %s13694_s28 = smov 33  }
  0x3a   :  { %s13919_s20 = sld [smem:[%s15799_s0 + %s13691_s7]]   ;;  %s13695_s7 = smov 34  }
  0x3b   :  { %15896 = sst [smem:[#allocation104_spill]] %s13909_s13 }
  0x3c   :  { %s13924_s9 = sld [smem:[%s15799_s0 + %s13692_s15]]   ;;  %s13696_s15 = smov 35  }
  0x3d   :  { %s13929_s30 = sld [smem:[%s15799_s0 + %s13693_s22]]   ;;  %s13697_s22 = smov 36  }
  0x3e   :  { %s13944_s19 = sld [smem:[%s15799_s0 + %s13696_s15]]   ;;  %s13700_s15 = smov 39  }
  0x3f   :  { %15897 = sst [smem:[#allocation105_spill]] %s13914_s4 }
  0x40   :  { %15898 = sst [smem:[#allocation106_spill]] %s13919_s20 }
  0x41   :  { %s13934_s4 = sld [smem:[%s15799_s0 + %s13694_s28]]   ;;  %s13698_s28 = smov 37  }
  0x42   :  { %15899 = sst [smem:[#allocation107_spill]] %s13924_s9 }
  0x43   :  { %15900 = sst [smem:[#allocation108_spill]] %s13929_s30 }
  0x44   :  { %s13939_s20 = sld [smem:[%s15799_s0 + %s13695_s7]]   ;;  %s13699_s7 = smov 38  }
  0x45   :  { %15903 = sst [smem:[#allocation111_spill]] %s13944_s19 }
  0x46   :  { %s13949_s30 = sld [smem:[%s15799_s0 + %s13697_s22]]   ;;  %s13701_s22 = smov 40  }
  0x47   :  { %15901 = sst [smem:[#allocation109_spill]] %s13934_s4 }
  0x48   :  { %s13954_s4 = sld [smem:[%s15799_s0 + %s13698_s28]]   ;;  %s13702_s28 = smov 41  }
  0x49   :  { %s13964_s19 = sld [smem:[%s15799_s0 + %s13700_s15]]   ;;  %s13704_s15 = smov 43  }
  0x4a   :  { %15902 = sst [smem:[#allocation110_spill]] %s13939_s20 }
  0x4b   :  { %s13959_s20 = sld [smem:[%s15799_s0 + %s13699_s7]]   ;;  %s13703_s7 = smov 42  }
  0x4c   :  { %s13969_s8 = sld [smem:[%s15799_s0 + %s13701_s22]]   ;;  %s13705_s22 = smov 44  }
  0x4d   :  { %s13989_s29 = sld [smem:[%s15799_s0 + %s13705_s22]]   ;;  %s13709_s22 = smov 48  }
  0x4e   :  { %15904 = sst [smem:[#allocation112_spill]] %s13954_s4 }
  0x4f   :  { %15906 = sst [smem:[#allocation114_spill]] %s13964_s19 }
  0x50   :  { %s13974_s4 = sld [smem:[%s15799_s0 + %s13702_s28]]   ;;  %s13706_s28 = smov 45  }
  0x51   :  { %15905 = sst [smem:[#allocation113_spill]] %s13959_s20 }
  0x52   :  { %15907 = sst [smem:[#allocation115_spill]] %s13969_s8 }
  0x53   :  { %s13979_s20 = sld [smem:[%s15799_s0 + %s13703_s7]]   ;;  %s13707_s7 = smov 46  }
  0x54   :  { %s13984_s19 = sld [smem:[%s15799_s0 + %s13704_s15]]   ;;  %s13708_s15 = smov 47  }
  0x55   :  { %15910 = sst [smem:[#allocation118_spill]] %s13989_s29 }
  0x56   :  { %15908 = sst [smem:[#allocation116_spill]] %s13974_s4 }
  0x57   :  { %s13994_s4 = sld [smem:[%s15799_s0 + %s13706_s28]]   ;;  %s13710_s28 = smov 49  }
  0x58   :  { %s13999_s21 = sld [smem:[%s15799_s0 + %s13707_s7]]   ;;  %s13711_s7 = smov 50  }
  0x59   :  { %s14009_s29 = sld [smem:[%s15799_s0 + %s13709_s22]]   ;;  %s13713_s22 = smov 52  }
  0x5a   :  { %15909 = sst [smem:[#allocation117_spill]] %s13984_s19 }
  0x5b   :  { %s14004_s19 = sld [smem:[%s15799_s0 + %s13708_s15]]   ;;  %s13712_s15 = smov 51  }
  0x5d   :  { %15911 = sst [smem:[#allocation119_spill]] %s13994_s4 }
  0x5e   :  { %15912 = sst [smem:[#allocation120_spill]] %s13999_s21 }
  0x5f   :  { %15914 = sst [smem:[#allocation122_spill]] %s14009_s29 }
  0x60   :  { %s14014_s4 = sld [smem:[%s15799_s0 + %s13710_s28]]   ;;  %s13714_s28 = smov 53  }
  0x61   :  { %15913 = sst [smem:[#allocation121_spill]] %s14004_s19 }
  0x62   :  { %s14019_s21 = sld [smem:[%s15799_s0 + %s13711_s7]]   ;;  %s13715_s7 = smov 54  }
  0x63   :  { %s14024_s19 = sld [smem:[%s15799_s0 + %s13712_s15]]  }
  0x64   :  { %s14029_s29 = sld [smem:[%s15799_s0 + %s13713_s22]]  }
  0x66   :  { %15915 = sst [smem:[#allocation123_spill]] %s14014_s4 }
  0x67   :  { %s14034_s4 = sld [smem:[%s15799_s0 + %s13714_s28]]  }
  0x68   :  { %15916 = sst [smem:[#allocation124_spill]] %s14019_s21 }
  0x69   :  { %15917 = sst [smem:[#allocation125_spill]] %s14024_s19 }
  0x6a   :  { %15918 = sst [smem:[#allocation126_spill]] %s14029_s29 }
  0x6b   :  { %s10101_s21 = sld [smem:[%s15799_s0 + %s13715_s7]]  }
  0x6c   :  { %s14042_s19 = sld [smem:[%s15799_s0 + %s13716_s16]]  }
  0x6d   :  { %15919 = sst [smem:[#allocation127_spill]] %s14034_s4 }
  0x6e   :  { %s14047_s29 = sld [smem:[%s15799_s0 + %s13717_s23]]  }
  0x71   :  { %v119_v0 = vstv %s10101_s21 }
  0x72   :  { %120 = vst [vmem:[#allocation3] sm:$0x1] %v119_v0 }
  0x74   :  { %15920 = sst [smem:[#allocation128_spill]] %s14047_s29 }
  0x75   :  { %121 = vsyncpa [#allocation5], 0 }
  0x76   :  { %123 = vsyncpa [#allocation5 + $0x1], 0 }
  0x77   :  { %124 = vsyncpa [#allocation8], 0 }
  0x78   :  { %125 = vsyncpa [#allocation11], 0 }
  0x79   :  { %126 = vsyncpa [#allocation14], 0 }
  0x7a   :  { %127 = vsyncpa [#allocation17], 0 }
  0x7b   :  { %128 = vsyncpa [#allocation20], 0 }
  0x7c   :  { %129 = vsyncpa [#allocation23], 0 }
  0x7d   :  { %130 = vsyncpa [#allocation26], 0 }
  0x7e   :  { %131 = vsyncpa [#allocation29], 0 }
  0x7f   :  { %132 = vsyncpa [#allocation32], 0 }
  0x80   :  { %133 = vsyncpa [#allocation35], 0 }
  0x81   :  { %134 = vsyncpa [#allocation38], 0 }
  0x82   :  { %135 = vsyncpa [#allocation41], 0 }
  0x83   :  { %136 = vsyncpa [#allocation44], 0 }
  0x84   :  { %137 = vsyncpa [#allocation47], 0 }
  0x85   :  { %138 = vsyncpa [#allocation50], 0 }
  0x86   :  { %139 = vsyncpa [#allocation53], 0 }
  0x87   :  { %140 = vsyncpa [#allocation56], 0 }
  0x88   :  { %141 = vsyncpa [#allocation6], 0 }
  0x89   :  { %143 = vsyncpa [#allocation6 + $0x1], 0  ;;  %s14049_s0 = smov 0   ;;  %s14051_s21 = smov 0  }
  0x8a   :  { %s14053_s28 = smov 0   ;;  %s14055_s1 = smov 0  }
  0x8b LB: > { %s15921_s4 = sld [smem:[#allocation127_spill]]  ;;  %s15923_s13 = sld [smem:[#allocation104_spill]]  ;;  %s13656_s28 = sphi %s14053_s28, %s16037_s28   ;;  %s13652_s21 = sphi %s14051_s21, %s16036_s21   ;;  %s13648_s0 = sphi %s14049_s0, %s16035_s0   ;;  %s13660_s1 = sphi %s14055_s1, %s16033_s1  }
  0x8c   : > { %s15922_s14 = sld [smem:[#allocation87_spill]]  ;;  %s15924_s12 = sld [smem:[#allocation91_spill]] }
  0x8d   : > { %s15925_s9 = sld [smem:[#allocation107_spill]]  ;;  %s15927_s6 = sld [smem:[#allocation98_spill]] }
  0x8e   : > { %s15926_s8 = sld [smem:[#allocation115_spill]]  ;;  %s15928_s5 = sld [smem:[#allocation96_spill]] }
  0x8f   : > { %s15929_s3 = sld [smem:[#allocation85_spill]]  ;;  %s15930_s25 = sld [smem:[#allocation83_spill]] }
  0x90   : > { %s15931_s17 = sld [smem:[#allocation81_spill]]  ;;  %15932 = sst [smem:[#allocation129_spill]] %s13648_s0 }
  0x91   : > { %s14070_s2 = sadd.s32 4294967295, %s13660_s1   ;;  %s10105_s7 = sadd.s32 4294967294, %s13660_s1  }
  0x92   : > { %s14074_s10 = sadd.s32 1, %s13660_s1   ;;  %s182_s11 = sadd.s32 1, %s13656_s28 }
  0x93   : > { %15933 = sst [smem:[#allocation130_spill]] %s14074_s10  ;;  %s179_s16 = ssub.s32 %s13660_s1, %s14074_s10 }
  0x94   : > { %p189_p0 = scmp.ne.s32.totalorder %s13656_s28, %s13652_s21  ;;  %p180_p1 = scmp.eq.s32.totalorder %s179_s16, 0 }
  0x95   : > { %p190_p2 = scmp.eq.s32.totalorder %s13660_s1, 0  ;;  %p195_p3 = scmp.ne.s32.totalorder %s13652_s21, %s13648_s0 }
  0x96   : > { %p15863_p4 = scmp.eq.s32.totalorder %s14070_s2, 0  ;;  %p1337_p7 = scmp.eq.s32.totalorder %s14070_s2, 1 }
  0x97   : > { %s14086_s15 = scalar_select %p180_p1, %s13656_s28, %s182_s11  }
  0x98   : > { %p14088_p5 = por %p190_p2, %p189_p0  ;;  %p14094_p6 = por %p15863_p4, %p195_p3 }
  0x99   : > { %15934 = sst [smem:[#allocation131_spill]] %s14086_s15  ;;  %p1343_p8 = scmp.eq.s32.totalorder %s10105_s7, 1 }
  0x9a   : > { %s15936_s23 = scalar_select %p14094_p6, 1, 0 }
  0x9b   : > { %p10106_p9 = scmp.ge.s32.totalorder %s13660_s1, 1  ;;  %p1376_p10 = scmp.lt.s32.totalorder %s13660_s1, 3 }
  0x9c   : > { %p14101_p11 = por %p1337_p7, %p189_p0  ;;  %p14105_p12 = por %p1343_p8, %p195_p3 }
  0x9d   : > { %p14109_p13 = pnand %p10106_p9, %p1376_p10 }
  0x9e   : > { %s15937_s22 = scalar_select %p14101_p11, 1, 0 }
  0x9f   : > { %s15938_s26 = scalar_select %p14105_p12, 1, 0 }
  0xa0   : > { %s15940_s11 = scalar_select %p14109_p13, 1, 0 }
  0xa1   : > { %15939 = sst [smem:[#allocation132_spill]] %s15938_s26  ;;  %1380 = sbr.rel (%p14109_p13) target bundleno = 989 (0x3dd), region = 12 }
  0xa2   : > { %s13718_s16 = smov (!%p14109_p13), [#allocation7]   ;;  %s13719_s15 = smov (!%p14109_p13), [#allocation10]  }
  0xa3   : > { %s1389_s7 = sshll.u32 (!%p14109_p13), %s13718_s16, 4  ;;  %s1411_s10 = sshll.u32 (!%p14109_p13), %s13719_s15, 4  ;;  %s1390_s7 = int_to_ptr.vmem [resolvable:$true] %s1389_s7  ;;  %s1412_s10 = int_to_ptr.vmem [resolvable:$true] %s1411_s10 }
  0xa4   : > { %s12612_s0 = scalar_lea.hbm (!%p14109_p13), %s15931_s17, 64 }
  0xa5   : > { %p12613_p0 = scmp.ne.s32.totalorder (!%p14109_p13), %s15931_s17, %s12612_s0  ;;  %p12618_p3 = scmp.lt.u32.totalorder (!%p14109_p13), %s12612_s0, %s15931_s17 }
  0xa7   : > { %p12614_p1 = pnand (!%p14109_p13), %p12613_p0, %p15863_p4 }
  0xa9   : > { %p12615_p2 = pneg %p12614_p1 }
  0xab   : > { %p12620_p7 = pnand %p12618_p3, %p12615_p2 }
  0xad   : > { %12623 = shalt.err (!%p12620_p7)
}
  0xae   : > { %s12624_s26 = scalar_lea.vmem %s1390_s7, 64  ;;  %p12631_p12 = scmp.lt.s32.totalorder %s1390_s7, %s1390_s7 }
  0xaf   : > { %p12625_p8 = scmp.ne.s32.totalorder %s1390_s7, %s12624_s26  ;;  %p12632_p11 = scmp.lt.s32.totalorder %s12624_s26, %s12624_s26 }
  0xb1   : > { %p12626_p9 = pnand %p12625_p8, %p15863_p4  ;;  %p12633_p6 = por %p12632_p11, %p12631_p12 }
  0xb3   : > { %p12627_p10 = pneg %p12626_p9 }
  0xb5   : > { %p12634_p13 = pnand %p12633_p6, %p12627_p10 }
  0xb7   : > { %12637 = shalt.err (!%p12634_p13)
}
  0xb8   : > { %12162 = dma.hbm_to_vmem [thread:$0]  (%p15863_p4), %s15931_s17, 64, %s1390_s7, [#allocation8]  }
  0xb9   : > { %s12638_s0 = scalar_lea.hbm %s15930_s25, 128 }
  0xba   : > { %p12639_p0 = scmp.ne.s32.totalorder %s15930_s25, %s12638_s0  ;;  %p12644_p3 = scmp.lt.u32.totalorder %s12638_s0, %s15930_s25 }
  0xbc   : > { %p12640_p1 = pnand %p12639_p0, %p15863_p4 }
  0xbe   : > { %p12641_p2 = pneg %p12640_p1 }
  0xc0   : > { %p12646_p7 = pnand %p12644_p3, %p12641_p2 }
  0xc2   : > { %12649 = shalt.err (!%p12646_p7)
}
  0xc3   : > { %s12650_s15 = scalar_lea.vmem %s1412_s10, 128  ;;  %p12657_p13 = scmp.lt.s32.totalorder %s1412_s10, %s1412_s10 }
  0xc4   : > { %p12651_p6 = scmp.ne.s32.totalorder %s1412_s10, %s12650_s15  ;;  %p12658_p8 = scmp.lt.s32.totalorder %s12650_s15, %s12650_s15 }
  0xc6   : > { %p12652_p11 = pnand %p12651_p6, %p15863_p4  ;;  %p12659_p9 = por %p12658_p8, %p12657_p13 }
  0xc8   : > { %p12653_p12 = pneg %p12652_p11 }
  0xca   : > { %p12660_p10 = pnand %p12659_p9, %p12653_p12 }
  0xcc   : > { %12663 = shalt.err (!%p12660_p10)
}
  0xcd   : > { %12166 = dma.hbm_to_vmem [thread:$0]  (%p15863_p4), %s15930_s25, 128, %s1412_s10, [#allocation11]  }
  0xce   : > { %s13720_s26 = smov [#allocation13]   ;;  %s12664_s7 = scalar_lea.hbm %s15929_s3, 384 }
  0xcf   : > { %s1432_s16 = sshll.u32 %s13720_s26, 4  ;;  %p12665_p0 = scmp.ne.s32.totalorder %s15929_s3, %s12664_s7  ;;  %s1433_s16 = int_to_ptr.vmem [resolvable:$true] %s1432_s16 }
  0xd0   : > { %p12670_p3 = scmp.lt.u32.totalorder %s12664_s7, %s15929_s3 }
  0xd1   : > { %p12666_p1 = pnand %p12665_p0, %p15863_p4 }
  0xd3   : > { %p12667_p2 = pneg %p12666_p1 }
  0xd5   : > { %p12672_p7 = pnand %p12670_p3, %p12667_p2 }
  0xd7   : > { %12675 = shalt.err (!%p12672_p7)
}
  0xd8   : > { %s12676_s0 = scalar_lea.vmem %s1433_s16, 384  ;;  %p12683_p13 = scmp.lt.s32.totalorder %s1433_s16, %s1433_s16 }
  0xd9   : > { %p12677_p6 = scmp.ne.s32.totalorder %s1433_s16, %s12676_s0  ;;  %p12684_p8 = scmp.lt.s32.totalorder %s12676_s0, %s12676_s0 }
  0xdb   : > { %p12678_p11 = pnand %p12677_p6, %p15863_p4  ;;  %p12685_p9 = por %p12684_p8, %p12683_p13 }
  0xdd   : > { %p12679_p12 = pneg %p12678_p11 }
  0xdf   : > { %p12686_p10 = pnand %p12685_p9, %p12679_p12 }
  0xe1   : > { %12689 = shalt.err (!%p12686_p10)
}
  0xe2   : > { %s15836_s10 = smov 128   ;;  %s15838_s15 = smov 8  }
  0xe3   : > { %12170 = dma.hbm_to_vmem [thread:$0]  (%p15863_p4), %s15929_s3, 384, %s1433_s16, [#allocation14], %s15836_s10, %s15836_s10, %s15838_s15  }
  0xe4   : > { %s13723_s26 = smov [#allocation16]   ;;  %s13724_s17 = smov [#allocation19]  }
  0xe5   : > { %s1456_s7 = sshll.u32 %s13723_s26, 4  ;;  %s1482_s0 = sshll.u32 %s13724_s17, 4  ;;  %s1457_s7 = int_to_ptr.vmem [resolvable:$true] %s1456_s7  ;;  %s14148_s0 = int_to_ptr.vmem [resolvable:$true] %s1482_s0 }
  0xe6   : > { %s12690_s25 = scalar_lea.hbm %s15922_s14, 2048 }
  0xe7   : > { %p12691_p0 = scmp.ne.s32.totalorder %s15922_s14, %s12690_s25  ;;  %p12696_p3 = scmp.lt.u32.totalorder %s12690_s25, %s15922_s14 }
  0xe9   : > { %p12692_p1 = pnand %p12691_p0, %p15863_p4 }
  0xeb   : > { %p12693_p2 = pneg %p12692_p1 }
  0xed   : > { %p12698_p7 = pnand %p12696_p3, %p12693_p2 }
  0xef   : > { %12701 = shalt.err (!%p12698_p7)
}
  0xf0   : > { %s12702_s29 = scalar_lea.vmem %s1457_s7, 2048  ;;  %p12709_p13 = scmp.lt.s32.totalorder %s1457_s7, %s1457_s7 }
  0xf1   : > { %p12703_p6 = scmp.ne.s32.totalorder %s1457_s7, %s12702_s29  ;;  %p12710_p8 = scmp.lt.s32.totalorder %s12702_s29, %s12702_s29 }
  0xf3   : > { %p12704_p11 = pnand %p12703_p6, %p15863_p4  ;;  %p12711_p9 = por %p12710_p8, %p12709_p13 }
  0xf5   : > { %p12705_p12 = pneg %p12704_p11 }
  0xf7   : > { %p12712_p10 = pnand %p12711_p9, %p12705_p12 }
  0xf9   : > { %12715 = shalt.err (!%p12712_p10)
}
  0xfa   : > { %12174 = dma.hbm_to_vmem [thread:$0]  (%p15863_p4), %s15922_s14, 2048, %s1457_s7, [#allocation17], %s15836_s10, %s15836_s10, %s15838_s15  }
  0xfb   : > { %s12716_s17 = scalar_lea.hbm %s13824_s24, 2048 }
  0xfc   : > { %p12717_p0 = scmp.ne.s32.totalorder %s13824_s24, %s12716_s17  ;;  %p12722_p3 = scmp.lt.u32.totalorder %s12716_s17, %s13824_s24 }
  0xfe   : > { %p12718_p1 = pnand %p12717_p0, %p15863_p4 }
 0x100   : > { %p12719_p2 = pneg %p12718_p1 }
 0x102   : > { %p12724_p7 = pnand %p12722_p3, %p12719_p2 }
 0x104   : > { %12727 = shalt.err (!%p12724_p7)
}
 0x105   : > { %s12728_s25 = scalar_lea.vmem %s14148_s0, 2048  ;;  %p12735_p13 = scmp.lt.s32.totalorder %s14148_s0, %s14148_s0 }
 0x106   : > { %p12729_p6 = scmp.ne.s32.totalorder %s14148_s0, %s12728_s25  ;;  %p12736_p8 = scmp.lt.s32.totalorder %s12728_s25, %s12728_s25 }
 0x108   : > { %p12730_p11 = pnand %p12729_p6, %p15863_p4  ;;  %p12737_p9 = por %p12736_p8, %p12735_p13 }
 0x10a   : > { %p12731_p12 = pneg %p12730_p11 }
 0x10c   : > { %p12738_p10 = pnand %p12737_p9, %p12731_p12 }
 0x10e   : > { %12741 = shalt.err (!%p12738_p10)
}
 0x10f   : > { %12178 = dma.hbm_to_vmem [thread:$0]  (%p15863_p4), %s13824_s24, 2048, %s14148_s0, [#allocation20], %s15836_s10, %s15836_s10, %s15838_s15  }
 0x110   : > { %s13725_s29 = smov [#allocation22]   ;;  %s13726_s26 = smov [#allocation25]  }
 0x111   : > { %s1511_s16 = sshll.u32 %s13725_s29, 4  ;;  %s1538_s7 = sshll.u32 %s13726_s26, 4  ;;  %s1512_s16 = int_to_ptr.vmem [resolvable:$true] %s1511_s16  ;;  %s14181_s7 = int_to_ptr.vmem [resolvable:$true] %s1538_s7 }
 0x112   : > { %s12742_s17 = scalar_lea.hbm %s15924_s12, 64 }
 0x113   : > { %p12743_p0 = scmp.ne.s32.totalorder %s15924_s12, %s12742_s17  ;;  %p12748_p3 = scmp.lt.u32.totalorder %s12742_s17, %s15924_s12 }
 0x115   : > { %p12744_p1 = pnand %p12743_p0, %p15863_p4 }
 0x117   : > { %p12745_p2 = pneg %p12744_p1 }
 0x119   : > { %p12750_p7 = pnand %p12748_p3, %p12745_p2 }
 0x11b   : > { %12753 = shalt.err (!%p12750_p7)
}
 0x11c   : > { %s12754_s25 = scalar_lea.vmem %s1512_s16, 64  ;;  %p12761_p13 = scmp.lt.s32.totalorder %s1512_s16, %s1512_s16 }
 0x11d   : > { %p12755_p6 = scmp.ne.s32.totalorder %s1512_s16, %s12754_s25  ;;  %p12762_p8 = scmp.lt.s32.totalorder %s12754_s25, %s12754_s25 }
 0x11f   : > { %p12756_p11 = pnand %p12755_p6, %p15863_p4  ;;  %p12763_p9 = por %p12762_p8, %p12761_p13 }
 0x121   : > { %p12757_p12 = pneg %p12756_p11 }
 0x123   : > { %p12764_p10 = pnand %p12763_p9, %p12757_p12 }
 0x125   : > { %12767 = shalt.err (!%p12764_p10)
}
 0x126   : > { %s15840_s0 = smov 16   ;;  %s15842_s29 = smov 1  }
 0x127   : > { %12182 = dma.hbm_to_vmem [thread:$0]  (%p15863_p4), %s15924_s12, 64, %s1512_s16, [#allocation23], %s15840_s0, %s15840_s0, %s15842_s29  }
 0x128   : > { %s12768_s26 = scalar_lea.hbm %s13849_s27, 16 }
 0x129   : > { %p12769_p0 = scmp.ne.s32.totalorder %s13849_s27, %s12768_s26  ;;  %p12774_p3 = scmp.lt.u32.totalorder %s12768_s26, %s13849_s27 }
 0x12b   : > { %p12770_p1 = pnand %p12769_p0, %p15863_p4 }
 0x12d   : > { %p12771_p2 = pneg %p12770_p1 }
 0x12f   : > { %p12776_p7 = pnand %p12774_p3, %p12771_p2 }
 0x131   : > { %12779 = shalt.err (!%p12776_p7)
}
 0x132   : > { %s12780_s17 = scalar_lea.vmem %s14181_s7, 16  ;;  %s12786_s25 = scalar_lea.vmem %s14181_s7, 32 }
 0x133   : > { %p12781_p6 = scmp.ne.s32.totalorder %s14181_s7, %s12780_s17  ;;  %p12787_p13 = scmp.lt.s32.totalorder %s14181_s7, %s14181_s7 }
 0x134   : > { %p12788_p8 = scmp.lt.s32.totalorder %s12786_s25, %s12780_s17 }
 0x135   : > { %p12782_p11 = pnand %p12781_p6, %p15863_p4 }
 0x136   : > { %p12789_p9 = por %p12788_p8, %p12787_p13 }
 0x137   : > { %p12783_p12 = pneg %p12782_p11 }
 0x139   : > { %p12790_p10 = pnand %p12789_p9, %p12783_p12 }
 0x13b   : > { %12793 = shalt.err (!%p12790_p10)
}
 0x13c   : > { %12186 = dma.hbm_to_vmem [thread:$0]  (%p15863_p4), %s13849_s27, 16, %s14181_s7, [#allocation26]  }
 0x13d   : > { %s13729_s16 = smov [#allocation28]   ;;  %s13730_s10 = smov [#allocation31]  }
 0x13e   : > { %s1568_s26 = sshll.u32 %s13729_s16, 4  ;;  %s1592_s15 = sshll.u32 %s13730_s10, 4  ;;  %s1569_s26 = int_to_ptr.vmem [resolvable:$true] %s1568_s26  ;;  %s14212_s15 = int_to_ptr.vmem [resolvable:$true] %s1592_s15 }
 0x13f   : > { %s12794_s17 = scalar_lea.hbm %s15928_s5, 16 }
 0x140   : > { %p12795_p0 = scmp.ne.s32.totalorder %s15928_s5, %s12794_s17  ;;  %p12800_p3 = scmp.lt.u32.totalorder %s12794_s17, %s15928_s5 }
 0x142   : > { %p12796_p1 = pnand %p12795_p0, %p15863_p4 }
 0x144   : > { %p12797_p2 = pneg %p12796_p1 }
 0x146   : > { %p12802_p7 = pnand %p12800_p3, %p12797_p2 }
 0x148   : > { %12805 = shalt.err (!%p12802_p7)
}
 0x149   : > { %s12806_s25 = scalar_lea.vmem %s1569_s26, 16  ;;  %s12812_s7 = scalar_lea.vmem %s1569_s26, 32 }
 0x14a   : > { %p12807_p6 = scmp.ne.s32.totalorder %s1569_s26, %s12806_s25  ;;  %p12813_p13 = scmp.lt.s32.totalorder %s1569_s26, %s1569_s26 }
 0x14b   : > { %p12814_p8 = scmp.lt.s32.totalorder %s12812_s7, %s12806_s25 }
 0x14c   : > { %p12808_p11 = pnand %p12807_p6, %p15863_p4 }
 0x14d   : > { %p12815_p9 = por %p12814_p8, %p12813_p13 }
 0x14e   : > { %p12809_p12 = pneg %p12808_p11 }
 0x150   : > { %p12816_p10 = pnand %p12815_p9, %p12809_p12 }
 0x152   : > { %12819 = shalt.err (!%p12816_p10)
}
 0x153   : > { %12190 = dma.hbm_to_vmem [thread:$0]  (%p15863_p4), %s15928_s5, 16, %s1569_s26, [#allocation29]  }
 0x154   : > { %s12820_s10 = scalar_lea.hbm %s15927_s6, 16 }
 0x155   : > { %p12821_p0 = scmp.ne.s32.totalorder %s15927_s6, %s12820_s10  ;;  %p12826_p3 = scmp.lt.u32.totalorder %s12820_s10, %s15927_s6 }
 0x157   : > { %p12822_p1 = pnand %p12821_p0, %p15863_p4 }
 0x159   : > { %p12823_p2 = pneg %p12822_p1 }
 0x15b   : > { %p12828_p7 = pnand %p12826_p3, %p12823_p2 }
 0x15d   : > { %12831 = shalt.err (!%p12828_p7)
}
 0x15e   : > { %s12832_s16 = scalar_lea.vmem %s14212_s15, 16  ;;  %s12838_s17 = scalar_lea.vmem %s14212_s15, 32 }
 0x15f   : > { %p12833_p6 = scmp.ne.s32.totalorder %s14212_s15, %s12832_s16  ;;  %p12839_p13 = scmp.lt.s32.totalorder %s14212_s15, %s14212_s15 }
 0x160   : > { %p12840_p8 = scmp.lt.s32.totalorder %s12838_s17, %s12832_s16 }
 0x161   : > { %p12834_p11 = pnand %p12833_p6, %p15863_p4 }
 0x162   : > { %p12841_p9 = por %p12840_p8, %p12839_p13 }
 0x163   : > { %p12835_p12 = pneg %p12834_p11 }
 0x165   : > { %p12842_p10 = pnand %p12841_p9, %p12835_p12 }
 0x167   : > { %12845 = shalt.err (!%p12842_p10)
}
 0x168   : > { %12194 = dma.hbm_to_vmem [thread:$0]  (%p15863_p4), %s15927_s6, 16, %s14212_s15, [#allocation32]  }
 0x169   : > { %s13731_s26 = smov [#allocation34]   ;;  %s13732_s7 = smov [#allocation37]  }
 0x16a   : > { %s1627_s25 = sshll.u32 %s13731_s26, 4  ;;  %s1656_s10 = sshll.u32 %s13732_s7, 4  ;;  %s1628_s25 = int_to_ptr.vmem [resolvable:$true] %s1627_s25  ;;  %s14240_s10 = int_to_ptr.vmem [resolvable:$true] %s1656_s10 }
 0x16b   : > { %s12846_s16 = scalar_lea.hbm %s15923_s13, 64 }
 0x16c   : > { %p12847_p0 = scmp.ne.s32.totalorder %s15923_s13, %s12846_s16  ;;  %p12852_p3 = scmp.lt.u32.totalorder %s12846_s16, %s15923_s13 }
 0x16e   : > { %p12848_p1 = pnand %p12847_p0, %p15863_p4 }
 0x170   : > { %p12849_p2 = pneg %p12848_p1 }
 0x172   : > { %p12854_p7 = pnand %p12852_p3, %p12849_p2 }
 0x174   : > { %12857 = shalt.err (!%p12854_p7)
}
 0x175   : > { %s12858_s17 = scalar_lea.vmem %s1628_s25, 64  ;;  %p12865_p13 = scmp.lt.s32.totalorder %s1628_s25, %s1628_s25 }
 0x176   : > { %p12859_p6 = scmp.ne.s32.totalorder %s1628_s25, %s12858_s17  ;;  %p12866_p8 = scmp.lt.s32.totalorder %s12858_s17, %s12858_s17 }
 0x178   : > { %p12860_p11 = pnand %p12859_p6, %p15863_p4  ;;  %p12867_p9 = por %p12866_p8, %p12865_p13 }
 0x17a   : > { %p12861_p12 = pneg %p12860_p11 }
 0x17c   : > { %p12868_p10 = pnand %p12867_p9, %p12861_p12 }
 0x17e   : > { %12871 = shalt.err (!%p12868_p10)
}
 0x17f   : > { %12198 = dma.hbm_to_vmem [thread:$0]  (%p15863_p4), %s15923_s13, 64, %s1628_s25, [#allocation35], %s15840_s0, %s15840_s0, %s15842_s29  }
 0x180   : > { %s12872_s15 = scalar_lea.hbm %s15925_s9, 512 }
 0x181   : > { %p12873_p0 = scmp.ne.s32.totalorder %s15925_s9, %s12872_s15  ;;  %p12878_p3 = scmp.lt.u32.totalorder %s12872_s15, %s15925_s9 }
 0x183   : > { %p12874_p1 = pnand %p12873_p0, %p15863_p4 }
 0x185   : > { %p12875_p2 = pneg %p12874_p1 }
 0x187   : > { %p12880_p7 = pnand %p12878_p3, %p12875_p2 }
 0x189   : > { %12883 = shalt.err (!%p12880_p7)
}
 0x18a   : > { %s12884_s26 = scalar_lea.vmem %s14240_s10, 512  ;;  %p12891_p13 = scmp.lt.s32.totalorder %s14240_s10, %s14240_s10 }
 0x18b   : > { %p12885_p6 = scmp.ne.s32.totalorder %s14240_s10, %s12884_s26  ;;  %p12892_p8 = scmp.lt.s32.totalorder %s12884_s26, %s12884_s26 }
 0x18d   : > { %p12886_p11 = pnand %p12885_p6, %p15863_p4  ;;  %p12893_p9 = por %p12892_p8, %p12891_p13 }
 0x18f   : > { %p12887_p12 = pneg %p12886_p11 }
 0x191   : > { %p12894_p10 = pnand %p12893_p9, %p12887_p12 }
 0x193   : > { %12897 = shalt.err (!%p12894_p10)
}
 0x194   : > { %s15941_s25 = smov 8   ;;  %s15942_s7 = smov 128  }
 0x195   : > { %12202 = dma.hbm_to_vmem [thread:$0]  (%p15863_p4), %s15925_s9, 512, %s14240_s10, [#allocation38], %s15942_s7, %s15942_s7, %s15941_s25  }
 0x196   : > { %s13733_s16 = smov [#allocation40]   ;;  %s13734_s15 = smov [#allocation43]  }
 0x197   : > { %s1689_s17 = sshll.u32 %s13733_s16, 4  ;;  %s1721_s0 = sshll.u32 %s13734_s15, 4  ;;  %s1690_s17 = int_to_ptr.vmem [resolvable:$true] %s1689_s17  ;;  %s14273_s0 = int_to_ptr.vmem [resolvable:$true] %s1721_s0 }
 0x198   : > { %s12898_s26 = scalar_lea.hbm %s13949_s30, 64 }
 0x199   : > { %p12899_p0 = scmp.ne.s32.totalorder %s13949_s30, %s12898_s26  ;;  %p12904_p3 = scmp.lt.u32.totalorder %s12898_s26, %s13949_s30 }
 0x19b   : > { %p12900_p1 = pnand %p12899_p0, %p15863_p4 }
 0x19d   : > { %p12901_p2 = pneg %p12900_p1 }
 0x19f   : > { %p12906_p7 = pnand %p12904_p3, %p12901_p2 }
 0x1a1   : > { %12909 = shalt.err (!%p12906_p7)
}
 0x1a2   : > { %s12910_s29 = scalar_lea.vmem %s1690_s17, 64  ;;  %p12917_p13 = scmp.lt.s32.totalorder %s1690_s17, %s1690_s17 }
 0x1a3   : > { %p12911_p6 = scmp.ne.s32.totalorder %s1690_s17, %s12910_s29  ;;  %p12918_p8 = scmp.lt.s32.totalorder %s12910_s29, %s12910_s29 }
 0x1a5   : > { %p12912_p11 = pnand %p12911_p6, %p15863_p4  ;;  %p12919_p9 = por %p12918_p8, %p12917_p13 }
 0x1a7   : > { %p12913_p12 = pneg %p12912_p11 }
 0x1a9   : > { %p12920_p10 = pnand %p12919_p9, %p12913_p12 }
 0x1ab   : > { %12923 = shalt.err (!%p12920_p10)
}
 0x1ac   : > { %s15943_s10 = smov 1   ;;  %s15944_s16 = smov 16  }
 0x1ad   : > { %12206 = dma.hbm_to_vmem [thread:$0]  (%p15863_p4), %s13949_s30, 64, %s1690_s17, [#allocation41], %s15944_s16, %s15944_s16, %s15943_s10  }
 0x1ae   : > { %s12924_s15 = scalar_lea.hbm %s15926_s8, 64 }
 0x1af   : > { %p12925_p0 = scmp.ne.s32.totalorder %s15926_s8, %s12924_s15  ;;  %p12930_p3 = scmp.lt.u32.totalorder %s12924_s15, %s15926_s8 }
 0x1b1   : > { %p12926_p1 = pnand %p12925_p0, %p15863_p4 }
 0x1b3   : > { %p12927_p2 = pneg %p12926_p1 }
 0x1b5   : > { %p12932_p7 = pnand %p12930_p3, %p12927_p2 }
 0x1b7   : > { %12935 = shalt.err (!%p12932_p7)
}
 0x1b8   : > { %s12936_s29 = scalar_lea.vmem %s14273_s0, 64  ;;  %p12943_p13 = scmp.lt.s32.totalorder %s14273_s0, %s14273_s0 }
 0x1b9   : > { %p12937_p6 = scmp.ne.s32.totalorder %s14273_s0, %s12936_s29  ;;  %p12944_p8 = scmp.lt.s32.totalorder %s12936_s29, %s12936_s29 }
 0x1bb   : > { %p12938_p11 = pnand %p12937_p6, %p15863_p4  ;;  %p12945_p9 = por %p12944_p8, %p12943_p13 }
 0x1bd   : > { %p12939_p12 = pneg %p12938_p11 }
 0x1bf   : > { %p12946_p10 = pnand %p12945_p9, %p12939_p12 }
 0x1c1   : > { %12949 = shalt.err (!%p12946_p10)
}
 0x1c2   : > { %12210 = dma.hbm_to_vmem [thread:$0]  (%p15863_p4), %s15926_s8, 64, %s14273_s0, [#allocation44], %s15944_s16, %s15944_s16, %s15943_s10  }
 0x1c3   : > { %s13735_s17 = smov [#allocation46]   ;;  %s13736_s15 = smov [#allocation49]  }
 0x1c4   : > { %s1748_s26 = sshll.u32 %s13735_s17, 4  ;;  %s1778_s3 = sshll.u32 %s13736_s15, 4  ;;  %s1749_s26 = int_to_ptr.vmem [resolvable:$true] %s1748_s26  ;;  %s14306_s3 = int_to_ptr.vmem [resolvable:$true] %s1778_s3 }
 0x1c5   : > { %s12950_s29 = scalar_lea.hbm %s13979_s20, 16 }
 0x1c6   : > { %p12951_p0 = scmp.ne.s32.totalorder %s13979_s20, %s12950_s29  ;;  %p12956_p3 = scmp.lt.u32.totalorder %s12950_s29, %s13979_s20 }
 0x1c8   : > { %p12952_p1 = pnand %p12951_p0, %p15863_p4 }
 0x1ca   : > { %p12953_p2 = pneg %p12952_p1 }
 0x1cc   : > { %p12958_p7 = pnand %p12956_p3, %p12953_p2 }
 0x1ce   : > { %12961 = shalt.err (!%p12958_p7)
}
 0x1cf   : > { %s12962_s5 = scalar_lea.vmem %s1749_s26, 16  ;;  %s12968_s0 = scalar_lea.vmem %s1749_s26, 32 }
 0x1d0   : > { %p12963_p6 = scmp.ne.s32.totalorder %s1749_s26, %s12962_s5  ;;  %p12969_p13 = scmp.lt.s32.totalorder %s1749_s26, %s1749_s26 }
 0x1d1   : > { %p12970_p8 = scmp.lt.s32.totalorder %s12968_s0, %s12962_s5 }
 0x1d2   : > { %p12964_p11 = pnand %p12963_p6, %p15863_p4 }
 0x1d3   : > { %p12971_p9 = por %p12970_p8, %p12969_p13 }
 0x1d4   : > { %p12965_p12 = pneg %p12964_p11 }
 0x1d6   : > { %p12972_p10 = pnand %p12971_p9, %p12965_p12 }
 0x1d8   : > { %12975 = shalt.err (!%p12972_p10)
}
 0x1d9   : > { %s15945_s17 = sld [smem:[#allocation120_spill]] }
 0x1da   : > { %12214 = dma.hbm_to_vmem [thread:$0]  (%p15863_p4), %s13979_s20, 16, %s1749_s26, [#allocation47]  }
 0x1df   : > { %s12976_s15 = scalar_lea.hbm %s15945_s17, 16 }
 0x1e0   : > { %p12977_p0 = scmp.ne.s32.totalorder %s15945_s17, %s12976_s15  ;;  %p12982_p3 = scmp.lt.u32.totalorder %s12976_s15, %s15945_s17 }
 0x1e2   : > { %p12978_p1 = pnand %p12977_p0, %p15863_p4 }
 0x1e4   : > { %p12979_p2 = pneg %p12978_p1 }
 0x1e6   : > { %p12984_p7 = pnand %p12982_p3, %p12979_p2 }
 0x1e8   : > { %12987 = shalt.err (!%p12984_p7)
}
 0x1e9   : > { %s12988_s5 = scalar_lea.vmem %s14306_s3, 16  ;;  %s12994_s29 = scalar_lea.vmem %s14306_s3, 32 }
 0x1ea   : > { %p12989_p6 = scmp.ne.s32.totalorder %s14306_s3, %s12988_s5  ;;  %p12995_p13 = scmp.lt.s32.totalorder %s14306_s3, %s14306_s3 }
 0x1eb   : > { %p12996_p8 = scmp.lt.s32.totalorder %s12994_s29, %s12988_s5 }
 0x1ec   : > { %p12990_p11 = pnand %p12989_p6, %p15863_p4 }
 0x1ed   : > { %p12997_p9 = por %p12996_p8, %p12995_p13 }
 0x1ee   : > { %p12991_p12 = pneg %p12990_p11 }
 0x1f0   : > { %p12998_p10 = pnand %p12997_p9, %p12991_p12 }
 0x1f2   : > { %13001 = shalt.err (!%p12998_p10)
}
 0x1f3   : > { %s15946_s26 = sld [smem:[#allocation122_spill]]  ;;  %s13737_s0 = smov [#allocation52]  }
 0x1f4   : > { %12218 = dma.hbm_to_vmem [thread:$0]  (%p15863_p4), %s15945_s17, 16, %s14306_s3, [#allocation50]  }
 0x1f5   : > { %s1802_s15 = sshll.u32 %s13737_s0, 4  ;;  %s13738_s6 = smov [#allocation55]   ;;  %s1803_s15 = int_to_ptr.vmem [resolvable:$true] %s1802_s15 }
 0x1f6   : > { %s1832_s8 = sshll.u32 %s13738_s6, 4  ;;  %s14334_s8 = int_to_ptr.vmem [resolvable:$true] %s1832_s8 }
 0x1f9   : > { %s13002_s5 = scalar_lea.hbm %s15946_s26, 16 }
 0x1fa   : > { %p13003_p0 = scmp.ne.s32.totalorder %s15946_s26, %s13002_s5  ;;  %p13008_p3 = scmp.lt.u32.totalorder %s13002_s5, %s15946_s26 }
 0x1fc   : > { %p13004_p1 = pnand %p13003_p0, %p15863_p4 }
 0x1fe   : > { %p13005_p2 = pneg %p13004_p1 }
 0x200   : > { %p13010_p7 = pnand %p13008_p3, %p13005_p2 }
 0x202   : > { %13013 = shalt.err (!%p13010_p7)
}
 0x203   : > { %s13014_s29 = scalar_lea.vmem %s1803_s15, 16  ;;  %s13020_s3 = scalar_lea.vmem %s1803_s15, 32 }
 0x204   : > { %p13015_p6 = scmp.ne.s32.totalorder %s1803_s15, %s13014_s29  ;;  %p13021_p13 = scmp.lt.s32.totalorder %s1803_s15, %s1803_s15 }
 0x205   : > { %p13022_p8 = scmp.lt.s32.totalorder %s13020_s3, %s13014_s29 }
 0x206   : > { %p13016_p11 = pnand %p13015_p6, %p15863_p4 }
 0x207   : > { %p13023_p9 = por %p13022_p8, %p13021_p13 }
 0x208   : > { %p13017_p12 = pneg %p13016_p11 }
 0x20a   : > { %p13024_p10 = pnand %p13023_p9, %p13017_p12 }
 0x20c   : > { %13027 = shalt.err (!%p13024_p10)
}
 0x20d   : > { %s15947_s6 = sld [smem:[#allocation126_spill]] }
 0x20e   : > { %12222 = dma.hbm_to_vmem [thread:$0]  (%p15863_p4), %s15946_s26, 16, %s1803_s15, [#allocation53]  }
 0x213   : > { %s13028_s0 = scalar_lea.hbm %s15947_s6, 16 }
 0x214   : > { %p13029_p0 = scmp.ne.s32.totalorder %s15947_s6, %s13028_s0  ;;  %p13034_p3 = scmp.lt.u32.totalorder %s13028_s0, %s15947_s6 }
 0x216   : > { %p13030_p1 = pnand %p13029_p0, %p15863_p4 }
 0x218   : > { %p13031_p2 = pneg %p13030_p1 }
 0x21a   : > { %p13036_p7 = pnand %p13034_p3, %p13031_p2 }
 0x21c   : > { %13039 = shalt.err (!%p13036_p7)
}
 0x21d   : > { %s13040_s5 = scalar_lea.vmem %s14334_s8, 16  ;;  %s13046_s29 = scalar_lea.vmem %s14334_s8, 32 }
 0x21e   : > { %p13041_p6 = scmp.ne.s32.totalorder %s14334_s8, %s13040_s5  ;;  %p13047_p13 = scmp.lt.s32.totalorder %s14334_s8, %s14334_s8 }
 0x21f   : > { %p13048_p8 = scmp.lt.s32.totalorder %s13046_s29, %s13040_s5 }
 0x220   : > { %p13042_p11 = pnand %p13041_p6, %p15863_p4 }
 0x221   : > { %p13049_p9 = por %p13048_p8, %p13047_p13 }
 0x222   : > { %p13043_p12 = pneg %p13042_p11 }
 0x224   : > { %p13050_p10 = pnand %p13049_p9, %p13043_p12 }
 0x226   : > { %13053 = shalt.err (!%p13050_p10)
}
 0x227   : > { %s15948_s15 = sld [smem:[#allocation82_spill]]  ;;  %s13739_s3 = smov [#allocation9]  }
 0x228   : > { %12226 = dma.hbm_to_vmem [thread:$0]  (%p15863_p4), %s15947_s6, 16, %s14334_s8, [#allocation56]  }
 0x229   : > { %s1400_s0 = sshll.u32 %s13739_s3, 4  ;;  %s13740_s9 = smov [#allocation12]   ;;  %s1401_s0 = int_to_ptr.vmem [resolvable:$true] %s1400_s0 }
 0x22a   : > { %s1422_s12 = sshll.u32 %s13740_s9, 4  ;;  %s14362_s12 = int_to_ptr.vmem [resolvable:$true] %s1422_s12 }
 0x22d   : > { %s13054_s5 = scalar_lea.hbm %s15948_s15, 16 }
 0x22e   : > { %p13055_p0 = scmp.ne.s32.totalorder %s15948_s15, %s13054_s5  ;;  %p13060_p3 = scmp.lt.u32.totalorder %s13054_s5, %s15948_s15 }
 0x230   : > { %p13056_p1 = pnand %p13055_p0, %p15863_p4 }
 0x232   : > { %p13057_p2 = pneg %p13056_p1 }
 0x234   : > { %p13062_p7 = pnand %p13060_p3, %p13057_p2 }
 0x236   : > { %13065 = shalt.err (!%p13062_p7)
}
 0x237   : > { %s13066_s29 = scalar_lea.vmem %s1401_s0, 16  ;;  %s13072_s8 = scalar_lea.vmem %s1401_s0, 32 }
 0x238   : > { %p13067_p6 = scmp.ne.s32.totalorder %s1401_s0, %s13066_s29  ;;  %p13073_p13 = scmp.lt.s32.totalorder %s1401_s0, %s1401_s0 }
 0x239   : > { %p13074_p8 = scmp.lt.s32.totalorder %s13072_s8, %s13066_s29 }
 0x23a   : > { %p13068_p11 = pnand %p13067_p6, %p15863_p4 }
 0x23b   : > { %p13075_p9 = por %p13074_p8, %p13073_p13 }
 0x23c   : > { %p13069_p12 = pneg %p13068_p11 }
 0x23e   : > { %p13076_p10 = pnand %p13075_p9, %p13069_p12 }
 0x240   : > { %13079 = shalt.err (!%p13076_p10)
}
 0x241   : > { %s15949_s9 = sld [smem:[#allocation84_spill]] }
 0x242   : > { %12164 = dma.hbm_to_vmem [thread:$0]  (%p15863_p4), %s15948_s15, 16, %s1401_s0, [#allocation8]  }
 0x247   : > { %s13080_s3 = scalar_lea.hbm %s15949_s9, 16 }
 0x248   : > { %p13081_p0 = scmp.ne.s32.totalorder %s15949_s9, %s13080_s3  ;;  %p13086_p3 = scmp.lt.u32.totalorder %s13080_s3, %s15949_s9 }
 0x24a   : > { %p13082_p1 = pnand %p13081_p0, %p15863_p4 }
 0x24c   : > { %p13083_p2 = pneg %p13082_p1 }
 0x24e   : > { %p13088_p7 = pnand %p13086_p3, %p13083_p2 }
 0x250   : > { %13091 = shalt.err (!%p13088_p7)
}
 0x251   : > { %s13092_s5 = scalar_lea.vmem %s14362_s12, 16  ;;  %s13098_s29 = scalar_lea.vmem %s14362_s12, 32 }
 0x252   : > { %p13093_p6 = scmp.ne.s32.totalorder %s14362_s12, %s13092_s5  ;;  %p13099_p13 = scmp.lt.s32.totalorder %s14362_s12, %s14362_s12 }
 0x253   : > { %p13100_p8 = scmp.lt.s32.totalorder %s13098_s29, %s13092_s5 }
 0x254   : > { %p13094_p11 = pnand %p13093_p6, %p15863_p4 }
 0x255   : > { %p13101_p9 = por %p13100_p8, %p13099_p13 }
 0x256   : > { %p13095_p12 = pneg %p13094_p11 }
 0x258   : > { %p13102_p10 = pnand %p13101_p9, %p13095_p12 }
 0x25a   : > { %13105 = shalt.err (!%p13102_p10)
}
 0x25b   : > { %s15950_s0 = sld [smem:[#allocation86_spill]]  ;;  %s13741_s3 = smov [#allocation15]  }
 0x25c   : > { %12168 = dma.hbm_to_vmem [thread:$0]  (%p15863_p4), %s15949_s9, 16, %s14362_s12, [#allocation11]  }
 0x25d   : > { %s1446_s6 = sshll.u32 %s13741_s3, 4  ;;  %s13742_s13 = smov [#allocation18]   ;;  %s1447_s6 = int_to_ptr.vmem [resolvable:$true] %s1446_s6 }
 0x25e   : > { %s1469_s14 = sshll.u32 %s13742_s13, 4  ;;  %s14390_s14 = int_to_ptr.vmem [resolvable:$true] %s1469_s14 }
 0x261   : > { %s15951_s8 = smov %s15950_s0  ;;  %s13106_s5 = scalar_lea.hbm %s15950_s0, 128 }
 0x262   : > { %p13107_p0 = scmp.ne.s32.totalorder %s15951_s8, %s13106_s5  ;;  %p13112_p3 = scmp.lt.u32.totalorder %s13106_s5, %s15951_s8 }
 0x264   : > { %p13108_p1 = pnand %p13107_p0, %p15863_p4 }
 0x266   : > { %p13109_p2 = pneg %p13108_p1 }
 0x268   : > { %p13114_p7 = pnand %p13112_p3, %p13109_p2 }
 0x26a   : > { %13117 = shalt.err (!%p13114_p7)
}
 0x26b   : > { %s13118_s29 = scalar_lea.vmem %s1447_s6, 128  ;;  %p13125_p13 = scmp.lt.s32.totalorder %s1447_s6, %s1447_s6 }
 0x26c   : > { %p13119_p6 = scmp.ne.s32.totalorder %s1447_s6, %s13118_s29  ;;  %p13126_p8 = scmp.lt.s32.totalorder %s13118_s29, %s13118_s29 }
 0x26e   : > { %p13120_p11 = pnand %p13119_p6, %p15863_p4  ;;  %p13127_p9 = por %p13126_p8, %p13125_p13 }
 0x270   : > { %p13121_p12 = pneg %p13120_p11 }
 0x272   : > { %p13128_p10 = pnand %p13127_p9, %p13121_p12 }
 0x274   : > { %13131 = shalt.err (!%p13128_p10)
}
 0x275   : > { %s15952_s13 = sld [smem:[#allocation88_spill]] }
 0x276   : > { %12172 = dma.hbm_to_vmem [thread:$0]  (%p15863_p4), %s15951_s8, 128, %s1447_s6, [#allocation14]  }
 0x27b   : > { %s13132_s12 = scalar_lea.hbm %s15952_s13, 64 }
 0x27c   : > { %p13133_p0 = scmp.ne.s32.totalorder %s15952_s13, %s13132_s12  ;;  %p13138_p3 = scmp.lt.u32.totalorder %s13132_s12, %s15952_s13 }
 0x27e   : > { %p13134_p1 = pnand %p13133_p0, %p15863_p4 }
 0x280   : > { %p13135_p2 = pneg %p13134_p1 }
 0x282   : > { %p13140_p7 = pnand %p13138_p3, %p13135_p2 }
 0x284   : > { %13143 = shalt.err (!%p13140_p7)
}
 0x285   : > { %s13144_s0 = scalar_lea.vmem %s14390_s14, 64  ;;  %p13151_p13 = scmp.lt.s32.totalorder %s14390_s14, %s14390_s14 }
 0x286   : > { %p13145_p6 = scmp.ne.s32.totalorder %s14390_s14, %s13144_s0  ;;  %p13152_p8 = scmp.lt.s32.totalorder %s13144_s0, %s13144_s0 }
 0x288   : > { %p13146_p11 = pnand %p13145_p6, %p15863_p4  ;;  %p13153_p9 = por %p13152_p8, %p13151_p13 }
 0x28a   : > { %p13147_p12 = pneg %p13146_p11 }
 0x28c   : > { %p13154_p10 = pnand %p13153_p9, %p13147_p12 }
 0x28e   : > { %13157 = shalt.err (!%p13154_p10)
}
 0x28f   : > { %s15953_s6 = sld [smem:[#allocation89_spill]]  ;;  %s13743_s3 = smov [#allocation21]  }
 0x290   : > { %12176 = dma.hbm_to_vmem [thread:$0]  (%p15863_p4), %s15952_s13, 64, %s14390_s14, [#allocation17], %s15944_s16, %s15944_s16, %s15943_s10  }
 0x291   : > { %s1495_s5 = sshll.u32 %s13743_s3, 4  ;;  %s13744_s29 = smov [#allocation24]   ;;  %s1496_s5 = int_to_ptr.vmem [resolvable:$true] %s1495_s5 }
 0x292   : > { %s1524_s12 = sshll.u32 %s13744_s29, 4  ;;  %s14420_s12 = int_to_ptr.vmem [resolvable:$true] %s1524_s12 }
 0x295   : > { %s13158_s0 = scalar_lea.hbm %s15953_s6, 64 }
 0x296   : > { %p13159_p0 = scmp.ne.s32.totalorder %s15953_s6, %s13158_s0  ;;  %p13164_p3 = scmp.lt.u32.totalorder %s13158_s0, %s15953_s6 }
 0x298   : > { %p13160_p1 = pnand %p13159_p0, %p15863_p4 }
 0x29a   : > { %p13161_p2 = pneg %p13160_p1 }
 0x29c   : > { %p13166_p7 = pnand %p13164_p3, %p13161_p2 }
 0x29e   : > { %13169 = shalt.err (!%p13166_p7)
}
 0x29f   : > { %s13170_s8 = scalar_lea.vmem %s1496_s5, 64  ;;  %p13177_p13 = scmp.lt.s32.totalorder %s1496_s5, %s1496_s5 }
 0x2a0   : > { %p13171_p6 = scmp.ne.s32.totalorder %s1496_s5, %s13170_s8  ;;  %p13178_p8 = scmp.lt.s32.totalorder %s13170_s8, %s13170_s8 }
 0x2a2   : > { %p13172_p11 = pnand %p13171_p6, %p15863_p4  ;;  %p13179_p9 = por %p13178_p8, %p13177_p13 }
 0x2a4   : > { %p13173_p12 = pneg %p13172_p11 }
 0x2a6   : > { %p13180_p10 = pnand %p13179_p9, %p13173_p12 }
 0x2a8   : > { %13183 = shalt.err (!%p13180_p10)
}
 0x2a9   : > { %s15954_s14 = sld [smem:[#allocation92_spill]] }
 0x2aa   : > { %12180 = dma.hbm_to_vmem [thread:$0]  (%p15863_p4), %s15953_s6, 64, %s1496_s5, [#allocation20], %s15944_s16, %s15944_s16, %s15943_s10  }
 0x2af   : > { %s13184_s3 = scalar_lea.hbm %s15954_s14, 512 }
 0x2b0   : > { %p13185_p0 = scmp.ne.s32.totalorder %s15954_s14, %s13184_s3  ;;  %p13190_p3 = scmp.lt.u32.totalorder %s13184_s3, %s15954_s14 }
 0x2b2   : > { %p13186_p1 = pnand %p13185_p0, %p15863_p4 }
 0x2b4   : > { %p13187_p2 = pneg %p13186_p1 }
 0x2b6   : > { %p13192_p7 = pnand %p13190_p3, %p13187_p2 }
 0x2b8   : > { %13195 = shalt.err (!%p13192_p7)
}
 0x2b9   : > { %s13196_s8 = scalar_lea.vmem %s14420_s12, 512  ;;  %p13203_p13 = scmp.lt.s32.totalorder %s14420_s12, %s14420_s12 }
 0x2ba   : > { %p13197_p6 = scmp.ne.s32.totalorder %s14420_s12, %s13196_s8  ;;  %p13204_p8 = scmp.lt.s32.totalorder %s13196_s8, %s13196_s8 }
 0x2bc   : > { %p13198_p11 = pnand %p13197_p6, %p15863_p4  ;;  %p13205_p9 = por %p13204_p8, %p13203_p13 }
 0x2be   : > { %p13199_p12 = pneg %p13198_p11 }
 0x2c0   : > { %p13206_p10 = pnand %p13205_p9, %p13199_p12 }
 0x2c2   : > { %13209 = shalt.err (!%p13206_p10)
}
 0x2c3   : > { %s15955_s5 = sld [smem:[#allocation95_spill]]  ;;  %s13745_s29 = smov [#allocation27]  }
 0x2c4   : > { %12184 = dma.hbm_to_vmem [thread:$0]  (%p15863_p4), %s15954_s14, 512, %s14420_s12, [#allocation23], %s15942_s7, %s15942_s7, %s15941_s25  }
 0x2c5   : > { %s1554_s0 = sshll.u32 %s13745_s29, 4  ;;  %s13746_s3 = smov [#allocation30]   ;;  %s1555_s0 = int_to_ptr.vmem [resolvable:$true] %s1554_s0 }
 0x2c6   : > { %s1578_s6 = sshll.u32 %s13746_s3, 4  ;;  %s14453_s6 = int_to_ptr.vmem [resolvable:$true] %s1578_s6 }
 0x2c9   : > { %s13210_s8 = scalar_lea.hbm %s15955_s5, 512 }
 0x2ca   : > { %p13211_p0 = scmp.ne.s32.totalorder %s15955_s5, %s13210_s8  ;;  %p13216_p3 = scmp.lt.u32.totalorder %s13210_s8, %s15955_s5 }
 0x2cc   : > { %p13212_p1 = pnand %p13211_p0, %p15863_p4 }
 0x2ce   : > { %p13213_p2 = pneg %p13212_p1 }
 0x2d0   : > { %p13218_p7 = pnand %p13216_p3, %p13213_p2 }
 0x2d2   : > { %13221 = shalt.err (!%p13218_p7)
}
 0x2d3   : > { %s13222_s9 = scalar_lea.vmem %s1555_s0, 512  ;;  %p13229_p13 = scmp.lt.s32.totalorder %s1555_s0, %s1555_s0 }
 0x2d4   : > { %p13223_p6 = scmp.ne.s32.totalorder %s1555_s0, %s13222_s9  ;;  %p13230_p8 = scmp.lt.s32.totalorder %s13222_s9, %s13222_s9 }
 0x2d6   : > { %p13224_p11 = pnand %p13223_p6, %p15863_p4  ;;  %p13231_p9 = por %p13230_p8, %p13229_p13 }
 0x2d8   : > { %p13225_p12 = pneg %p13224_p11 }
 0x2da   : > { %p13232_p10 = pnand %p13231_p9, %p13225_p12 }
 0x2dc   : > { %13235 = shalt.err (!%p13232_p10)
}
 0x2dd   : > { %s15956_s12 = sld [smem:[#allocation97_spill]] }
 0x2de   : > { %12188 = dma.hbm_to_vmem [thread:$0]  (%p15863_p4), %s15955_s5, 512, %s1555_s0, [#allocation26], %s15942_s7, %s15942_s7, %s15941_s25  }
 0x2e3   : > { %s13236_s29 = scalar_lea.hbm %s15956_s12, 1024 }
 0x2e4   : > { %p13237_p0 = scmp.ne.s32.totalorder %s15956_s12, %s13236_s29  ;;  %p13242_p3 = scmp.lt.u32.totalorder %s13236_s29, %s15956_s12 }
 0x2e6   : > { %p13238_p1 = pnand %p13237_p0, %p15863_p4 }
 0x2e8   : > { %p13239_p2 = pneg %p13238_p1 }
 0x2ea   : > { %p13244_p7 = pnand %p13242_p3, %p13239_p2 }
 0x2ec   : > { %13247 = shalt.err (!%p13244_p7)
}
 0x2ed   : > { %s13248_s9 = scalar_lea.vmem %s14453_s6, 1024  ;;  %p13255_p13 = scmp.lt.s32.totalorder %s14453_s6, %s14453_s6 }
 0x2ee   : > { %p13249_p6 = scmp.ne.s32.totalorder %s14453_s6, %s13248_s9  ;;  %p13256_p8 = scmp.lt.s32.totalorder %s13248_s9, %s13248_s9 }
 0x2f0   : > { %p13250_p11 = pnand %p13249_p6, %p15863_p4  ;;  %p13257_p9 = por %p13256_p8, %p13255_p13 }
 0x2f2   : > { %p13251_p12 = pneg %p13250_p11 }
 0x2f4   : > { %p13258_p10 = pnand %p13257_p9, %p13251_p12 }
 0x2f6   : > { %13261 = shalt.err (!%p13258_p10)
}
 0x2f7   : > { %s15957_s0 = sld [smem:[#allocation102_spill]]  ;;  %s13747_s8 = smov [#allocation33]  }
 0x2f8   : > { %12192 = dma.hbm_to_vmem [thread:$0]  (%p15863_p4), %s15956_s12, 1024, %s14453_s6, [#allocation29], %s15942_s7, %s15942_s7, %s15941_s25  }
 0x2f9   : > { %s1611_s29 = sshll.u32 %s13747_s8, 4  ;;  %s13748_s5 = smov [#allocation36]   ;;  %s1612_s29 = int_to_ptr.vmem [resolvable:$true] %s1611_s29 }
 0x2fa   : > { %s1643_s13 = sshll.u32 %s13748_s5, 4  ;;  %s14486_s13 = int_to_ptr.vmem [resolvable:$true] %s1643_s13 }
 0x2fd   : > { %s15958_s3 = smov %s15957_s0  ;;  %s13262_s9 = scalar_lea.hbm %s15957_s0, 64 }
 0x2fe   : > { %p13263_p0 = scmp.ne.s32.totalorder %s15958_s3, %s13262_s9  ;;  %p13268_p3 = scmp.lt.u32.totalorder %s13262_s9, %s15958_s3 }
 0x300   : > { %p13264_p1 = pnand %p13263_p0, %p15863_p4 }
 0x302   : > { %p13265_p2 = pneg %p13264_p1 }
 0x304   : > { %p13270_p7 = pnand %p13268_p3, %p13265_p2 }
 0x306   : > { %13273 = shalt.err (!%p13270_p7)
}
 0x307   : > { %s13274_s14 = scalar_lea.vmem %s1612_s29, 64  ;;  %p13281_p13 = scmp.lt.s32.totalorder %s1612_s29, %s1612_s29 }
 0x308   : > { %p13275_p6 = scmp.ne.s32.totalorder %s1612_s29, %s13274_s14  ;;  %p13282_p8 = scmp.lt.s32.totalorder %s13274_s14, %s13274_s14 }
 0x30a   : > { %p13276_p11 = pnand %p13275_p6, %p15863_p4  ;;  %p13283_p9 = por %p13282_p8, %p13281_p13 }
 0x30c   : > { %p13277_p12 = pneg %p13276_p11 }
 0x30e   : > { %p13284_p10 = pnand %p13283_p9, %p13277_p12 }
 0x310   : > { %13287 = shalt.err (!%p13284_p10)
}
 0x311   : > { %s15959_s6 = sld [smem:[#allocation106_spill]] }
 0x312   : > { %12196 = dma.hbm_to_vmem [thread:$0]  (%p15863_p4), %s15958_s3, 64, %s1612_s29, [#allocation32], %s15944_s16, %s15944_s16, %s15943_s10  }
 0x317   : > { %s13288_s5 = scalar_lea.hbm %s15959_s6, 64 }
 0x318   : > { %p13289_p0 = scmp.ne.s32.totalorder %s15959_s6, %s13288_s5  ;;  %p13294_p3 = scmp.lt.u32.totalorder %s13288_s5, %s15959_s6 }
 0x31a   : > { %p13290_p1 = pnand %p13289_p0, %p15863_p4 }
 0x31c   : > { %p13291_p2 = pneg %p13290_p1 }
 0x31e   : > { %p13296_p7 = pnand %p13294_p3, %p13291_p2 }
 0x320   : > { %13299 = shalt.err (!%p13296_p7)
}
 0x321   : > { %s13300_s14 = scalar_lea.vmem %s14486_s13, 64  ;;  %p13307_p13 = scmp.lt.s32.totalorder %s14486_s13, %s14486_s13 }
 0x322   : > { %p13301_p6 = scmp.ne.s32.totalorder %s14486_s13, %s13300_s14  ;;  %p13308_p8 = scmp.lt.s32.totalorder %s13300_s14, %s13300_s14 }
 0x324   : > { %p13302_p11 = pnand %p13301_p6, %p15863_p4  ;;  %p13309_p9 = por %p13308_p8, %p13307_p13 }
 0x326   : > { %p13303_p12 = pneg %p13302_p11 }
 0x328   : > { %p13310_p10 = pnand %p13309_p9, %p13303_p12 }
 0x32a   : > { %13313 = shalt.err (!%p13310_p10)
}
 0x32b   : > { %s15960_s0 = sld [smem:[#allocation108_spill]]  ;;  %s13749_s29 = smov [#allocation39]  }
 0x32c   : > { %12200 = dma.hbm_to_vmem [thread:$0]  (%p15863_p4), %s15959_s6, 64, %s14486_s13, [#allocation35], %s15944_s16, %s15944_s16, %s15943_s10  }
 0x32d   : > { %s1670_s9 = sshll.u32 %s13749_s29, 4  ;;  %s13750_s5 = smov [#allocation42]   ;;  %s1671_s9 = int_to_ptr.vmem [resolvable:$true] %s1670_s9 }
 0x32e   : > { %s1705_s3 = sshll.u32 %s13750_s5, 4  ;;  %s14519_s3 = int_to_ptr.vmem [resolvable:$true] %s1705_s3 }
 0x331   : > { %s15961_s8 = smov %s15960_s0  ;;  %s13314_s14 = scalar_lea.hbm %s15960_s0, 16 }
 0x332   : > { %p13315_p0 = scmp.ne.s32.totalorder %s15961_s8, %s13314_s14  ;;  %p13320_p3 = scmp.lt.u32.totalorder %s13314_s14, %s15961_s8 }
 0x334   : > { %p13316_p1 = pnand %p13315_p0, %p15863_p4 }
 0x336   : > { %p13317_p2 = pneg %p13316_p1 }
 0x338   : > { %p13322_p7 = pnand %p13320_p3, %p13317_p2 }
 0x33a   : > { %13325 = shalt.err (!%p13322_p7)
}
 0x33b   : > { %s13326_s12 = scalar_lea.vmem %s1671_s9, 16  ;;  %s13332_s13 = scalar_lea.vmem %s1671_s9, 32 }
 0x33c   : > { %p13327_p6 = scmp.ne.s32.totalorder %s1671_s9, %s13326_s12  ;;  %p13333_p13 = scmp.lt.s32.totalorder %s1671_s9, %s1671_s9 }
 0x33d   : > { %p13334_p8 = scmp.lt.s32.totalorder %s13332_s13, %s13326_s12 }
 0x33e   : > { %p13328_p11 = pnand %p13327_p6, %p15863_p4 }
 0x33f   : > { %p13335_p9 = por %p13334_p8, %p13333_p13 }
 0x340   : > { %p13329_p12 = pneg %p13328_p11 }
 0x342   : > { %p13336_p10 = pnand %p13335_p9, %p13329_p12 }
 0x344   : > { %13339 = shalt.err (!%p13336_p10)
}
 0x345   : > { %s15962_s0 = sld [smem:[#allocation113_spill]] }
 0x346   : > { %12204 = dma.hbm_to_vmem [thread:$0]  (%p15863_p4), %s15961_s8, 16, %s1671_s9, [#allocation38]  }
 0x34b   : > { %s15963_s29 = smov %s15962_s0  ;;  %s13340_s5 = scalar_lea.hbm %s15962_s0, 64 }
 0x34c   : > { %p13341_p0 = scmp.ne.s32.totalorder %s15963_s29, %s13340_s5  ;;  %p13346_p3 = scmp.lt.u32.totalorder %s13340_s5, %s15963_s29 }
 0x34e   : > { %p13342_p1 = pnand %p13341_p0, %p15863_p4 }
 0x350   : > { %p13343_p2 = pneg %p13342_p1 }
 0x352   : > { %p13348_p7 = pnand %p13346_p3, %p13343_p2 }
 0x354   : > { %13351 = shalt.err (!%p13348_p7)
}
 0x355   : > { %s13352_s12 = scalar_lea.vmem %s14519_s3, 64  ;;  %p13359_p13 = scmp.lt.s32.totalorder %s14519_s3, %s14519_s3 }
 0x356   : > { %p13353_p6 = scmp.ne.s32.totalorder %s14519_s3, %s13352_s12  ;;  %p13360_p8 = scmp.lt.s32.totalorder %s13352_s12, %s13352_s12 }
 0x358   : > { %p13354_p11 = pnand %p13353_p6, %p15863_p4  ;;  %p13361_p9 = por %p13360_p8, %p13359_p13 }
 0x35a   : > { %p13355_p12 = pneg %p13354_p11 }
 0x35c   : > { %p13362_p10 = pnand %p13361_p9, %p13355_p12 }
 0x35e   : > { %13365 = shalt.err (!%p13362_p10)
}
 0x35f   : > { %s15964_s9 = sld [smem:[#allocation116_spill]]  ;;  %s13751_s14 = smov [#allocation45]  }
 0x360   : > { %12208 = dma.hbm_to_vmem [thread:$0]  (%p15863_p4), %s15963_s29, 64, %s14519_s3, [#allocation41], %s15944_s16, %s15944_s16, %s15943_s10  }
 0x361   : > { %s1734_s13 = sshll.u32 %s13751_s14, 4  ;;  %s13752_s0 = smov [#allocation48]   ;;  %s1735_s13 = int_to_ptr.vmem [resolvable:$true] %s1734_s13 }
 0x362   : > { %s1764_s5 = sshll.u32 %s13752_s0, 4  ;;  %s14549_s5 = int_to_ptr.vmem [resolvable:$true] %s1764_s5 }
 0x365   : > { %s13366_s12 = scalar_lea.hbm %s15964_s9, 512 }
 0x366   : > { %p13367_p0 = scmp.ne.s32.totalorder %s15964_s9, %s13366_s12  ;;  %p13372_p3 = scmp.lt.u32.totalorder %s13366_s12, %s15964_s9 }
 0x368   : > { %p13368_p1 = pnand %p13367_p0, %p15863_p4 }
 0x36a   : > { %p13369_p2 = pneg %p13368_p1 }
 0x36c   : > { %p13374_p7 = pnand %p13372_p3, %p13369_p2 }
 0x36e   : > { %13377 = shalt.err (!%p13374_p7)
}
 0x36f   : > { %s13378_s6 = scalar_lea.vmem %s1735_s13, 512  ;;  %p13385_p13 = scmp.lt.s32.totalorder %s1735_s13, %s1735_s13 }
 0x370   : > { %p13379_p6 = scmp.ne.s32.totalorder %s1735_s13, %s13378_s6  ;;  %p13386_p8 = scmp.lt.s32.totalorder %s13378_s6, %s13378_s6 }
 0x372   : > { %p13380_p11 = pnand %p13379_p6, %p15863_p4  ;;  %p13387_p9 = por %p13386_p8, %p13385_p13 }
 0x374   : > { %p13381_p12 = pneg %p13380_p11 }
 0x376   : > { %p13388_p10 = pnand %p13387_p9, %p13381_p12 }
 0x378   : > { %13391 = shalt.err (!%p13388_p10)
}
 0x379   : > { %s15965_s10 = sld [smem:[#allocation119_spill]] }
 0x37a   : > { %12212 = dma.hbm_to_vmem [thread:$0]  (%p15863_p4), %s15964_s9, 512, %s1735_s13, [#allocation44], %s15942_s7, %s15942_s7, %s15941_s25  }
 0x37f   : > { %s13392_s16 = scalar_lea.hbm %s15965_s10, 512 }
 0x380   : > { %p13393_p0 = scmp.ne.s32.totalorder %s15965_s10, %s13392_s16  ;;  %p13398_p3 = scmp.lt.u32.totalorder %s13392_s16, %s15965_s10 }
 0x382   : > { %p13394_p1 = pnand %p13393_p0, %p15863_p4 }
 0x384   : > { %p13395_p2 = pneg %p13394_p1 }
 0x386   : > { %p13400_p7 = pnand %p13398_p3, %p13395_p2 }
 0x388   : > { %13403 = shalt.err (!%p13400_p7)
}
 0x389   : > { %s13404_s3 = scalar_lea.vmem %s14549_s5, 512  ;;  %p13411_p13 = scmp.lt.s32.totalorder %s14549_s5, %s14549_s5 }
 0x38a   : > { %p13405_p6 = scmp.ne.s32.totalorder %s14549_s5, %s13404_s3  ;;  %p13412_p8 = scmp.lt.s32.totalorder %s13404_s3, %s13404_s3 }
 0x38c   : > { %p13406_p11 = pnand %p13405_p6, %p15863_p4  ;;  %p13413_p9 = por %p13412_p8, %p13411_p13 }
 0x38e   : > { %p13407_p12 = pneg %p13406_p11 }
 0x390   : > { %p13414_p10 = pnand %p13413_p9, %p13407_p12 }
 0x392   : > { %13417 = shalt.err (!%p13414_p10)
}
 0x393   : > { %s15966_s6 = sld [smem:[#allocation121_spill]]  ;;  %s13753_s14 = smov [#allocation51]  }
 0x394   : > { %12216 = dma.hbm_to_vmem [thread:$0]  (%p15863_p4), %s15965_s10, 512, %s14549_s5, [#allocation47], %s15942_s7, %s15942_s7, %s15941_s25  }
 0x395   : > { %s1788_s13 = sshll.u32 %s13753_s14, 4  ;;  %s13754_s0 = smov [#allocation54]   ;;  %s1789_s13 = int_to_ptr.vmem [resolvable:$true] %s1788_s13 }
 0x396   : > { %s1818_s12 = sshll.u32 %s13754_s0, 4  ;;  %s14582_s12 = int_to_ptr.vmem [resolvable:$true] %s1818_s12 }
 0x399   : > { %s13418_s16 = scalar_lea.hbm %s15966_s6, 1024 }
 0x39a   : > { %p13419_p0 = scmp.ne.s32.totalorder %s15966_s6, %s13418_s16  ;;  %p13424_p3 = scmp.lt.u32.totalorder %s13418_s16, %s15966_s6 }
 0x39c   : > { %p13420_p1 = pnand %p13419_p0, %p15863_p4 }
 0x39e   : > { %p13421_p2 = pneg %p13420_p1 }
 0x3a0   : > { %p13426_p7 = pnand %p13424_p3, %p13421_p2 }
 0x3a2   : > { %13429 = shalt.err (!%p13426_p7)
}
 0x3a3   : > { %s13430_s3 = scalar_lea.vmem %s1789_s13, 1024  ;;  %p13437_p13 = scmp.lt.s32.totalorder %s1789_s13, %s1789_s13 }
 0x3a4   : > { %p13431_p6 = scmp.ne.s32.totalorder %s1789_s13, %s13430_s3  ;;  %p13438_p8 = scmp.lt.s32.totalorder %s13430_s3, %s13430_s3 }
 0x3a6   : > { %p13432_p11 = pnand %p13431_p6, %p15863_p4  ;;  %p13439_p9 = por %p13438_p8, %p13437_p13 }
 0x3a8   : > { %p13433_p12 = pneg %p13432_p11 }
 0x3aa   : > { %p13440_p10 = pnand %p13439_p9, %p13433_p12 }
 0x3ac   : > { %13443 = shalt.err (!%p13440_p10)
}
 0x3ad   : > { %s15967_s5 = sld [smem:[#allocation125_spill]] }
 0x3ae   : > { %12220 = dma.hbm_to_vmem [thread:$0]  (%p15863_p4), %s15966_s6, 1024, %s1789_s13, [#allocation50], %s15942_s7, %s15942_s7, %s15941_s25  }
 0x3b3   : > { %s13444_s14 = scalar_lea.hbm %s15967_s5, 512 }
 0x3b4   : > { %p13445_p0 = scmp.ne.s32.totalorder %s15967_s5, %s13444_s14  ;;  %p13450_p3 = scmp.lt.u32.totalorder %s13444_s14, %s15967_s5 }
 0x3b6   : > { %p13446_p1 = pnand %p13445_p0, %p15863_p4 }
 0x3b8   : > { %p13447_p2 = pneg %p13446_p1 }
 0x3ba   : > { %p13452_p7 = pnand %p13450_p3, %p13447_p2 }
 0x3bc   : > { %13455 = shalt.err (!%p13452_p7)
}
 0x3bd   : > { %s13456_s0 = scalar_lea.vmem %s14582_s12, 512  ;;  %p13463_p13 = scmp.lt.s32.totalorder %s14582_s12, %s14582_s12 }
 0x3be   : > { %p13457_p6 = scmp.ne.s32.totalorder %s14582_s12, %s13456_s0  ;;  %p13464_p8 = scmp.lt.s32.totalorder %s13456_s0, %s13456_s0 }
 0x3c0   : > { %p13458_p11 = pnand %p13457_p6, %p15863_p4  ;;  %p13465_p9 = por %p13464_p8, %p13463_p13 }
 0x3c2   : > { %p13459_p12 = pneg %p13458_p11 }
 0x3c4   : > { %p13466_p10 = pnand %p13465_p9, %p13459_p12 }
 0x3c6   : > { %13469 = shalt.err (!%p13466_p10)
}
 0x3c7   : > { %12224 = dma.hbm_to_vmem [thread:$0]  (%p15863_p4), %s15967_s5, 512, %s14582_s12, [#allocation53], %s15942_s7, %s15942_s7, %s15941_s25  }
 0x3c8   : > { %s13755_s13 = smov [#allocation57]   ;;  %s13470_s3 = scalar_lea.hbm %s15921_s4, 512 }
 0x3c9   : > { %s1842_s16 = sshll.u32 %s13755_s13, 4  ;;  %p13471_p0 = scmp.ne.s32.totalorder %s15921_s4, %s13470_s3  ;;  %s1843_s16 = int_to_ptr.vmem [resolvable:$true] %s1842_s16 }
 0x3ca   : > { %p13476_p3 = scmp.lt.u32.totalorder %s13470_s3, %s15921_s4 }
 0x3cb   : > { %p13472_p1 = pnand %p13471_p0, %p15863_p4 }
 0x3cd   : > { %p13473_p2 = pneg %p13472_p1 }
 0x3cf   : > { %p13478_p7 = pnand %p13476_p3, %p13473_p2 }
 0x3d1   : > { %13481 = shalt.err (!%p13478_p7)
}
 0x3d2   : > { %s13482_s14 = scalar_lea.vmem %s1843_s16, 512  ;;  %p13489_p13 = scmp.lt.s32.totalorder %s1843_s16, %s1843_s16 }
 0x3d3   : > { %p13483_p6 = scmp.ne.s32.totalorder %s1843_s16, %s13482_s14  ;;  %p13490_p8 = scmp.lt.s32.totalorder %s13482_s14, %s13482_s14 }
 0x3d5   : > { %p13484_p11 = pnand %p13483_p6, %p15863_p4  ;;  %p13491_p9 = por %p13490_p8, %p13489_p13 }
 0x3d7   : > { %p13485_p12 = pneg %p13484_p11 }
 0x3d9   : > { %p13492_p10 = pnand %p13491_p9, %p13485_p12 }
 0x3db   : > { %13495 = shalt.err (!%p13492_p10)
}
 0x3dc   : > { %12228 = dma.hbm_to_vmem [thread:$0]  (%p15863_p4), %s15921_s4, 512, %s1843_s16, [#allocation56], %s15942_s7, %s15942_s7, %s15941_s25  }
 0x3dd PF: > { %s15968_s12 = sld [smem:[#allocation79_spill]]  ;;  %p12343_p1 = scmp.lt.s32.totalorder %s13660_s1, 2 }
 0x3de   : > { %s1867_s0 = sand.u32 1, %s13656_s28   ;;  %s10142_s13 = sshll.u32 %s13660_s1, 4 }
 0x3df   : > { %s1870_s25 = scalar_lea.vmem [#allocation4], %s1867_s0  ;;  %p14639_p2 = pnand %p12343_p1, %p14088_p5 }
 0x3e0   : > { %s1877_s7 = sshll.u32 %s1870_s25, 4  ;;  %s1868_s14 = scalar_lea.sflag [#allocation5], %s1867_s0  ;;  %s14635_s7 = int_to_ptr.vmem [resolvable:$true] %s1877_s7 }
 0x3e1   : > { %p13498_p7 = pneg %p14639_p2 }
 0x3e3   : > { %s14633_s3 = scalar_lea.hbm %s15968_s12, %s10142_s13  ;;  %s13501_s13 = scalar_lea.hbm %s15968_s12, 32 }
 0x3e4   : > { %s13496_s4 = scalar_lea.hbm %s14633_s3, 16  ;;  %p13502_p12 = scmp.lt.u32.totalorder %s14633_s3, %s15968_s12 }
 0x3e5   : > { %p13497_p3 = scmp.ne.s32.totalorder %s14633_s3, %s13496_s4  ;;  %p13503_p13 = scmp.lt.u32.totalorder %s13501_s13, %s13496_s4 }
 0x3e6   : > { %p13505_p9 = scmp.lt.u32.totalorder %s13496_s4, %s14633_s3 }
 0x3e7   : > { %p13499_p6 = pnand %p13498_p7, %p13497_p3  ;;  %p13504_p8 = por %p13503_p13, %p13502_p12 }
 0x3e9   : > { %p13500_p11 = pneg %p13499_p6  ;;  %p13506_p5 = por %p13505_p9, %p13504_p8 }
 0x3eb   : > { %p13507_p10 = pnand %p13506_p5, %p13500_p11 }
 0x3ed   : > { %13510 = shalt.err (!%p13507_p10)
}
 0x3ee   : > { %s13511_s18 = scalar_lea.vmem %s14635_s7, 16  ;;  %s13756_s0 = smov [#allocation4]  }
 0x3ef   : > { %p13512_p1 = scmp.ne.s32.totalorder %s14635_s7, %s13511_s18  ;;  %s13516_s25 = sshll.u32 %s13756_s0, 4  ;;  %s13517_s25 = int_to_ptr.vmem [resolvable:$false] %s13516_s25 }
 0x3f0   : > { %s13518_s5 = scalar_lea.vmem %s13517_s25, 32  ;;  %p13519_p3 = scmp.lt.s32.totalorder %s14635_s7, %s13517_s25 }
 0x3f1   : > { %p13514_p0 = pnand %p13512_p1, %p13498_p7  ;;  %p13520_p6 = scmp.lt.s32.totalorder %s13518_s5, %s13511_s18 }
 0x3f3   : > { %p13515_p4 = pneg %p13514_p0  ;;  %p13521_p12 = por %p13520_p6, %p13519_p3 }
 0x3f5   : > { %p13522_p13 = pnand %p13521_p12, %p13515_p4 }
 0x3f7   : > { %13525 = shalt.err (!%p13522_p13)
}
 0x3f8   : > { %12304 = dma.hbm_to_vmem [thread:$0]  (!%p14639_p2), %s14633_s3, 16, %s14635_s7, %s1868_s14  }
 0x3f9   : > { %p15970_p11 = scmp.ne.s32.totalorder %s15940_s11, 0 }
 0x3fa   : > { %s14667_s4 = sand.u32 (!%p15970_p11), 1, %s13652_s21   ;;  %p15971_p0 = scmp.ne.s32.totalorder (!%p15970_p11), %s15936_s23, 0 }
 0x3fb   : > { %1892 = sbr.rel (%p15970_p11) target bundleno = 15090 (0x3af2), region = 240  ;;  %s1895_s13 = scalar_lea.sflag (!%p15970_p11), [#allocation5], %s14667_s4 }
 0x3fc   : > { %s1897_s0 = scalar_lea.vmem (!%p15970_p11), [#allocation4], %s14667_s4 }
 0x402   : > { %13571 = dma.done.wait (%p15971_p0), %s1895_s13, 16  }
 0x403   : > { %13573 = vsyncadd (%p15971_p0), %s1895_s13, 4294967280  ;;  %p15972_p4 = scmp.eq.s32.totalorder %s14070_s2, 0 }
 0x405   : > { %13575 = dma.done.wait (%p15972_p4), [#allocation8], 80   ;;  %p15973_p2 = pmov %p15972_p4 }
 0x407   : > { %13577 = vsyncadd (%p15973_p2), [#allocation8], 4294967216  ;;  %p15974_p7 = pmov %p15973_p2 }
 0x408   : > { %p15975_p8 = pmov %p15973_p2 }
 0x409   : > { %13579 = dma.done.wait (%p15974_p7), [#allocation11], 144  }
 0x40a   : > { %13581 = vsyncadd (%p15975_p8), [#allocation11], 4294967152  ;;  %p15976_p9 = pmov %p15973_p2 }
 0x40b   : > { %p15977_p5 = pmov %p15973_p2 }
 0x40c   : > { %13583 = dma.done.wait (%p15976_p9), [#allocation14], 512  }
 0x40d   : > { %13585 = vsyncadd (%p15977_p5), [#allocation14], 4294966784  ;;  %p15978_p10 = pmov %p15973_p2 }
 0x40e   : > { %p15979_p1 = pmov %p15973_p2 }
 0x40f   : > { %13587 = dma.done.wait (%p15978_p10), [#allocation17], 2112  }
 0x410   : > { %13589 = vsyncadd (%p15979_p1), [#allocation17], 4294965184  ;;  %p15980_p3 = pmov %p15979_p1 }
 0x411   : > { %p15981_p6 = pmov %p15979_p1 }
 0x412   : > { %13591 = dma.done.wait (%p15980_p3), [#allocation20], 2112  }
 0x413   : > { %13593 = vsyncadd (%p15981_p6), [#allocation20], 4294965184  ;;  %p15982_p12 = pmov %p15979_p1 }
 0x414   : > { %p15983_p13 = pmov %p15979_p1 }
 0x415   : > { %13595 = dma.done.wait (%p15982_p12), [#allocation23], 576  }
 0x416   : > { %13597 = vsyncadd (%p15983_p13), [#allocation23], 4294966720  ;;  %p15984_p11 = pmov %p15979_p1 }
 0x417   : > { %p15985_p0 = pmov %p15979_p1 }
 0x418   : > { %13599 = dma.done.wait (%p15984_p11), [#allocation26], 528  }
 0x419   : > { %13601 = vsyncadd (%p15985_p0), [#allocation26], 4294966768  ;;  %p15986_p4 = pmov %p15985_p0 }
 0x41a   : > { %p15987_p2 = pmov %p15985_p0 }
 0x41b   : > { %13603 = dma.done.wait (%p15986_p4), [#allocation29], 1040  }
 0x41c   : > { %13605 = vsyncadd (%p15987_p2), [#allocation29], 4294966256  ;;  %p15988_p7 = pmov %p15985_p0 }
 0x41d   : > { %p15989_p8 = pmov %p15985_p0 }
 0x41e   : > { %13607 = dma.done.wait (%p15988_p7), [#allocation32], 80  }
 0x41f   : > { %13609 = vsyncadd (%p15989_p8), [#allocation32], 4294967216  ;;  %p15990_p9 = pmov %p15985_p0 }
 0x420   : > { %p15991_p5 = pmov %p15985_p0 }
 0x421   : > { %13611 = dma.done.wait (%p15990_p9), [#allocation35], 128  }
 0x422   : > { %13613 = vsyncadd (%p15991_p5), [#allocation35], 4294967168  ;;  %p15992_p10 = pmov %p15985_p0 }
 0x423   : > { %p15993_p1 = pmov %p15985_p0 }
 0x424   : > { %13615 = dma.done.wait (%p15992_p10), [#allocation38], 528  }
 0x425   : > { %13617 = vsyncadd (%p15993_p1), [#allocation38], 4294966768  ;;  %p15994_p3 = pmov %p15985_p0 }
 0x426   : > { %p15995_p6 = pmov %p15985_p0 }
 0x427   : > { %13619 = dma.done.wait (%p15994_p3), [#allocation41], 128  }
 0x428   : > { %13621 = vsyncadd (%p15995_p6), [#allocation41], 4294967168  ;;  %p15996_p12 = pmov %p15985_p0 }
 0x429   : > { %p15997_p13 = pmov %p15985_p0 }
 0x42a   : > { %13623 = dma.done.wait (%p15996_p12), [#allocation44], 576  }
 0x42b   : > { %13625 = vsyncadd (%p15997_p13), [#allocation44], 4294966720  ;;  %p15998_p11 = pmov %p15985_p0 }
 0x42d   : > { %13627 = dma.done.wait (%p15998_p11), [#allocation47], 528  }
 0x42e   : > { %13629 = vsyncadd (%p15985_p0), [#allocation47], 4294966768  ;;  %p15999_p4 = pmov %p15985_p0 }
 0x42f   : > { %p16000_p2 = pmov %p15985_p0 }
 0x430   : > { %13631 = dma.done.wait (%p15999_p4), [#allocation50], 1040  }
 0x431   : > { %13633 = vsyncadd (%p16000_p2), [#allocation50], 4294966256  ;;  %p16001_p7 = pmov %p15985_p0 }
 0x432   : > { %p16002_p8 = pmov %p15985_p0 }
 0x433   : > { %13635 = dma.done.wait (%p16001_p7), [#allocation53], 528  }
 0x434   : > { %13637 = vsyncadd (%p16002_p8), [#allocation53], 4294966768  ;;  %p16003_p9 = pmov %p15985_p0 }
 0x435   : > { %p16004_p5 = pmov %p15985_p0 }
 0x436   : > { %13639 = dma.done.wait (%p16003_p9), [#allocation56], 528  }
 0x437   : > { %13641 = vsyncadd (%p16004_p5), [#allocation56], 4294966768  ;;  %s16005_s23 = sld [smem:[#allocation78_spill]]  ;;  %p2173_p10 = scmp.lt.s32.totalorder %s14070_s2, 1  ;;  %vm13757_vm0 = vmmov 0   ;;  %v13758_v1 = vmov 0.0  }
 0x438   : > { %10940 = vmatprep.mubr.msk.f32.mxu1 %vm13757_vm0, %v13758_v1  ;;  %vm2202_vm1 = vcmask 1042432   ;;  %vm2195_vm2 = vcmask 23552   ;;  %v2187_v2 = vld [vmem:[#allocation7] sm:$0x7]  ;;  %s16006_s7 = sld [smem:[#allocation80_spill]]  ;;  %vm2288_vm3 = vcmask 1046528  }
 0x439   : > { %s14745_s11 = scalar_select %p2173_p10, %s14070_s2, 1  ;;  %10905 = vmatprep.subr.msk.mxu0 %vm2202_vm1, %v2187_v2  ;;  %v2282_v5 = vld [vmem:[#allocation10] sm:$0x7f]  ;;  %v2281_v6 = vld [vmem:[%s1897_s0] sm:$0x1]  ;;  %vm2284_vm4 = vcmask 56320  }
 0x43a   : > { %10906 = vmatpush3.msk.msra.mxu0 %vm2202_vm1, %v2187_v2  ;;  %vm2363_vm5 = vcmask 253952   ;;  %v2378_v8 = vld [vmem:[#allocation16] sm:$0xff]  ;;  %v2379_v9 = vld [vmem:[#allocation16 + $0x8] sm:$0xff]  ;;  %v13759_v13 = vmov 0.0|0.0   ;;  %v2380_v15 = vld [vmem:[#allocation16 + $0x10] sm:$0xff]  ;;  %s16007_s14 = sld [smem:[#allocation90_spill]] }
 0x43b   : > { %s10509_s5 = sshll.u32 %s14745_s11, 4  ;;  %10910 = vmatprep.subr.mxu0 %v13758_v1  ;;  %v2478_v10 = vld [vmem:[#allocation19] sm:$0xff]  ;;  %v11842_v11 = vpack.c.bf16 %v2379_v9, %v2378_v8  ;;  %v2479_v12 = vld [vmem:[#allocation19 + $0x8] sm:$0xff]  ;;  %11847 = vmatprep.subr.bf16.mxu1 %v13759_v13  ;;  %v2381_v16 = vld [vmem:[#allocation16 + $0x18] sm:$0xff]  ;;  %vm2366_vm6 = vcmask 261120   ;;  %vm2669_vm7 = vcmask 64512  }
 0x43c   : > { %v11848_v14 = vpack.c.bf16 %v2479_v12, %v2478_v10  ;;  %v2480_v17 = vld [vmem:[#allocation19 + $0x10] sm:$0xff]  ;;  %v11845_v18 = vpack.c.bf16 %v2381_v16, %v2380_v15  ;;  %v2481_v19 = vld [vmem:[#allocation19 + $0x18] sm:$0xff]  ;;  %v2370_v35 = vld [vmem:[#allocation13 + $0x8] sm:$0xff]  ;;  %vm2815_vm9 = vcmask 1041408   ;;  %vm2771_vm10 = vcmask 146432   ;;  %s16010_s18 = sld [smem:[#allocation93_spill]] }
 0x43d   : > { %s2177_s3 = scalar_lea.vmem %s16005_s23, %s10509_s5  ;;  %v11851_v20 = vpack.c.bf16 %v2481_v19, %v2480_v17  ;;  %v10182_v21 = vld [vmem:[#allocation9] ss:$0 sm:$0xff]  ;;  %v2283_v26 = vld [vmem:[#allocation12] sm:$0x1]  ;;  %v2369_v30 = vld [vmem:[#allocation13] sm:$0xff]  ;;  %vm2778_vm11 = vcmask 140288  }
 0x43e   : > { %v2185_v3 = vld [vmem:[%s2177_s3] sm:$0xff]  ;;  %v2186_v4 = vld [vmem:[%s2177_s3 + $0x8] sm:$0xff]  ;;  %s2180_s16 = scalar_lea.vmem %s16006_s7, %s14745_s11  ;;  %11849 = vmatpush3.bf16.msra.mxu1 %v11848_v14  ;;  %v2371_v43 = vld [vmem:[#allocation13 + $0x10] sm:$0x3]  ;;  %vm4804_vm12 = vcmask 254976   ;;  %s16011_s25 = sld [smem:[#allocation94_spill]] }
 0x43f   : > { %10907 = vmatprep.mubr.msk.f32.mxu0 %vm2195_vm2, %v2185_v3  ;;  %v2362_v7 = vld [vmem:[%s2180_s16] sm:$0x1]  ;;  %11850 = vmatprep.subr.bf16.mxu1 %v13759_v13  ;;  %v10192_v49 = vld [vmem:[#allocation21] ss:$0 sm:$0xff]  ;;  %vm14829_vm8 = vmpackc.low %vm2669_vm7, %vm2669_vm7  ;;  %s16012_s13 = sld [smem:[#allocation101_spill]]  ;;  %s16013_s0 = sld [smem:[#allocation103_spill]] }
 0x440   : > { %10908 = vmatmul.mubr.msk.f32.vlgmr.msra.gmra.mrb[0].mxu0 %vm2195_vm2, %v2186_v4  ;;  %2364 = vst.msk [vmem:[#allocation2] sm:$0x1] %vm2363_vm5, %v2362_v7  ;;  %v2569_v31 = vld [vmem:[%s16007_s14] sm:$0xff]  ;;  %v2570_v32 = vld [vmem:[%s16007_s14 + $0x8] sm:$0xff]  ;;  %v2571_v38 = vld [vmem:[%s16007_s14 + $0x10] sm:$0xff]  ;;  %vm4975_vm13 = vcmask 523264  }
 0x441   : > { %10911 = vmatpush3.msk.msra.mxu0 %vm2288_vm3, %v2282_v5  ;;  %10912 = vmatprep.mubr.msk.f32.mxu0 %vm13757_vm0, %v13758_v1  ;;  %v11854_v36 = vpack.c.bf16 %v2570_v32, %v2569_v31  ;;  %v2572_v39 = vld [vmem:[%s16007_s14 + $0x18] sm:$0xff]  ;;  %v10196_v0 = vld [vmem:[#allocation22] ss:$0 sm:$0xff]  ;;  %v10188_v2 = vld [vmem:[#allocation18] ss:$0 sm:$0xff]  ;;  %s16015_s5 = sld [smem:[#allocation105_spill]] }
 0x442   : > { %11841 = vmatprep.subr.bf16.mxu0 %v13759_v13  ;;  %11852 = vmatpush3.bf16.msra.mxu1 %v11851_v20  ;;  %v11857_v41 = vpack.c.bf16 %v2572_v39, %v2571_v38  ;;  %v2901_v4 = vld [vmem:[#allocation16 + $0x20] sm:$0xff]  ;;  %v2902_v5 = vld [vmem:[#allocation16 + $0x28] sm:$0xff]  ;;  %v2903_v14 = vld [vmem:[#allocation16 + $0x30] sm:$0xff]  ;;  %s16016_s3 = sld [smem:[#allocation112_spill]]  ;;  %s16017_s7 = sld [smem:[#allocation99_spill]] }
 0x443   : > { %11859 = vmatprep.subr.bf16.mxu1 %v13759_v13  ;;  %v2904_v15 = vld [vmem:[#allocation16 + $0x38] sm:$0xff]  ;;  %s16018_s16 = sld [smem:[#allocation100_spill]]  ;;  %s9594_s6 = scalar_lea.sflag [#allocation6], %s14667_s4 }
 0x444   : > { %10913 = vmatmul.mubr.msk.f32.vlgmr.msra.gmra.mrb[2].mxu0 %vm2284_vm4, %v2281_v6  ;;  %v11870_v19 = vpack.c.bf16 %v2904_v15, %v2903_v14  ;;  %p16027_p3 = scmp.ne.s32.totalorder %s15937_s22, 0 }
 0x445   : > { %10923 = vmatprep.mubr.msk.f32.mxu0 %vm13757_vm0, %v13758_v1  ;;  %11843 = vmatpush3.bf16.msra.mxu0 %v11842_v11  ;;  %v11867_v11 = vpack.c.bf16 %v2902_v5, %v2901_v4  ;;  %s16014_s23 = smov %s16013_s0 }
 0x446   : > { %11844 = vmatprep.subr.bf16.mxu0 %v13759_v13 }
 0x449   : > { %11846 = vmatpush3.bf16.msra.mxu0 %v11845_v18 }
 0x44a   : > { %11853 = vmatprep.subr.bf16.mxu0 %v13759_v13 }
 0x513   : > { %v10909_v22 = vpop.f32.mrb[0].mxu0 }
 0x514   : > { %v2278_v23 = vadd.f32 %v10909_v22, %v10182_v21  ;;  %v2272_v24 = vpop.f32.mrb[1].mxu0  ;;  %v10218_v22 = vld [vmem:[%s16007_s14 + $0x20] sm:$0xff] }
 0x515   : > { %v2273_v25 = vadd.f32 %v10182_v21, %v2272_v24 }
 0x516   : > { %2368 = vst.msk [vmem:[#allocation2 + $0xa] sm:$0xff] %vm2366_vm6, %v2278_v23  ;;  %v10219_v23 = vld [vmem:[%s16007_s14 + $0x28] sm:$0xff] }
 0x517   : > { %2367 = vst.msk [vmem:[#allocation2 + $0x2] sm:$0xff] %vm2366_vm6, %v2273_v25  ;;  %v2358_v27 = vpop.f32.mrb[2].mxu0  ;;  %v11879_v24 = vpack.c.bf16 %v10219_v23, %v10218_v22  ;;  %v10220_v25 = vld [vmem:[%s16007_s14 + $0x30] sm:$0xff] }
 0x518   : > { %v2359_v28 = vadd.f32 %v2358_v27, %v2283_v26  ;;  %v10914_v29 = vpop.f32.mrb[3].mxu0  ;;  %v10221_v26 = vld [vmem:[%s16007_s14 + $0x38] sm:$0xff] }
 0x519   : > { %v11882_v27 = vpack.c.bf16 %v10221_v26, %v10220_v25  ;;  %v2996_v25 = vld [vmem:[#allocation19 + $0x30] sm:$0xff]  ;;  %v2997_v26 = vld [vmem:[#allocation19 + $0x38] sm:$0xff] }
 0x51a   : > { %2365 = vst.msk [vmem:[#allocation2 + $0x1] sm:$0x1] %vm2363_vm5, %v2359_v28 }
 0x51d   : > { %v14792_v42 = vld [vmem:[#allocation2 + $0x10] sm:$0x3] }
 0x51e   : > { %v14777_v37 = vld [vmem:[#allocation2 + $0x8] sm:$0xff]  ;;  %v14804_v44 = vadd.f32 %v14792_v42, %v2371_v43 }
 0x51f   : > { %v14790_v40 = vadd.f32 %v14777_v37, %v2370_v35 }
 0x521   : > { %v14772_v33 = vld [vmem:[#allocation2] sm:$0xff] }
 0x522   : > { %v14775_v34 = vadd.f32 %v14772_v33, %v2369_v30 }
 0x524   : > { %10924 = vmatmul.mubr.msk.f32.vlgmr.msra.gmra.mrb[4].mxu0 %vm2366_vm6, %v14775_v34  ;;  %10941 = vmatmul.mubr.msk.f32.vlgmr.msra.gmra.mrb[0].mxu1 %vm2366_vm6, %v14775_v34 }
 0x525   : > { %10926 = vmatprep.mubr.msk.f32.mxu0 %vm13757_vm0, %v13758_v1  ;;  %10943 = vmatprep.mubr.msk.f32.mxu1 %vm13757_vm0, %v13758_v1 }
 0x526   : > { %11855 = vmatpush3.bf16.msra.mxu0 %v11854_v36 }
 0x527   : > { %11856 = vmatprep.subr.bf16.mxu0 %v13759_v13 }
 0x528   : > { %10927 = vmatmul.mubr.msk.f32.gmra.mrb[6].mxu0 %vm2366_vm6, %v14790_v40  ;;  %10944 = vmatmul.mubr.msk.f32.gmra.mrb[2].mxu1 %vm2366_vm6, %v14790_v40 }
 0x529   : > { %10929 = vmatprep.mubr.msk.f32.mxu0 %vm13757_vm0, %v13758_v1  ;;  %10946 = vmatprep.mubr.msk.f32.mxu1 %vm13757_vm0, %v13758_v1 }
 0x52a   : > { %11858 = vmatpush3.bf16.msra.mxu0 %v11857_v41 }
 0x52b   : > { %11863 = vmatprep.subr.bf16.mxu0 %v13759_v13 }
 0x52c   : > { %10930 = vmatmul.mubr.msk.f32.gmra.mrb[8].mxu0 %vm2366_vm6, %v14804_v44  ;;  %10947 = vmatmul.mubr.msk.f32.gmra.mrb[4].mxu1 %vm2366_vm6, %v14804_v44 }
 0x52d   : > { %10957 = vmatprep.mubr.msk.f32.mxu0 %vm13757_vm0, %v13758_v1  ;;  %10972 = vmatprep.mubr.msk.f32.mxu1 %vm13757_vm0, %v13758_v1 }
 0x530   : > { %10958 = vmatmul.mubr.msk.f32.vlgmr.msra.gmra.mrb[10].mxu0 %vm2366_vm6, %v14772_v33 }
 0x531   : > { %10960 = vmatprep.mubr.msk.f32.mxu0 %vm13757_vm0, %v13758_v1 }
 0x534   : > { %10961 = vmatmul.mubr.msk.f32.gmra.mrb[12].mxu0 %vm2366_vm6, %v14777_v37 }
 0x535   : > { %10963 = vmatprep.mubr.msk.f32.mxu0 %vm13757_vm0, %v13758_v1 }
 0x538   : > { %10964 = vmatmul.mubr.msk.f32.gmra.mrb[14].mxu0 %vm2366_vm6, %v14792_v42 }
 0x539   : > { %10987 = vmatprep.mubr.msk.f32.mxu0 %vm13757_vm0, %v13758_v1 }
 0x5f7   : > { %v2464_v45 = vpop.f32.mrb[4].mxu0  ;;  %v2555_v46 = vpop.f32.mrb[0].mxu1 }
 0x5f8   : > { %v10925_v47 = vpop.f32.mrb[5].mxu0  ;;  %v10942_v48 = vpop.f32.mrb[1].mxu1  ;;  %v2556_v52 = vadd.f32 %v10192_v49, %v2555_v46  ;;  %v2465_v10 = vadd.f32 %v10188_v2, %v2464_v45 }
 0x5fb   : > { %v2469_v50 = vpop.f32.mrb[6].mxu0  ;;  %v2560_v51 = vpop.f32.mrb[2].mxu1 }
 0x5fc   : > { %v2561_v53 = vadd.f32 %v10192_v49, %v2560_v51  ;;  %v10928_v54 = vpop.f32.mrb[7].mxu0  ;;  %v10945_v55 = vpop.f32.mrb[3].mxu1  ;;  %v2470_v18 = vadd.f32 %v10188_v2, %v2469_v50 }
 0x5fd   : > { %v10222_v54 = vld [vmem:[#allocation22 + $0x1] ss:$0 sm:$0xff] }
 0x5fe   : > { %v11860_v57 = vpack.c.bf16 %v2561_v53, %v2556_v52 }
 0x5ff   : > { %v2474_v58 = vpop.f32.mrb[8].mxu0  ;;  %v2565_v59 = vpop.f32.mrb[4].mxu1 }
 0x600   : > { %v10931_v60 = vpop.f32.mrb[9].mxu0  ;;  %v10948_v61 = vpop.f32.mrb[5].mxu1  ;;  %11862 = vmatpush3.bf16.xpose.msk.msra.mxu1 %vm14829_vm8, %v11860_v57  ;;  %v2566_v3 = vadd.f32 %v10192_v49, %v2565_v59  ;;  %v2475_v21 = vadd.f32 %v10188_v2, %v2474_v58 }
 0x601   : > { %10970 = vmatprep.subr.mxu1 %v13758_v1 }
 0x603   : > { %v2655_v62 = vpop.f32.mrb[10].mxu0 }
 0x604   : > { %v10959_v63 = vpop.f32.mrb[11].mxu0  ;;  %v2656_v7 = vadd.f32 %v10196_v0, %v2655_v62 }
 0x607   : > { %v2660_v6 = vpop.f32.mrb[12].mxu0 }
 0x608   : > { %v2661_v8 = vadd.f32 %v10196_v0, %v2660_v6  ;;  %v10962_v9 = vpop.f32.mrb[13].mxu0  ;;  %10971 = vmatpush3.xpose.msk.msra.mxu1 %vm2669_vm7, %v2566_v3 }
 0x609   : > { %11866 = vmatprep.subr.bf16.mxu1 %v13759_v13 }
 0x60a   : > { %v11864_v12 = vpack.c.bf16 %v2661_v8, %v2656_v7 }
 0x60b   : > { %v2665_v16 = vpop.f32.mrb[14].mxu0  ;;  %10973 = vmatmul.mubr.msk.f32.vlgmr.msra.gmra.mrb[6].mxu1 %vm2669_vm7, %v2465_v10 }
 0x60c   : > { %v10965_v17 = vpop.f32.mrb[15].mxu0  ;;  %11865 = vmatpush3.bf16.msra.mxu0 %v11864_v12  ;;  %10975 = vmatprep.mubr.msk.f32.mxu1 %vm13757_vm0, %v13758_v1  ;;  %v2666_v20 = vadd.f32 %v10196_v0, %v2665_v16 }
 0x60d   : > { %10985 = vmatprep.subr.mxu0 %v13758_v1  ;;  %11868 = vmatpush3.bf16.msra.mxu1 %v11867_v11 }
 0x60e   : > { %11869 = vmatprep.subr.bf16.mxu1 %v13759_v13 }
 0x60f   : > { %10976 = vmatmul.mubr.msk.f32.gmra.mrb[8].mxu1 %vm2669_vm7, %v2470_v18 }
 0x610   : > { %10986 = vmatpush3.msk.msra.mxu0 %vm2815_vm9, %v2666_v20  ;;  %10978 = vmatprep.mubr.msk.f32.mxu1 %vm13757_vm0, %v13758_v1  ;;  %v2994_v20 = vld [vmem:[#allocation19 + $0x20] sm:$0xff] }
 0x611   : > { %11871 = vmatpush3.bf16.msra.mxu1 %v11870_v19  ;;  %11872 = vmatprep.subr.bf16.mxu0 %v13759_v13 }
 0x612   : > { %11878 = vmatprep.subr.bf16.mxu1 %v13759_v13 }
 0x613   : > { %10979 = vmatmul.mubr.msk.f32.gmra.mrb[10].mxu1 %vm2669_vm7, %v2475_v21  ;;  %v2995_v21 = vld [vmem:[#allocation19 + $0x28] sm:$0xff] }
 0x614   : > { %11004 = vmatprep.mubr.msk.f32.mxu1 %vm13757_vm0, %v13758_v1  ;;  %v11873_v23 = vpack.c.bf16 %v2995_v21, %v2994_v20 }
 0x617   : > { %11005 = vmatmul.mubr.msk.f32.vlgmr.msra.gmra.mrb[12].mxu1 %vm2366_vm6, %v14775_v34 }
 0x618   : > { %11007 = vmatprep.mubr.msk.f32.mxu1 %vm13757_vm0, %v13758_v1  ;;  %11880 = vmatpush3.bf16.msra.mxu1 %v11879_v24 }
 0x619   : > { %11881 = vmatprep.subr.bf16.mxu1 %v13759_v13 }
 0x61b   : > { %11008 = vmatmul.mubr.msk.f32.gmra.mrb[14].mxu1 %vm2366_vm6, %v14790_v40 }
 0x61c   : > { %11010 = vmatprep.mubr.msk.f32.mxu1 %vm13757_vm0, %v13758_v1  ;;  %11883 = vmatpush3.bf16.msra.mxu1 %v11882_v27 }
 0x61d   : > { %11888 = vmatprep.subr.bf16.mxu1 %v13759_v13 }
 0x61f   : > { %11011 = vmatmul.mubr.msk.f32.gmra.mrb[16].mxu1 %vm2366_vm6, %v14804_v44 }
 0x620   : > { %11038 = vmatprep.mubr.msk.f32.mxu1 %vm13757_vm0, %v13758_v1 }
 0x623   : > { %11039 = vmatmul.mubr.msk.f32.vlgmr.msra.gmra.mrb[18].mxu1 %vm2366_vm6, %v14772_v33 }
 0x624   : > { %11041 = vmatprep.mubr.msk.f32.mxu1 %vm13757_vm0, %v13758_v1 }
 0x627   : > { %11042 = vmatmul.mubr.msk.f32.gmra.mrb[20].mxu1 %vm2366_vm6, %v14777_v37 }
 0x628   : > { %11044 = vmatprep.mubr.msk.f32.mxu1 %vm13757_vm0, %v13758_v1 }
 0x62b   : > { %11045 = vmatmul.mubr.msk.f32.gmra.mrb[22].mxu1 %vm2366_vm6, %v14792_v42 }
 0x62c   : > { %11068 = vmatprep.mubr.msk.f32.mxu1 %vm13757_vm0, %v13758_v1 }
 0x6de   : > { %v2754_v28 = vpop.f32.mrb[6].mxu1 }
 0x6df   : > { %v2768_v29 = vmul.f32 0.35355338, %v2754_v28  ;;  %v10974_v30 = vpop.f32.mrb[7].mxu1  ;;  %v11876_v28 = vpack.c.bf16 %v2997_v26, %v2996_v25  ;;  %v3406_v25 = vld [vmem:[#allocation24 + $0x8] sm:$0xff] }
 0x6e1   : > { %v2772_v31 = vsel %vm2771_vm10, %v2768_v29, -inf }
 0x6e2   : > { %2773 = vmax.xlane.f32.xlu0 %v2772_v31  ;;  %v2759_v32 = vpop.f32.mrb[8].mxu1 }
 0x6e3   : > { %v2769_v35 = vmul.f32 0.35355338, %v2759_v32  ;;  %v10977_v36 = vpop.f32.mrb[9].mxu1 }
 0x6e5   : > { %v2775_v38 = vsel %vm2771_vm10, %v2769_v35, -inf }
 0x6e6   : > { %2776 = vmax.xlane.f32.xlu0 %v2775_v38  ;;  %v2764_v39 = vpop.f32.mrb[10].mxu1 }
 0x6e7   : > { %v2770_v41 = vmul.f32 0.35355338, %v2764_v39  ;;  %v10980_v43 = vpop.f32.mrb[11].mxu1 }
 0x6e9   : > { %v2779_v45 = vsel %vm2778_vm11, %v2770_v41, -inf }
 0x6ea   : > { %2780 = vmax.xlane.f32.xlu1 %v2779_v45  ;;  %v14885_v46 = vpop.f32.mrb[12].mxu1 }
 0x6eb   : > { %v11006_v47 = vpop.f32.mrb[13].mxu1 }
 0x6ec   : > { %v10214_v47 = vld [vmem:[#allocation21 + $0x1] ss:$0 sm:$0xff] }
 0x6ee   : > { %v14887_v48 = vpop.f32.mrb[14].mxu1 }
 0x6ef   : > { %v11009_v49 = vpop.f32.mrb[15].mxu1 }
 0x6f2   : > { %v14889_v50 = vpop.f32.mrb[16].mxu1 }
 0x6f3   : > { %v11012_v51 = vpop.f32.mrb[17].mxu1 }
 0x6f6   : > { %v3165_v52 = vpop.f32.mrb[18].mxu1 }
 0x6f7   : > { %v11040_v53 = vpop.f32.mrb[19].mxu1  ;;  %v3166_v57 = vadd.f32 %v10222_v54, %v3165_v52 }
 0x6fa   : > { %v3170_v55 = vpop.f32.mrb[20].mxu1 }
 0x6fb   : > { %v3171_v58 = vadd.f32 %v10222_v54, %v3170_v55  ;;  %v11043_v59 = vpop.f32.mrb[21].mxu1 }
 0x6fd   : > { %v11889_v60 = vpack.c.bf16 %v3171_v58, %v3166_v57  ;;  %v10210_v58 = vld [vmem:[#allocation18 + $0x1] ss:$0 sm:$0xff] }
 0x6fe   : > { %v3175_v61 = vpop.f32.mrb[22].mxu1 }
 0x6ff   : > { %v11046_v62 = vpop.f32.mrb[23].mxu1  ;;  %11890 = vmatpush3.bf16.msra.mxu1 %v11889_v60  ;;  %v3176_v63 = vadd.f32 %v10222_v54, %v3175_v61  ;;  %v2980_v60 = vadd.f32 %v10210_v58, %v14885_v46  ;;  %v2985_v61 = vadd.f32 %v10210_v58, %v14887_v48 }
 0x700   : > { %11066 = vmatprep.subr.mxu1 %v13758_v1  ;;  %v2990_v62 = vadd.f32 %v10210_v58, %v14889_v50 }
 0x703   : > { %11067 = vmatpush3.msk.msra.mxu1 %vm2815_vm9, %v3176_v63 }
 0x704   : > { %11088 = vmatprep.subr.mxu1 %v13758_v1 }
 0x76f   : > { %v2774_v0 = vpop.xlane.xlu0 %2773 }
 0x770   : > { %v2782_v2 = vsub.f32 %v2768_v29, %v2774_v0 }
 0x772   : > { %v2785_v3 = vmul.f32 1.442695, %v2782_v2 }
 0x773   : > { %v2777_v4 = vpop.xlane.xlu0 %2776 }
 0x774   : > { %12508 = vpow2.f32 %v2785_v3  ;;  %v2783_v5 = vsub.f32 %v2769_v35, %v2777_v4 }
 0x776   : > { %v2787_v6 = vmul.f32 1.442695, %v2783_v5 }
 0x777   : > { %v2781_v7 = vpop.xlane.xlu1 %2780 }
 0x778   : > { %12510 = vpow2.f32 %v2787_v6  ;;  %v2784_v8 = vsub.f32 %v2770_v41, %v2781_v7 }
 0x77a   : > { %v2789_v9 = vmul.f32 1.442695, %v2784_v8 }
 0x77c   : > { %12512 = vpow2.f32 %v2789_v9 }
 0x77e   : > { %v12509_v10 = vpop.eup %12508 }
 0x77f   : > { %v2791_v11 = vsel %vm2771_vm10, %v12509_v10, 0.0 }
 0x780   : > { %2792 = vadd.xlane.f32.xlu1 %v2791_v11 }
 0x782   : > { %v12511_v12 = vpop.eup %12510 }
 0x783   : > { %v2794_v14 = vsel %vm2771_vm10, %v12511_v12, 0.0 }
 0x784   : > { %2795 = vadd.xlane.f32.xlu0 %v2794_v14 }
 0x786   : > { %v12513_v15 = vpop.eup %12512 }
 0x787   : > { %v2797_v16 = vsel %vm2778_vm11, %v12513_v15, 0.0 }
 0x788   : > { %2798 = vadd.xlane.f32.xlu1 %v2797_v16 }
 0x80d   : > { %v2793_v17 = vpop.xlane.xlu1 %2792 }
 0x80e   : > { %12514 = vrcp.f32 %v2793_v17 }
 0x811   : > { %v2796_v18 = vpop.xlane.xlu0 %2795 }
 0x812   : > { %12516 = vrcp.f32 %v2796_v18 }
 0x815   : > { %v2799_v19 = vpop.xlane.xlu1 %2798 }
 0x816   : > { %12518 = vrcp.f32 %v2799_v19 }
 0x818   : > { %v12515_v22 = vpop.eup %12514 }
 0x819   : > { %v2803_v24 = vmul.f32 %v12515_v22, %v12509_v10 }
 0x81b   : > { %10988 = vmatmul.mubr.msk.f32.vlgmr.msra.gmra.mrb[16].mxu0 %vm2771_vm10, %v2803_v24 }
 0x81c   : > { %v12517_v27 = vpop.eup %12516  ;;  %10990 = vmatprep.mubr.msk.f32.mxu0 %vm13757_vm0, %v13758_v1  ;;  %11874 = vmatpush3.bf16.msra.mxu0 %v11873_v23 }
 0x81d   : > { %v2804_v29 = vmul.f32 %v12517_v27, %v12511_v12  ;;  %11875 = vmatprep.subr.bf16.mxu0 %v13759_v13 }
 0x81f   : > { %10991 = vmatmul.mubr.msk.f32.gmra.mrb[18].mxu0 %vm2771_vm10, %v2804_v29 }
 0x820   : > { %v12519_v30 = vpop.eup %12518  ;;  %10993 = vmatprep.mubr.msk.f32.mxu0 %vm13757_vm0, %v13758_v1  ;;  %11877 = vmatpush3.bf16.msra.mxu0 %v11876_v28 }
 0x821   : > { %v2805_v31 = vmul.f32 %v12519_v30, %v12513_v15  ;;  %11884 = vmatprep.subr.bf16.mxu0 %v13759_v13 }
 0x823   : > { %10994 = vmatmul.mubr.msk.f32.gmra.mrb[20].mxu0 %vm2771_vm10, %v2805_v31  ;;  %v2899_v31 = vld [vmem:[#allocation24] sm:$0xff] }
 0x824   : > { %11021 = vmatprep.mubr.msk.f32.mxu0 %vm13757_vm0, %v13758_v1 }
 0x827   : > { %11022 = vmatmul.mubr.msk.f32.vlgmr.msra.gmra.mrb[22].mxu0 %vm2366_vm6, %v14775_v34 }
 0x828   : > { %11024 = vmatprep.mubr.msk.f32.mxu0 %vm13757_vm0, %v13758_v1 }
 0x82b   : > { %11025 = vmatmul.mubr.msk.f32.gmra.mrb[24].mxu0 %vm2366_vm6, %v14790_v40 }
 0x82c   : > { %11027 = vmatprep.mubr.msk.f32.mxu0 %vm13757_vm0, %v13758_v1 }
 0x82f   : > { %11028 = vmatmul.mubr.msk.f32.gmra.mrb[26].mxu0 %vm2366_vm6, %v14804_v44 }
 0x830   : > { %11053 = vmatprep.mubr.msk.f32.mxu0 %vm13757_vm0, %v13758_v1 }
 0x8ee   : > { %v14920_v32 = vpop.f32.mrb[16].mxu0 }
 0x8ef   : > { %v10989_v35 = vpop.f32.mrb[17].mxu0 }
 0x8f2   : > { %v14922_v36 = vpop.f32.mrb[18].mxu0 }
 0x8f3   : > { %v10992_v38 = vpop.f32.mrb[19].mxu0 }
 0x8f6   : > { %v14924_v39 = vpop.f32.mrb[20].mxu0 }
 0x8f7   : > { %v10995_v41 = vpop.f32.mrb[21].mxu0 }
 0x8fa   : > { %v3072_v43 = vpop.f32.mrb[22].mxu0 }
 0x8fb   : > { %v11023_v45 = vpop.f32.mrb[23].mxu0  ;;  %v3073_v51 = vadd.f32 %v10214_v47, %v3072_v43 }
 0x8fc   : > { %v3679_v45 = vld [vmem:[#allocation19 + $0x40] sm:$0xff] }
 0x8fe   : > { %v3077_v49 = vpop.f32.mrb[24].mxu0 }
 0x8ff   : > { %v3078_v52 = vadd.f32 %v10214_v47, %v3077_v49  ;;  %v11026_v53 = vpop.f32.mrb[25].mxu0 }
 0x901   : > { %v11885_v54 = vpack.c.bf16 %v3078_v52, %v3073_v51  ;;  %v3681_v51 = vld [vmem:[#allocation19 + $0x50] sm:$0xff]  ;;  %v3682_v52 = vld [vmem:[#allocation19 + $0x58] sm:$0xff] }
 0x902   : > { %v3082_v55 = vpop.f32.mrb[26].mxu0  ;;  %v11901_v53 = vpack.c.bf16 %v3682_v52, %v3681_v51 }
 0x903   : > { %v11029_v57 = vpop.f32.mrb[27].mxu0  ;;  %11887 = vmatpush3.bf16.xpose.msk.msra.mxu0 %vm14829_vm8, %v11885_v54  ;;  %v3083_v59 = vadd.f32 %v10214_v47, %v3082_v55  ;;  %v3680_v47 = vld [vmem:[#allocation19 + $0x48] sm:$0xff]  ;;  %v3589_v55 = vld [vmem:[#allocation16 + $0x58] sm:$0xff] }
 0x904   : > { %11051 = vmatprep.subr.mxu0 %v13758_v1  ;;  %v11898_v49 = vpack.c.bf16 %v3680_v47, %v3679_v45  ;;  %v3588_v54 = vld [vmem:[#allocation16 + $0x50] sm:$0xff] }
 0x90b   : > { %11052 = vmatpush3.xpose.msk.msra.mxu0 %vm2669_vm7, %v3083_v59  ;;  %v11895_v59 = vpack.c.bf16 %v3589_v55, %v3588_v54 }
 0x90c   : > { %11077 = vmatprep.subr.mxu0 %v13758_v1 }
 0x90e   : > { %11054 = vmatmul.mubr.msk.f32.vlgmr.msra.gmra.mrb[28].mxu0 %vm2669_vm7, %v2980_v60 }
 0x90f   : > { %11056 = vmatprep.mubr.msk.f32.mxu0 %vm13757_vm0, %v13758_v1  ;;  %11078 = vmatpush3.msra.mxu0 %v3406_v25 }
 0x910   : > { %11891 = vmatprep.subr.bf16.mxu0 %v13759_v13 }
 0x912   : > { %11057 = vmatmul.mubr.msk.f32.gmra.mrb[30].mxu0 %vm2669_vm7, %v2985_v61 }
 0x913   : > { %11059 = vmatprep.mubr.msk.f32.mxu0 %vm13757_vm0, %v13758_v1 }
 0x916   : > { %11060 = vmatmul.mubr.msk.f32.gmra.mrb[32].mxu0 %vm2669_vm7, %v2990_v62  ;;  %v10250_v62 = vld [vmem:[%s16007_s14 + $0x40] sm:$0xff] }
 0x917   : > { %11079 = vmatprep.mubr.msk.f32.mxu0 %vm13757_vm0, %v13758_v1 }
 0x9e1   : > { %v3263_v46 = vpop.f32.mrb[28].mxu0 }
 0x9e2   : > { %v3277_v63 = vmul.f32 0.35355338, %v3263_v46  ;;  %v11055_v0 = vpop.f32.mrb[29].mxu0  ;;  %v10251_v46 = vld [vmem:[%s16007_s14 + $0x48] sm:$0xff] }
 0x9e4   : > { %v3280_v2 = vsel %vm2771_vm10, %v3277_v63, -inf }
 0x9e5   : > { %3281 = vmax.xlane.f32.xlu0 %v3280_v2  ;;  %v3268_v3 = vpop.f32.mrb[30].mxu0  ;;  %v11904_v2 = vpack.c.bf16 %v10251_v46, %v10250_v62 }
 0x9e6   : > { %v3278_v48 = vmul.f32 0.35355338, %v3268_v3  ;;  %v11058_v4 = vpop.f32.mrb[31].mxu0  ;;  %v10252_v3 = vld [vmem:[%s16007_s14 + $0x50] sm:$0xff] }
 0x9e8   : > { %v3283_v5 = vsel %vm2771_vm10, %v3278_v48, -inf }
 0x9e9   : > { %3284 = vmax.xlane.f32.xlu1 %v3283_v5  ;;  %v3273_v6 = vpop.f32.mrb[32].mxu0 }
 0x9ea   : > { %v3279_v7 = vmul.f32 0.35355338, %v3273_v6  ;;  %v11061_v50 = vpop.f32.mrb[33].mxu0 }
 0x9ec   : > { %v3286_v8 = vsel %vm2778_vm11, %v3279_v7, -inf }
 0x9ed   : > { %3287 = vmax.xlane.f32.xlu0 %v3286_v8 }
 0xa72   : > { %v3282_v9 = vpop.xlane.xlu0 %3281 }
 0xa73   : > { %v3289_v10 = vsub.f32 %v3277_v63, %v3282_v9 }
 0xa75   : > { %v3292_v11 = vmul.f32 1.442695, %v3289_v10 }
 0xa76   : > { %v3285_v12 = vpop.xlane.xlu1 %3284 }
 0xa77   : > { %12520 = vpow2.f32 %v3292_v11  ;;  %v3290_v14 = vsub.f32 %v3278_v48, %v3285_v12  ;;  %v10253_v48 = vld [vmem:[%s16007_s14 + $0x58] sm:$0xff]  ;;  %v10246_v12 = vld [vmem:[#allocation21 + $0x2] ss:$0 sm:$0xff] }
 0xa78   : > { %v11907_v6 = vpack.c.bf16 %v10253_v48, %v10252_v3 }
 0xa79   : > { %v3294_v15 = vmul.f32 1.442695, %v3290_v14 }
 0xa7a   : > { %v3288_v16 = vpop.xlane.xlu0 %3287 }
 0xa7b   : > { %12522 = vpow2.f32 %v3294_v15  ;;  %v3291_v17 = vsub.f32 %v3279_v7, %v3288_v16 }
 0xa7d   : > { %v3296_v18 = vmul.f32 1.442695, %v3291_v17 }
 0xa7f   : > { %12524 = vpow2.f32 %v3296_v18 }
 0xa81   : > { %v12521_v19 = vpop.eup %12520 }
 0xa82   : > { %v3298_v20 = vsel %vm2771_vm10, %v12521_v19, 0.0 }
 0xa83   : > { %3299 = vadd.xlane.f32.xlu1 %v3298_v20 }
 0xa85   : > { %v12523_v21 = vpop.eup %12522 }
 0xa86   : > { %v3301_v22 = vsel %vm2771_vm10, %v12523_v21, 0.0 }
 0xa87   : > { %3302 = vadd.xlane.f32.xlu0 %v3301_v22 }
 0xa89   : > { %v12525_v23 = vpop.eup %12524 }
 0xa8a   : > { %v3304_v24 = vsel %vm2778_vm11, %v12525_v23, 0.0 }
 0xa8b   : > { %3305 = vadd.xlane.f32.xlu1 %v3304_v24 }
 0xb10   : > { %v3300_v26 = vpop.xlane.xlu1 %3299 }
 0xb11   : > { %12526 = vrcp.f32 %v3300_v26 }
 0xb14   : > { %v3303_v27 = vpop.xlane.xlu0 %3302 }
 0xb15   : > { %12528 = vrcp.f32 %v3303_v27 }
 0xb18   : > { %v3306_v28 = vpop.xlane.xlu1 %3305 }
 0xb19   : > { %12530 = vrcp.f32 %v3306_v28 }
 0xb1b   : > { %v12527_v29 = vpop.eup %12526 }
 0xb1c   : > { %v3310_v30 = vmul.f32 %v12527_v29, %v12521_v19 }
 0xb1e   : > { %11069 = vmatmul.mubr.msk.f32.vlgmr.msra.gmra.mrb[24].mxu1 %vm2771_vm10, %v3310_v30 }
 0xb1f   : > { %v12529_v35 = vpop.eup %12528  ;;  %11071 = vmatprep.mubr.msk.f32.mxu1 %vm13757_vm0, %v13758_v1  ;;  %11089 = vmatpush3.msra.mxu1 %v2899_v31  ;;  %v10242_v31 = vld [vmem:[#allocation18 + $0x2] ss:$0 sm:$0xff] }
 0xb20   : > { %v3311_v38 = vmul.f32 %v12529_v35, %v12523_v21  ;;  %11897 = vmatprep.subr.bf16.mxu1 %v13759_v13 }
 0xb22   : > { %11072 = vmatmul.mubr.msk.f32.gmra.mrb[26].mxu1 %vm2771_vm10, %v3311_v38 }
 0xb23   : > { %v12531_v41 = vpop.eup %12530  ;;  %11074 = vmatprep.mubr.msk.f32.mxu1 %vm13757_vm0, %v13758_v1 }
 0xb24   : > { %v3312_v43 = vmul.f32 %v12531_v41, %v12525_v23 }
 0xb26   : > { %11075 = vmatmul.mubr.msk.f32.gmra.mrb[28].mxu1 %vm2771_vm10, %v3312_v43 }
 0xb27   : > { %11090 = vmatprep.mubr.msk.f32.mxu1 %vm13757_vm0, %v13758_v1 }
 0xb2a   : > { %11091 = vmatmul.mubr.msk.f32.vlgmr.msra.gmra.mrb[30].mxu1 %vm2669_vm7, %v14920_v32  ;;  %v3586_v32 = vld [vmem:[#allocation16 + $0x40] sm:$0xff] }
 0xb2b   : > { %11093 = vmatprep.mubr.msk.f32.mxu1 %vm13757_vm0, %v13758_v1  ;;  %11899 = vmatpush3.bf16.msra.mxu1 %v11898_v49 }
 0xb2c   : > { %11900 = vmatprep.subr.bf16.mxu1 %v13759_v13 }
 0xb2e   : > { %11094 = vmatmul.mubr.msk.f32.gmra.mrb[32].mxu1 %vm2669_vm7, %v14922_v36  ;;  %v3587_v36 = vld [vmem:[#allocation16 + $0x48] sm:$0xff] }
 0xb2f   : > { %11096 = vmatprep.mubr.msk.f32.mxu1 %vm13757_vm0, %v13758_v1  ;;  %11902 = vmatpush3.bf16.msra.mxu1 %v11901_v53 }
 0xb30   : > { %11909 = vmatprep.subr.bf16.mxu1 %v13759_v13 }
 0xb32   : > { %11097 = vmatmul.mubr.msk.f32.gmra.mrb[34].mxu1 %vm2669_vm7, %v14924_v39  ;;  %v11892_v39 = vpack.c.bf16 %v3587_v36, %v3586_v32  ;;  %v10254_v36 = vld [vmem:[#allocation22 + $0x2] ss:$0 sm:$0xff] }
 0xb33   : > { %11124 = vmatprep.mubr.msk.f32.mxu1 %vm13757_vm0, %v13758_v1 }
 0xb36   : > { %11125 = vmatmul.mubr.msk.f32.vlgmr.msra.gmra.mrb[36].mxu1 %vm2366_vm6, %v14775_v34 }
 0xb37   : > { %11127 = vmatprep.mubr.msk.f32.mxu1 %vm13757_vm0, %v13758_v1 }
 0xb3a   : > { %11128 = vmatmul.mubr.msk.f32.gmra.mrb[38].mxu1 %vm2366_vm6, %v14790_v40 }
 0xb3b   : > { %11130 = vmatprep.mubr.msk.f32.mxu1 %vm13757_vm0, %v13758_v1 }
 0xb3e   : > { %11131 = vmatmul.mubr.msk.f32.gmra.mrb[40].mxu1 %vm2366_vm6, %v14804_v44 }
 0xb3f   : > { %11156 = vmatprep.mubr.msk.f32.mxu1 %vm13757_vm0, %v13758_v1 }
 0xbf1   : > { %v3391_v57 = vpop.f32.mrb[24].mxu1 }
 0xbf2   : > { %v11070_v58 = vpop.f32.mrb[25].mxu1  ;;  %11080 = vmatmul.mubr.msk.f32.vlgmr.msra.gmra.mrb[34].mxu0 %vm2669_vm7, %v3391_v57 }
 0xbf3   : > { %11082 = vmatprep.mubr.msk.f32.mxu0 %vm13757_vm0, %v13758_v1  ;;  %11893 = vmatpush3.bf16.msra.mxu0 %v11892_v39 }
 0xbf4   : > { %11894 = vmatprep.subr.bf16.mxu0 %v13759_v13 }
 0xbf5   : > { %v3396_v60 = vpop.f32.mrb[26].mxu1 }
 0xbf6   : > { %v11073_v61 = vpop.f32.mrb[27].mxu1  ;;  %11083 = vmatmul.mubr.msk.f32.gmra.mrb[36].mxu0 %vm2669_vm7, %v3396_v60 }
 0xbf7   : > { %11085 = vmatprep.mubr.msk.f32.mxu0 %vm13757_vm0, %v13758_v1  ;;  %11896 = vmatpush3.bf16.msra.mxu0 %v11895_v59 }
 0xbf8   : > { %11903 = vmatprep.subr.bf16.mxu0 %v13759_v13 }
 0xbf9   : > { %v3401_v63 = vpop.f32.mrb[28].mxu1 }
 0xbfa   : > { %v11076_v0 = vpop.f32.mrb[29].mxu1  ;;  %11086 = vmatmul.mubr.msk.f32.gmra.mrb[38].mxu0 %vm2669_vm7, %v3401_v63 }
 0xbfb   : > { %11107 = vmatprep.mubr.msk.f32.mxu0 %vm13757_vm0, %v13758_v1 }
 0xbfd   : > { %v3571_v4 = vpop.f32.mrb[30].mxu1 }
 0xbfe   : > { %v11092_v5 = vpop.f32.mrb[31].mxu1  ;;  %11108 = vmatmul.mubr.msk.f32.vlgmr.msra.gmra.mrb[40].mxu0 %vm2366_vm6, %v14775_v34 }
 0xbff   : > { %11110 = vmatprep.mubr.msk.f32.mxu0 %vm13757_vm0, %v13758_v1  ;;  %11905 = vmatpush3.bf16.msra.mxu0 %v11904_v2 }
 0xc00   : > { %11906 = vmatprep.subr.bf16.mxu0 %v13759_v13 }
 0xc01   : > { %v3576_v7 = vpop.f32.mrb[32].mxu1 }
 0xc02   : > { %v11095_v50 = vpop.f32.mrb[33].mxu1  ;;  %11111 = vmatmul.mubr.msk.f32.gmra.mrb[42].mxu0 %vm2366_vm6, %v14790_v40 }
 0xc03   : > { %11113 = vmatprep.mubr.msk.f32.mxu0 %vm13757_vm0, %v13758_v1  ;;  %11908 = vmatpush3.bf16.msra.mxu0 %v11907_v6 }
 0xc04   : > { %11913 = vmatprep.subr.bf16.mxu0 %v13759_v13 }
 0xc05   : > { %v3581_v8 = vpop.f32.mrb[34].mxu1 }
 0xc06   : > { %v11098_v9 = vpop.f32.mrb[35].mxu1  ;;  %11114 = vmatmul.mubr.msk.f32.gmra.mrb[44].mxu0 %vm2366_vm6, %v14804_v44 }
 0xc07   : > { %11141 = vmatprep.mubr.msk.f32.mxu0 %vm13757_vm0, %v13758_v1 }
 0xc09   : > { %v3757_v10 = vpop.f32.mrb[36].mxu1 }
 0xc0a   : > { %v11126_v11 = vpop.f32.mrb[37].mxu1  ;;  %11142 = vmatmul.mubr.msk.f32.vlgmr.msra.gmra.mrb[46].mxu0 %vm2366_vm6, %v14772_v33  ;;  %v3758_v15 = vadd.f32 %v10246_v12, %v3757_v10 }
 0xc0b   : > { %11144 = vmatprep.mubr.msk.f32.mxu0 %vm13757_vm0, %v13758_v1 }
 0xc0d   : > { %v3762_v14 = vpop.f32.mrb[38].mxu1 }
 0xc0e   : > { %v3763_v16 = vadd.f32 %v10246_v12, %v3762_v14  ;;  %v11129_v17 = vpop.f32.mrb[39].mxu1  ;;  %11145 = vmatmul.mubr.msk.f32.gmra.mrb[48].mxu0 %vm2366_vm6, %v14777_v37 }
 0xc0f   : > { %11147 = vmatprep.mubr.msk.f32.mxu0 %vm13757_vm0, %v13758_v1 }
 0xc10   : > { %v11910_v18 = vpack.c.bf16 %v3763_v16, %v3758_v15 }
 0xc11   : > { %v3767_v19 = vpop.f32.mrb[40].mxu1 }
 0xc12   : > { %v11132_v20 = vpop.f32.mrb[41].mxu1  ;;  %11148 = vmatmul.mubr.msk.f32.gmra.mrb[50].mxu0 %vm2366_vm6, %v14792_v42  ;;  %11912 = vmatpush3.bf16.xpose.msk.msra.mxu1 %vm14829_vm8, %v11910_v18  ;;  %v3768_v21 = vadd.f32 %v10246_v12, %v3767_v19 }
 0xc13   : > { %11154 = vmatprep.subr.mxu1 %v13758_v1  ;;  %11171 = vmatprep.mubr.msk.f32.mxu0 %vm13757_vm0, %v13758_v1 }
 0xc1a   : > { %11155 = vmatpush3.xpose.msk.msra.mxu1 %vm2669_vm7, %v3768_v21 }
 0xc1b   : > { %11180 = vmatprep.subr.mxu1 %v13758_v1 }
 0xcc5   : > { %v3482_v22 = vpop.f32.mrb[34].mxu0 }
 0xcc6   : > { %v15032_v23 = vadd.f32 %v3571_v4, %v3482_v22  ;;  %v11081_v24 = vpop.f32.mrb[35].mxu0 }
 0xcc9   : > { %v3487_v25 = vpop.f32.mrb[36].mxu0 }
 0xcca   : > { %v15034_v26 = vadd.f32 %v3576_v7, %v3487_v25  ;;  %v11084_v27 = vpop.f32.mrb[37].mxu0  ;;  %v4091_v25 = vld [vmem:[#allocation24 + $0x10] sm:$0xff] }
 0xccd   : > { %v3492_v28 = vpop.f32.mrb[38].mxu0 }
 0xcce   : > { %v15036_v29 = vadd.f32 %v3581_v8, %v3492_v28  ;;  %v11087_v30 = vpop.f32.mrb[39].mxu0 }
 0xcd1   : > { %v3664_v35 = vpop.f32.mrb[40].mxu0 }
 0xcd2   : > { %v3665_v38 = vadd.f32 %v10242_v31, %v3664_v35  ;;  %v11109_v41 = vpop.f32.mrb[41].mxu0  ;;  %v4186_v35 = vld [vmem:[#allocation16 + $0x68] sm:$0xff] }
 0xcd4   : > { %11157 = vmatmul.mubr.msk.f32.vlgmr.msra.gmra.mrb[42].mxu1 %vm2669_vm7, %v3665_v38 }
 0xcd5   : > { %v3669_v43 = vpop.f32.mrb[42].mxu0  ;;  %11159 = vmatprep.mubr.msk.f32.mxu1 %vm13757_vm0, %v13758_v1  ;;  %11181 = vmatpush3.msra.mxu1 %v4091_v25 }
 0xcd6   : > { %v3670_v45 = vadd.f32 %v10242_v31, %v3669_v43  ;;  %v11112_v47 = vpop.f32.mrb[43].mxu0  ;;  %11922 = vmatprep.subr.bf16.mxu1 %v13759_v13 }
 0xcd7   : > { %v4188_v47 = vld [vmem:[#allocation16 + $0x78] sm:$0xff] }
 0xcd8   : > { %11160 = vmatmul.mubr.msk.f32.gmra.mrb[44].mxu1 %vm2669_vm7, %v3670_v45  ;;  %v4187_v45 = vld [vmem:[#allocation16 + $0x70] sm:$0xff] }
 0xcd9   : > { %v3674_v49 = vpop.f32.mrb[44].mxu0  ;;  %11162 = vmatprep.mubr.msk.f32.mxu1 %vm13757_vm0, %v13758_v1 }
 0xcda   : > { %v3675_v51 = vadd.f32 %v10242_v31, %v3674_v49  ;;  %v11115_v52 = vpop.f32.mrb[45].mxu0  ;;  %v4185_v31 = vld [vmem:[#allocation16 + $0x60] sm:$0xff] }
 0xcdb   : > { %v11917_v41 = vpack.c.bf16 %v4186_v35, %v4185_v31  ;;  %v10275_v31 = vld [vmem:[#allocation21 + $0x3] ss:$0 sm:$0xff] }
 0xcdc   : > { %11163 = vmatmul.mubr.msk.f32.gmra.mrb[46].mxu1 %vm2669_vm7, %v3675_v51  ;;  %v11920_v51 = vpack.c.bf16 %v4188_v47, %v4187_v45 }
 0xcdd   : > { %v3850_v53 = vpop.f32.mrb[46].mxu0  ;;  %11182 = vmatprep.mubr.msk.f32.mxu1 %vm13757_vm0, %v13758_v1 }
 0xcde   : > { %v11143_v32 = vpop.f32.mrb[47].mxu0  ;;  %v3851_v54 = vadd.f32 %v10254_v36, %v3850_v53 }
 0xce1   : > { %v3855_v39 = vpop.f32.mrb[48].mxu0 }
 0xce2   : > { %v3856_v55 = vadd.f32 %v10254_v36, %v3855_v39  ;;  %v11146_v57 = vpop.f32.mrb[49].mxu0  ;;  %v10280_v39 = vld [vmem:[%s16007_s14 + $0x68] sm:$0xff] }
 0xce3   : > { %v10282_v57 = vld [vmem:[%s16007_s14 + $0x78] sm:$0xff] }
 0xce4   : > { %v11914_v58 = vpack.c.bf16 %v3856_v55, %v3851_v54  ;;  %v10281_v55 = vld [vmem:[%s16007_s14 + $0x70] sm:$0xff] }
 0xce5   : > { %v3860_v59 = vpop.f32.mrb[50].mxu0 }
 0xce6   : > { %v11149_v60 = vpop.f32.mrb[51].mxu0  ;;  %11915 = vmatpush3.bf16.msra.mxu0 %v11914_v58  ;;  %v3861_v61 = vadd.f32 %v10254_v36, %v3860_v59  ;;  %v10279_v36 = vld [vmem:[%s16007_s14 + $0x60] sm:$0xff]  ;;  %v11932_v58 = vpack.c.bf16 %v10282_v57, %v10281_v55  ;;  %v4278_v59 = vld [vmem:[#allocation19 + $0x60] sm:$0xff] }
 0xce7   : > { %11169 = vmatprep.subr.mxu0 %v13758_v1  ;;  %v11929_v54 = vpack.c.bf16 %v10280_v39, %v10279_v36  ;;  %v4279_v60 = vld [vmem:[#allocation19 + $0x68] sm:$0xff] }
 0xcea   : > { %11170 = vmatpush3.msk.msra.mxu0 %vm2815_vm9, %v3861_v61  ;;  %v11923_v61 = vpack.c.bf16 %v4279_v60, %v4278_v59 }
 0xceb   : > { %11916 = vmatprep.subr.bf16.mxu0 %v13759_v13 }
 0xda7   : > { %v3948_v62 = vpop.f32.mrb[42].mxu1 }
 0xda8   : > { %v3962_v46 = vmul.f32 0.35355338, %v3948_v62  ;;  %v11158_v63 = vpop.f32.mrb[43].mxu1  ;;  %v4280_v62 = vld [vmem:[#allocation19 + $0x70] sm:$0xff] }
 0xdaa   : > { %v3965_v0 = vsel %vm2771_vm10, %v3962_v46, -inf }
 0xdab   : > { %3966 = vmax.xlane.f32.xlu0 %v3965_v0  ;;  %v3953_v2 = vpop.f32.mrb[44].mxu1 }
 0xdac   : > { %v3963_v3 = vmul.f32 0.35355338, %v3953_v2  ;;  %v11161_v48 = vpop.f32.mrb[45].mxu1 }
 0xdae   : > { %v3968_v4 = vsel %vm2771_vm10, %v3963_v3, -inf }
 0xdaf   : > { %3969 = vmax.xlane.f32.xlu1 %v3968_v4  ;;  %v3958_v5 = vpop.f32.mrb[46].mxu1 }
 0xdb0   : > { %v3964_v6 = vmul.f32 0.35355338, %v3958_v5  ;;  %v11164_v7 = vpop.f32.mrb[47].mxu1 }
 0xdb2   : > { %v3971_v50 = vsel %vm2778_vm11, %v3964_v6, -inf }
 0xdb3   : > { %3972 = vmax.xlane.f32.xlu0 %v3971_v50 }
 0xe38   : > { %v3967_v8 = vpop.xlane.xlu0 %3966 }
 0xe39   : > { %v3974_v9 = vsub.f32 %v3962_v46, %v3967_v8 }
 0xe3b   : > { %v3977_v10 = vmul.f32 1.442695, %v3974_v9  ;;  %v10283_v9 = vld [vmem:[#allocation22 + $0x3] ss:$0 sm:$0xff] }
 0xe3c   : > { %v3970_v11 = vpop.xlane.xlu1 %3969 }
 0xe3d   : > { %12532 = vpow2.f32 %v3977_v10  ;;  %v3975_v12 = vsub.f32 %v3963_v3, %v3970_v11 }
 0xe3f   : > { %v3979_v14 = vmul.f32 1.442695, %v3975_v12 }
 0xe40   : > { %v3973_v15 = vpop.xlane.xlu0 %3972 }
 0xe41   : > { %12534 = vpow2.f32 %v3979_v14  ;;  %v3976_v16 = vsub.f32 %v3964_v6, %v3973_v15 }
 0xe43   : > { %v3981_v17 = vmul.f32 1.442695, %v3976_v16 }
 0xe45   : > { %12536 = vpow2.f32 %v3981_v17 }
 0xe47   : > { %v12533_v18 = vpop.eup %12532 }
 0xe48   : > { %v3983_v19 = vsel %vm2771_vm10, %v12533_v18, 0.0 }
 0xe49   : > { %3984 = vadd.xlane.f32.xlu1 %v3983_v19 }
 0xe4b   : > { %v12535_v20 = vpop.eup %12534 }
 0xe4c   : > { %v3986_v21 = vsel %vm2771_vm10, %v12535_v20, 0.0 }
 0xe4d   : > { %3987 = vadd.xlane.f32.xlu0 %v3986_v21 }
 0xe4f   : > { %v12537_v22 = vpop.eup %12536 }
 0xe50   : > { %v3989_v24 = vsel %vm2778_vm11, %v12537_v22, 0.0 }
 0xe51   : > { %3990 = vadd.xlane.f32.xlu1 %v3989_v24 }
 0xed6   : > { %v3985_v27 = vpop.xlane.xlu1 %3984 }
 0xed7   : > { %12538 = vrcp.f32 %v3985_v27 }
 0xeda   : > { %v3988_v28 = vpop.xlane.xlu0 %3987 }
 0xedb   : > { %12540 = vrcp.f32 %v3988_v28 }
 0xede   : > { %v3991_v30 = vpop.xlane.xlu1 %3990 }
 0xedf   : > { %12542 = vrcp.f32 %v3991_v30 }
 0xee1   : > { %v12539_v38 = vpop.eup %12538 }
 0xee2   : > { %v3995_v43 = vmul.f32 %v12539_v38, %v12533_v18 }
 0xee4   : > { %11172 = vmatmul.mubr.msk.f32.vlgmr.msra.gmra.mrb[52].mxu0 %vm2771_vm10, %v3995_v43 }
 0xee5   : > { %v12541_v49 = vpop.eup %12540  ;;  %11174 = vmatprep.mubr.msk.f32.mxu0 %vm13757_vm0, %v13758_v1  ;;  %11918 = vmatpush3.bf16.msra.mxu0 %v11917_v41 }
 0xee6   : > { %v3996_v52 = vmul.f32 %v12541_v49, %v12535_v20  ;;  %11919 = vmatprep.subr.bf16.mxu0 %v13759_v13 }
 0xee8   : > { %11175 = vmatmul.mubr.msk.f32.gmra.mrb[54].mxu0 %vm2771_vm10, %v3996_v52 }
 0xee9   : > { %v12543_v53 = vpop.eup %12542  ;;  %11177 = vmatprep.mubr.msk.f32.mxu0 %vm13757_vm0, %v13758_v1  ;;  %11921 = vmatpush3.bf16.msra.mxu0 %v11920_v51 }
 0xeea   : > { %v3997_v32 = vmul.f32 %v12543_v53, %v12537_v22  ;;  %11928 = vmatprep.subr.bf16.mxu0 %v13759_v13 }
 0xeec   : > { %11178 = vmatmul.mubr.msk.f32.gmra.mrb[56].mxu0 %vm2771_vm10, %v3997_v32 }
 0xeed   : > { %11199 = vmatprep.mubr.msk.f32.mxu0 %vm13757_vm0, %v13758_v1 }
 0xef0   : > { %11200 = vmatmul.mubr.msk.f32.vlgmr.msra.gmra.mrb[58].mxu0 %vm2366_vm6, %v14775_v34 }
 0xef1   : > { %11202 = vmatprep.mubr.msk.f32.mxu0 %vm13757_vm0, %v13758_v1  ;;  %11930 = vmatpush3.bf16.msra.mxu0 %v11929_v54 }
 0xef2   : > { %11931 = vmatprep.subr.bf16.mxu0 %v13759_v13 }
 0xef4   : > { %11203 = vmatmul.mubr.msk.f32.gmra.mrb[60].mxu0 %vm2366_vm6, %v14790_v40 }
 0xef5   : > { %11205 = vmatprep.mubr.msk.f32.mxu0 %vm13757_vm0, %v13758_v1  ;;  %11933 = vmatpush3.bf16.msra.mxu0 %v11932_v58 }
 0xef6   : > { %11938 = vmatprep.subr.bf16.mxu0 %v13759_v13 }
 0xef8   : > { %11206 = vmatmul.mubr.msk.f32.gmra.mrb[62].mxu0 %vm2366_vm6, %v14804_v44 }
 0xef9   : > { %11233 = vmatprep.mubr.msk.f32.mxu0 %vm13757_vm0, %v13758_v1 }
 0xefc   : > { %11234 = vmatmul.mubr.msk.f32.vlgmr.msra.gmra.mrb[64].mxu0 %vm2366_vm6, %v14772_v33  ;;  %v4281_v33 = vld [vmem:[#allocation19 + $0x78] sm:$0xff] }
 0xefd   : > { %11236 = vmatprep.mubr.msk.f32.mxu0 %vm13757_vm0, %v13758_v1 }
 0xf00   : > { %11237 = vmatmul.mubr.msk.f32.gmra.mrb[66].mxu0 %vm2366_vm6, %v14777_v37  ;;  %v11926_v37 = vpack.c.bf16 %v4281_v33, %v4280_v62 }
 0xf01   : > { %11239 = vmatprep.mubr.msk.f32.mxu0 %vm13757_vm0, %v13758_v1 }
 0xf04   : > { %11240 = vmatmul.mubr.msk.f32.gmra.mrb[68].mxu0 %vm2366_vm6, %v14792_v42 }
 0xf05   : > { %11263 = vmatprep.mubr.msk.f32.mxu0 %vm13757_vm0, %v13758_v1 }
 0xfb7   : > { %v4076_v46 = vpop.f32.mrb[52].mxu0 }
 0xfb8   : > { %v11173_v63 = vpop.f32.mrb[53].mxu0  ;;  %11183 = vmatmul.mubr.msk.f32.vlgmr.msra.gmra.mrb[48].mxu1 %vm2669_vm7, %v4076_v46 }
 0xfb9   : > { %11185 = vmatprep.mubr.msk.f32.mxu1 %vm13757_vm0, %v13758_v1  ;;  %11924 = vmatpush3.bf16.msra.mxu1 %v11923_v61 }
 0xfba   : > { %11925 = vmatprep.subr.bf16.mxu1 %v13759_v13 }
 0xfbb   : > { %v4081_v42 = vpop.f32.mrb[54].mxu0 }
 0xfbc   : > { %v11176_v0 = vpop.f32.mrb[55].mxu0  ;;  %11186 = vmatmul.mubr.msk.f32.gmra.mrb[50].mxu1 %vm2669_vm7, %v4081_v42 }
 0xfbd   : > { %11188 = vmatprep.mubr.msk.f32.mxu1 %vm13757_vm0, %v13758_v1  ;;  %11927 = vmatpush3.bf16.msra.mxu1 %v11926_v37 }
 0xfbe   : > { %11934 = vmatprep.subr.bf16.mxu1 %v13759_v13 }
 0xfbf   : > { %v4086_v2 = vpop.f32.mrb[56].mxu0 }
 0xfc0   : > { %v11179_v3 = vpop.f32.mrb[57].mxu0  ;;  %11189 = vmatmul.mubr.msk.f32.gmra.mrb[52].mxu1 %vm2669_vm7, %v4086_v2 }
 0xfc1   : > { %11216 = vmatprep.mubr.msk.f32.mxu1 %vm13757_vm0, %v13758_v1 }
 0xfc3   : > { %v4263_v48 = vpop.f32.mrb[58].mxu0 }
 0xfc4   : > { %v11201_v4 = vpop.f32.mrb[59].mxu0  ;;  %11217 = vmatmul.mubr.msk.f32.vlgmr.msra.gmra.mrb[54].mxu1 %vm2366_vm6, %v14775_v34 }
 0xfc5   : > { %11219 = vmatprep.mubr.msk.f32.mxu1 %vm13757_vm0, %v13758_v1 }
 0xfc7   : > { %v4268_v5 = vpop.f32.mrb[60].mxu0 }
 0xfc8   : > { %v11204_v6 = vpop.f32.mrb[61].mxu0  ;;  %11220 = vmatmul.mubr.msk.f32.gmra.mrb[56].mxu1 %vm2366_vm6, %v14790_v40 }
 0xfc9   : > { %11222 = vmatprep.mubr.msk.f32.mxu1 %vm13757_vm0, %v13758_v1 }
 0xfcb   : > { %v4273_v7 = vpop.f32.mrb[62].mxu0 }
 0xfcc   : > { %v11207_v50 = vpop.f32.mrb[63].mxu0  ;;  %11223 = vmatmul.mubr.msk.f32.gmra.mrb[58].mxu1 %vm2366_vm6, %v14804_v44 }
 0xfcd   : > { %11248 = vmatprep.mubr.msk.f32.mxu1 %vm13757_vm0, %v13758_v1 }
 0xfcf   : > { %v4449_v34 = vpop.f32.mrb[64].mxu0 }
 0xfd0   : > { %v11235_v8 = vpop.f32.mrb[65].mxu0  ;;  %v4450_v11 = vadd.f32 %v10283_v9, %v4449_v34 }
 0xfd1   : > { %v4690_v8 = vld [vmem:[#allocation24 + $0x18] sm:$0xff] }
 0xfd3   : > { %v4454_v10 = vpop.f32.mrb[66].mxu0 }
 0xfd4   : > { %v4455_v12 = vadd.f32 %v10283_v9, %v4454_v10  ;;  %v11238_v14 = vpop.f32.mrb[67].mxu0 }
 0xfd6   : > { %v11939_v15 = vpack.c.bf16 %v4455_v12, %v4450_v11 }
 0xfd7   : > { %v4459_v40 = vpop.f32.mrb[68].mxu0 }
 0xfd8   : > { %v11241_v16 = vpop.f32.mrb[69].mxu0  ;;  %11940 = vmatpush3.bf16.msra.mxu0 %v11939_v15  ;;  %v4460_v17 = vadd.f32 %v10283_v9, %v4459_v40 }
 0xfd9   : > { %11261 = vmatprep.subr.mxu0 %v13758_v1 }
 0xfdc   : > { %11262 = vmatpush3.msk.msra.mxu0 %vm2815_vm9, %v4460_v17 }
 0xfdd   : > { %11941 = vmatprep.subr.bf16.mxu0 %v13759_v13 }
0x108b   : > { %v4167_v44 = vpop.f32.mrb[48].mxu1 }
0x108c   : > { %v15125_v18 = vadd.f32 %v4167_v44, %v15032_v23  ;;  %v11184_v19 = vpop.f32.mrb[49].mxu1 }
0x108f   : > { %v4172_v20 = vpop.f32.mrb[50].mxu1 }
0x1090   : > { %v15128_v21 = vadd.f32 %v4172_v20, %v15034_v26  ;;  %v11187_v22 = vpop.f32.mrb[51].mxu1  ;;  %v10271_v26 = vld [vmem:[#allocation18 + $0x3] ss:$0 sm:$0xff] }
0x1091   : > { %v4269_v51 = vadd.f32 %v10271_v26, %v4268_v5  ;;  %v4274_v52 = vadd.f32 %v10271_v26, %v4273_v7 }
0x1093   : > { %v4177_v24 = vpop.f32.mrb[52].mxu1 }
0x1094   : > { %v15131_v25 = vadd.f32 %v4177_v24, %v15036_v29  ;;  %v11190_v27 = vpop.f32.mrb[53].mxu1  ;;  %v4264_v29 = vadd.f32 %v10271_v26, %v4263_v48 }
0x1097   : > { %v4356_v28 = vpop.f32.mrb[54].mxu1 }
0x1098   : > { %v11218_v30 = vpop.f32.mrb[55].mxu1  ;;  %v4357_v38 = vadd.f32 %v10275_v31, %v4356_v28 }
0x1099   : > { %v10300_v30 = vld [vmem:[#allocation25] ss:$0 sm:$0xff] }
0x109b   : > { %v4361_v35 = vpop.f32.mrb[56].mxu1 }
0x109c   : > { %v4362_v41 = vadd.f32 %v10275_v31, %v4361_v35  ;;  %v11221_v43 = vpop.f32.mrb[57].mxu1 }
0x109e   : > { %v11935_v23 = vpack.c.bf16 %v4362_v41, %v4357_v38 }
0x109f   : > { %v4366_v45 = vpop.f32.mrb[58].mxu1 }
0x10a0   : > { %v11224_v47 = vpop.f32.mrb[59].mxu1  ;;  %11937 = vmatpush3.bf16.xpose.msk.msra.mxu1 %vm14829_vm8, %v11935_v23  ;;  %v4367_v49 = vadd.f32 %v10275_v31, %v4366_v45  ;;  %v12606_v45 = vld [vmem:[#allocation2] sm:$0xff] }
0x10a1   : > { %11246 = vmatprep.subr.mxu1 %v13758_v1 }
0x10a8   : > { %11247 = vmatpush3.xpose.msk.msra.mxu1 %vm2669_vm7, %v4367_v49 }
0x10a9   : > { %11272 = vmatprep.subr.mxu1 %v13758_v1 }
0x10ab   : > { %11249 = vmatmul.mubr.msk.f32.vlgmr.msra.gmra.mrb[60].mxu1 %vm2669_vm7, %v4264_v29 }
0x10ac   : > { %11251 = vmatprep.mubr.msk.f32.mxu1 %vm13757_vm0, %v13758_v1  ;;  %11273 = vmatpush3.msra.mxu1 %v4690_v8  ;;  %v4962_v8 = vld [vmem:[#allocation30 + $0x10] sm:$0xff] }
0x10ad   : > { %11947 = vmatprep.subr.bf16.mxu1 %v13759_v13 }
0x10af   : > { %11252 = vmatmul.mubr.msk.f32.gmra.mrb[62].mxu1 %vm2669_vm7, %v4269_v51 }
0x10b0   : > { %11254 = vmatprep.mubr.msk.f32.mxu1 %vm13757_vm0, %v13758_v1 }
0x10b3   : > { %11255 = vmatmul.mubr.msk.f32.gmra.mrb[64].mxu1 %vm2669_vm7, %v4274_v52 }
0x10b4   : > { %11274 = vmatprep.mubr.msk.f32.mxu1 %vm13757_vm0, %v13758_v1 }
0x117e   : > { %v4547_v53 = vpop.f32.mrb[60].mxu1 }
0x117f   : > { %v4561_v32 = vmul.f32 0.35355338, %v4547_v53  ;;  %v11250_v36 = vpop.f32.mrb[61].mxu1  ;;  %v12607_v53 = vld [vmem:[#allocation2 + $0x8] sm:$0xff] }
0x1181   : > { %v4564_v39 = vsel %vm2771_vm10, %v4561_v32, -inf }
0x1182   : > { %4565 = vmax.xlane.f32.xlu0 %v4564_v39  ;;  %v4552_v54 = vpop.f32.mrb[62].mxu1  ;;  %v12608_v39 = vld [vmem:[#allocation2 + $0x10] sm:$0x3] }
0x1183   : > { %v4562_v55 = vmul.f32 0.35355338, %v4552_v54  ;;  %v11253_v57 = vpop.f32.mrb[63].mxu1 }
0x1185   : > { %v4567_v58 = vsel %vm2771_vm10, %v4562_v55, -inf }
0x1186   : > { %4568 = vmax.xlane.f32.xlu1 %v4567_v58  ;;  %v4557_v59 = vpop.f32.mrb[64].mxu1 }
0x1187   : > { %v4563_v60 = vmul.f32 0.35355338, %v4557_v59  ;;  %v11256_v61 = vpop.f32.mrb[65].mxu1 }
0x1189   : > { %v4570_v62 = vsel %vm2778_vm11, %v4563_v60, -inf }
0x118a   : > { %4571 = vmax.xlane.f32.xlu0 %v4570_v62 }
0x120f   : > { %v4566_v33 = vpop.xlane.xlu0 %4565 }
0x1210   : > { %v4573_v46 = vsub.f32 %v4561_v32, %v4566_v33 }
0x1212   : > { %v4576_v63 = vmul.f32 1.442695, %v4573_v46 }
0x1213   : > { %v4569_v37 = vpop.xlane.xlu1 %4568 }
0x1214   : > { %12544 = vpow2.f32 %v4576_v63  ;;  %v4574_v42 = vsub.f32 %v4562_v55, %v4569_v37 }
0x1216   : > { %v4578_v0 = vmul.f32 1.442695, %v4574_v42 }
0x1217   : > { %v4572_v2 = vpop.xlane.xlu0 %4571 }
0x1218   : > { %12546 = vpow2.f32 %v4578_v0  ;;  %v4575_v3 = vsub.f32 %v4563_v60, %v4572_v2 }
0x121a   : > { %v4580_v48 = vmul.f32 1.442695, %v4575_v3  ;;  %v4857_v3 = vld [vmem:[#allocation27] sm:$0xff] }
0x121c   : > { %12548 = vpow2.f32 %v4580_v48  ;;  %v4858_v48 = vld [vmem:[#allocation27 + $0x8] sm:$0xff] }
0x121e   : > { %v12545_v4 = vpop.eup %12544 }
0x121f   : > { %v4582_v5 = vsel %vm2771_vm10, %v12545_v4, 0.0 }
0x1220   : > { %4583 = vadd.xlane.f32.xlu1 %v4582_v5  ;;  %v4859_v5 = vld [vmem:[#allocation27 + $0x10] sm:$0xff] }
0x1222   : > { %v12547_v6 = vpop.eup %12546 }
0x1223   : > { %v4585_v7 = vsel %vm2771_vm10, %v12547_v6, 0.0 }
0x1224   : > { %4586 = vadd.xlane.f32.xlu0 %v4585_v7 }
0x1226   : > { %v12549_v50 = vpop.eup %12548 }
0x1227   : > { %v4588_v34 = vsel %vm2778_vm11, %v12549_v50, 0.0 }
0x1228   : > { %4589 = vadd.xlane.f32.xlu1 %v4588_v34  ;;  %v4961_v34 = vld [vmem:[#allocation30 + $0x8] sm:$0xff] }
0x12ad   : > { %v4584_v9 = vpop.xlane.xlu1 %4583 }
0x12ae   : > { %12550 = vrcp.f32 %v4584_v9 }
0x12b1   : > { %v4587_v10 = vpop.xlane.xlu0 %4586 }
0x12b2   : > { %12552 = vrcp.f32 %v4587_v10  ;;  %v4963_v10 = vld [vmem:[#allocation30 + $0x18] sm:$0xff] }
0x12b5   : > { %v4590_v11 = vpop.xlane.xlu1 %4589 }
0x12b6   : > { %12554 = vrcp.f32 %v4590_v11  ;;  %v11951_v11 = vpack.c.bf16 %v4963_v10, %v4962_v8  ;;  %v15240_v10 = vld [vmem:[#allocation31] ss:$0 sm:$0xff] }
0x12b8   : > { %v12551_v12 = vpop.eup %12550 }
0x12b9   : > { %v4594_v14 = vmul.f32 %v12551_v12, %v12545_v4  ;;  %v11942_v4 = vpack.c.bf16 %v4858_v48, %v4857_v3  ;;  %v4964_v12 = vld [vmem:[#allocation30 + $0x20] sm:$0xff] }
0x12bb   : > { %11264 = vmatmul.mubr.msk.f32.vlgmr.msra.gmra.mrb[70].mxu0 %vm2771_vm10, %v4594_v14  ;;  %v4965_v14 = vld [vmem:[#allocation30 + $0x28] sm:$0xff] }
0x12bc   : > { %v12553_v15 = vpop.eup %12552  ;;  %11266 = vmatprep.mubr.msk.f32.mxu0 %vm13757_vm0, %v13758_v1  ;;  %11943 = vmatpush3.bf16.msra.mxu0 %v11942_v4 }
0x12bd   : > { %v4595_v40 = vmul.f32 %v12553_v15, %v12547_v6  ;;  %11944 = vmatprep.subr.bf16.mxu0 %v13759_v13  ;;  %v4860_v6 = vld [vmem:[#allocation27 + $0x18] sm:$0xff]  ;;  %v11954_v15 = vpack.c.bf16 %v4965_v14, %v4964_v12 }
0x12be   : > { %v11945_v7 = vpack.c.bf16 %v4860_v6, %v4859_v5 }
0x12bf   : > { %11267 = vmatmul.mubr.msk.f32.gmra.mrb[72].mxu0 %vm2771_vm10, %v4595_v40 }
0x12c0   : > { %v12555_v16 = vpop.eup %12554  ;;  %11269 = vmatprep.mubr.msk.f32.mxu0 %vm13757_vm0, %v13758_v1  ;;  %11946 = vmatpush3.bf16.msra.mxu0 %v11945_v7 }
0x12c1   : > { %v4596_v17 = vmul.f32 %v12555_v16, %v12549_v50  ;;  %11959 = vmatprep.subr.bf16.mxu0 %v13759_v13  ;;  %v4960_v50 = vld [vmem:[#allocation30] sm:$0xff] }
0x12c2   : > { %v11948_v9 = vpack.c.bf16 %v4961_v34, %v4960_v50 }
0x12c3   : > { %11270 = vmatmul.mubr.msk.f32.gmra.mrb[74].mxu0 %vm2771_vm10, %v4596_v17 }
0x12c4   : > { %11291 = vmatprep.mubr.msk.f32.mxu0 %vm13757_vm0, %v13758_v1 }
0x138e   : > { %v4675_v44 = vpop.f32.mrb[70].mxu0 }
0x138f   : > { %v11265_v19 = vpop.f32.mrb[71].mxu0  ;;  %11275 = vmatmul.mubr.msk.f32.vlgmr.msra.gmra.mrb[66].mxu1 %vm2669_vm7, %v4675_v44 }
0x1390   : > { %11277 = vmatprep.mubr.msk.f32.mxu1 %vm13757_vm0, %v13758_v1  ;;  %11949 = vmatpush3.bf16.msra.mxu1 %v11948_v9 }
0x1391   : > { %11950 = vmatprep.subr.bf16.mxu1 %v13759_v13 }
0x1392   : > { %v4680_v20 = vpop.f32.mrb[72].mxu0 }
0x1393   : > { %v11268_v22 = vpop.f32.mrb[73].mxu0  ;;  %11278 = vmatmul.mubr.msk.f32.gmra.mrb[68].mxu1 %vm2669_vm7, %v4680_v20 }
0x1394   : > { %11280 = vmatprep.mubr.msk.f32.mxu1 %vm13757_vm0, %v13758_v1  ;;  %11952 = vmatpush3.bf16.msra.mxu1 %v11951_v11 }
0x1395   : > { %11953 = vmatprep.subr.bf16.mxu1 %v13759_v13 }
0x1396   : > { %v4685_v24 = vpop.f32.mrb[74].mxu0 }
0x1397   : > { %v11271_v27 = vpop.f32.mrb[75].mxu0  ;;  %11281 = vmatmul.mubr.msk.f32.gmra.mrb[70].mxu1 %vm2669_vm7, %v4685_v24 }
0x1398   : > { %11316 = vmatprep.mubr.msk.f32.mxu1 %vm13757_vm0, %v13758_v1  ;;  %11955 = vmatpush3.bf16.msra.mxu1 %v11954_v15 }
0x1399   : > { %11956 = vmatprep.subr.bf16.mxu1 %v13759_v13 }
0x1462   : > { %v4766_v28 = vpop.f32.mrb[66].mxu1 }
0x1463   : > { %v4780_v31 = vadd.f32 %v4766_v28, %v15125_v18  ;;  %v11276_v35 = vpop.f32.mrb[67].mxu1 }
0x1464   : > { %v10302_v35 = vld [vmem:[%s16011_s25] ss:$0 sm:$0xff]  ;;  %s16020_s25 = sld [smem:[#allocation109_spill]] }
0x1465   : > { %v4790_v38 = vadd.f32 %v10300_v30, %v4780_v31 }
0x1466   : > { %v4771_v41 = vpop.f32.mrb[68].mxu1 }
0x1467   : > { %v4781_v43 = vadd.f32 %v4771_v41, %v15128_v21  ;;  %v11279_v23 = vpop.f32.mrb[69].mxu1  ;;  %v4793_v47 = vadd.f32 %v12606_v45, %v4790_v38 }
0x1469   : > { %v4791_v26 = vadd.f32 %v10300_v30, %v4781_v43  ;;  %v4798_v49 = vsel %vm2366_vm6, %v4793_v47, 0.0 }
0x146a   : > { %4799 = vadd.xlane.f32.xlu0 %v4798_v49  ;;  %v4776_v29 = vpop.f32.mrb[70].mxu1 }
0x146b   : > { %v4782_v51 = vadd.f32 %v4776_v29, %v15131_v25  ;;  %v11282_v52 = vpop.f32.mrb[71].mxu1  ;;  %v4794_v32 = vadd.f32 %v12607_v53, %v4791_v26  ;;  %v4967_v53 = vld [vmem:[#allocation30 + $0x38] sm:$0xff] }
0x146c   : > { %v4966_v52 = vld [vmem:[#allocation30 + $0x30] sm:$0xff] }
0x146d   : > { %v4792_v36 = vadd.f32 %v10300_v30, %v4782_v51  ;;  %v4801_v18 = vsel %vm2366_vm6, %v4794_v32, 0.0  ;;  %v10301_v30 = vld [vmem:[%s16010_s18] ss:$0 sm:$0xff]  ;;  %s16019_s18 = sld [smem:[#allocation111_spill]] }
0x146e   : > { %4802 = vadd.xlane.f32.xlu1 %v4801_v18  ;;  %v5130_v18 = vld [vmem:[%s16012_s13 + $0x8] sm:$0xff] }
0x146f   : > { %v4795_v21 = vadd.f32 %v12608_v39, %v4792_v36  ;;  %v5129_v36 = vld [vmem:[%s16012_s13] sm:$0xff] }
0x1470   : > { %v11960_v39 = vpack.c.bf16 %v5130_v18, %v5129_v36  ;;  %v10317_v36 = vld [vmem:[#allocation36] ss:$0 sm:$0xff] }
0x1471   : > { %v4805_v54 = vsel %vm4804_vm12, %v4795_v21, 0.0 }
0x1472   : > { %4806 = vadd.xlane.f32.xlu0 %v4805_v54  ;;  %v5132_v54 = vld [vmem:[%s16012_s13 + $0x18] sm:$0xff] }
0x14f7   : > { %v4800_v55 = vpop.xlane.xlu0 %4799 }
0x14f8   : > { %v4809_v57 = vmul.f32 0.03125, %v4800_v55 }
0x14fa   : > { %v4812_v58 = vsub.f32 %v4793_v47, %v4809_v57  ;;  %v15213_v57 = vld [vmem:[#allocation15] sm:$0xff] }
0x14fb   : > { %v4803_v59 = vpop.xlane.xlu1 %4802 }
0x14fc   : > { %v4810_v60 = vmul.f32 0.03125, %v4803_v59  ;;  %v4815_v61 = vmul.f32 %v4812_v58, %v4812_v58  ;;  %v5213_v59 = vld [vmem:[%s16013_s0] sm:$0xff]  ;;  %s16021_s0 = sld [smem:[#allocation110_spill]] }
0x14fe   : > { %v4813_v25 = vsub.f32 %v4794_v32, %v4810_v60  ;;  %v4818_v62 = vsel %vm2366_vm6, %v4815_v61, 0.0  ;;  %v11957_v32 = vpack.c.bf16 %v4967_v53, %v4966_v52  ;;  %v5214_v60 = vld [vmem:[%s16014_s23 + $0x8] sm:$0xff] }
0x14ff   : > { %4819 = vadd.xlane.f32.xlu1 %v4818_v62  ;;  %v4807_v33 = vpop.xlane.xlu0 %4806 }
0x1500   : > { %v4811_v46 = vmul.f32 0.03125, %v4807_v33  ;;  %v4816_v63 = vmul.f32 %v4813_v25, %v4813_v25  ;;  %11958 = vmatpush3.bf16.msra.mxu1 %v11957_v32  ;;  %v11966_v33 = vpack.c.bf16 %v5214_v60, %v5213_v59  ;;  %v10324_v59 = vld [vmem:[%s16012_s13 + $0x38] sm:$0xff] }
0x1501   : > { %11965 = vmatprep.subr.bf16.mxu1 %v13759_v13 }
0x1502   : > { %v4814_v37 = vsub.f32 %v4795_v21, %v4811_v46  ;;  %v4821_v42 = vsel %vm2366_vm6, %v4816_v63, 0.0  ;;  %v5131_v21 = vld [vmem:[%s16012_s13 + $0x10] sm:$0xff] }
0x1503   : > { %4822 = vadd.xlane.f32.xlu0 %v4821_v42  ;;  %v11963_v55 = vpack.c.bf16 %v5132_v54, %v5131_v21  ;;  %v5215_v63 = vld [vmem:[%s16014_s23 + $0x10] sm:$0xff]  ;;  %v10321_v21 = vld [vmem:[%s16012_s13 + $0x20] sm:$0xff]  ;;  %v10322_v54 = vld [vmem:[%s16012_s13 + $0x28] sm:$0xff] }
0x1504   : > { %v4817_v0 = vmul.f32 %v4814_v37, %v4814_v37 }
0x1506   : > { %v4824_v2 = vsel %vm4804_vm12, %v4817_v0, 0.0 }
0x1507   : > { %4825 = vadd.xlane.f32.xlu1 %v4824_v2 }
0x158c   : > { %v4820_v40 = vpop.xlane.xlu1 %4819 }
0x158d   : > { %v4827_v16 = vmul.f32 0.03125, %v4820_v40 }
0x158f   : > { %v4830_v17 = vadd.f32 1e-05, %v4827_v16  ;;  %v10315_v16 = vld [vmem:[#allocation34] ss:$0 sm:$0xff] }
0x1590   : > { %v4823_v44 = vpop.xlane.xlu0 %4822 }
0x1591   : > { %12556 = vrsqrt.f32 %v4830_v17  ;;  %v4828_v19 = vmul.f32 0.03125, %v4823_v44  ;;  %v10313_v17 = vld [vmem:[#allocation33] ss:$0 sm:$0xff] }
0x1593   : > { %v4831_v20 = vadd.f32 1e-05, %v4828_v19 }
0x1594   : > { %v4826_v22 = vpop.xlane.xlu1 %4825 }
0x1595   : > { %12558 = vrsqrt.f32 %v4831_v20  ;;  %v4829_v24 = vmul.f32 0.03125, %v4826_v22 }
0x1597   : > { %v4832_v27 = vadd.f32 1e-05, %v4829_v24  ;;  %v5294_v24 = vld [vmem:[%s16015_s5] sm:$0xff] }
0x1599   : > { %12560 = vrsqrt.f32 %v4832_v27  ;;  %v5295_v27 = vld [vmem:[%s16015_s5 + $0x8] sm:$0xff] }
0x159b   : > { %v12557_v28 = vpop.eup %12556 }
0x159c   : > { %v4836_v31 = vmul.f32 %v12557_v28, %v4812_v58  ;;  %v10303_v58 = vld [vmem:[#allocation28] ss:$0 sm:$0xff]  ;;  %v5296_v28 = vld [vmem:[%s16015_s5 + $0x10] sm:$0xff] }
0x159e   : > { %v4845_v38 = vmul.f32 %v10301_v30, %v4836_v31  ;;  %v5297_v31 = vld [vmem:[%s16015_s5 + $0x18] sm:$0xff] }
0x159f   : > { %v12559_v41 = vpop.eup %12558 }
0x15a0   : > { %v15188_v43 = vadd.f32 %v10302_v35, %v4845_v38  ;;  %v4837_v23 = vmul.f32 %v12559_v41, %v4813_v25 }
0x15a2   : > { %11292 = vmatmul.mubr.msk.f32.vlgmr.msra.gmra.mrb[76].mxu0 %vm2366_vm6, %v15188_v43  ;;  %v4846_v45 = vmul.f32 %v10301_v30, %v4837_v23 }
0x15a3   : > { %v12561_v47 = vpop.eup %12560  ;;  %11294 = vmatprep.mubr.msk.f32.mxu0 %vm13757_vm0, %v13758_v1  ;;  %11961 = vmatpush3.bf16.msra.mxu0 %v11960_v39 }
0x15a4   : > { %v15194_v26 = vadd.f32 %v10302_v35, %v4846_v45  ;;  %v4838_v49 = vmul.f32 %v12561_v47, %v4814_v37  ;;  %11962 = vmatprep.subr.bf16.mxu0 %v13759_v13  ;;  %v5216_v37 = vld [vmem:[%s16014_s23 + $0x18] sm:$0xff] }
0x15a5   : > { %v11969_v3 = vpack.c.bf16 %v5216_v37, %v5215_v63  ;;  %v10329_v37 = vld [vmem:[%s16014_s23 + $0x30] sm:$0xff] }
0x15a6   : > { %11295 = vmatmul.mubr.msk.f32.gmra.mrb[78].mxu0 %vm2366_vm6, %v15194_v26  ;;  %v4847_v29 = vmul.f32 %v10301_v30, %v4838_v49  ;;  %v11972_v30 = vpack.c.bf16 %v5295_v27, %v5294_v24 }
0x15a7   : > { %11297 = vmatprep.mubr.msk.f32.mxu0 %vm13757_vm0, %v13758_v1  ;;  %11964 = vmatpush3.bf16.msra.mxu0 %v11963_v55  ;;  %v11978_v55 = vpack.c.bf16 %v10322_v54, %v10321_v21  ;;  %v10352_v21 = vld [vmem:[%s16014_s23 + $0x58] sm:$0xff] }
0x15a8   : > { %v15200_v51 = vadd.f32 %v10302_v35, %v4847_v29  ;;  %11971 = vmatprep.subr.bf16.mxu0 %v13759_v13  ;;  %v11975_v35 = vpack.c.bf16 %v5297_v31, %v5296_v28 }
0x15aa   : > { %11298 = vmatmul.mubr.msk.f32.gmra.mrb[80].mxu0 %vm2366_vm6, %v15200_v51 }
0x15ab   : > { %11333 = vmatprep.mubr.msk.f32.mxu0 %vm13757_vm0, %v13758_v1 }
0x15ae   : > { %11334 = vmatmul.mubr.msk.f32.vlgmr.msra.gmra.mrb[82].mxu0 %vm2366_vm6, %v15213_v57 }
0x15af   : > { %11355 = vmatprep.mubr.msk.f32.mxu0 %vm13757_vm0, %v13758_v1  ;;  %11973 = vmatpush3.bf16.msra.mxu0 %v11972_v30 }
0x15b0   : > { %11974 = vmatprep.subr.bf16.mxu0 %v13759_v13 }
0x15b3   : > { %11976 = vmatpush3.bf16.msra.mxu0 %v11975_v35 }
0x15b4   : > { %11363 = vmatprep.subr.mxu0 %v13758_v1 }
0x15b6   : > { %11356 = vmatmul.mubr.f32.vlgmr.msra.gmra.mrb[84].mxu0 %v13758_v1 }
0x15b7   : > { %11365 = vmatprep.mubr.msk.f32.mxu0 %vm13757_vm0, %v13758_v1 }
0x1675   : > { %v4943_v61 = vpop.f32.mrb[76].mxu0 }
0x1676   : > { %v4944_v25 = vadd.f32 %v10303_v58, %v4943_v61  ;;  %v11293_v62 = vpop.f32.mrb[77].mxu0 }
0x1677   : > { %v10328_v62 = vld [vmem:[%s16014_s23 + $0x28] sm:$0xff] }
0x1678   : > { %v4957_v46 = vmax.f32 %v4944_v25, 0.0  ;;  %v10327_v25 = vld [vmem:[%s16014_s23 + $0x20] sm:$0xff] }
0x1679   : > { %v4948_v42 = vpop.f32.mrb[78].mxu0 }
0x167a   : > { %v4949_v0 = vadd.f32 %v10303_v58, %v4948_v42  ;;  %v11296_v2 = vpop.f32.mrb[79].mxu0  ;;  %11317 = vmatmul.mubr.msk.f32.vlgmr.msra.gmra.mrb[72].mxu1 %vm4975_vm13, %v4957_v46  ;;  %v11984_v46 = vpack.c.bf16 %v10328_v62, %v10327_v25  ;;  %v10330_v42 = vld [vmem:[%s16014_s23 + $0x38] sm:$0xff] }
0x167b   : > { %11319 = vmatprep.mubr.msk.f32.mxu1 %vm13757_vm0, %v13758_v1  ;;  %11967 = vmatpush3.bf16.msra.mxu1 %v11966_v33 }
0x167c   : > { %v4958_v48 = vmax.f32 %v4949_v0, 0.0  ;;  %11968 = vmatprep.subr.bf16.mxu1 %v13759_v13  ;;  %v11987_v0 = vpack.c.bf16 %v10330_v42, %v10329_v37  ;;  %v10353_v37 = vld [vmem:[#allocation34 + $0x2] ss:$0 sm:$0xff] }
0x167d   : > { %v4953_v4 = vpop.f32.mrb[80].mxu0 }
0x167e   : > { %v4954_v5 = vadd.f32 %v10303_v58, %v4953_v4  ;;  %v11299_v6 = vpop.f32.mrb[81].mxu0  ;;  %11320 = vmatmul.mubr.msk.f32.gmra.mrb[74].mxu1 %vm4975_vm13, %v4958_v48  ;;  %v10323_v58 = vld [vmem:[%s16012_s13 + $0x30] sm:$0xff] }
0x167f   : > { %11322 = vmatprep.mubr.msk.f32.mxu1 %vm13757_vm0, %v13758_v1  ;;  %11970 = vmatpush3.bf16.msra.mxu1 %v11969_v3  ;;  %v11981_v60 = vpack.c.bf16 %v10324_v59, %v10323_v58  ;;  %v10325_v6 = vld [vmem:[#allocation33 + $0x1] ss:$0 sm:$0xff]  ;;  %v10344_v58 = vld [vmem:[%s16012_s13 + $0x48] sm:$0xff] }
0x1680   : > { %v4959_v7 = vmax.f32 %v4954_v5, 0.0  ;;  %11358 = vmatprep.subr.mxu1 %v13758_v1  ;;  %v10331_v5 = vld [vmem:[#allocation34 + $0x1] ss:$0 sm:$0xff] }
0x1681   : > { %v5209_v50 = vpop.f32.mrb[82].mxu0 }
0x1682   : > { %11323 = vmatmul.mubr.msk.f32.gmra.mrb[76].mxu1 %vm4975_vm13, %v4959_v7  ;;  %v11335_v34 = vpop.f32.mrb[83].mxu0  ;;  %v5210_v22 = vadd.f32 %v10313_v17, %v5209_v50  ;;  %v10336_v17 = vld [vmem:[%s16015_s5 + $0x38] sm:$0xff] }
0x1683   : > { %11344 = vmatprep.mubr.msk.f32.mxu1 %vm13757_vm0, %v13758_v1 }
0x1686   : > { %11345 = vmatmul.mubr.msk.f32.vlgmr.msra.gmra.mrb[78].mxu1 %vm2366_vm6, %v15213_v57 }
0x1687   : > { %11360 = vmatprep.mubr.msk.f32.mxu1 %vm13757_vm0, %v13758_v1 }
0x1689   : > { %v5374_v32 = vpop.f32.mrb[84].mxu0 }
0x168a   : > { %v11357_v18 = vpop.f32.mrb[85].mxu0  ;;  %v5375_v39 = vadd.f32 %v10317_v36, %v5374_v32  ;;  %v10349_v32 = vld [vmem:[%s16014_s23 + $0x40] sm:$0xff]  ;;  %v10350_v36 = vld [vmem:[%s16014_s23 + $0x48] sm:$0xff] }
0x168b   : > { %v12002_v18 = vpack.c.bf16 %v10350_v36, %v10349_v32  ;;  %v10366_v32 = vld [vmem:[%s16012_s13 + $0x70] sm:$0xff]  ;;  %v10367_v36 = vld [vmem:[%s16012_s13 + $0x78] sm:$0xff] }
0x168c   : > { %11364 = vmatpush3.msra.mxu0 %v5375_v39  ;;  %v10351_v39 = vld [vmem:[%s16014_s23 + $0x50] sm:$0xff] }
0x168d   : > { %11983 = vmatprep.subr.bf16.mxu0 %v13759_v13  ;;  %v12005_v54 = vpack.c.bf16 %v10352_v21, %v10351_v39  ;;  %v10370_v39 = vld [vmem:[%s16014_s23 + $0x60] sm:$0xff]  ;;  %v10371_v21 = vld [vmem:[%s16014_s23 + $0x68] sm:$0xff] }
0x174d   : > { %v15238_v8 = vpop.f32.mrb[72].mxu1 }
0x174e   : > { %v11318_v9 = vpop.f32.mrb[73].mxu1 }
0x1751   : > { %v5056_v11 = vpop.f32.mrb[74].mxu1 }
0x1752   : > { %v15243_v12 = vadd.f32 %v15240_v10, %v5056_v11  ;;  %v11321_v14 = vpop.f32.mrb[75].mxu1  ;;  %v10333_v11 = vld [vmem:[%s16015_s5 + $0x20] sm:$0xff] }
0x1753   : > { %v10334_v14 = vld [vmem:[%s16015_s5 + $0x28] sm:$0xff] }
0x1755   : > { %v15245_v15 = vpop.f32.mrb[76].mxu1 }
0x1756   : > { %v11324_v40 = vpop.f32.mrb[77].mxu1 }
0x1757   : > { %v10335_v40 = vld [vmem:[%s16015_s5 + $0x30] sm:$0xff] }
0x1759   : > { %v5290_v44 = vpop.f32.mrb[78].mxu1 }
0x175a   : > { %v5291_v19 = vadd.f32 %v10315_v16, %v5290_v44  ;;  %v11346_v20 = vpop.f32.mrb[79].mxu1  ;;  %v11990_v16 = vpack.c.bf16 %v10334_v14, %v10333_v11  ;;  %v11993_v44 = vpack.c.bf16 %v10336_v17, %v10335_v40  ;;  %v10357_v11 = vld [vmem:[%s16015_s5 + $0x50] sm:$0xff]  ;;  %v10358_v40 = vld [vmem:[%s16015_s5 + $0x58] sm:$0xff] }
0x175c   : > { %11359 = vmatpush3.xpose.msk.msra.mxu1 %vm2669_vm7, %v5291_v19 }
0x175d   : > { %11977 = vmatprep.subr.bf16.mxu1 %v13759_v13 }
0x175f   : > { %11361 = vmatmul.mubr.msk.f32.vlgmr.msra.gmra.mrb[80].mxu1 %vm2669_vm7, %v5210_v22 }
0x1760   : > { %11376 = vmatprep.mubr.msk.f32.mxu1 %vm13757_vm0, %v13758_v1  ;;  %11979 = vmatpush3.bf16.msra.mxu1 %v11978_v55  ;;  %v10343_v55 = vld [vmem:[%s16012_s13 + $0x40] sm:$0xff] }
0x1761   : > { %11980 = vmatprep.subr.bf16.mxu1 %v13759_v13  ;;  %v11996_v59 = vpack.c.bf16 %v10344_v58, %v10343_v55  ;;  %v10372_v55 = vld [vmem:[%s16014_s23 + $0x70] sm:$0xff]  ;;  %v10373_v58 = vld [vmem:[%s16014_s23 + $0x78] sm:$0xff] }
0x1764   : > { %11982 = vmatpush3.bf16.msra.mxu1 %v11981_v60  ;;  %v10345_v60 = vld [vmem:[%s16012_s13 + $0x50] sm:$0xff] }
0x1765   : > { %11989 = vmatprep.subr.bf16.mxu1 %v13759_v13 }
0x1767   : > { %11377 = vmatmul.mubr.msk.f32.vlgmr.msra.gmra.mrb[82].mxu1 %vm2366_vm6, %v15213_v57 }
0x1768   : > { %11398 = vmatprep.mubr.msk.f32.mxu1 %vm13757_vm0, %v13758_v1  ;;  %11991 = vmatpush3.bf16.msra.mxu1 %v11990_v16  ;;  %v12011_v16 = vpack.c.bf16 %v10358_v40, %v10357_v11 }
0x1769   : > { %11992 = vmatprep.subr.bf16.mxu1 %v13759_v13 }
0x176c   : > { %11994 = vmatpush3.bf16.msra.mxu1 %v11993_v44 }
0x176d   : > { %11411 = vmatprep.subr.mxu1 %v13758_v1 }
0x176f   : > { %11399 = vmatmul.mubr.f32.vlgmr.msra.gmra.mrb[84].mxu1 %v13758_v1 }
0x1770   : > { %11413 = vmatprep.mubr.msk.f32.mxu1 %vm13757_vm0, %v13758_v1 }
0x1832   : > { %v5450_v38 = vpop.f32.mrb[80].mxu1 }
0x1833   : > { %v5454_v41 = vmul.f32 0.35355338, %v5450_v38  ;;  %v11362_v23 = vpop.f32.mrb[81].mxu1 }
0x1835   : > { %v5455_v45 = vsel %vm2669_vm7, %v5454_v41, -inf }
0x1836   : > { %5456 = vmax.xlane.f32.xlu0 %v5455_v45 }
0x183a   : > { %v5619_v2 = vpop.f32.mrb[82].mxu1 }
0x183b   : > { %v11378_v3 = vpop.f32.mrb[83].mxu1  ;;  %v5620_v9 = vadd.f32 %v10325_v6, %v5619_v2 }
0x1842   : > { %v5785_v38 = vpop.f32.mrb[84].mxu1 }
0x1843   : > { %v11400_v23 = vpop.f32.mrb[85].mxu1 }
0x1844   : > { %v6509_v23 = vld [vmem:[#allocation37 + $0x10] sm:$0xff] }
0x18c3   : > { %v5457_v47 = vpop.xlane.xlu0 %5456 }
0x18c4   : > { %v5458_v49 = vsub.f32 %v5454_v41, %v5457_v47  ;;  %v10337_v41 = vld [vmem:[#allocation36 + $0x1] ss:$0 sm:$0xff]  ;;  %v5951_v47 = vld [vmem:[#allocation37 + $0x8] sm:$0xff] }
0x18c5   : > { %v5786_v45 = vadd.f32 %v10337_v41, %v5785_v38  ;;  %11412 = vmatpush3.msra.mxu1 %v5951_v47 }
0x18c6   : > { %v5459_v29 = vmul.f32 1.442695, %v5458_v49  ;;  %11995 = vmatprep.subr.bf16.mxu1 %v13759_v13 }
0x18c8   : > { %12562 = vpow2.f32 %v5459_v29 }
0x18d2   : > { %v12563_v52 = vpop.eup %12562 }
0x18d3   : > { %v5461_v53 = vsel %vm2669_vm7, %v12563_v52, 0.0 }
0x18d4   : > { %5462 = vadd.xlane.f32.xlu1 %v5461_v53  ;;  %v5539_v53 = vld [vmem:[#allocation37] sm:$0xff] }
0x1961   : > { %v5463_v61 = vpop.xlane.xlu1 %5462 }
0x1962   : > { %12564 = vrcp.f32 %v5463_v61  ;;  %v10346_v61 = vld [vmem:[%s16012_s13 + $0x58] sm:$0xff] }
0x196c   : > { %v12565_v33 = vpop.eup %12564 }
0x196d   : > { %v5465_v63 = vmul.f32 %v12565_v33, %v12563_v52  ;;  %v11999_v33 = vpack.c.bf16 %v10346_v61, %v10345_v60  ;;  %v12023_v61 = vpack.c.bf16 %v10373_v58, %v10372_v55 }
0x196f   : > { %11366 = vmatmul.mubr.msk.f32.vlgmr.msra.gmra.mrb[86].mxu0 %vm2669_vm7, %v5465_v63 }
0x1970   : > { %11985 = vmatpush3.bf16.msra.mxu0 %v11984_v46  ;;  %11387 = vmatprep.mubr.msk.f32.mxu0 %vm13757_vm0, %v13758_v1 }
0x1971   : > { %11986 = vmatprep.subr.bf16.mxu0 %v13759_v13 }
0x1974   : > { %11988 = vmatpush3.bf16.msra.mxu0 %v11987_v0 }
0x1975   : > { %11401 = vmatprep.subr.mxu0 %v13758_v1 }
0x1977   : > { %11388 = vmatmul.mubr.msk.f32.vlgmr.msra.gmra.mrb[88].mxu0 %vm2366_vm6, %v15213_v57 }
0x1978   : > { %11403 = vmatprep.mubr.msk.f32.mxu0 %vm13757_vm0, %v13758_v1 }
0x1a42   : > { %v5535_v48 = vpop.f32.mrb[86].mxu0 }
0x1a43   : > { %v11367_v4 = vpop.f32.mrb[87].mxu0 }
0x1a4a   : > { %v5702_v7 = vpop.f32.mrb[88].mxu0 }
0x1a4b   : > { %v5703_v50 = vadd.f32 %v10331_v5, %v5702_v7  ;;  %v11389_v34 = vpop.f32.mrb[89].mxu0  ;;  %v10347_v5 = vld [vmem:[#allocation33 + $0x2] ss:$0 sm:$0xff] }
0x1a4c   : > { %v10355_v34 = vld [vmem:[%s16015_s5 + $0x40] sm:$0xff] }
0x1a4d   : > { %11402 = vmatpush3.xpose.msk.msra.mxu0 %vm2669_vm7, %v5703_v50 }
0x1a4e   : > { %11406 = vmatprep.subr.mxu0 %v13758_v1 }
0x1a50   : > { %11404 = vmatmul.mubr.msk.f32.vlgmr.msra.gmra.mrb[90].mxu0 %vm2669_vm7, %v5620_v9  ;;  %v10356_v9 = vld [vmem:[%s16015_s5 + $0x48] sm:$0xff] }
0x1a51   : > { %11408 = vmatprep.mubr.msk.f32.mxu0 %vm13757_vm0, %v13758_v1  ;;  %11407 = vmatpush3.msra.mxu0 %v5786_v45  ;;  %v12008_v14 = vpack.c.bf16 %v10356_v9, %v10355_v34  ;;  %v5052_v9 = vadd.f32 %v15240_v10, %v15238_v8 }
0x1a52   : > { %11416 = vmatprep.subr.mxu0 %v13758_v1 }
0x1b23   : > { %v5861_v19 = vpop.f32.mrb[90].mxu0 }
0x1b24   : > { %v5865_v20 = vmul.f32 0.35355338, %v5861_v19  ;;  %v11405_v22 = vpop.f32.mrb[91].mxu0 }
0x1b26   : > { %v5866_v24 = vsel %vm2669_vm7, %v5865_v20, -inf }
0x1b27   : > { %5867 = vmax.xlane.f32.xlu0 %v5866_v24 }
0x1bb4   : > { %v5868_v27 = vpop.xlane.xlu0 %5867 }
0x1bb5   : > { %v5869_v28 = vsub.f32 %v5865_v20, %v5868_v27 }
0x1bb7   : > { %v5870_v30 = vmul.f32 1.442695, %v5869_v28 }
0x1bb9   : > { %12566 = vpow2.f32 %v5870_v30 }
0x1bc3   : > { %v12567_v31 = vpop.eup %12566 }
0x1bc4   : > { %v5872_v35 = vsel %vm2669_vm7, %v12567_v31, 0.0 }
0x1bc5   : > { %5873 = vadd.xlane.f32.xlu1 %v5872_v35  ;;  %v10359_v35 = vld [vmem:[#allocation36 + $0x2] ss:$0 sm:$0xff] }
0x1c52   : > { %v5874_v49 = vpop.xlane.xlu1 %5873 }
0x1c53   : > { %12568 = vrcp.f32 %v5874_v49 }
0x1c5d   : > { %v12569_v29 = vpop.eup %12568 }
0x1c5e   : > { %v5876_v52 = vmul.f32 %v12569_v29, %v12567_v31  ;;  %v10364_v29 = vld [vmem:[%s16012_s13 + $0x60] sm:$0xff] }
0x1c60   : > { %11409 = vmatmul.mubr.msk.f32.vlgmr.msra.gmra.mrb[92].mxu0 %vm2669_vm7, %v5876_v52  ;;  %v10365_v52 = vld [vmem:[%s16012_s13 + $0x68] sm:$0xff] }
0x1c61   : > { %11417 = vmatpush3.msra.mxu0 %v5539_v53  ;;  %11418 = vmatprep.mubr.msk.f32.mxu0 %vm13757_vm0, %v13758_v1  ;;  %v12014_v53 = vpack.c.bf16 %v10365_v52, %v10364_v29  ;;  %v10380_v52 = vld [vmem:[#allocation36 + $0x3] ss:$0 sm:$0xff] }
0x1c62   : > { %12001 = vmatprep.subr.bf16.mxu0 %v13759_v13 }
0x1c64   : > { %11419 = vmatmul.mubr.msk.f32.vlgmr.msra.gmra.mrb[94].mxu0 %vm2669_vm7, %v5535_v48 }
0x1c65   : > { %12003 = vmatpush3.bf16.msra.mxu0 %v12002_v18  ;;  %11440 = vmatprep.mubr.msk.f32.mxu0 %vm13757_vm0, %v13758_v1  ;;  %v12017_v18 = vpack.c.bf16 %v10367_v36, %v10366_v32  ;;  %v6995_v36 = vld [vmem:[#allocation37 + $0x18] sm:$0xff] }
0x1c66   : > { %12004 = vmatprep.subr.bf16.mxu0 %v13759_v13 }
0x1c69   : > { %12006 = vmatpush3.bf16.msra.mxu0 %v12005_v54  ;;  %v12020_v54 = vpack.c.bf16 %v10371_v21, %v10370_v39 }
0x1c6a   : > { %11454 = vmatprep.subr.mxu0 %v13758_v1 }
0x1c6c   : > { %11441 = vmatmul.mubr.msk.f32.vlgmr.msra.gmra.mrb[96].mxu0 %vm2366_vm6, %v15213_v57 }
0x1c6d   : > { %11456 = vmatprep.mubr.msk.f32.mxu0 %vm13757_vm0, %v13758_v1 }
0x1d33   : > { %v5946_v25 = vpop.f32.mrb[92].mxu0 }
0x1d34   : > { %v11410_v62 = vpop.f32.mrb[93].mxu0  ;;  %11414 = vmatmul.mubr.msk.f32.vlgmr.msra.gmra.mrb[86].mxu1 %vm2669_vm7, %v5946_v25 }
0x1d35   : > { %11997 = vmatpush3.bf16.msra.mxu1 %v11996_v59  ;;  %11429 = vmatprep.mubr.msk.f32.mxu1 %vm13757_vm0, %v13758_v1 }
0x1d36   : > { %11998 = vmatprep.subr.bf16.mxu1 %v13759_v13 }
0x1d37   : > { %v6094_v46 = vpop.f32.mrb[94].mxu0 }
0x1d38   : > { %v11420_v63 = vpop.f32.mrb[95].mxu0 }
0x1d39   : > { %12000 = vmatpush3.bf16.msra.mxu1 %v11999_v33 }
0x1d3a   : > { %12007 = vmatprep.subr.bf16.mxu1 %v13759_v13 }
0x1d3c   : > { %11430 = vmatmul.mubr.msk.f32.vlgmr.msra.gmra.mrb[88].mxu1 %vm2366_vm6, %v15213_v57 }
0x1d3d   : > { %11451 = vmatprep.mubr.msk.f32.mxu1 %vm13757_vm0, %v13758_v1  ;;  %12009 = vmatpush3.bf16.msra.mxu1 %v12008_v14 }
0x1d3e   : > { %12010 = vmatprep.subr.bf16.mxu1 %v13759_v13 }
0x1d3f   : > { %v6260_v42 = vpop.f32.mrb[96].mxu0 }
0x1d40   : > { %v6261_v0 = vadd.f32 %v10353_v37, %v6260_v42  ;;  %v11442_v2 = vpop.f32.mrb[97].mxu0  ;;  %v10374_v37 = vld [vmem:[#allocation34 + $0x3] ss:$0 sm:$0xff]  ;;  %v10368_v42 = vld [vmem:[#allocation33 + $0x3] ss:$0 sm:$0xff] }
0x1d41   : > { %12012 = vmatpush3.bf16.msra.mxu1 %v12011_v16  ;;  %v5062_v16 = vadd.f32 %v15240_v10, %v15245_v15 }
0x1d42   : > { %11455 = vmatpush3.xpose.msk.msra.mxu0 %vm2669_vm7, %v6261_v0  ;;  %11464 = vmatprep.subr.mxu1 %v13758_v1 }
0x1d43   : > { %11459 = vmatprep.subr.mxu0 %v13758_v1 }
0x1d44   : > { %11452 = vmatmul.mubr.f32.vlgmr.msra.gmra.mrb[90].mxu1 %v13758_v1 }
0x1d45   : > { %11466 = vmatprep.mubr.msk.f32.mxu1 %vm13757_vm0, %v13758_v1  ;;  %11465 = vmatpush3.msra.mxu1 %v6509_v23 }
0x1d46   : > { %12019 = vmatprep.subr.bf16.mxu1 %v13759_v13 }
0x1e07   : > { %v6021_v3 = vpop.f32.mrb[86].mxu1 }
0x1e08   : > { %v15337_v48 = vadd.f32 %v6094_v46, %v6021_v3  ;;  %v11415_v4 = vpop.f32.mrb[87].mxu1 }
0x1e0f   : > { %v6177_v6 = vpop.f32.mrb[88].mxu1 }
0x1e10   : > { %v6178_v7 = vadd.f32 %v10347_v5, %v6177_v6  ;;  %v11431_v50 = vpop.f32.mrb[89].mxu1  ;;  %v10376_v5 = vld [vmem:[%s16015_s5 + $0x60] sm:$0xff]  ;;  %v10378_v6 = vld [vmem:[%s16015_s5 + $0x70] sm:$0xff] }
0x1e11   : > { %v10379_v50 = vld [vmem:[%s16015_s5 + $0x78] sm:$0xff] }
0x1e12   : > { %11457 = vmatmul.mubr.msk.f32.vlgmr.msra.gmra.mrb[98].mxu0 %vm2669_vm7, %v6178_v7  ;;  %v12029_v34 = vpack.c.bf16 %v10379_v50, %v10378_v6  ;;  %v10385_v50 = vld [vmem:[#allocation39] ss:$0 sm:$0xff] }
0x1e13   : > { %11461 = vmatprep.mubr.msk.f32.mxu0 %vm13757_vm0, %v13758_v1 }
0x1e17   : > { %v6343_v31 = vpop.f32.mrb[90].mxu1 }
0x1e18   : > { %v11453_v38 = vpop.f32.mrb[91].mxu1  ;;  %v6344_v41 = vadd.f32 %v10359_v35, %v6343_v31 }
0x1e1a   : > { %11460 = vmatpush3.msra.mxu0 %v6344_v41 }
0x1e1b   : > { %12013 = vmatprep.subr.bf16.mxu0 %v13759_v13 }
0x1ee5   : > { %v6419_v17 = vpop.f32.mrb[98].mxu0 }
0x1ee6   : > { %v6423_v44 = vmul.f32 0.35355338, %v6419_v17  ;;  %v11458_v19 = vpop.f32.mrb[99].mxu0 }
0x1ee8   : > { %v6424_v20 = vsel %vm2669_vm7, %v6423_v44, -inf }
0x1ee9   : > { %6425 = vmax.xlane.f32.xlu0 %v6424_v20  ;;  %v5067_v20 = vadd.f32 %v5062_v16, %v15200_v51 }
0x1f76   : > { %v6426_v22 = vpop.xlane.xlu0 %6425 }
0x1f77   : > { %v6427_v24 = vsub.f32 %v6423_v44, %v6426_v22  ;;  %v5065_v44 = vadd.f32 %v5052_v9, %v15188_v43  ;;  %v5076_v22 = vsel %vm4804_vm12, %v5067_v20, 0.0 }
0x1f79   : > { %v6428_v27 = vmul.f32 1.442695, %v6427_v24  ;;  %v5070_v19 = vsel %vm2366_vm6, %v5065_v44, 0.0 }
0x1f7b   : > { %12570 = vpow2.f32 %v6428_v27 }
0x1f85   : > { %v12571_v28 = vpop.eup %12570 }
0x1f86   : > { %v6430_v30 = vsel %vm2669_vm7, %v12571_v28, 0.0 }
0x1f87   : > { %6431 = vadd.xlane.f32.xlu1 %v6430_v30 }
0x2014   : > { %v6432_v45 = vpop.xlane.xlu1 %6431 }
0x2015   : > { %12572 = vrcp.f32 %v6432_v45 }
0x201f   : > { %v12573_v47 = vpop.eup %12572 }
0x2020   : > { %v6434_v49 = vmul.f32 %v12573_v47, %v12571_v28  ;;  %v5066_v47 = vadd.f32 %v15243_v12, %v15194_v26 }
0x2022   : > { %11462 = vmatmul.mubr.msk.f32.vlgmr.msra.gmra.mrb[100].mxu0 %vm2669_vm7, %v6434_v49  ;;  %v5073_v49 = vsel %vm2366_vm6, %v5066_v47, 0.0 }
0x2023   : > { %11477 = vmatprep.mubr.msk.f32.mxu0 %vm13757_vm0, %v13758_v1  ;;  %12015 = vmatpush3.bf16.msra.mxu0 %v12014_v53 }
0x2024   : > { %12016 = vmatprep.subr.bf16.mxu0 %v13759_v13 }
0x2027   : > { %12018 = vmatpush3.bf16.msra.mxu0 %v12017_v18 }
0x2028   : > { %12025 = vmatprep.subr.bf16.mxu0 %v13759_v13 }
0x202a   : > { %11478 = vmatmul.mubr.msk.f32.vlgmr.msra.gmra.mrb[102].mxu0 %vm2366_vm6, %v15213_v57 }
0x202b   : > { %11499 = vmatprep.mubr.msk.f32.mxu0 %vm13757_vm0, %v13758_v1 }
0x20f5   : > { %v6504_v59 = vpop.f32.mrb[100].mxu0 }
0x20f6   : > { %v11463_v60 = vpop.f32.mrb[101].mxu0  ;;  %11467 = vmatmul.mubr.msk.f32.vlgmr.msra.gmra.mrb[92].mxu1 %vm2669_vm7, %v6504_v59  ;;  %v7196_v59 = vld [vmem:[%s16016_s3] sm:$0xff] }
0x20f7   : > { %12021 = vmatpush3.bf16.msra.mxu1 %v12020_v54  ;;  %11488 = vmatprep.mubr.msk.f32.mxu1 %vm13757_vm0, %v13758_v1  ;;  %v7197_v60 = vld [vmem:[%s16016_s3 + $0x8] sm:$0xff] }
0x20f8   : > { %12022 = vmatprep.subr.bf16.mxu1 %v13759_v13 }
0x20fb   : > { %12024 = vmatpush3.bf16.msra.mxu1 %v12023_v61  ;;  %v10311_v61 = vld [vmem:[%s16017_s7] ss:$0 sm:$0xff]  ;;  %s16022_s7 = sld [smem:[#allocation114_spill]] }
0x20fc   : > { %11502 = vmatprep.subr.mxu1 %v13758_v1 }
0x20fd   : > { %v6663_v25 = vpop.f32.mrb[102].mxu0 }
0x20fe   : > { %11489 = vmatmul.mubr.msk.f32.vlgmr.msra.gmra.mrb[94].mxu1 %vm2366_vm6, %v15213_v57  ;;  %v11479_v62 = vpop.f32.mrb[103].mxu0  ;;  %v6664_v4 = vadd.f32 %v10368_v42, %v6663_v25  ;;  %v12038_v25 = vpack.c.bf16 %v7197_v60, %v7196_v59  ;;  %v10386_v59 = vld [vmem:[%s16020_s25] ss:$0 sm:$0xff]  ;;  %s16024_s25 = sld [smem:[#allocation118_spill]] }
0x20ff   : > { %11504 = vmatprep.mubr.msk.f32.mxu1 %vm13757_vm0, %v13758_v1 }
0x21c9   : > { %v6579_v33 = vpop.f32.mrb[92].mxu1 }
0x21ca   : > { %v15382_v46 = vadd.f32 %v6579_v33, %v15337_v48  ;;  %v11468_v63 = vpop.f32.mrb[93].mxu1  ;;  %v10377_v48 = vld [vmem:[%s16015_s5 + $0x68] sm:$0xff]  ;;  %v7198_v33 = vld [vmem:[%s16016_s3 + $0x10] sm:$0xff] }
0x21cb   : > { %v12026_v7 = vpack.c.bf16 %v10377_v48, %v10376_v5  ;;  %v7199_v63 = vld [vmem:[%s16016_s3 + $0x18] sm:$0xff] }
0x21cd   : > { %12027 = vmatpush3.bf16.msra.mxu0 %v12026_v7 }
0x21ce   : > { %12028 = vmatprep.subr.bf16.mxu0 %v13759_v13 }
0x21d1   : > { %v6746_v0 = vpop.f32.mrb[94].mxu1  ;;  %12030 = vmatpush3.bf16.msra.mxu0 %v12029_v34 }
0x21d2   : > { %v6747_v2 = vadd.f32 %v10374_v37, %v6746_v0  ;;  %v11490_v3 = vpop.f32.mrb[95].mxu1  ;;  %11512 = vmatprep.subr.mxu0 %v13758_v1  ;;  %v10312_v37 = vld [vmem:[%s16018_s16] ss:$0 sm:$0xff]  ;;  %s16023_s16 = sld [smem:[#allocation117_spill]] }
0x21d4   : > { %11503 = vmatpush3.xpose.msk.msra.mxu1 %vm2669_vm7, %v6747_v2  ;;  %11500 = vmatmul.mubr.f32.vlgmr.msra.gmra.mrb[104].mxu0 %v13758_v1  ;;  %v12041_v2 = vpack.c.bf16 %v7199_v63, %v7198_v33  ;;  %v7297_v33 = vld [vmem:[%s16022_s7 + $0x8] sm:$0xff] }
0x21d5   : > { %11507 = vmatprep.subr.mxu1 %v13758_v1  ;;  %11514 = vmatprep.mubr.msk.f32.mxu0 %vm13757_vm0, %v13758_v1 }
0x21d6   : > { %11513 = vmatpush3.msra.mxu0 %v6995_v36  ;;  %v7113_v36 = vld [vmem:[%s16019_s18 + $0x8] sm:$0xff] }
0x21d7   : > { %11505 = vmatmul.mubr.msk.f32.vlgmr.msra.gmra.mrb[96].mxu1 %vm2669_vm7, %v6664_v4  ;;  %12037 = vmatprep.subr.bf16.mxu0 %v13759_v13  ;;  %v12609_v4 = vld [vmem:[#allocation13] sm:$0xff] }
0x21d8   : > { %11509 = vmatprep.mubr.msk.f32.mxu1 %vm13757_vm0, %v13758_v1 }
0x22a7   : > { %v6829_v29 = vpop.f32.mrb[104].mxu0 }
0x22a8   : > { %v11501_v53 = vpop.f32.mrb[105].mxu0  ;;  %v6830_v32 = vadd.f32 %v10380_v52, %v6829_v29  ;;  %v12610_v29 = vld [vmem:[#allocation13 + $0x8] sm:$0xff] }
0x22aa   : > { %v6905_v11 = vpop.f32.mrb[96].mxu1  ;;  %11508 = vmatpush3.msra.mxu1 %v6830_v32  ;;  %v7112_v32 = vld [vmem:[%s16019_s18] sm:$0xff] }
0x22ab   : > { %v6909_v14 = vmul.f32 0.35355338, %v6905_v11  ;;  %v11506_v40 = vpop.f32.mrb[97].mxu1  ;;  %12031 = vmatprep.subr.bf16.mxu1 %v13759_v13 }
0x22ad   : > { %v6910_v17 = vsel %vm2669_vm7, %v6909_v14, -inf }
0x22ae   : > { %6911 = vmax.xlane.f32.xlu0 %v6910_v17 }
0x22b2   : > { %5071 = vadd.xlane.f32.xlu0 %v5070_v19 }
0x22b6   : > { %5077 = vadd.xlane.f32.xlu0 %v5076_v22 }
0x233b   : > { %v6912_v8 = vpop.xlane.xlu0 %6911 }
0x233c   : > { %v6913_v24 = vsub.f32 %v6909_v14, %v6912_v8 }
0x233e   : > { %v6914_v27 = vmul.f32 1.442695, %v6913_v24 }
0x233f   : > { %v5072_v28 = vpop.xlane.xlu0 %5071 }
0x2340   : > { %12574 = vpow2.f32 %v6914_v27  ;;  %v5079_v30 = vmul.f32 0.03125, %v5072_v28 }
0x2342   : > { %v5082_v10 = vsub.f32 %v5065_v44, %v5079_v30 }
0x2343   : > { %v5078_v15 = vpop.xlane.xlu0 %5077 }
0x2344   : > { %v5081_v31 = vmul.f32 0.03125, %v5078_v15  ;;  %v5085_v35 = vmul.f32 %v5082_v10, %v5082_v10 }
0x2346   : > { %v15407_v43 = vsub.f32 %v5067_v20, %v5081_v31  ;;  %v5088_v38 = vsel %vm2366_vm6, %v5085_v35, 0.0 }
0x2347   : > { %5089 = vadd.xlane.f32.xlu0 %v5088_v38 }
0x2348   : > { %v5087_v51 = vmul.f32 %v15407_v43, %v15407_v43 }
0x234a   : > { %v12575_v41 = vpop.eup %12574  ;;  %v5094_v23 = vsel %vm4804_vm12, %v5087_v51, 0.0 }
0x234b   : > { %5095 = vadd.xlane.f32.xlu0 %v5094_v23  ;;  %v6916_v45 = vsel %vm2669_vm7, %v12575_v41, 0.0 }
0x234c   : > { %6917 = vadd.xlane.f32.xlu1 %v6916_v45 }
0x2350   : > { %5074 = vadd.xlane.f32.xlu1 %v5073_v49 }
0x23d4   : > { %v5090_v39 = vpop.xlane.xlu0 %5089 }
0x23d5   : > { %v5097_v21 = vmul.f32 0.03125, %v5090_v39 }
0x23d7   : > { %v5100_v54 = vadd.f32 1e-05, %v5097_v21 }
0x23d8   : > { %v5096_v20 = vpop.xlane.xlu0 %5095 }
0x23d9   : > { %v6918_v18 = vpop.xlane.xlu1 %6917  ;;  %v5099_v22 = vmul.f32 0.03125, %v5096_v20 }
0x23da   : > { %12576 = vrcp.f32 %v6918_v18  ;;  %v12032_v18 = vpack.c.bf16 %v7113_v36, %v7112_v32 }
0x23db   : > { %12578 = vrsqrt.f32 %v5100_v54  ;;  %v5102_v24 = vadd.f32 1e-05, %v5099_v22 }
0x23dd   : > { %v5075_v48 = vpop.xlane.xlu1 %5074  ;;  %12580 = vrsqrt.f32 %v5102_v24  ;;  %v10407_v24 = vld [vmem:[%s16019_s18 + $0x38] sm:$0xff] }
0x23de   : > { %v5080_v6 = vmul.f32 0.03125, %v5075_v48 }
0x23e0   : > { %v5083_v34 = vsub.f32 %v5066_v47, %v5080_v6 }
0x23e2   : > { %v5086_v16 = vmul.f32 %v5083_v34, %v5083_v34 }
0x23e4   : > { %v12577_v26 = vpop.eup %12576  ;;  %v5091_v19 = vsel %vm2366_vm6, %v5086_v16, 0.0  ;;  %v10405_v16 = vld [vmem:[%s16019_s18 + $0x28] sm:$0xff] }
0x23e5   : > { %v6920_v12 = vmul.f32 %v12577_v26, %v12575_v41  ;;  %v12579_v55 = vpop.eup %12578  ;;  %v7114_v26 = vld [vmem:[%s16019_s18 + $0x10] sm:$0xff] }
0x23e6   : > { %v5106_v58 = vmul.f32 %v12579_v55, %v5082_v10 }
0x23e7   : > { %11510 = vmatmul.mubr.msk.f32.vlgmr.msra.gmra.mrb[98].mxu1 %vm2669_vm7, %v6920_v12  ;;  %v12581_v35 = vpop.eup %12580  ;;  %v7115_v12 = vld [vmem:[%s16019_s18 + $0x18] sm:$0xff] }
0x23e8   : > { %11525 = vmatprep.mubr.msk.f32.mxu1 %vm13757_vm0, %v13758_v1  ;;  %v5115_v62 = vmul.f32 %v10311_v61, %v5106_v58  ;;  %v5108_v38 = vmul.f32 %v12581_v35, %v15407_v43  ;;  %v12611_v43 = vld [vmem:[#allocation13 + $0x10] sm:$0x3]  ;;  %12033 = vmatpush3.bf16.msra.mxu1 %v12032_v18  ;;  %v12035_v39 = vpack.c.bf16 %v7115_v12, %v7114_v26 }
0x23e9   : > { %12034 = vmatprep.subr.bf16.mxu1 %v13759_v13  ;;  %v10421_v35 = vld [vmem:[%s16022_s7 + $0x38] sm:$0xff] }
0x23ea   : > { %v15431_v3 = vadd.f32 %v10312_v37, %v5115_v62  ;;  %v5117_v23 = vmul.f32 %v10311_v61, %v5108_v38  ;;  %v7296_v62 = vld [vmem:[%s16022_s7] sm:$0xff]  ;;  %v10394_v38 = vld [vmem:[#allocation43] ss:$0 sm:$0xff] }
0x23ec   : > { %v15435_v5 = vadd.f32 %v12609_v4, %v15431_v3  ;;  %v15451_v49 = vadd.f32 %v10312_v37, %v5117_v23  ;;  %12036 = vmatpush3.bf16.msra.mxu1 %v12035_v39 }
0x23ed   : > { %12043 = vmatprep.subr.bf16.mxu1 %v13759_v13 }
0x23ee   : > { %v15461_v53 = vadd.f32 %v12611_v43, %v15451_v49 }
0x24ba   : > { %v6990_v42 = vpop.f32.mrb[98].mxu1 }
0x24bb   : > { %v11511_v0 = vpop.f32.mrb[99].mxu1  ;;  %11515 = vmatmul.mubr.msk.f32.vlgmr.msra.gmra.mrb[106].mxu0 %vm2669_vm7, %v6990_v42 }
0x24bc   : > { %12039 = vmatpush3.bf16.msra.mxu0 %v12038_v25  ;;  %11536 = vmatprep.mubr.msk.f32.mxu0 %vm13757_vm0, %v13758_v1  ;;  %v7298_v0 = vld [vmem:[%s16022_s7 + $0x10] sm:$0xff] }
0x24bd   : > { %12040 = vmatprep.subr.bf16.mxu0 %v13759_v13 }
0x24c0   : > { %12042 = vmatpush3.bf16.msra.mxu0 %v12041_v2  ;;  %v7299_v2 = vld [vmem:[%s16022_s7 + $0x18] sm:$0xff] }
0x24c1   : > { %12049 = vmatprep.subr.bf16.mxu0 %v13759_v13  ;;  %v12047_v4 = vpack.c.bf16 %v7299_v2, %v7298_v0 }
0x24c3   : > { %11537 = vmatmul.mubr.msk.f32.vlgmr.msra.gmra.mrb[108].mxu0 %vm2366_vm6, %v15435_v5 }
0x24c4   : > { %11539 = vmatprep.mubr.msk.f32.mxu0 %vm13757_vm0, %v13758_v1 }
0x258e   : > { %v7065_v7 = vpop.f32.mrb[106].mxu0 }
0x258f   : > { %v7069_v9 = vadd.f32 %v7065_v7, %v15382_v46  ;;  %v11516_v11 = vpop.f32.mrb[107].mxu0 }
0x2591   : > { %v7077_v14 = vadd.f32 %v10385_v50, %v7069_v9 }
0x2593   : > { %v7081_v40 = vsel %vm2366_vm6, %v7077_v14, 0.0 }
0x2594   : > { %7082 = vadd.xlane.f32.xlu1 %v7081_v40  ;;  %v10404_v40 = vld [vmem:[%s16019_s18 + $0x20] sm:$0xff] }
0x2596   : > { %v15444_v17 = vpop.f32.mrb[108].mxu0 }
0x2597   : > { %v11538_v44 = vpop.f32.mrb[109].mxu0 }
0x2598   : > { %5092 = vadd.xlane.f32.xlu1 %v5091_v19  ;;  %v12057_v19 = vpack.c.bf16 %v10405_v16, %v10404_v40 }
0x2621   : > { %v7083_v8 = vpop.xlane.xlu1 %7082 }
0x2622   : > { %v7084_v27 = vmul.f32 0.03125, %v7083_v8  ;;  %v10406_v8 = vld [vmem:[%s16019_s18 + $0x30] sm:$0xff] }
0x2624   : > { %v7085_v28 = vsub.f32 %v7077_v14, %v7084_v27  ;;  %v12060_v27 = vpack.c.bf16 %v10407_v24, %v10406_v8 }
0x2625   : > { %v5093_v30 = vpop.xlane.xlu1 %5092 }
0x2626   : > { %v5098_v46 = vmul.f32 0.03125, %v5093_v30  ;;  %v7086_v10 = vmul.f32 %v7085_v28, %v7085_v28  ;;  %v10419_v30 = vld [vmem:[%s16022_s7 + $0x28] sm:$0xff] }
0x2628   : > { %v5101_v15 = vadd.f32 1e-05, %v5098_v46  ;;  %v7087_v31 = vsel %vm2366_vm6, %v7086_v10, 0.0 }
0x2629   : > { %7088 = vadd.xlane.f32.xlu1 %v7087_v31  ;;  %v10420_v31 = vld [vmem:[%s16022_s7 + $0x30] sm:$0xff] }
0x262a   : > { %12582 = vrsqrt.f32 %v5101_v15 }
0x2634   : > { %v12583_v51 = vpop.eup %12582 }
0x2635   : > { %v5107_v41 = vmul.f32 %v12583_v51, %v5083_v34 }
0x2637   : > { %v5116_v45 = vmul.f32 %v10311_v61, %v5107_v41  ;;  %v10387_v61 = vld [vmem:[%s16021_s0] ss:$0 sm:$0xff]  ;;  %v12072_v41 = vpack.c.bf16 %v10421_v35, %v10420_v31  ;;  %s16025_s0 = sld [smem:[#allocation123_spill]] }
0x2639   : > { %v15449_v47 = vadd.f32 %v10312_v37, %v5116_v45  ;;  %v12044_v37 = vpack.c.bf16 %v7297_v33, %v7296_v62 }
0x263b   : > { %v15454_v52 = vadd.f32 %v12610_v29, %v15449_v47 }
0x263d   : > { %11540 = vmatmul.mubr.msk.f32.gmra.mrb[110].mxu0 %vm2366_vm6, %v15454_v52 }
0x263e   : > { %11542 = vmatprep.mubr.msk.f32.mxu0 %vm13757_vm0, %v13758_v1 }
0x2641   : > { %11543 = vmatmul.mubr.msk.f32.gmra.mrb[112].mxu0 %vm2366_vm6, %v15461_v53 }
0x2642   : > { %11568 = vmatprep.mubr.msk.f32.mxu0 %vm13757_vm0, %v13758_v1 }
0x26b6   : > { %v7089_v21 = vpop.xlane.xlu1 %7088 }
0x26b7   : > { %v7090_v54 = vmul.f32 0.03125, %v7089_v21 }
0x26b9   : > { %v7091_v55 = vadd.f32 1e-05, %v7090_v54 }
0x26bb   : > { %12584 = vrsqrt.f32 %v7091_v55 }
0x26c5   : > { %v12585_v58 = vpop.eup %12584 }
0x26c6   : > { %v7093_v60 = vmul.f32 %v12585_v58, %v7085_v28  ;;  %v10418_v28 = vld [vmem:[%s16022_s7 + $0x20] sm:$0xff] }
0x26c7   : > { %v12069_v10 = vpack.c.bf16 %v10419_v30, %v10418_v28 }
0x26c8   : > { %v7100_v25 = vmul.f32 %v10386_v59, %v7093_v60  ;;  %v10422_v60 = vld [vmem:[#allocation43 + $0x1] ss:$0 sm:$0xff] }
0x26ca   : > { %v15477_v63 = vadd.f32 %v10387_v61, %v7100_v25 }
0x26cc   : > { %v15481_v42 = vadd.f32 %v15477_v63, %v15213_v57  ;;  %v10390_v57 = vld [vmem:[#allocation42] ss:$0 sm:$0xff] }
0x26cd   : > { %v7283_v6 = vadd.f32 %v10390_v57, %v15444_v17  ;;  %v10388_v17 = vld [vmem:[#allocation40] ss:$0 sm:$0xff] }
0x26ce   : > { %11526 = vmatmul.mubr.msk.f32.vlgmr.msra.gmra.mrb[100].mxu1 %vm2366_vm6, %v15481_v42 }
0x26cf   : > { %12045 = vmatpush3.bf16.msra.mxu1 %v12044_v37  ;;  %11553 = vmatprep.mubr.msk.f32.mxu1 %vm13757_vm0, %v13758_v1 }
0x26d0   : > { %12046 = vmatprep.subr.bf16.mxu1 %v13759_v13 }
0x26d3   : > { %12048 = vmatpush3.bf16.msra.mxu1 %v12047_v4 }
0x26d4   : > { %12053 = vmatprep.subr.bf16.mxu1 %v13759_v13 }
0x26d6   : > { %11554 = vmatmul.mubr.msk.f32.vlgmr.msra.gmra.mrb[102].mxu1 %vm2366_vm6, %v15431_v3 }
0x26d7   : > { %11556 = vmatprep.mubr.msk.f32.mxu1 %vm13757_vm0, %v13758_v1 }
0x26da   : > { %11557 = vmatmul.mubr.msk.f32.gmra.mrb[104].mxu1 %vm2366_vm6, %v15449_v47 }
0x26db   : > { %11559 = vmatprep.mubr.msk.f32.mxu1 %vm13757_vm0, %v13758_v1 }
0x26de   : > { %11560 = vmatmul.mubr.msk.f32.gmra.mrb[106].mxu1 %vm2366_vm6, %v15451_v49 }
0x26df   : > { %11577 = vmatprep.mubr.msk.f32.mxu1 %vm13757_vm0, %v13758_v1 }
0x2710   : > { %v7287_v48 = vpop.f32.mrb[110].mxu0 }
0x2711   : > { %v7288_v7 = vadd.f32 %v10390_v57, %v7287_v48  ;;  %v11541_v50 = vpop.f32.mrb[111].mxu0 }
0x2713   : > { %v12050_v34 = vpack.c.bf16 %v7288_v7, %v7283_v6 }
0x2714   : > { %v7292_v9 = vpop.f32.mrb[112].mxu0 }
0x2715   : > { %v11544_v11 = vpop.f32.mrb[113].mxu0  ;;  %12052 = vmatpush3.bf16.xpose.msk.msra.mxu0 %vm14829_vm8, %v12050_v34  ;;  %v7293_v14 = vadd.f32 %v10390_v57, %v7292_v9  ;;  %v10410_v9 = vld [vmem:[%s16016_s3 + $0x20] sm:$0xff] }
0x2716   : > { %11566 = vmatprep.subr.mxu0 %v13758_v1  ;;  %v10411_v11 = vld [vmem:[%s16016_s3 + $0x28] sm:$0xff] }
0x2717   : > { %v12063_v40 = vpack.c.bf16 %v10411_v11, %v10410_v9 }
0x271d   : > { %11567 = vmatpush3.xpose.msk.msra.mxu0 %vm2669_vm7, %v7293_v14 }
0x271e   : > { %12056 = vmatprep.subr.bf16.mxu0 %v13759_v13 }
0x27a1   : > { %v7192_v44 = vpop.f32.mrb[100].mxu1 }
0x27a2   : > { %v7193_v20 = vadd.f32 %v10388_v17, %v7192_v44  ;;  %v11527_v22 = vpop.f32.mrb[101].mxu1  ;;  %v10412_v17 = vld [vmem:[%s16016_s3 + $0x30] sm:$0xff]  ;;  %v10413_v44 = vld [vmem:[%s16016_s3 + $0x38] sm:$0xff] }
0x27a4   : > { %11569 = vmatmul.mubr.msk.f32.vlgmr.msra.gmra.mrb[114].mxu0 %vm2669_vm7, %v7193_v20 }
0x27a5   : > { %12058 = vmatpush3.bf16.msra.mxu0 %v12057_v19  ;;  %11588 = vmatprep.mubr.msk.f32.mxu0 %vm13757_vm0, %v13758_v1  ;;  %v12066_v19 = vpack.c.bf16 %v10413_v44, %v10412_v17 }
0x27a6   : > { %12059 = vmatprep.subr.bf16.mxu0 %v13759_v13 }
0x27a9   : > { %v7382_v46 = vpop.f32.mrb[102].mxu1  ;;  %12061 = vmatpush3.bf16.msra.mxu0 %v12060_v27  ;;  %v10414_v27 = vld [vmem:[#allocation42 + $0x1] ss:$0 sm:$0xff] }
0x27aa   : > { %v11555_v15 = vpop.f32.mrb[103].mxu1  ;;  %12068 = vmatprep.subr.bf16.mxu0 %v13759_v13  ;;  %v7383_v23 = vadd.f32 %v10394_v38, %v7382_v46 }
0x27ac   : > { %11589 = vmatmul.mubr.msk.f32.vlgmr.msra.gmra.mrb[116].mxu0 %vm2366_vm6, %v15481_v42 }
0x27ad   : > { %v7387_v51 = vpop.f32.mrb[104].mxu1  ;;  %12070 = vmatpush3.bf16.msra.mxu0 %v12069_v10  ;;  %11616 = vmatprep.mubr.msk.f32.mxu0 %vm13757_vm0, %v13758_v1 }
0x27ae   : > { %v7388_v45 = vadd.f32 %v10394_v38, %v7387_v51  ;;  %v11558_v29 = vpop.f32.mrb[105].mxu1  ;;  %12071 = vmatprep.subr.bf16.mxu0 %v13759_v13 }
0x27b0   : > { %v12054_v43 = vpack.c.bf16 %v7388_v45, %v7383_v23 }
0x27b1   : > { %v7392_v32 = vpop.f32.mrb[106].mxu1  ;;  %12073 = vmatpush3.bf16.msra.mxu0 %v12072_v41 }
0x27b2   : > { %v11561_v36 = vpop.f32.mrb[107].mxu1  ;;  %12055 = vmatpush3.bf16.msra.mxu1 %v12054_v43  ;;  %12078 = vmatprep.subr.bf16.mxu0 %v13759_v13  ;;  %v7393_v18 = vadd.f32 %v10394_v38, %v7392_v32  ;;  %v10408_v38 = vld [vmem:[#allocation40 + $0x1] ss:$0 sm:$0xff] }
0x27b3   : > { %11575 = vmatprep.subr.mxu1 %v13758_v1 }
0x27b4   : > { %11617 = vmatmul.mubr.msk.f32.vlgmr.msra.gmra.mrb[118].mxu0 %vm2366_vm6, %v15431_v3 }
0x27b5   : > { %11619 = vmatprep.mubr.msk.f32.mxu0 %vm13757_vm0, %v13758_v1 }
0x27b6   : > { %11576 = vmatpush3.msk.msra.mxu1 %vm2815_vm9, %v7393_v18 }
0x27b7   : > { %12062 = vmatprep.subr.bf16.mxu1 %v13759_v13 }
0x27b8   : > { %11620 = vmatmul.mubr.msk.f32.gmra.mrb[120].mxu0 %vm2366_vm6, %v15449_v47 }
0x27b9   : > { %11622 = vmatprep.mubr.msk.f32.mxu0 %vm13757_vm0, %v13758_v1 }
0x27bc   : > { %11623 = vmatmul.mubr.msk.f32.gmra.mrb[122].mxu0 %vm2366_vm6, %v15451_v49 }
0x27bd   : > { %11640 = vmatprep.mubr.msk.f32.mxu0 %vm13757_vm0, %v13758_v1 }
0x2877   : > { %v7474_v26 = vpop.f32.mrb[114].mxu0 }
0x2878   : > { %v7478_v12 = vmul.f32 0.35355338, %v7474_v26  ;;  %v11570_v39 = vpop.f32.mrb[115].mxu0 }
0x2879   : > { %v8007_v39 = vld [vmem:[#allocation45 + $0x8] sm:$0xff] }
0x287a   : > { %v7479_v21 = vsel %vm2771_vm10, %v7478_v12, -inf }
0x287b   : > { %7480 = vmax.xlane.f32.xlu0 %v7479_v21 }
0x287f   : > { %v15544_v54 = vpop.f32.mrb[116].mxu0 }
0x2880   : > { %v11590_v55 = vpop.f32.mrb[117].mxu0  ;;  %v7647_v41 = vadd.f32 %v10408_v38, %v15544_v54  ;;  %v10438_v38 = vld [vmem:[#allocation40 + $0x2] ss:$0 sm:$0xff] }
0x2887   : > { %v7822_v58 = vpop.f32.mrb[118].mxu0 }
0x2888   : > { %v11618_v59 = vpop.f32.mrb[119].mxu0  ;;  %v7823_v25 = vadd.f32 %v10422_v60, %v7822_v58  ;;  %v7566_v58 = vld [vmem:[#allocation45] sm:$0xff] }
0x2889   : > { %v10440_v59 = vld [vmem:[%s16016_s3 + $0x40] sm:$0xff] }
0x288b   : > { %v7827_v61 = vpop.f32.mrb[120].mxu0 }
0x288c   : > { %v7828_v62 = vadd.f32 %v10422_v60, %v7827_v61  ;;  %v11621_v33 = vpop.f32.mrb[121].mxu0 }
0x288e   : > { %v12079_v37 = vpack.c.bf16 %v7828_v62, %v7823_v25  ;;  %v10442_v25 = vld [vmem:[%s16016_s3 + $0x50] sm:$0xff]  ;;  %v10443_v62 = vld [vmem:[%s16016_s3 + $0x58] sm:$0xff] }
0x288f   : > { %v7832_v0 = vpop.f32.mrb[122].mxu0  ;;  %v12091_v33 = vpack.c.bf16 %v10443_v62, %v10442_v25 }
0x2890   : > { %v11624_v2 = vpop.f32.mrb[123].mxu0  ;;  %12080 = vmatpush3.bf16.msra.mxu0 %v12079_v37  ;;  %v7833_v4 = vadd.f32 %v10422_v60, %v7832_v0  ;;  %v10441_v60 = vld [vmem:[%s16016_s3 + $0x48] sm:$0xff]  ;;  %v10434_v37 = vld [vmem:[%s16019_s18 + $0x40] sm:$0xff] }
0x2891   : > { %11638 = vmatprep.subr.mxu0 %v13758_v1  ;;  %v12088_v61 = vpack.c.bf16 %v10441_v60, %v10440_v59  ;;  %v10435_v0 = vld [vmem:[%s16019_s18 + $0x48] sm:$0xff] }
0x2892   : > { %v12082_v2 = vpack.c.bf16 %v10435_v0, %v10434_v37  ;;  %v8594_v0 = vld [vmem:[#allocation45 + $0x10] sm:$0xff] }
0x2894   : > { %11639 = vmatpush3.msk.msra.mxu0 %vm2815_vm9, %v7833_v4  ;;  %v10436_v4 = vld [vmem:[%s16019_s18 + $0x50] sm:$0xff] }
0x2895   : > { %11648 = vmatprep.subr.mxu0 %v13758_v1 }
0x2908   : > { %v7481_v57 = vpop.xlane.xlu0 %7480 }
0x2909   : > { %v7482_v48 = vsub.f32 %v7478_v12, %v7481_v57  ;;  %v10437_v57 = vld [vmem:[%s16019_s18 + $0x58] sm:$0xff] }
0x290b   : > { %v7483_v6 = vmul.f32 1.442695, %v7482_v48 }
0x290d   : > { %12586 = vpow2.f32 %v7483_v6 }
0x2917   : > { %v12587_v7 = vpop.eup %12586 }
0x2918   : > { %v7485_v50 = vsel %vm2771_vm10, %v12587_v7, 0.0 }
0x2919   : > { %7486 = vadd.xlane.f32.xlu1 %v7485_v50  ;;  %v10448_v50 = vld [vmem:[%s16022_s7 + $0x40] sm:$0xff] }
0x29a6   : > { %v7487_v34 = vpop.xlane.xlu1 %7486 }
0x29a7   : > { %12588 = vrcp.f32 %v7487_v34  ;;  %v10449_v34 = vld [vmem:[%s16022_s7 + $0x48] sm:$0xff] }
0x29b1   : > { %v12589_v14 = vpop.eup %12588 }
0x29b2   : > { %v7489_v16 = vmul.f32 %v12589_v14, %v12587_v7  ;;  %v12085_v7 = vpack.c.bf16 %v10437_v57, %v10436_v4  ;;  %v12094_v14 = vpack.c.bf16 %v10449_v34, %v10448_v50  ;;  %v10469_v4 = vld [vmem:[%s16016_s3 + $0x60] sm:$0xff]  ;;  %v10470_v57 = vld [vmem:[%s16016_s3 + $0x68] sm:$0xff]  ;;  %v10471_v50 = vld [vmem:[%s16016_s3 + $0x70] sm:$0xff] }
0x29b3   : > { %v10472_v34 = vld [vmem:[%s16016_s3 + $0x78] sm:$0xff] }
0x29b4   : > { %11578 = vmatmul.mubr.msk.f32.vlgmr.msra.gmra.mrb[108].mxu1 %vm2771_vm10, %v7489_v16  ;;  %v10451_v16 = vld [vmem:[%s16022_s7 + $0x58] sm:$0xff] }
0x29b5   : > { %12064 = vmatpush3.bf16.msra.mxu1 %v12063_v40  ;;  %11599 = vmatprep.mubr.msk.f32.mxu1 %vm13757_vm0, %v13758_v1  ;;  %v10450_v40 = vld [vmem:[%s16022_s7 + $0x50] sm:$0xff] }
0x29b6   : > { %12065 = vmatprep.subr.bf16.mxu1 %v13759_v13  ;;  %v12097_v17 = vpack.c.bf16 %v10451_v16, %v10450_v40  ;;  %v10465_v40 = vld [vmem:[%s16019_s18 + $0x70] sm:$0xff]  ;;  %v10466_v16 = vld [vmem:[%s16019_s18 + $0x78] sm:$0xff] }
0x29b9   : > { %12067 = vmatpush3.bf16.msra.mxu1 %v12066_v19 }
0x29ba   : > { %12074 = vmatprep.subr.bf16.mxu1 %v13759_v13 }
0x29bc   : > { %11600 = vmatmul.mubr.msk.f32.vlgmr.msra.gmra.mrb[110].mxu1 %vm2366_vm6, %v15435_v5 }
0x29bd   : > { %11602 = vmatprep.mubr.msk.f32.mxu1 %vm13757_vm0, %v13758_v1 }
0x29c0   : > { %11603 = vmatmul.mubr.msk.f32.gmra.mrb[112].mxu1 %vm2366_vm6, %v15454_v52 }
0x29c1   : > { %11605 = vmatprep.mubr.msk.f32.mxu1 %vm13757_vm0, %v13758_v1 }
0x29c4   : > { %11606 = vmatmul.mubr.msk.f32.gmra.mrb[114].mxu1 %vm2366_vm6, %v15461_v53 }
0x29c5   : > { %11631 = vmatprep.mubr.msk.f32.mxu1 %vm13757_vm0, %v13758_v1 }
0x2a87   : > { %v7562_v20 = vpop.f32.mrb[108].mxu1 }
0x2a88   : > { %v11579_v22 = vpop.f32.mrb[109].mxu1 }
0x2a8f   : > { %v7729_v8 = vpop.f32.mrb[110].mxu1 }
0x2a90   : > { %v11601_v24 = vpop.f32.mrb[111].mxu1  ;;  %v7730_v30 = vadd.f32 %v10414_v27, %v7729_v8 }
0x2a93   : > { %v7734_v28 = vpop.f32.mrb[112].mxu1 }
0x2a94   : > { %v7735_v46 = vadd.f32 %v10414_v27, %v7734_v28  ;;  %v11604_v10 = vpop.f32.mrb[113].mxu1 }
0x2a96   : > { %v12075_v15 = vpack.c.bf16 %v7735_v46, %v7730_v30 }
0x2a97   : > { %v7739_v31 = vpop.f32.mrb[114].mxu1 }
0x2a98   : > { %v11607_v35 = vpop.f32.mrb[115].mxu1  ;;  %12077 = vmatpush3.bf16.xpose.msk.msra.mxu1 %vm14829_vm8, %v12075_v15  ;;  %v7740_v51 = vadd.f32 %v10414_v27, %v7739_v31 }
0x2a99   : > { %11629 = vmatprep.subr.mxu1 %v13758_v1 }
0x2aa0   : > { %11630 = vmatpush3.xpose.msk.msra.mxu1 %vm2669_vm7, %v7740_v51 }
0x2aa1   : > { %11643 = vmatprep.subr.mxu1 %v13758_v1 }
0x2aa3   : > { %11632 = vmatmul.mubr.msk.f32.vlgmr.msra.gmra.mrb[116].mxu1 %vm2669_vm7, %v7647_v41 }
0x2aa4   : > { %11645 = vmatprep.mubr.msk.f32.mxu1 %vm13757_vm0, %v13758_v1  ;;  %11644 = vmatpush3.msra.mxu1 %v8007_v39 }
0x2aa5   : > { %12081 = vmatprep.subr.bf16.mxu1 %v13759_v13 }
0x2b76   : > { %v7914_v23 = vpop.f32.mrb[116].mxu1 }
0x2b77   : > { %v7918_v45 = vmul.f32 0.35355338, %v7914_v23  ;;  %v11633_v29 = vpop.f32.mrb[117].mxu1 }
0x2b79   : > { %v7919_v43 = vsel %vm2771_vm10, %v7918_v45, -inf }
0x2b7a   : > { %7920 = vmax.xlane.f32.xlu0 %v7919_v43  ;;  %v10452_v43 = vld [vmem:[#allocation43 + $0x2] ss:$0 sm:$0xff] }
0x2c07   : > { %v7921_v32 = vpop.xlane.xlu0 %7920 }
0x2c08   : > { %v7922_v36 = vsub.f32 %v7918_v45, %v7921_v32 }
0x2c0a   : > { %v7923_v18 = vmul.f32 1.442695, %v7922_v36 }
0x2c0c   : > { %12590 = vpow2.f32 %v7923_v18 }
0x2c16   : > { %v12591_v26 = vpop.eup %12590 }
0x2c17   : > { %v7925_v12 = vsel %vm2771_vm10, %v12591_v26, 0.0 }
0x2c18   : > { %7926 = vadd.xlane.f32.xlu1 %v7925_v12 }
0x2ca5   : > { %v7927_v21 = vpop.xlane.xlu1 %7926 }
0x2ca6   : > { %12592 = vrcp.f32 %v7927_v21 }
0x2cb0   : > { %v12593_v54 = vpop.eup %12592 }
0x2cb1   : > { %v7929_v55 = vmul.f32 %v12593_v54, %v12591_v26 }
0x2cb3   : > { %11641 = vmatmul.mubr.msk.f32.vlgmr.msra.gmra.mrb[124].mxu0 %vm2771_vm10, %v7929_v55 }
0x2cb4   : > { %11649 = vmatpush3.msra.mxu0 %v7566_v58  ;;  %11650 = vmatprep.mubr.msk.f32.mxu0 %vm13757_vm0, %v13758_v1 }
0x2cb5   : > { %12087 = vmatprep.subr.bf16.mxu0 %v13759_v13 }
0x2cb7   : > { %11651 = vmatmul.mubr.msk.f32.vlgmr.msra.gmra.mrb[126].mxu0 %vm2669_vm7, %v7562_v20  ;;  %v10444_v20 = vld [vmem:[#allocation42 + $0x2] ss:$0 sm:$0xff] }
0x2cb8   : > { %12089 = vmatpush3.bf16.msra.mxu0 %v12088_v61  ;;  %11672 = vmatprep.mubr.msk.f32.mxu0 %vm13757_vm0, %v13758_v1 }
0x2cb9   : > { %12090 = vmatprep.subr.bf16.mxu0 %v13759_v13 }
0x2cbc   : > { %12092 = vmatpush3.bf16.msra.mxu0 %v12091_v33 }
0x2cbd   : > { %12099 = vmatprep.subr.bf16.mxu0 %v13759_v13 }
0x2cbf   : > { %11673 = vmatmul.mubr.msk.f32.vlgmr.msra.gmra.mrb[128].mxu0 %vm2366_vm6, %v15435_v5 }
0x2cc0   : > { %11675 = vmatprep.mubr.msk.f32.mxu0 %vm13757_vm0, %v13758_v1 }
0x2cc3   : > { %11676 = vmatmul.mubr.msk.f32.gmra.mrb[130].mxu0 %vm2366_vm6, %v15454_v52 }
0x2cc4   : > { %11678 = vmatprep.mubr.msk.f32.mxu0 %vm13757_vm0, %v13758_v1 }
0x2cc7   : > { %11679 = vmatmul.mubr.msk.f32.gmra.mrb[132].mxu0 %vm2366_vm6, %v15461_v53 }
0x2cc8   : > { %11704 = vmatprep.mubr.msk.f32.mxu0 %vm13757_vm0, %v13758_v1 }
0x2d86   : > { %v8002_v48 = vpop.f32.mrb[124].mxu0 }
0x2d87   : > { %v11642_v6 = vpop.f32.mrb[125].mxu0  ;;  %11646 = vmatmul.mubr.msk.f32.vlgmr.msra.gmra.mrb[118].mxu1 %vm2669_vm7, %v8002_v48 }
0x2d88   : > { %12083 = vmatpush3.bf16.msra.mxu1 %v12082_v2  ;;  %11661 = vmatprep.mubr.msk.f32.mxu1 %vm13757_vm0, %v13758_v1  ;;  %v12113_v6 = vpack.c.bf16 %v10470_v57, %v10469_v4 }
0x2d89   : > { %12084 = vmatprep.subr.bf16.mxu1 %v13759_v13 }
0x2d8a   : > { %v8150_v9 = vpop.f32.mrb[126].mxu0 }
0x2d8b   : > { %v11652_v11 = vpop.f32.mrb[127].mxu0 }
0x2d8c   : > { %12086 = vmatpush3.bf16.msra.mxu1 %v12085_v7  ;;  %v10463_v11 = vld [vmem:[%s16019_s18 + $0x60] sm:$0xff] }
0x2d8d   : > { %12093 = vmatprep.subr.bf16.mxu1 %v13759_v13 }
0x2d8f   : > { %11662 = vmatmul.mubr.msk.f32.vlgmr.msra.gmra.mrb[120].mxu1 %vm2366_vm6, %v15481_v42 }
0x2d90   : > { %12095 = vmatpush3.bf16.msra.mxu1 %v12094_v14  ;;  %11689 = vmatprep.mubr.msk.f32.mxu1 %vm13757_vm0, %v13758_v1  ;;  %v10464_v14 = vld [vmem:[%s16019_s18 + $0x68] sm:$0xff] }
0x2d91   : > { %12096 = vmatprep.subr.bf16.mxu1 %v13759_v13 }
0x2d92   : > { %v8316_v44 = vpop.f32.mrb[128].mxu0 }
0x2d93   : > { %v11674_v19 = vpop.f32.mrb[129].mxu0  ;;  %v8317_v8 = vadd.f32 %v10444_v20, %v8316_v44  ;;  %v12110_v44 = vpack.c.bf16 %v10466_v16, %v10465_v40 }
0x2d94   : > { %12098 = vmatpush3.bf16.msra.mxu1 %v12097_v17  ;;  %v10478_v19 = vld [vmem:[%s16022_s7 + $0x68] sm:$0xff] }
0x2d95   : > { %12103 = vmatprep.subr.bf16.mxu1 %v13759_v13 }
0x2d96   : > { %v8321_v22 = vpop.f32.mrb[130].mxu0 }
0x2d97   : > { %v8322_v24 = vadd.f32 %v10444_v20, %v8321_v22  ;;  %v11677_v27 = vpop.f32.mrb[131].mxu0  ;;  %11690 = vmatmul.mubr.msk.f32.vlgmr.msra.gmra.mrb[122].mxu1 %vm2366_vm6, %v15431_v3  ;;  %v10479_v22 = vld [vmem:[%s16022_s7 + $0x70] sm:$0xff] }
0x2d98   : > { %11692 = vmatprep.mubr.msk.f32.mxu1 %vm13757_vm0, %v13758_v1 }
0x2d99   : > { %v12100_v28 = vpack.c.bf16 %v8322_v24, %v8317_v8  ;;  %v10480_v8 = vld [vmem:[%s16022_s7 + $0x78] sm:$0xff] }
0x2d9a   : > { %v8326_v30 = vpop.f32.mrb[132].mxu0 }
0x2d9b   : > { %v11680_v46 = vpop.f32.mrb[133].mxu0  ;;  %11693 = vmatmul.mubr.msk.f32.gmra.mrb[124].mxu1 %vm2366_vm6, %v15449_v47  ;;  %12102 = vmatpush3.bf16.xpose.msk.msra.mxu0 %vm14829_vm8, %v12100_v28  ;;  %v8327_v10 = vadd.f32 %v10444_v20, %v8326_v30  ;;  %v10473_v28 = vld [vmem:[#allocation42 + $0x3] ss:$0 sm:$0xff]  ;;  %v12122_v30 = vpack.c.bf16 %v10480_v8, %v10479_v22  ;;  %v9224_v8 = vld [vmem:[#allocation48 + $0x10] sm:$0xff] }
0x2d9c   : > { %11695 = vmatprep.mubr.msk.f32.mxu1 %vm13757_vm0, %v13758_v1  ;;  %11702 = vmatprep.subr.mxu0 %v13758_v1 }
0x2d9f   : > { %11696 = vmatmul.mubr.msk.f32.gmra.mrb[126].mxu1 %vm2366_vm6, %v15451_v49 }
0x2da0   : > { %11713 = vmatprep.mubr.msk.f32.mxu1 %vm13757_vm0, %v13758_v1 }
0x2da3   : > { %11703 = vmatpush3.xpose.msk.msra.mxu0 %vm2669_vm7, %v8327_v10 }
0x2da4   : > { %11716 = vmatprep.subr.mxu0 %v13758_v1 }
0x2e5a   : > { %v8077_v15 = vpop.f32.mrb[118].mxu1 }
0x2e5b   : > { %v15644_v31 = vadd.f32 %v8150_v9, %v8077_v15  ;;  %v11647_v35 = vpop.f32.mrb[119].mxu1  ;;  %v12116_v9 = vpack.c.bf16 %v10472_v34, %v10471_v50  ;;  %v10492_v34 = vld [vmem:[#allocation46] ss:$0 sm:$0xff] }
0x2e62   : > { %v8233_v51 = vpop.f32.mrb[120].mxu1 }
0x2e63   : > { %v8234_v41 = vadd.f32 %v10438_v38, %v8233_v51  ;;  %v11663_v23 = vpop.f32.mrb[121].mxu1 }
0x2e65   : > { %11705 = vmatmul.mubr.msk.f32.vlgmr.msra.gmra.mrb[134].mxu0 %vm2669_vm7, %v8234_v41 }
0x2e66   : > { %11718 = vmatprep.mubr.msk.f32.mxu0 %vm13757_vm0, %v13758_v1  ;;  %11717 = vmatpush3.msra.mxu0 %v8594_v0 }
0x2e67   : > { %12106 = vmatprep.subr.bf16.mxu0 %v13759_v13 }
0x2e6a   : > { %v8409_v45 = vpop.f32.mrb[122].mxu1 }
0x2e6b   : > { %v11691_v29 = vpop.f32.mrb[123].mxu1  ;;  %v8410_v36 = vadd.f32 %v10452_v43, %v8409_v45  ;;  %v10467_v45 = vld [vmem:[#allocation40 + $0x3] ss:$0 sm:$0xff] }
0x2e6e   : > { %v8414_v32 = vpop.f32.mrb[124].mxu1 }
0x2e6f   : > { %v8415_v18 = vadd.f32 %v10452_v43, %v8414_v32  ;;  %v11694_v26 = vpop.f32.mrb[125].mxu1 }
0x2e71   : > { %v12104_v12 = vpack.c.bf16 %v8415_v18, %v8410_v36  ;;  %v10481_v36 = vld [vmem:[#allocation43 + $0x3] ss:$0 sm:$0xff] }
0x2e72   : > { %v8419_v39 = vpop.f32.mrb[126].mxu1 }
0x2e73   : > { %v11697_v21 = vpop.f32.mrb[127].mxu1  ;;  %12105 = vmatpush3.bf16.msra.mxu1 %v12104_v12  ;;  %v8420_v54 = vadd.f32 %v10452_v43, %v8419_v39 }
0x2e74   : > { %11711 = vmatprep.subr.mxu1 %v13758_v1 }
0x2e77   : > { %11712 = vmatpush3.msk.msra.mxu1 %vm2815_vm9, %v8420_v54 }
0x2e78   : > { %12112 = vmatprep.subr.bf16.mxu1 %v13759_v13 }
0x2f38   : > { %v8501_v55 = vpop.f32.mrb[134].mxu0 }
0x2f39   : > { %v8505_v58 = vmul.f32 0.35355338, %v8501_v55  ;;  %v11706_v59 = vpop.f32.mrb[135].mxu0 }
0x2f3b   : > { %v8506_v60 = vsel %vm2771_vm10, %v8505_v58, -inf }
0x2f3c   : > { %8507 = vmax.xlane.f32.xlu0 %v8506_v60 }
0x2fc9   : > { %v8508_v61 = vpop.xlane.xlu0 %8507 }
0x2fca   : > { %v8509_v25 = vsub.f32 %v8505_v58, %v8508_v61 }
0x2fcc   : > { %v8510_v62 = vmul.f32 1.442695, %v8509_v25 }
0x2fce   : > { %12594 = vpow2.f32 %v8510_v62 }
0x2fd8   : > { %v12595_v33 = vpop.eup %12594 }
0x2fd9   : > { %v8512_v37 = vsel %vm2771_vm10, %v12595_v33, 0.0 }
0x2fda   : > { %8513 = vadd.xlane.f32.xlu1 %v8512_v37 }
0x3067   : > { %v8514_v2 = vpop.xlane.xlu1 %8513 }
0x3068   : > { %12596 = vrcp.f32 %v8514_v2  ;;  %v9109_v2 = vld [vmem:[#allocation45 + $0x18] sm:$0xff] }
0x3072   : > { %v12597_v48 = vpop.eup %12596 }
0x3073   : > { %v8516_v7 = vmul.f32 %v12597_v48, %v12595_v33 }
0x3075   : > { %11714 = vmatmul.mubr.msk.f32.vlgmr.msra.gmra.mrb[128].mxu1 %vm2771_vm10, %v8516_v7 }
0x3076   : > { %12114 = vmatpush3.bf16.msra.mxu1 %v12113_v6  ;;  %11740 = vmatprep.mubr.msk.f32.mxu1 %vm13757_vm0, %v13758_v1 }
0x3077   : > { %12115 = vmatprep.subr.bf16.mxu1 %v13759_v13 }
0x307a   : > { %12117 = vmatpush3.bf16.msra.mxu1 %v12116_v9 }
0x307b   : > { %12124 = vmatprep.subr.bf16.mxu1 %v13759_v13 }
0x307d   : > { %11741 = vmatmul.mubr.msk.f32.vlgmr.msra.gmra.mrb[130].mxu1 %vm2366_vm6, %v15435_v5  ;;  %v12107_v5 = vpack.c.bf16 %v10464_v14, %v10463_v11 }
0x307e   : > { %11743 = vmatprep.mubr.msk.f32.mxu1 %vm13757_vm0, %v13758_v1 }
0x3081   : > { %11744 = vmatmul.mubr.msk.f32.gmra.mrb[132].mxu1 %vm2366_vm6, %v15454_v52 }
0x3082   : > { %11746 = vmatprep.mubr.msk.f32.mxu1 %vm13757_vm0, %v13758_v1 }
0x3085   : > { %11747 = vmatmul.mubr.msk.f32.gmra.mrb[134].mxu1 %vm2366_vm6, %v15461_v53  ;;  %v10477_v53 = vld [vmem:[%s16022_s7 + $0x60] sm:$0xff] }
0x3086   : > { %11772 = vmatprep.mubr.msk.f32.mxu1 %vm13757_vm0, %v13758_v1  ;;  %v12119_v20 = vpack.c.bf16 %v10478_v19, %v10477_v53  ;;  %v9222_v19 = vld [vmem:[#allocation48] sm:$0xff] }
0x3148   : > { %v8589_v17 = vpop.f32.mrb[128].mxu1 }
0x3149   : > { %v11715_v52 = vpop.f32.mrb[129].mxu1  ;;  %11719 = vmatmul.mubr.msk.f32.vlgmr.msra.gmra.mrb[136].mxu0 %vm2669_vm7, %v8589_v17 }
0x314a   : > { %12108 = vmatpush3.bf16.msra.mxu0 %v12107_v5  ;;  %11729 = vmatprep.mubr.msk.f32.mxu0 %vm13757_vm0, %v13758_v1 }
0x314b   : > { %12109 = vmatprep.subr.bf16.mxu0 %v13759_v13 }
0x314e   : > { %12111 = vmatpush3.bf16.msra.mxu0 %v12110_v44 }
0x314f   : > { %12118 = vmatprep.subr.bf16.mxu0 %v13759_v13 }
0x3150   : > { %v8831_v24 = vpop.f32.mrb[130].mxu1 }
0x3151   : > { %11730 = vmatmul.mubr.msk.f32.vlgmr.msra.gmra.mrb[138].mxu0 %vm2366_vm6, %v15481_v42  ;;  %v11742_v27 = vpop.f32.mrb[131].mxu1  ;;  %v8832_v10 = vadd.f32 %v10473_v28, %v8831_v24  ;;  %v9225_v24 = vld [vmem:[#allocation48 + $0x18] sm:$0xff] }
0x3152   : > { %12120 = vmatpush3.bf16.msra.mxu0 %v12119_v20  ;;  %11757 = vmatprep.mubr.msk.f32.mxu0 %vm13757_vm0, %v13758_v1  ;;  %v9223_v20 = vld [vmem:[#allocation48 + $0x8] sm:$0xff]  ;;  %v12135_v27 = vpack.c.bf16 %v9225_v24, %v9224_v8 }
0x3153   : > { %12121 = vmatprep.subr.bf16.mxu0 %v13759_v13  ;;  %v12132_v22 = vpack.c.bf16 %v9223_v20, %v9222_v19  ;;  %v9513_v19 = vld [vmem:[#allocation57 + $0x18] sm:$0xff] }
0x3154   : > { %v8836_v46 = vpop.f32.mrb[132].mxu1 }
0x3155   : > { %v8837_v15 = vadd.f32 %v10473_v28, %v8836_v46  ;;  %v11745_v35 = vpop.f32.mrb[133].mxu1 }
0x3156   : > { %12123 = vmatpush3.bf16.msra.mxu0 %v12122_v30  ;;  %v9309_v30 = vld [vmem:[#allocation51 + $0x10] sm:$0xff]  ;;  %v9311_v35 = vld [vmem:[#allocation51 + $0x20] sm:$0xff] }
0x3157   : > { %v12125_v38 = vpack.c.bf16 %v8837_v15, %v8832_v10  ;;  %11784 = vmatprep.subr.mxu0 %v13758_v1  ;;  %v9310_v10 = vld [vmem:[#allocation51 + $0x18] sm:$0xff] }
0x3158   : > { %v8841_v51 = vpop.f32.mrb[134].mxu1  ;;  %v12141_v15 = vpack.c.bf16 %v9310_v10, %v9309_v30 }
0x3159   : > { %v11748_v41 = vpop.f32.mrb[135].mxu1  ;;  %11758 = vmatmul.mubr.msk.f32.vlgmr.msra.gmra.mrb[140].mxu0 %vm2366_vm6, %v15431_v3  ;;  %12127 = vmatpush3.bf16.xpose.msk.msra.mxu1 %vm14829_vm8, %v12125_v38  ;;  %v8842_v42 = vadd.f32 %v10473_v28, %v8841_v51  ;;  %v9308_v28 = vld [vmem:[#allocation51 + $0x8] sm:$0xff] }
0x315a   : > { %11760 = vmatprep.mubr.msk.f32.mxu0 %vm13757_vm0, %v13758_v1  ;;  %11770 = vmatprep.subr.mxu1 %v13758_v1  ;;  %v9312_v38 = vld [vmem:[#allocation51 + $0x28] sm:$0xff] }
0x315b   : > { %11785 = vmatpush3.msra.mxu0 %v9109_v2  ;;  %v12144_v51 = vpack.c.bf16 %v9312_v38, %v9311_v35  ;;  %v9426_v2 = vld [vmem:[#allocation54 + $0x8] sm:$0xff] }
0x315c   : > { %12137 = vmatprep.subr.bf16.mxu0 %v13759_v13 }
0x315d   : > { %11761 = vmatmul.mubr.msk.f32.gmra.mrb[142].mxu0 %vm2366_vm6, %v15449_v47 }
0x315e   : > { %11763 = vmatprep.mubr.msk.f32.mxu0 %vm13757_vm0, %v13758_v1 }
0x3161   : > { %11764 = vmatmul.mubr.msk.f32.gmra.mrb[144].mxu0 %vm2366_vm6, %v15451_v49  ;;  %11771 = vmatpush3.xpose.msk.msra.mxu1 %vm2669_vm7, %v8842_v42 }
0x3162   : > { %12128 = vmatprep.subr.bf16.mxu1 %v13759_v13  ;;  %11786 = vmatprep.mubr.msk.f32.mxu0 %vm13757_vm0, %v13758_v1 }
0x321c   : > { %v8664_v56 = vpop.f32.mrb[136].mxu0 }
0x321d   : > { %v8668_v3 = vadd.f32 %v8664_v56, %v15644_v31  ;;  %v11720_v23 = vpop.f32.mrb[137].mxu0 }
0x321e   : > { %v10493_v23 = vld [vmem:[%s16023_s16] ss:$0 sm:$0xff]  ;;  %s16026_s16 = sld [smem:[#allocation124_spill]] }
0x3224   : > { %v8748_v47 = vpop.f32.mrb[138].mxu0 }
0x3225   : > { %v8749_v29 = vadd.f32 %v10467_v45, %v8748_v47  ;;  %v11731_v43 = vpop.f32.mrb[139].mxu0  ;;  %v10494_v47 = vld [vmem:[%s16024_s25] ss:$0 sm:$0xff]  ;;  %s10178_s25 = sshll.u32 %s14667_s4, 3 }
0x3227   : > { %11773 = vmatmul.mubr.msk.f32.vlgmr.msra.gmra.mrb[136].mxu1 %vm2669_vm7, %v8749_v29 }
0x3228   : > { %11781 = vmatprep.mubr.msk.f32.mxu1 %vm13757_vm0, %v13758_v1 }
0x322c   : > { %v8924_v49 = vpop.f32.mrb[140].mxu0 }
0x322d   : > { %v11759_v32 = vpop.f32.mrb[141].mxu0  ;;  %v8925_v26 = vadd.f32 %v10481_v36, %v8924_v49  ;;  %v9313_v49 = vld [vmem:[#allocation51 + $0x30] sm:$0xff] }
0x322e   : > { %v9314_v32 = vld [vmem:[#allocation51 + $0x38] sm:$0xff] }
0x3230   : > { %v8929_v18 = vpop.f32.mrb[142].mxu0 }
0x3231   : > { %v8930_v12 = vadd.f32 %v10481_v36, %v8929_v18  ;;  %v11762_v39 = vpop.f32.mrb[143].mxu0  ;;  %v10495_v18 = vld [vmem:[#allocation49] ss:$0 sm:$0xff] }
0x3233   : > { %v12129_v21 = vpack.c.bf16 %v8930_v12, %v8925_v26 }
0x3234   : > { %v8934_v54 = vpop.f32.mrb[144].mxu0 }
0x3235   : > { %v11765_v31 = vpop.f32.mrb[145].mxu0  ;;  %12130 = vmatpush3.bf16.msra.mxu1 %v12129_v21  ;;  %v8935_v55 = vadd.f32 %v10481_v36, %v8934_v54  ;;  %v12147_v36 = vpack.c.bf16 %v9314_v32, %v9313_v49  ;;  %v10497_v54 = vld [vmem:[#allocation52] ss:$0 sm:$0xff] }
0x3236   : > { %11779 = vmatprep.subr.mxu1 %v13758_v1 }
0x3239   : > { %11780 = vmatpush3.msk.msra.mxu1 %vm2815_vm9, %v8935_v55 }
0x323a   : > { %12131 = vmatprep.subr.bf16.mxu1 %v13759_v13 }
0x32fa   : > { %v9016_v58 = vpop.f32.mrb[136].mxu1 }
0x32fb   : > { %v9020_v59 = vmul.f32 0.35355338, %v9016_v58  ;;  %v11774_v60 = vpop.f32.mrb[137].mxu1 }
0x32fd   : > { %v9021_v61 = vsel %vm2771_vm10, %v9020_v59, -inf }
0x32fe   : > { %9022 = vmax.xlane.f32.xlu0 %v9021_v61 }
0x338b   : > { %v9023_v25 = vpop.xlane.xlu0 %9022 }
0x338c   : > { %v9024_v62 = vsub.f32 %v9020_v59, %v9023_v25 }
0x338e   : > { %v9025_v33 = vmul.f32 1.442695, %v9024_v62 }
0x3390   : > { %12598 = vpow2.f32 %v9025_v33 }
0x339a   : > { %v12599_v37 = vpop.eup %12598 }
0x339b   : > { %v9027_v0 = vsel %vm2771_vm10, %v12599_v37, 0.0 }
0x339c   : > { %9028 = vadd.xlane.f32.xlu1 %v9027_v0  ;;  %v9425_v0 = vld [vmem:[#allocation54] sm:$0xff] }
0x3429   : > { %v9029_v4 = vpop.xlane.xlu1 %9028 }
0x342a   : > { %12600 = vrcp.f32 %v9029_v4  ;;  %v12150_v4 = vpack.c.bf16 %v9426_v2, %v9425_v0 }
0x3434   : > { %v12601_v57 = vpop.eup %12600 }
0x3435   : > { %v9031_v48 = vmul.f32 %v12601_v57, %v12599_v37  ;;  %v9427_v57 = vld [vmem:[#allocation54 + $0x10] sm:$0xff] }
0x3437   : > { %11782 = vmatmul.mubr.msk.f32.vlgmr.msra.gmra.mrb[138].mxu1 %vm2771_vm10, %v9031_v48  ;;  %v9428_v48 = vld [vmem:[#allocation54 + $0x18] sm:$0xff] }
0x3438   : > { %11797 = vmatprep.mubr.msk.f32.mxu1 %vm13757_vm0, %v13758_v1  ;;  %12133 = vmatpush3.bf16.msra.mxu1 %v12132_v22  ;;  %v10501_v22 = vld [vmem:[#allocation55] ss:$0 sm:$0xff] }
0x3439   : > { %12134 = vmatprep.subr.bf16.mxu1 %v13759_v13 }
0x343c   : > { %12136 = vmatpush3.bf16.msra.mxu1 %v12135_v27 }
0x343d   : > { %12149 = vmatprep.subr.bf16.mxu1 %v13759_v13 }
0x350a   : > { %v9104_v6 = vpop.f32.mrb[138].mxu1 }
0x350b   : > { %v11783_v7 = vpop.f32.mrb[139].mxu1  ;;  %11787 = vmatmul.mubr.msk.f32.vlgmr.msra.gmra.mrb[146].mxu0 %vm2669_vm7, %v9104_v6  ;;  %v12153_v6 = vpack.c.bf16 %v9428_v48, %v9427_v57 }
0x350c   : > { %11816 = vmatprep.mubr.msk.f32.mxu0 %vm13757_vm0, %v13758_v1 }
0x35de   : > { %v9179_v50 = vpop.f32.mrb[146].mxu0 }
0x35df   : > { %v9183_v9 = vadd.f32 %v9179_v50, %v8668_v3  ;;  %v11788_v11 = vpop.f32.mrb[147].mxu0 }
0x35e0   : > { %v10499_v11 = vld [vmem:[%s16025_s0] ss:$0 sm:$0xff]  ;;  %s10506_s0 = sshll.u32 %s14070_s2, 7  ;;  %s13760_s2 = smov [#allocation58]  }
0x35e1   : > { %v9191_v14 = vadd.f32 %v10492_v34, %v9183_v9  ;;  %s15756_s5 = scalar_lea.hbm %s14042_s19, %s10506_s0 }
0x35e3   : > { %v9192_v5 = vadd.f32 %v9191_v14, %v15477_v63  ;;  %v9307_v63 = vld [vmem:[#allocation51] sm:$0xff] }
0x35e4   : > { %v12138_v46 = vpack.c.bf16 %v9308_v28, %v9307_v63 }
0x35e5   : > { %v9195_v40 = vsel %vm2366_vm6, %v9192_v5, 0.0 }
0x35e6   : > { %9196 = vadd.xlane.f32.xlu0 %v9195_v40  ;;  %12139 = vmatpush3.bf16.msra.mxu0 %v12138_v46  ;;  %v9511_v40 = vld [vmem:[#allocation57 + $0x8] sm:$0xff] }
0x35e7   : > { %12140 = vmatprep.subr.bf16.mxu0 %v13759_v13 }
0x35ea   : > { %12142 = vmatpush3.bf16.msra.mxu0 %v12141_v15 }
0x35eb   : > { %12143 = vmatprep.subr.bf16.mxu0 %v13759_v13 }
0x35ee   : > { %12145 = vmatpush3.bf16.msra.mxu0 %v12144_v51 }
0x35ef   : > { %12146 = vmatprep.subr.bf16.mxu0 %v13759_v13 }
0x35f2   : > { %12148 = vmatpush3.bf16.msra.mxu0 %v12147_v36 }
0x3673   : > { %v9197_v16 = vpop.xlane.xlu0 %9196 }
0x3674   : > { %v9198_v17 = vmul.f32 0.03125, %v9197_v16  ;;  %v10500_v16 = vld [vmem:[%s16026_s16] ss:$0 sm:$0xff]  ;;  %s2166_s16 = scalar_lea.vmem [#allocation58], %s10178_s25  ;;  %s13530_s25 = sshll.u32 %s13760_s2, 4  ;;  %s13531_s25 = int_to_ptr.vmem [resolvable:$false] %s13530_s25 }
0x3675   : > { %s9611_s3 = sshll.u32 %s2166_s16, 4  ;;  %s13532_s8 = scalar_lea.vmem %s13531_s25, 256  ;;  %s15758_s3 = int_to_ptr.vmem [resolvable:$true] %s9611_s3 }
0x3676   : > { %v9199_v52 = vsub.f32 %v9192_v5, %v9198_v17  ;;  %v9510_v5 = vld [vmem:[#allocation57] sm:$0xff]  ;;  %s13526_s7 = scalar_lea.vmem %s15758_s3, 128  ;;  %p13533_p13 = scmp.lt.s32.totalorder %s15758_s3, %s13531_s25 }
0x3677   : > { %p13527_p1 = scmp.ne.s32.totalorder %s15758_s3, %s13526_s7  ;;  %p13534_p11 = scmp.lt.s32.totalorder %s13532_s8, %s13526_s7 }
0x3678   : > { %v9200_v44 = vmul.f32 %v9199_v52, %v9199_v52 }
0x3679   : > { %p13528_p6 = pnand %p13527_p1, %p16027_p3  ;;  %p13535_p0 = por %p13534_p11, %p13533_p13 }
0x367a   : > { %v9201_v53 = vsel %vm2366_vm6, %v9200_v44, 0.0 }
0x367b   : > { %9202 = vadd.xlane.f32.xlu1 %v9201_v53  ;;  %v9512_v53 = vld [vmem:[#allocation57 + $0x10] sm:$0xff]  ;;  %p13529_p12 = pneg %p13528_p6 }
0x367c   : > { %v12159_v20 = vpack.c.bf16 %v9513_v19, %v9512_v53 }
0x367d   : > { %p13536_p4 = pnand %p13535_p0, %p13529_p12 }
0x3708   : > { %v9203_v41 = vpop.xlane.xlu1 %9202 }
0x3709   : > { %v9204_v42 = vmul.f32 0.03125, %v9203_v41 }
0x370b   : > { %v9205_v56 = vadd.f32 1e-05, %v9204_v42 }
0x370d   : > { %12602 = vrsqrt.f32 %v9205_v56 }
0x3717   : > { %v12603_v3 = vpop.eup %12602 }
0x3718   : > { %v9207_v45 = vmul.f32 %v12603_v3, %v9199_v52  ;;  %v12156_v52 = vpack.c.bf16 %v9511_v40, %v9510_v5 }
0x371a   : > { %v9214_v29 = vmul.f32 %v10493_v23, %v9207_v45 }
0x371c   : > { %v9221_v43 = vadd.f32 %v10494_v47, %v9214_v29 }
0x371e   : > { %11798 = vmatmul.mubr.msk.f32.vlgmr.msra.gmra.mrb[140].mxu1 %vm2366_vm6, %v9221_v43 }
0x371f   : > { %11827 = vmatprep.mubr.msk.f32.mxu1 %vm13757_vm0, %v13758_v1  ;;  %12151 = vmatpush3.bf16.msra.mxu1 %v12150_v4 }
0x3720   : > { %12152 = vmatprep.subr.bf16.mxu1 %v13759_v13 }
0x3723   : > { %12154 = vmatpush3.bf16.msra.mxu1 %v12153_v6 }
0x3724   : > { %12155 = vmatprep.subr.bf16.mxu1 %v13759_v13 }
0x37f1   : > { %v9302_v26 = vpop.f32.mrb[140].mxu1 }
0x37f2   : > { %v9303_v12 = vadd.f32 %v10495_v18, %v9302_v26  ;;  %v11799_v39 = vpop.f32.mrb[141].mxu1 }
0x37f4   : > { %v9306_v21 = vmax.f32 %v9303_v12, 0.0 }
0x37f6   : > { %11817 = vmatmul.mubr.msk.f32.vlgmr.msra.gmra.mrb[148].mxu0 %vm4975_vm13, %v9306_v21 }
0x38c9   : > { %v9391_v31 = vpop.f32.mrb[148].mxu0 }
0x38ca   : > { %v9392_v55 = vadd.f32 %v10497_v54, %v9391_v31  ;;  %v11818_v58 = vpop.f32.mrb[149].mxu0 }
0x38cc   : > { %v9395_v59 = vadd.f32 %v9392_v55, %v9221_v43 }
0x38ce   : > { %v9398_v60 = vsel %vm2366_vm6, %v9395_v59, 0.0 }
0x38cf   : > { %9399 = vadd.xlane.f32.xlu0 %v9398_v60 }
0x395c   : > { %v9400_v61 = vpop.xlane.xlu0 %9399 }
0x395d   : > { %v9401_v25 = vmul.f32 0.03125, %v9400_v61 }
0x395f   : > { %v9402_v62 = vsub.f32 %v9395_v59, %v9401_v25 }
0x3961   : > { %v9403_v33 = vmul.f32 %v9402_v62, %v9402_v62 }
0x3963   : > { %v9404_v37 = vsel %vm2366_vm6, %v9403_v33, 0.0 }
0x3964   : > { %9405 = vadd.xlane.f32.xlu1 %v9404_v37 }
0x39f1   : > { %v9406_v7 = vpop.xlane.xlu1 %9405 }
0x39f2   : > { %v9407_v50 = vmul.f32 0.03125, %v9406_v7 }
0x39f4   : > { %v9408_v34 = vadd.f32 1e-05, %v9407_v50 }
0x39f6   : > { %12604 = vrsqrt.f32 %v9408_v34 }
0x3a00   : > { %v12605_v9 = vpop.eup %12604 }
0x3a01   : > { %v9410_v14 = vmul.f32 %v12605_v9, %v9402_v62 }
0x3a03   : > { %v9417_v17 = vmul.f32 %v10499_v11, %v9410_v14 }
0x3a05   : > { %v9424_v44 = vadd.f32 %v10500_v16, %v9417_v17 }
0x3a07   : > { %11828 = vmatmul.mubr.msk.f32.vlgmr.msra.gmra.mrb[142].mxu1 %vm2366_vm6, %v9424_v44 }
0x3a08   : > { %12157 = vmatpush3.bf16.msra.mxu1 %v12156_v52  ;;  %11838 = vmatprep.mubr.msk.f32.mxu1 %vm13757_vm0, %v13758_v1 }
0x3a09   : > { %12158 = vmatprep.subr.bf16.mxu1 %v13759_v13 }
0x3a0c   : > { %12160 = vmatpush3.bf16.msra.mxu1 %v12159_v20 }
0x3a0f   : > { %11839 = vmatmul.mubr.msk.f32.vlgmr.msra.gmra.mrb[144].mxu1 %vm2366_vm6, %v9424_v44 }
0x3ada   : > { %v9505_v8 = vpop.f32.mrb[142].mxu1 }
0x3adb   : > { %v9506_v24 = vadd.f32 %v10501_v22, %v9505_v8  ;;  %v11829_v27 = vpop.f32.mrb[143].mxu1 }
0x3add   : > { %9509 = vst.msk [vmem:[%s2166_s16] sm:$0xff] %vm2669_vm7, %v9506_v24 }
0x3ade   : > { %13539 = shalt.err (!%p13536_p4)
}
0x3adf   : > { %s13540_s4 = scalar_lea.hbm %s15756_s5, 128  ;;  %s13544_s0 = scalar_lea.hbm %s14042_s19, 256 }
0x3ae0   : > { %p13541_p2 = scmp.ne.s32.totalorder %s15756_s5, %s13540_s4  ;;  %p13545_p9 = scmp.lt.u32.totalorder %s15756_s5, %s14042_s19 }
0x3ae1   : > { %p13546_p5 = scmp.lt.u32.totalorder %s13544_s0, %s13540_s4  ;;  %p13548_p1 = scmp.lt.u32.totalorder %s13540_s4, %s15756_s5 }
0x3ae2   : > { %p13542_p7 = pnand %p13541_p2, %p16027_p3 }
0x3ae3   : > { %p13547_p10 = por %p13546_p5, %p13545_p9 }
0x3ae4   : > { %p13543_p8 = pneg %p13542_p7 }
0x3ae5   : > { %p13549_p6 = por %p13548_p1, %p13547_p10 }
0x3ae7   : > { %p13550_p12 = pnand %p13549_p6, %p13543_p8 }
0x3ae9   : > { %13553 = shalt.err (!%p13550_p12)
}
0x3aea   : > { %s16028_s8 = sld [smem:[#allocation128_spill]]  ;;  %s10181_s7 = sshll.u32 %s14745_s11, 3  ;;  %v10503_v1 = vld [vmem:[#allocation3] ss:$0 sm:$0xff]  ;;  %v9587_v13 = vpop.f32.mrb[144].mxu1  ;;  %vm9591_vm14 = vcmask 7168  }
0x3aeb   : > { %12299 = dma.vmem_to_hbm [thread:$0]  (%p16027_p3), %s15758_s3, 128, %s15756_s5, %s9594_s6   ;;  %v9588_v63 = vadd.f32 %v10503_v1, %v9587_v13  ;;  %v11840_v28 = vpop.f32.mrb[145].mxu1 }
0x3af0   : > { %s2184_s16 = scalar_lea.vmem %s16028_s8, %s10181_s7 }
0x3af1   : > { %9592 = vst.msk [vmem:[%s2184_s16] sm:$0xff] %vm9591_vm14, %v9588_v63 }
0x3af2 PF: > { %s16029_s2 = sld [smem:[#allocation129_spill]]  ;;  %s16030_s25 = sld [smem:[#allocation132_spill]] }
0x3af3   : > { %p16032_p11 = scmp.ge.s32.totalorder %s13660_s1, 2 }
0x3af8   : > { %s9626_s4 = sand.u32 1, %s16029_s2   ;;  %p16031_p13 = scmp.ne.s32.totalorder %s16030_s25, 0 }
0x3af9   : > { %s9627_s22 = scalar_lea.sflag [#allocation6], %s9626_s4 }
0x3afa   : > { %p12306_p0 = pnand %p16032_p11, %p16031_p13 }
0x3afc   : > { %13643 = dma.done.wait (!%p12306_p0), %s9627_s22, 128  }
0x3afd   : > { %13645 = vsyncadd (!%p12306_p0), %s9627_s22, 4294967168  ;;  %s16033_s1 = sld [smem:[#allocation130_spill]]  ;;  %s16034_s6 = sld [smem:[#allocation131_spill]] }
0x3afe   : > { %s16035_s0 = smov %s13652_s21  ;;  %s16036_s21 = smov %s13656_s28 }
0x3b03   : > { %p146_p3 = scmp.ge.s32.totalorder %s16033_s1, 4   ;;  %s16037_s28 = smov %s16034_s6 }
0x3b05   :  { %148 = sbr.rel (!%p146_p3) target bundleno = 139 (0x8b), region = 558 }
0x3b0c   :  { %9639 = vsyncpa [#allocation5], 1 }
0x3b0d   :  { %9641 = vsyncpa [#allocation5 + $0x1], 1 }
0x3b0e   :  { %9642 = vsyncpa [#allocation8], 1 }
0x3b0f   :  { %9643 = vsyncpa [#allocation11], 1 }
0x3b10   :  { %9644 = vsyncpa [#allocation14], 1 }
0x3b11   :  { %9645 = vsyncpa [#allocation17], 1 }
0x3b12   :  { %9646 = vsyncpa [#allocation20], 1 }
0x3b13   :  { %9647 = vsyncpa [#allocation23], 1 }
0x3b14   :  { %9648 = vsyncpa [#allocation26], 1 }
0x3b15   :  { %9649 = vsyncpa [#allocation29], 1 }
0x3b16   :  { %9650 = vsyncpa [#allocation32], 1 }
0x3b17   :  { %9651 = vsyncpa [#allocation35], 1 }
0x3b18   :  { %9652 = vsyncpa [#allocation38], 1 }
0x3b19   :  { %9653 = vsyncpa [#allocation41], 1 }
0x3b1a   :  { %9654 = vsyncpa [#allocation44], 1 }
0x3b1b   :  { %9655 = vsyncpa [#allocation47], 1 }
0x3b1c   :  { %9656 = vsyncpa [#allocation50], 1 }
0x3b1d   :  { %9657 = vsyncpa [#allocation53], 1 }
0x3b1e   :  { %9658 = vsyncpa [#allocation56], 1 }
0x3b1f   :  { %9659 = vsyncpa [#allocation6], 1 }
0x3b20   :  { %9661 = vsyncpa [#allocation6 + $0x1], 1 }

</bundles_post_ra>
